<compile_context>
chip_gen: v6e
topology: v6e:2x2x1
jax: 0.10.0
libtpu: 0.0.40
codegen_flags: <defaults>
</compile_context>

<pallas_src>
import functools

import numpy as np

import jax
import jax.numpy as jnp
from jax.experimental import pallas as pl


# ------------------------------ small helpers ------------------------------ #

def _round_up(n, m):
    return ((n + m - 1) // m) * m


def _vmem_full_spec(arr):
    """Whole-array single block (no grid): block shape == array shape."""
    zeros = (0,) * arr.ndim
    return pl.BlockSpec(arr.shape, lambda zeros=zeros: zeros)


# --------------------- constant gather ("selection") matrices -------------- #
# Spatial patch gathering / pooling on the tiny post-conv1 feature maps is
# expressed as 0/1 matrices applied on the MXU.  Built once on the host and
# passed to the kernel as bf16 constants (they depend only on batch size).

def _conv_selectors(batch, h, w, k, pad):
    """(k*k, B*H*W, B*H*W) gather matrices for a stride-1 'same' k x k conv."""
    m = batch * h * w
    sel = np.zeros((k * k, m, m), np.float32)
    for b in range(batch):
        for y in range(h):
            for x in range(w):
                mo = (b * h + y) * w + x
                for i in range(k):
                    for j in range(k):
                        yy, xx = y + i - pad, x + j - pad
                        if 0 <= yy < h and 0 <= xx < w:
                            sel[i * k + j, mo, (b * h + yy) * w + xx] = 1.0
    return sel


def _pool_selectors(batch, h, w):
    """(4, B*(H/2)*(W/2), B*H*W) gather matrices for MaxPool2d(2, 2)."""
    ho, wo = h // 2, w // 2
    sel = np.zeros((4, batch * ho * wo, batch * h * w), np.float32)
    for b in range(batch):
        for y in range(ho):
            for x in range(wo):
                mo = (b * ho + y) * wo + x
                for dy in range(2):
                    for dx in range(2):
                        sel[dy * 2 + dx, mo,
                            (b * h + 2 * y + dy) * w + 2 * x + dx] = 1.0
    return sel


# ------------------------------ fused kernel ------------------------------- #

def _alexnet2_fused_kernel(
    p1_ref, w1_ref, b1_ref,                 # conv1 (pre-gathered patches)
    selp1_ref,                              # maxpool 8x8 -> 4x4
    selc2_ref, w2_ref, b2_ref,              # conv2 5x5 pad2
    selp2_ref,                              # maxpool 4x4 -> 2x2
    selc3_ref, w3_ref, b3_ref,              # conv3 3x3 pad1
    w4_ref, b4_ref,                         # conv4 3x3 pad1
    w5_ref, b5_ref,                         # conv5 3x3 pad1
    selp3_ref,                              # maxpool 2x2 -> 1x1
    wfc_ref, bfc_ref,                       # classifier (N lane-padded to 128)
    out_ref,
):
    f32, bf16 = jnp.float32, jnp.bfloat16

    def dot32(a, b):                        # bf16 x bf16 -> f32 (MXU)
        return jnp.dot(a, b, preferred_element_type=f32)

    def conv_relu(x_bf, sel_ref, n_off, w_ref, b_ref):
        """Stride-1 'same' conv + bias + ReLU on a flattened (M, Cin) map.

        sel_ref : (n_off, M, M)       bf16 0/1 gather matrix per kernel offset
        w_ref   : (n_off, Cin, Cout)  bf16 weights per kernel offset
        b_ref   : (1, Cout)           f32
        """
        acc = None
        for o in range(n_off):
            gathered = dot32(sel_ref[o], x_bf).astype(bf16)   # exact row gather
            term = dot32(gathered, w_ref[o])                  # f32 accumulate
            acc = term if acc is None else acc + term
        return jnp.maximum(acc + b_ref[...], 0.0)

    def maxpool(y, selp_ref):
        """MaxPool2d(2, 2) on a flattened (M, C) map: 4 row gathers + max."""
        yb = y.astype(bf16)
        p0 = dot32(selp_ref[0], yb)
        p1 = dot32(selp_ref[1], yb)
        p2 = dot32(selp_ref[2], yb)
        p3 = dot32(selp_ref[3], yb)
        return jnp.maximum(jnp.maximum(p0, p1), jnp.maximum(p2, p3))

    # conv1 (11x11 / stride 4 / pad 5) + ReLU; patches arrive pre-gathered.
    y = jnp.maximum(dot32(p1_ref[...], w1_ref[...]) + b1_ref[...], 0.0)  # (B*64, 64)
    y = maxpool(y, selp1_ref).astype(bf16)                               # (B*16, 64)
    y = conv_relu(y, selc2_ref, 25, w2_ref, b2_ref)                      # (B*16, 192)
    y = maxpool(y, selp2_ref).astype(bf16)                               # (B*4, 192)
    y = conv_relu(y, selc3_ref, 9, w3_ref, b3_ref).astype(bf16)          # (B*4, 384)
    y = conv_relu(y, selc3_ref, 9, w4_ref, b4_ref).astype(bf16)          # (B*4, 256)
    y = conv_relu(y, selc3_ref, 9, w5_ref, b5_ref)                       # (B*4, 256)
    y = maxpool(y, selp3_ref).astype(bf16)                               # (B, 256)
    logits = dot32(y, wfc_ref[...]) + bfc_ref[...]                       # (B, 128)
    out_ref[...] = logits.astype(out_ref.dtype)


# ------------------------------- JAX wrapper -------------------------------- #

def _conv1_patches(x_nhwc, k_pad):
    """im2col for the 11x11 / stride-4 / pad-5 first conv; K order = (kh, kw, Cin)."""
    # TODO(synk): move this last piece of XLA im2col glue in-kernel (strided
    # pl.ds reads + in-kernel accumulation) for large batch; at batch=2 it is
    # a ~100 KB gather and negligible.
    b, h, w, c = x_nhwc.shape
    xp = jnp.pad(x_nhwc, ((0, 0), (5, 5), (5, 5), (0, 0)))
    ho = (h + 10 - 11) // 4 + 1
    wo = (w + 10 - 11) // 4 + 1
    cols = []
    for i in range(11):
        for j in range(11):
            cols.append(xp[:, i:i + 4 * ho:4, j:j + 4 * wo:4, :])
    patches = jnp.stack(cols, axis=3).reshape(b * ho * wo, 121 * c)
    patches = jnp.pad(patches, ((0, 0), (0, k_pad - 121 * c)))
    return patches.astype(jnp.bfloat16)


@functools.partial(jax.jit, static_argnames=("num_classes",))
def alexnet2_forward(x_nchw, prepped, *, num_classes=10):
    batch = x_nchw.shape[0]
    x = jnp.transpose(x_nchw, (0, 2, 3, 1))                   # NCHW -> NHWC
    p1 = _conv1_patches(x, prepped["w1"].shape[0])            # (B*64, 384) bf16

    operands = [
        p1, prepped["w1"], prepped["b1"],
        prepped["selp1"],
        prepped["selc2"], prepped["w2"], prepped["b2"],
        prepped["selp2"],
        prepped["selc3"], prepped["w3"], prepped["b3"],
        prepped["w4"], prepped["b4"],
        prepped["w5"], prepped["b5"],
        prepped["selp3"],
        prepped["wfc"], prepped["bfc"],
    ]
    n_pad = prepped["wfc"].shape[1]
    out = pl.pallas_call(
        _alexnet2_fused_kernel,
        out_shape=jax.ShapeDtypeStruct((batch, n_pad), jnp.float32),
        in_specs=[_vmem_full_spec(a) for a in operands],
        out_specs=pl.BlockSpec((batch, n_pad), lambda: (0, 0)),
    )(*operands)
    return out[:, :num_classes]


# --------------------------- parameter preparation -------------------------- #

def init_params(key, num_classes=10):
    """Deterministic synthetic parameters, PyTorch layout (matches AlexNet2)."""
    conv_shapes = [
        (64, 3, 11, 11),
        (192, 64, 5, 5),
        (384, 192, 3, 3),
        (256, 384, 3, 3),
        (256, 256, 3, 3),
    ]
    params = []
    for shp in conv_shapes:
        key, kw_, kb_ = jax.random.split(key, 3)
        fan_in = shp[1] * shp[2] * shp[3]
        w = jax.random.normal(kw_, shp, jnp.float32) / jnp.sqrt(float(fan_in))
        b = jax.random.normal(kb_, (shp[0],), jnp.float32) * 0.01
        params.append((w, b))
    key, kw_, kb_ = jax.random.split(key, 3)
    wl = jax.random.normal(kw_, (num_classes, 256), jnp.float32) / jnp.sqrt(256.0)
    bl = jax.random.normal(kb_, (num_classes,), jnp.float32) * 0.01
    params.append((wl, bl))
    return params


def prepare_params(params, batch_size, num_classes=10):
    """One-time conversion of PyTorch-layout params into kernel-ready tensors.

    Hoists every weight transpose / reshape / bf16 cast / lane pad out of the
    per-step forward pass and bakes the constant gather matrices for the given
    batch size.
    """
    (w1, b1), (w2, b2), (w3, b3), (w4, b4), (w5, b5), (wl, bl) = params
    bf16, f32 = jnp.bfloat16, jnp.float32

    def per_offset(w):                      # (Cout,Cin,kh,kw) -> (kh*kw, Cin, Cout)
        cout, cin, kh, kw = w.shape
        return jnp.transpose(w, (2, 3, 1, 0)).reshape(kh * kw, cin, cout).astype(bf16)

    def bias_row(b):
        return b.astype(f32).reshape(1, -1)

    # conv1 as a dense (K, Cout) matrix, K ordered (kh, kw, Cin), lane-padded.
    k1 = 11 * 11 * 3
    k1_pad = _round_up(k1, 128)
    w1m = jnp.transpose(w1, (2, 3, 1, 0)).reshape(k1, w1.shape[0])
    w1m = jnp.pad(w1m, ((0, k1_pad - k1), (0, 0))).astype(bf16)

    # classifier: pre-transposed, N lane-padded to a multiple of 128.
    n_pad = _round_up(num_classes, 128)
    wfc = jnp.pad(wl.T, ((0, 0), (0, n_pad - num_classes))).astype(bf16)
    bfc = jnp.pad(bl, (0, n_pad - num_classes)).astype(f32).reshape(1, n_pad)

    B = batch_size
    return dict(
        w1=w1m, b1=bias_row(b1),
        w2=per_offset(w2), b2=bias_row(b2),
        w3=per_offset(w3), b3=bias_row(b3),
        w4=per_offset(w4), b4=bias_row(b4),
        w5=per_offset(w5), b5=bias_row(b5),
        wfc=wfc, bfc=bfc,
        selp1=jnp.asarray(_pool_selectors(B, 8, 8), bf16),        # (4, 32, 128)
        selc2=jnp.asarray(_conv_selectors(B, 4, 4, 5, 2), bf16),  # (25, 32, 32)
        selp2=jnp.asarray(_pool_selectors(B, 4, 4), bf16),        # (4, 8, 32)
        selc3=jnp.asarray(_conv_selectors(B, 2, 2, 3, 1), bf16),  # (9, 8, 8)
        selp3=jnp.asarray(_pool_selectors(B, 2, 2), bf16),        # (4, 2, 8)
    )


if __name__ == "__main__":
    key = jax.random.PRNGKey(0)
    key, kx = jax.random.split(key)
    batch, num_classes = 2, 10
    # The classifier Linear(256, 10) implies a 32x32 input (features -> 1x1x256).
    x = jax.random.normal(kx, (batch, 3, 32, 32), jnp.float32)
    params = init_params(key, num_classes=num_classes)
    prepped = prepare_params(params, batch_size=batch, num_classes=num_classes)
    out = alexnet2_forward(x, prepped, num_classes=num_classes)
    out = jax.block_until_ready(out)
    assert out.shape == (batch, num_classes) and out.dtype == jnp.float32
    assert bool(jnp.all(jnp.isfinite(out)))
    print("KERNEL_OK")
</pallas_src>

<mosaic_0001>
module attributes {stable_mosaic.version = 11 : i64} {
  func.func @_alexnet2_fused_kernel(%arg0: memref<128x384xbf16, #tpu.memory_space<vmem>>, %arg1: memref<384x64xbf16, #tpu.memory_space<vmem>>, %arg2: memref<1x64xf32, #tpu.memory_space<vmem>>, %arg3: memref<4x32x128xbf16, #tpu.memory_space<vmem>>, %arg4: memref<25x32x32xbf16, #tpu.memory_space<vmem>>, %arg5: memref<25x64x192xbf16, #tpu.memory_space<vmem>>, %arg6: memref<1x192xf32, #tpu.memory_space<vmem>>, %arg7: memref<4x8x32xbf16, #tpu.memory_space<vmem>>, %arg8: memref<9x8x8xbf16, #tpu.memory_space<vmem>>, %arg9: memref<9x192x384xbf16, #tpu.memory_space<vmem>>, %arg10: memref<1x384xf32, #tpu.memory_space<vmem>>, %arg11: memref<9x384x256xbf16, #tpu.memory_space<vmem>>, %arg12: memref<1x256xf32, #tpu.memory_space<vmem>>, %arg13: memref<9x256x256xbf16, #tpu.memory_space<vmem>>, %arg14: memref<1x256xf32, #tpu.memory_space<vmem>>, %arg15: memref<4x2x8xbf16, #tpu.memory_space<vmem>>, %arg16: memref<256x128xbf16, #tpu.memory_space<vmem>>, %arg17: memref<1x128xf32, #tpu.memory_space<vmem>>, %arg18: memref<2x128xf32, #tpu.memory_space<vmem>>) attributes {dimension_semantics = [], scalar_prefetch = 0 : i64, scratch_operands = 0 : i64, tpu.core_type = #tpu.core_type<tc>} {
    %c0 = arith.constant 0 : index
    %c0_0 = arith.constant 0 : index
    %0 = vector.load %arg0[%c0, %c0_0] : memref<128x384xbf16, #tpu.memory_space<vmem>>, vector<128x384xbf16>
    %c0_1 = arith.constant 0 : index
    %c0_2 = arith.constant 0 : index
    %1 = vector.load %arg1[%c0_1, %c0_2] : memref<384x64xbf16, #tpu.memory_space<vmem>>, vector<384x64xbf16>
    %cst = arith.constant dense<0.000000e+00> : vector<128x64xf32>
    %2 = tpu.matmul %0, %1, %cst {dimension_numbers = #tpu.dot_dimension_numbers<[1], [0], [0], [1], [0, 0, 1, 1], [], []>} : vector<128x384xbf16>, vector<384x64xbf16>, vector<128x64xf32> -> vector<128x64xf32>
    %c0_3 = arith.constant 0 : index
    %c0_4 = arith.constant 0 : index
    %3 = vector.load %arg2[%c0_3, %c0_4] : memref<1x64xf32, #tpu.memory_space<vmem>>, vector<1x64xf32>
    %4 = vector.broadcast %3 : vector<1x64xf32> to vector<128x64xf32>
    %5 = arith.addf %2, %4 : vector<128x64xf32>
    %cst_5 = arith.constant 0.000000e+00 : f32
    %6 = vector.broadcast %cst_5 : f32 to vector<128x64xf32>
    %7 = arith.maximumf %5, %6 : vector<128x64xf32>
    %8 = arith.truncf %7 : vector<128x64xf32> to vector<128x64xbf16>
    %c0_6 = arith.constant 0 : index
    %c0_7 = arith.constant 0 : index
    %c0_8 = arith.constant 0 : index
    %9 = vector.load %arg3[%c0_6, %c0_7, %c0_8] : memref<4x32x128xbf16, #tpu.memory_space<vmem>>, vector<1x32x128xbf16>
    %10 = vector.shape_cast %9 : vector<1x32x128xbf16> to vector<32x128xbf16>
    %cst_9 = arith.constant dense<0.000000e+00> : vector<32x64xf32>
    %11 = tpu.matmul %10, %8, %cst_9 {dimension_numbers = #tpu.dot_dimension_numbers<[1], [0], [0], [1], [0, 0, 1, 1], [], []>} : vector<32x128xbf16>, vector<128x64xbf16>, vector<32x64xf32> -> vector<32x64xf32>
    %c1 = arith.constant 1 : index
    %c0_10 = arith.constant 0 : index
    %c0_11 = arith.constant 0 : index
    %12 = vector.load %arg3[%c1, %c0_10, %c0_11] : memref<4x32x128xbf16, #tpu.memory_space<vmem>>, vector<1x32x128xbf16>
    %13 = vector.shape_cast %12 : vector<1x32x128xbf16> to vector<32x128xbf16>
    %cst_12 = arith.constant dense<0.000000e+00> : vector<32x64xf32>
    %14 = tpu.matmul %13, %8, %cst_12 {dimension_numbers = #tpu.dot_dimension_numbers<[1], [0], [0], [1], [0, 0, 1, 1], [], []>} : vector<32x128xbf16>, vector<128x64xbf16>, vector<32x64xf32> -> vector<32x64xf32>
    %c2 = arith.constant 2 : index
    %c0_13 = arith.constant 0 : index
    %c0_14 = arith.constant 0 : index
    %15 = vector.load %arg3[%c2, %c0_13, %c0_14] : memref<4x32x128xbf16, #tpu.memory_space<vmem>>, vector<1x32x128xbf16>
    %16 = vector.shape_cast %15 : vector<1x32x128xbf16> to vector<32x128xbf16>
    %cst_15 = arith.constant dense<0.000000e+00> : vector<32x64xf32>
    %17 = tpu.matmul %16, %8, %cst_15 {dimension_numbers = #tpu.dot_dimension_numbers<[1], [0], [0], [1], [0, 0, 1, 1], [], []>} : vector<32x128xbf16>, vector<128x64xbf16>, vector<32x64xf32> -> vector<32x64xf32>
    %c3 = arith.constant 3 : index
    %c0_16 = arith.constant 0 : index
    %c0_17 = arith.constant 0 : index
    %18 = vector.load %arg3[%c3, %c0_16, %c0_17] : memref<4x32x128xbf16, #tpu.memory_space<vmem>>, vector<1x32x128xbf16>
    %19 = vector.shape_cast %18 : vector<1x32x128xbf16> to vector<32x128xbf16>
    %cst_18 = arith.constant dense<0.000000e+00> : vector<32x64xf32>
    %20 = tpu.matmul %19, %8, %cst_18 {dimension_numbers = #tpu.dot_dimension_numbers<[1], [0], [0], [1], [0, 0, 1, 1], [], []>} : vector<32x128xbf16>, vector<128x64xbf16>, vector<32x64xf32> -> vector<32x64xf32>
    %21 = arith.maximumf %11, %14 : vector<32x64xf32>
    %22 = arith.maximumf %17, %20 : vector<32x64xf32>
    %23 = arith.maximumf %21, %22 : vector<32x64xf32>
    %24 = arith.truncf %23 : vector<32x64xf32> to vector<32x64xbf16>
    %c0_19 = arith.constant 0 : index
    %c0_20 = arith.constant 0 : index
    %c0_21 = arith.constant 0 : index
    %25 = vector.load %arg4[%c0_19, %c0_20, %c0_21] : memref<25x32x32xbf16, #tpu.memory_space<vmem>>, vector<1x32x32xbf16>
    %26 = vector.shape_cast %25 : vector<1x32x32xbf16> to vector<32x32xbf16>
    %cst_22 = arith.constant dense<0.000000e+00> : vector<32x64xf32>
    %27 = tpu.matmul %26, %24, %cst_22 {dimension_numbers = #tpu.dot_dimension_numbers<[1], [0], [0], [1], [0, 0, 1, 1], [], []>} : vector<32x32xbf16>, vector<32x64xbf16>, vector<32x64xf32> -> vector<32x64xf32>
    %28 = arith.truncf %27 : vector<32x64xf32> to vector<32x64xbf16>
    %c0_23 = arith.constant 0 : index
    %c0_24 = arith.constant 0 : index
    %c0_25 = arith.constant 0 : index
    %29 = vector.load %arg5[%c0_23, %c0_24, %c0_25] : memref<25x64x192xbf16, #tpu.memory_space<vmem>>, vector<1x64x192xbf16>
    %30 = vector.shape_cast %29 : vector<1x64x192xbf16> to vector<64x192xbf16>
    %cst_26 = arith.constant dense<0.000000e+00> : vector<32x192xf32>
    %31 = tpu.matmul %28, %30, %cst_26 {dimension_numbers = #tpu.dot_dimension_numbers<[1], [0], [0], [1], [0, 0, 1, 1], [], []>} : vector<32x64xbf16>, vector<64x192xbf16>, vector<32x192xf32> -> vector<32x192xf32>
    %c1_27 = arith.constant 1 : index
    %c0_28 = arith.constant 0 : index
    %c0_29 = arith.constant 0 : index
    %32 = vector.load %arg4[%c1_27, %c0_28, %c0_29] : memref<25x32x32xbf16, #tpu.memory_space<vmem>>, vector<1x32x32xbf16>
    %33 = vector.shape_cast %32 : vector<1x32x32xbf16> to vector<32x32xbf16>
    %cst_30 = arith.constant dense<0.000000e+00> : vector<32x64xf32>
    %34 = tpu.matmul %33, %24, %cst_30 {dimension_numbers = #tpu.dot_dimension_numbers<[1], [0], [0], [1], [0, 0, 1, 1], [], []>} : vector<32x32xbf16>, vector<32x64xbf16>, vector<32x64xf32> -> vector<32x64xf32>
    %35 = arith.truncf %34 : vector<32x64xf32> to vector<32x64xbf16>
    %c1_31 = arith.constant 1 : index
    %c0_32 = arith.constant 0 : index
    %c0_33 = arith.constant 0 : index
    %36 = vector.load %arg5[%c1_31, %c0_32, %c0_33] : memref<25x64x192xbf16, #tpu.memory_space<vmem>>, vector<1x64x192xbf16>
    %37 = vector.shape_cast %36 : vector<1x64x192xbf16> to vector<64x192xbf16>
    %cst_34 = arith.constant dense<0.000000e+00> : vector<32x192xf32>
    %38 = tpu.matmul %35, %37, %cst_34 {dimension_numbers = #tpu.dot_dimension_numbers<[1], [0], [0], [1], [0, 0, 1, 1], [], []>} : vector<32x64xbf16>, vector<64x192xbf16>, vector<32x192xf32> -> vector<32x192xf32>
    %39 = arith.addf %31, %38 : vector<32x192xf32>
    %c2_35 = arith.constant 2 : index
    %c0_36 = arith.constant 0 : index
    %c0_37 = arith.constant 0 : index
    %40 = vector.load %arg4[%c2_35, %c0_36, %c0_37] : memref<25x32x32xbf16, #tpu.memory_space<vmem>>, vector<1x32x32xbf16>
    %41 = vector.shape_cast %40 : vector<1x32x32xbf16> to vector<32x32xbf16>
    %cst_38 = arith.constant dense<0.000000e+00> : vector<32x64xf32>
    %42 = tpu.matmul %41, %24, %cst_38 {dimension_numbers = #tpu.dot_dimension_numbers<[1], [0], [0], [1], [0, 0, 1, 1], [], []>} : vector<32x32xbf16>, vector<32x64xbf16>, vector<32x64xf32> -> vector<32x64xf32>
    %43 = arith.truncf %42 : vector<32x64xf32> to vector<32x64xbf16>
    %c2_39 = arith.constant 2 : index
    %c0_40 = arith.constant 0 : index
    %c0_41 = arith.constant 0 : index
    %44 = vector.load %arg5[%c2_39, %c0_40, %c0_41] : memref<25x64x192xbf16, #tpu.memory_space<vmem>>, vector<1x64x192xbf16>
    %45 = vector.shape_cast %44 : vector<1x64x192xbf16> to vector<64x192xbf16>
    %cst_42 = arith.constant dense<0.000000e+00> : vector<32x192xf32>
    %46 = tpu.matmul %43, %45, %cst_42 {dimension_numbers = #tpu.dot_dimension_numbers<[1], [0], [0], [1], [0, 0, 1, 1], [], []>} : vector<32x64xbf16>, vector<64x192xbf16>, vector<32x192xf32> -> vector<32x192xf32>
    %47 = arith.addf %39, %46 : vector<32x192xf32>
    %c3_43 = arith.constant 3 : index
    %c0_44 = arith.constant 0 : index
    %c0_45 = arith.constant 0 : index
    %48 = vector.load %arg4[%c3_43, %c0_44, %c0_45] : memref<25x32x32xbf16, #tpu.memory_space<vmem>>, vector<1x32x32xbf16>
    %49 = vector.shape_cast %48 : vector<1x32x32xbf16> to vector<32x32xbf16>
    %cst_46 = arith.constant dense<0.000000e+00> : vector<32x64xf32>
    %50 = tpu.matmul %49, %24, %cst_46 {dimension_numbers = #tpu.dot_dimension_numbers<[1], [0], [0], [1], [0, 0, 1, 1], [], []>} : vector<32x32xbf16>, vector<32x64xbf16>, vector<32x64xf32> -> vector<32x64xf32>
    %51 = arith.truncf %50 : vector<32x64xf32> to vector<32x64xbf16>
    %c3_47 = arith.constant 3 : index
    %c0_48 = arith.constant 0 : index
    %c0_49 = arith.constant 0 : index
    %52 = vector.load %arg5[%c3_47, %c0_48, %c0_49] : memref<25x64x192xbf16, #tpu.memory_space<vmem>>, vector<1x64x192xbf16>
    %53 = vector.shape_cast %52 : vector<1x64x192xbf16> to vector<64x192xbf16>
    %cst_50 = arith.constant dense<0.000000e+00> : vector<32x192xf32>
    %54 = tpu.matmul %51, %53, %cst_50 {dimension_numbers = #tpu.dot_dimension_numbers<[1], [0], [0], [1], [0, 0, 1, 1], [], []>} : vector<32x64xbf16>, vector<64x192xbf16>, vector<32x192xf32> -> vector<32x192xf32>
    %55 = arith.addf %47, %54 : vector<32x192xf32>
    %c4 = arith.constant 4 : index
    %c0_51 = arith.constant 0 : index
    %c0_52 = arith.constant 0 : index
    %56 = vector.load %arg4[%c4, %c0_51, %c0_52] : memref<25x32x32xbf16, #tpu.memory_space<vmem>>, vector<1x32x32xbf16>
    %57 = vector.shape_cast %56 : vector<1x32x32xbf16> to vector<32x32xbf16>
    %cst_53 = arith.constant dense<0.000000e+00> : vector<32x64xf32>
    %58 = tpu.matmul %57, %24, %cst_53 {dimension_numbers = #tpu.dot_dimension_numbers<[1], [0], [0], [1], [0, 0, 1, 1], [], []>} : vector<32x32xbf16>, vector<32x64xbf16>, vector<32x64xf32> -> vector<32x64xf32>
    %59 = arith.truncf %58 : vector<32x64xf32> to vector<32x64xbf16>
    %c4_54 = arith.constant 4 : index
    %c0_55 = arith.constant 0 : index
    %c0_56 = arith.constant 0 : index
    %60 = vector.load %arg5[%c4_54, %c0_55, %c0_56] : memref<25x64x192xbf16, #tpu.memory_space<vmem>>, vector<1x64x192xbf16>
    %61 = vector.shape_cast %60 : vector<1x64x192xbf16> to vector<64x192xbf16>
    %cst_57 = arith.constant dense<0.000000e+00> : vector<32x192xf32>
    %62 = tpu.matmul %59, %61, %cst_57 {dimension_numbers = #tpu.dot_dimension_numbers<[1], [0], [0], [1], [0, 0, 1, 1], [], []>} : vector<32x64xbf16>, vector<64x192xbf16>, vector<32x192xf32> -> vector<32x192xf32>
    %63 = arith.addf %55, %62 : vector<32x192xf32>
    %c5 = arith.constant 5 : index
    %c0_58 = arith.constant 0 : index
    %c0_59 = arith.constant 0 : index
    %64 = vector.load %arg4[%c5, %c0_58, %c0_59] : memref<25x32x32xbf16, #tpu.memory_space<vmem>>, vector<1x32x32xbf16>
    %65 = vector.shape_cast %64 : vector<1x32x32xbf16> to vector<32x32xbf16>
    %cst_60 = arith.constant dense<0.000000e+00> : vector<32x64xf32>
    %66 = tpu.matmul %65, %24, %cst_60 {dimension_numbers = #tpu.dot_dimension_numbers<[1], [0], [0], [1], [0, 0, 1, 1], [], []>} : vector<32x32xbf16>, vector<32x64xbf16>, vector<32x64xf32> -> vector<32x64xf32>
    %67 = arith.truncf %66 : vector<32x64xf32> to vector<32x64xbf16>
    %c5_61 = arith.constant 5 : index
    %c0_62 = arith.constant 0 : index
    %c0_63 = arith.constant 0 : index
    %68 = vector.load %arg5[%c5_61, %c0_62, %c0_63] : memref<25x64x192xbf16, #tpu.memory_space<vmem>>, vector<1x64x192xbf16>
    %69 = vector.shape_cast %68 : vector<1x64x192xbf16> to vector<64x192xbf16>
    %cst_64 = arith.constant dense<0.000000e+00> : vector<32x192xf32>
    %70 = tpu.matmul %67, %69, %cst_64 {dimension_numbers = #tpu.dot_dimension_numbers<[1], [0], [0], [1], [0, 0, 1, 1], [], []>} : vector<32x64xbf16>, vector<64x192xbf16>, vector<32x192xf32> -> vector<32x192xf32>
    %71 = arith.addf %63, %70 : vector<32x192xf32>
    %c6 = arith.constant 6 : index
    %c0_65 = arith.constant 0 : index
    %c0_66 = arith.constant 0 : index
    %72 = vector.load %arg4[%c6, %c0_65, %c0_66] : memref<25x32x32xbf16, #tpu.memory_space<vmem>>, vector<1x32x32xbf16>
    %73 = vector.shape_cast %72 : vector<1x32x32xbf16> to vector<32x32xbf16>
    %cst_67 = arith.constant dense<0.000000e+00> : vector<32x64xf32>
    %74 = tpu.matmul %73, %24, %cst_67 {dimension_numbers = #tpu.dot_dimension_numbers<[1], [0], [0], [1], [0, 0, 1, 1], [], []>} : vector<32x32xbf16>, vector<32x64xbf16>, vector<32x64xf32> -> vector<32x64xf32>
    %75 = arith.truncf %74 : vector<32x64xf32> to vector<32x64xbf16>
    %c6_68 = arith.constant 6 : index
    %c0_69 = arith.constant 0 : index
    %c0_70 = arith.constant 0 : index
    %76 = vector.load %arg5[%c6_68, %c0_69, %c0_70] : memref<25x64x192xbf16, #tpu.memory_space<vmem>>, vector<1x64x192xbf16>
    %77 = vector.shape_cast %76 : vector<1x64x192xbf16> to vector<64x192xbf16>
    %cst_71 = arith.constant dense<0.000000e+00> : vector<32x192xf32>
    %78 = tpu.matmul %75, %77, %cst_71 {dimension_numbers = #tpu.dot_dimension_numbers<[1], [0], [0], [1], [0, 0, 1, 1], [], []>} : vector<32x64xbf16>, vector<64x192xbf16>, vector<32x192xf32> -> vector<32x192xf32>
    %79 = arith.addf %71, %78 : vector<32x192xf32>
    %c7 = arith.constant 7 : index
    %c0_72 = arith.constant 0 : index
    %c0_73 = arith.constant 0 : index
    %80 = vector.load %arg4[%c7, %c0_72, %c0_73] : memref<25x32x32xbf16, #tpu.memory_space<vmem>>, vector<1x32x32xbf16>
    %81 = vector.shape_cast %80 : vector<1x32x32xbf16> to vector<32x32xbf16>
    %cst_74 = arith.constant dense<0.000000e+00> : vector<32x64xf32>
    %82 = tpu.matmul %81, %24, %cst_74 {dimension_numbers = #tpu.dot_dimension_numbers<[1], [0], [0], [1], [0, 0, 1, 1], [], []>} : vector<32x32xbf16>, vector<32x64xbf16>, vector<32x64xf32> -> vector<32x64xf32>
    %83 = arith.truncf %82 : vector<32x64xf32> to vector<32x64xbf16>
    %c7_75 = arith.constant 7 : index
    %c0_76 = arith.constant 0 : index
    %c0_77 = arith.constant 0 : index
    %84 = vector.load %arg5[%c7_75, %c0_76, %c0_77] : memref<25x64x192xbf16, #tpu.memory_space<vmem>>, vector<1x64x192xbf16>
    %85 = vector.shape_cast %84 : vector<1x64x192xbf16> to vector<64x192xbf16>
    %cst_78 = arith.constant dense<0.000000e+00> : vector<32x192xf32>
    %86 = tpu.matmul %83, %85, %cst_78 {dimension_numbers = #tpu.dot_dimension_numbers<[1], [0], [0], [1], [0, 0, 1, 1], [], []>} : vector<32x64xbf16>, vector<64x192xbf16>, vector<32x192xf32> -> vector<32x192xf32>
    %87 = arith.addf %79, %86 : vector<32x192xf32>
    %c8 = arith.constant 8 : index
    %c0_79 = arith.constant 0 : index
    %c0_80 = arith.constant 0 : index
    %88 = vector.load %arg4[%c8, %c0_79, %c0_80] : memref<25x32x32xbf16, #tpu.memory_space<vmem>>, vector<1x32x32xbf16>
    %89 = vector.shape_cast %88 : vector<1x32x32xbf16> to vector<32x32xbf16>
    %cst_81 = arith.constant dense<0.000000e+00> : vector<32x64xf32>
    %90 = tpu.matmul %89, %24, %cst_81 {dimension_numbers = #tpu.dot_dimension_numbers<[1], [0], [0], [1], [0, 0, 1, 1], [], []>} : vector<32x32xbf16>, vector<32x64xbf16>, vector<32x64xf32> -> vector<32x64xf32>
    %91 = arith.truncf %90 : vector<32x64xf32> to vector<32x64xbf16>
    %c8_82 = arith.constant 8 : index
    %c0_83 = arith.constant 0 : index
    %c0_84 = arith.constant 0 : index
    %92 = vector.load %arg5[%c8_82, %c0_83, %c0_84] : memref<25x64x192xbf16, #tpu.memory_space<vmem>>, vector<1x64x192xbf16>
    %93 = vector.shape_cast %92 : vector<1x64x192xbf16> to vector<64x192xbf16>
    %cst_85 = arith.constant dense<0.000000e+00> : vector<32x192xf32>
    %94 = tpu.matmul %91, %93, %cst_85 {dimension_numbers = #tpu.dot_dimension_numbers<[1], [0], [0], [1], [0, 0, 1, 1], [], []>} : vector<32x64xbf16>, vector<64x192xbf16>, vector<32x192xf32> -> vector<32x192xf32>
    %95 = arith.addf %87, %94 : vector<32x192xf32>
    %c9 = arith.constant 9 : index
    %c0_86 = arith.constant 0 : index
    %c0_87 = arith.constant 0 : index
    %96 = vector.load %arg4[%c9, %c0_86, %c0_87] : memref<25x32x32xbf16, #tpu.memory_space<vmem>>, vector<1x32x32xbf16>
    %97 = vector.shape_cast %96 : vector<1x32x32xbf16> to vector<32x32xbf16>
    %cst_88 = arith.constant dense<0.000000e+00> : vector<32x64xf32>
    %98 = tpu.matmul %97, %24, %cst_88 {dimension_numbers = #tpu.dot_dimension_numbers<[1], [0], [0], [1], [0, 0, 1, 1], [], []>} : vector<32x32xbf16>, vector<32x64xbf16>, vector<32x64xf32> -> vector<32x64xf32>
    %99 = arith.truncf %98 : vector<32x64xf32> to vector<32x64xbf16>
    %c9_89 = arith.constant 9 : index
    %c0_90 = arith.constant 0 : index
    %c0_91 = arith.constant 0 : index
    %100 = vector.load %arg5[%c9_89, %c0_90, %c0_91] : memref<25x64x192xbf16, #tpu.memory_space<vmem>>, vector<1x64x192xbf16>
    %101 = vector.shape_cast %100 : vector<1x64x192xbf16> to vector<64x192xbf16>
    %cst_92 = arith.constant dense<0.000000e+00> : vector<32x192xf32>
    %102 = tpu.matmul %99, %101, %cst_92 {dimension_numbers = #tpu.dot_dimension_numbers<[1], [0], [0], [1], [0, 0, 1, 1], [], []>} : vector<32x64xbf16>, vector<64x192xbf16>, vector<32x192xf32> -> vector<32x192xf32>
    %103 = arith.addf %95, %102 : vector<32x192xf32>
    %c10 = arith.constant 10 : index
    %c0_93 = arith.constant 0 : index
    %c0_94 = arith.constant 0 : index
    %104 = vector.load %arg4[%c10, %c0_93, %c0_94] : memref<25x32x32xbf16, #tpu.memory_space<vmem>>, vector<1x32x32xbf16>
    %105 = vector.shape_cast %104 : vector<1x32x32xbf16> to vector<32x32xbf16>
    %cst_95 = arith.constant dense<0.000000e+00> : vector<32x64xf32>
    %106 = tpu.matmul %105, %24, %cst_95 {dimension_numbers = #tpu.dot_dimension_numbers<[1], [0], [0], [1], [0, 0, 1, 1], [], []>} : vector<32x32xbf16>, vector<32x64xbf16>, vector<32x64xf32> -> vector<32x64xf32>
    %107 = arith.truncf %106 : vector<32x64xf32> to vector<32x64xbf16>
    %c10_96 = arith.constant 10 : index
    %c0_97 = arith.constant 0 : index
    %c0_98 = arith.constant 0 : index
    %108 = vector.load %arg5[%c10_96, %c0_97, %c0_98] : memref<25x64x192xbf16, #tpu.memory_space<vmem>>, vector<1x64x192xbf16>
    %109 = vector.shape_cast %108 : vector<1x64x192xbf16> to vector<64x192xbf16>
    %cst_99 = arith.constant dense<0.000000e+00> : vector<32x192xf32>
    %110 = tpu.matmul %107, %109, %cst_99 {dimension_numbers = #tpu.dot_dimension_numbers<[1], [0], [0], [1], [0, 0, 1, 1], [], []>} : vector<32x64xbf16>, vector<64x192xbf16>, vector<32x192xf32> -> vector<32x192xf32>
    %111 = arith.addf %103, %110 : vector<32x192xf32>
    %c11 = arith.constant 11 : index
    %c0_100 = arith.constant 0 : index
    %c0_101 = arith.constant 0 : index
    %112 = vector.load %arg4[%c11, %c0_100, %c0_101] : memref<25x32x32xbf16, #tpu.memory_space<vmem>>, vector<1x32x32xbf16>
    %113 = vector.shape_cast %112 : vector<1x32x32xbf16> to vector<32x32xbf16>
    %cst_102 = arith.constant dense<0.000000e+00> : vector<32x64xf32>
    %114 = tpu.matmul %113, %24, %cst_102 {dimension_numbers = #tpu.dot_dimension_numbers<[1], [0], [0], [1], [0, 0, 1, 1], [], []>} : vector<32x32xbf16>, vector<32x64xbf16>, vector<32x64xf32> -> vector<32x64xf32>
    %115 = arith.truncf %114 : vector<32x64xf32> to vector<32x64xbf16>
    %c11_103 = arith.constant 11 : index
    %c0_104 = arith.constant 0 : index
    %c0_105 = arith.constant 0 : index
    %116 = vector.load %arg5[%c11_103, %c0_104, %c0_105] : memref<25x64x192xbf16, #tpu.memory_space<vmem>>, vector<1x64x192xbf16>
    %117 = vector.shape_cast %116 : vector<1x64x192xbf16> to vector<64x192xbf16>
    %cst_106 = arith.constant dense<0.000000e+00> : vector<32x192xf32>
    %118 = tpu.matmul %115, %117, %cst_106 {dimension_numbers = #tpu.dot_dimension_numbers<[1], [0], [0], [1], [0, 0, 1, 1], [], []>} : vector<32x64xbf16>, vector<64x192xbf16>, vector<32x192xf32> -> vector<32x192xf32>
    %119 = arith.addf %111, %118 : vector<32x192xf32>
    %c12 = arith.constant 12 : index
    %c0_107 = arith.constant 0 : index
    %c0_108 = arith.constant 0 : index
    %120 = vector.load %arg4[%c12, %c0_107, %c0_108] : memref<25x32x32xbf16, #tpu.memory_space<vmem>>, vector<1x32x32xbf16>
    %121 = vector.shape_cast %120 : vector<1x32x32xbf16> to vector<32x32xbf16>
    %cst_109 = arith.constant dense<0.000000e+00> : vector<32x64xf32>
    %122 = tpu.matmul %121, %24, %cst_109 {dimension_numbers = #tpu.dot_dimension_numbers<[1], [0], [0], [1], [0, 0, 1, 1], [], []>} : vector<32x32xbf16>, vector<32x64xbf16>, vector<32x64xf32> -> vector<32x64xf32>
    %123 = arith.truncf %122 : vector<32x64xf32> to vector<32x64xbf16>
    %c12_110 = arith.constant 12 : index
    %c0_111 = arith.constant 0 : index
    %c0_112 = arith.constant 0 : index
    %124 = vector.load %arg5[%c12_110, %c0_111, %c0_112] : memref<25x64x192xbf16, #tpu.memory_space<vmem>>, vector<1x64x192xbf16>
    %125 = vector.shape_cast %124 : vector<1x64x192xbf16> to vector<64x192xbf16>
    %cst_113 = arith.constant dense<0.000000e+00> : vector<32x192xf32>
    %126 = tpu.matmul %123, %125, %cst_113 {dimension_numbers = #tpu.dot_dimension_numbers<[1], [0], [0], [1], [0, 0, 1, 1], [], []>} : vector<32x64xbf16>, vector<64x192xbf16>, vector<32x192xf32> -> vector<32x192xf32>
    %127 = arith.addf %119, %126 : vector<32x192xf32>
    %c13 = arith.constant 13 : index
    %c0_114 = arith.constant 0 : index
    %c0_115 = arith.constant 0 : index
    %128 = vector.load %arg4[%c13, %c0_114, %c0_115] : memref<25x32x32xbf16, #tpu.memory_space<vmem>>, vector<1x32x32xbf16>
    %129 = vector.shape_cast %128 : vector<1x32x32xbf16> to vector<32x32xbf16>
    %cst_116 = arith.constant dense<0.000000e+00> : vector<32x64xf32>
    %130 = tpu.matmul %129, %24, %cst_116 {dimension_numbers = #tpu.dot_dimension_numbers<[1], [0], [0], [1], [0, 0, 1, 1], [], []>} : vector<32x32xbf16>, vector<32x64xbf16>, vector<32x64xf32> -> vector<32x64xf32>
    %131 = arith.truncf %130 : vector<32x64xf32> to vector<32x64xbf16>
    %c13_117 = arith.constant 13 : index
    %c0_118 = arith.constant 0 : index
    %c0_119 = arith.constant 0 : index
    %132 = vector.load %arg5[%c13_117, %c0_118, %c0_119] : memref<25x64x192xbf16, #tpu.memory_space<vmem>>, vector<1x64x192xbf16>
    %133 = vector.shape_cast %132 : vector<1x64x192xbf16> to vector<64x192xbf16>
    %cst_120 = arith.constant dense<0.000000e+00> : vector<32x192xf32>
    %134 = tpu.matmul %131, %133, %cst_120 {dimension_numbers = #tpu.dot_dimension_numbers<[1], [0], [0], [1], [0, 0, 1, 1], [], []>} : vector<32x64xbf16>, vector<64x192xbf16>, vector<32x192xf32> -> vector<32x192xf32>
    %135 = arith.addf %127, %134 : vector<32x192xf32>
    %c14 = arith.constant 14 : index
    %c0_121 = arith.constant 0 : index
    %c0_122 = arith.constant 0 : index
    %136 = vector.load %arg4[%c14, %c0_121, %c0_122] : memref<25x32x32xbf16, #tpu.memory_space<vmem>>, vector<1x32x32xbf16>
    %137 = vector.shape_cast %136 : vector<1x32x32xbf16> to vector<32x32xbf16>
    %cst_123 = arith.constant dense<0.000000e+00> : vector<32x64xf32>
    %138 = tpu.matmul %137, %24, %cst_123 {dimension_numbers = #tpu.dot_dimension_numbers<[1], [0], [0], [1], [0, 0, 1, 1], [], []>} : vector<32x32xbf16>, vector<32x64xbf16>, vector<32x64xf32> -> vector<32x64xf32>
    %139 = arith.truncf %138 : vector<32x64xf32> to vector<32x64xbf16>
    %c14_124 = arith.constant 14 : index
    %c0_125 = arith.constant 0 : index
    %c0_126 = arith.constant 0 : index
    %140 = vector.load %arg5[%c14_124, %c0_125, %c0_126] : memref<25x64x192xbf16, #tpu.memory_space<vmem>>, vector<1x64x192xbf16>
    %141 = vector.shape_cast %140 : vector<1x64x192xbf16> to vector<64x192xbf16>
    %cst_127 = arith.constant dense<0.000000e+00> : vector<32x192xf32>
    %142 = tpu.matmul %139, %141, %cst_127 {dimension_numbers = #tpu.dot_dimension_numbers<[1], [0], [0], [1], [0, 0, 1, 1], [], []>} : vector<32x64xbf16>, vector<64x192xbf16>, vector<32x192xf32> -> vector<32x192xf32>
    %143 = arith.addf %135, %142 : vector<32x192xf32>
    %c15 = arith.constant 15 : index
    %c0_128 = arith.constant 0 : index
    %c0_129 = arith.constant 0 : index
    %144 = vector.load %arg4[%c15, %c0_128, %c0_129] : memref<25x32x32xbf16, #tpu.memory_space<vmem>>, vector<1x32x32xbf16>
    %145 = vector.shape_cast %144 : vector<1x32x32xbf16> to vector<32x32xbf16>
    %cst_130 = arith.constant dense<0.000000e+00> : vector<32x64xf32>
    %146 = tpu.matmul %145, %24, %cst_130 {dimension_numbers = #tpu.dot_dimension_numbers<[1], [0], [0], [1], [0, 0, 1, 1], [], []>} : vector<32x32xbf16>, vector<32x64xbf16>, vector<32x64xf32> -> vector<32x64xf32>
    %147 = arith.truncf %146 : vector<32x64xf32> to vector<32x64xbf16>
    %c15_131 = arith.constant 15 : index
    %c0_132 = arith.constant 0 : index
    %c0_133 = arith.constant 0 : index
    %148 = vector.load %arg5[%c15_131, %c0_132, %c0_133] : memref<25x64x192xbf16, #tpu.memory_space<vmem>>, vector<1x64x192xbf16>
    %149 = vector.shape_cast %148 : vector<1x64x192xbf16> to vector<64x192xbf16>
    %cst_134 = arith.constant dense<0.000000e+00> : vector<32x192xf32>
    %150 = tpu.matmul %147, %149, %cst_134 {dimension_numbers = #tpu.dot_dimension_numbers<[1], [0], [0], [1], [0, 0, 1, 1], [], []>} : vector<32x64xbf16>, vector<64x192xbf16>, vector<32x192xf32> -> vector<32x192xf32>
    %151 = arith.addf %143, %150 : vector<32x192xf32>
    %c16 = arith.constant 16 : index
    %c0_135 = arith.constant 0 : index
    %c0_136 = arith.constant 0 : index
    %152 = vector.load %arg4[%c16, %c0_135, %c0_136] : memref<25x32x32xbf16, #tpu.memory_space<vmem>>, vector<1x32x32xbf16>
    %153 = vector.shape_cast %152 : vector<1x32x32xbf16> to vector<32x32xbf16>
    %cst_137 = arith.constant dense<0.000000e+00> : vector<32x64xf32>
    %154 = tpu.matmul %153, %24, %cst_137 {dimension_numbers = #tpu.dot_dimension_numbers<[1], [0], [0], [1], [0, 0, 1, 1], [], []>} : vector<32x32xbf16>, vector<32x64xbf16>, vector<32x64xf32> -> vector<32x64xf32>
    %155 = arith.truncf %154 : vector<32x64xf32> to vector<32x64xbf16>
    %c16_138 = arith.constant 16 : index
    %c0_139 = arith.constant 0 : index
    %c0_140 = arith.constant 0 : index
    %156 = vector.load %arg5[%c16_138, %c0_139, %c0_140] : memref<25x64x192xbf16, #tpu.memory_space<vmem>>, vector<1x64x192xbf16>
    %157 = vector.shape_cast %156 : vector<1x64x192xbf16> to vector<64x192xbf16>
    %cst_141 = arith.constant dense<0.000000e+00> : vector<32x192xf32>
    %158 = tpu.matmul %155, %157, %cst_141 {dimension_numbers = #tpu.dot_dimension_numbers<[1], [0], [0], [1], [0, 0, 1, 1], [], []>} : vector<32x64xbf16>, vector<64x192xbf16>, vector<32x192xf32> -> vector<32x192xf32>
    %159 = arith.addf %151, %158 : vector<32x192xf32>
    %c17 = arith.constant 17 : index
    %c0_142 = arith.constant 0 : index
    %c0_143 = arith.constant 0 : index
    %160 = vector.load %arg4[%c17, %c0_142, %c0_143] : memref<25x32x32xbf16, #tpu.memory_space<vmem>>, vector<1x32x32xbf16>
    %161 = vector.shape_cast %160 : vector<1x32x32xbf16> to vector<32x32xbf16>
    %cst_144 = arith.constant dense<0.000000e+00> : vector<32x64xf32>
    %162 = tpu.matmul %161, %24, %cst_144 {dimension_numbers = #tpu.dot_dimension_numbers<[1], [0], [0], [1], [0, 0, 1, 1], [], []>} : vector<32x32xbf16>, vector<32x64xbf16>, vector<32x64xf32> -> vector<32x64xf32>
    %163 = arith.truncf %162 : vector<32x64xf32> to vector<32x64xbf16>
    %c17_145 = arith.constant 17 : index
    %c0_146 = arith.constant 0 : index
    %c0_147 = arith.constant 0 : index
    %164 = vector.load %arg5[%c17_145, %c0_146, %c0_147] : memref<25x64x192xbf16, #tpu.memory_space<vmem>>, vector<1x64x192xbf16>
    %165 = vector.shape_cast %164 : vector<1x64x192xbf16> to vector<64x192xbf16>
    %cst_148 = arith.constant dense<0.000000e+00> : vector<32x192xf32>
    %166 = tpu.matmul %163, %165, %cst_148 {dimension_numbers = #tpu.dot_dimension_numbers<[1], [0], [0], [1], [0, 0, 1, 1], [], []>} : vector<32x64xbf16>, vector<64x192xbf16>, vector<32x192xf32> -> vector<32x192xf32>
    %167 = arith.addf %159, %166 : vector<32x192xf32>
    %c18 = arith.constant 18 : index
    %c0_149 = arith.constant 0 : index
    %c0_150 = arith.constant 0 : index
    %168 = vector.load %arg4[%c18, %c0_149, %c0_150] : memref<25x32x32xbf16, #tpu.memory_space<vmem>>, vector<1x32x32xbf16>
    %169 = vector.shape_cast %168 : vector<1x32x32xbf16> to vector<32x32xbf16>
    %cst_151 = arith.constant dense<0.000000e+00> : vector<32x64xf32>
    %170 = tpu.matmul %169, %24, %cst_151 {dimension_numbers = #tpu.dot_dimension_numbers<[1], [0], [0], [1], [0, 0, 1, 1], [], []>} : vector<32x32xbf16>, vector<32x64xbf16>, vector<32x64xf32> -> vector<32x64xf32>
    %171 = arith.truncf %170 : vector<32x64xf32> to vector<32x64xbf16>
    %c18_152 = arith.constant 18 : index
    %c0_153 = arith.constant 0 : index
    %c0_154 = arith.constant 0 : index
    %172 = vector.load %arg5[%c18_152, %c0_153, %c0_154] : memref<25x64x192xbf16, #tpu.memory_space<vmem>>, vector<1x64x192xbf16>
    %173 = vector.shape_cast %172 : vector<1x64x192xbf16> to vector<64x192xbf16>
    %cst_155 = arith.constant dense<0.000000e+00> : vector<32x192xf32>
    %174 = tpu.matmul %171, %173, %cst_155 {dimension_numbers = #tpu.dot_dimension_numbers<[1], [0], [0], [1], [0, 0, 1, 1], [], []>} : vector<32x64xbf16>, vector<64x192xbf16>, vector<32x192xf32> -> vector<32x192xf32>
    %175 = arith.addf %167, %174 : vector<32x192xf32>
    %c19 = arith.constant 19 : index
    %c0_156 = arith.constant 0 : index
    %c0_157 = arith.constant 0 : index
    %176 = vector.load %arg4[%c19, %c0_156, %c0_157] : memref<25x32x32xbf16, #tpu.memory_space<vmem>>, vector<1x32x32xbf16>
    %177 = vector.shape_cast %176 : vector<1x32x32xbf16> to vector<32x32xbf16>
    %cst_158 = arith.constant dense<0.000000e+00> : vector<32x64xf32>
    %178 = tpu.matmul %177, %24, %cst_158 {dimension_numbers = #tpu.dot_dimension_numbers<[1], [0], [0], [1], [0, 0, 1, 1], [], []>} : vector<32x32xbf16>, vector<32x64xbf16>, vector<32x64xf32> -> vector<32x64xf32>
    %179 = arith.truncf %178 : vector<32x64xf32> to vector<32x64xbf16>
    %c19_159 = arith.constant 19 : index
    %c0_160 = arith.constant 0 : index
    %c0_161 = arith.constant 0 : index
    %180 = vector.load %arg5[%c19_159, %c0_160, %c0_161] : memref<25x64x192xbf16, #tpu.memory_space<vmem>>, vector<1x64x192xbf16>
    %181 = vector.shape_cast %180 : vector<1x64x192xbf16> to vector<64x192xbf16>
    %cst_162 = arith.constant dense<0.000000e+00> : vector<32x192xf32>
    %182 = tpu.matmul %179, %181, %cst_162 {dimension_numbers = #tpu.dot_dimension_numbers<[1], [0], [0], [1], [0, 0, 1, 1], [], []>} : vector<32x64xbf16>, vector<64x192xbf16>, vector<32x192xf32> -> vector<32x192xf32>
    %183 = arith.addf %175, %182 : vector<32x192xf32>
    %c20 = arith.constant 20 : index
    %c0_163 = arith.constant 0 : index
    %c0_164 = arith.constant 0 : index
    %184 = vector.load %arg4[%c20, %c0_163, %c0_164] : memref<25x32x32xbf16, #tpu.memory_space<vmem>>, vector<1x32x32xbf16>
    %185 = vector.shape_cast %184 : vector<1x32x32xbf16> to vector<32x32xbf16>
    %cst_165 = arith.constant dense<0.000000e+00> : vector<32x64xf32>
    %186 = tpu.matmul %185, %24, %cst_165 {dimension_numbers = #tpu.dot_dimension_numbers<[1], [0], [0], [1], [0, 0, 1, 1], [], []>} : vector<32x32xbf16>, vector<32x64xbf16>, vector<32x64xf32> -> vector<32x64xf32>
    %187 = arith.truncf %186 : vector<32x64xf32> to vector<32x64xbf16>
    %c20_166 = arith.constant 20 : index
    %c0_167 = arith.constant 0 : index
    %c0_168 = arith.constant 0 : index
    %188 = vector.load %arg5[%c20_166, %c0_167, %c0_168] : memref<25x64x192xbf16, #tpu.memory_space<vmem>>, vector<1x64x192xbf16>
    %189 = vector.shape_cast %188 : vector<1x64x192xbf16> to vector<64x192xbf16>
    %cst_169 = arith.constant dense<0.000000e+00> : vector<32x192xf32>
    %190 = tpu.matmul %187, %189, %cst_169 {dimension_numbers = #tpu.dot_dimension_numbers<[1], [0], [0], [1], [0, 0, 1, 1], [], []>} : vector<32x64xbf16>, vector<64x192xbf16>, vector<32x192xf32> -> vector<32x192xf32>
    %191 = arith.addf %183, %190 : vector<32x192xf32>
    %c21 = arith.constant 21 : index
    %c0_170 = arith.constant 0 : index
    %c0_171 = arith.constant 0 : index
    %192 = vector.load %arg4[%c21, %c0_170, %c0_171] : memref<25x32x32xbf16, #tpu.memory_space<vmem>>, vector<1x32x32xbf16>
    %193 = vector.shape_cast %192 : vector<1x32x32xbf16> to vector<32x32xbf16>
    %cst_172 = arith.constant dense<0.000000e+00> : vector<32x64xf32>
    %194 = tpu.matmul %193, %24, %cst_172 {dimension_numbers = #tpu.dot_dimension_numbers<[1], [0], [0], [1], [0, 0, 1, 1], [], []>} : vector<32x32xbf16>, vector<32x64xbf16>, vector<32x64xf32> -> vector<32x64xf32>
    %195 = arith.truncf %194 : vector<32x64xf32> to vector<32x64xbf16>
    %c21_173 = arith.constant 21 : index
    %c0_174 = arith.constant 0 : index
    %c0_175 = arith.constant 0 : index
    %196 = vector.load %arg5[%c21_173, %c0_174, %c0_175] : memref<25x64x192xbf16, #tpu.memory_space<vmem>>, vector<1x64x192xbf16>
    %197 = vector.shape_cast %196 : vector<1x64x192xbf16> to vector<64x192xbf16>
    %cst_176 = arith.constant dense<0.000000e+00> : vector<32x192xf32>
    %198 = tpu.matmul %195, %197, %cst_176 {dimension_numbers = #tpu.dot_dimension_numbers<[1], [0], [0], [1], [0, 0, 1, 1], [], []>} : vector<32x64xbf16>, vector<64x192xbf16>, vector<32x192xf32> -> vector<32x192xf32>
    %199 = arith.addf %191, %198 : vector<32x192xf32>
    %c22 = arith.constant 22 : index
    %c0_177 = arith.constant 0 : index
    %c0_178 = arith.constant 0 : index
    %200 = vector.load %arg4[%c22, %c0_177, %c0_178] : memref<25x32x32xbf16, #tpu.memory_space<vmem>>, vector<1x32x32xbf16>
    %201 = vector.shape_cast %200 : vector<1x32x32xbf16> to vector<32x32xbf16>
    %cst_179 = arith.constant dense<0.000000e+00> : vector<32x64xf32>
    %202 = tpu.matmul %201, %24, %cst_179 {dimension_numbers = #tpu.dot_dimension_numbers<[1], [0], [0], [1], [0, 0, 1, 1], [], []>} : vector<32x32xbf16>, vector<32x64xbf16>, vector<32x64xf32> -> vector<32x64xf32>
    %203 = arith.truncf %202 : vector<32x64xf32> to vector<32x64xbf16>
    %c22_180 = arith.constant 22 : index
    %c0_181 = arith.constant 0 : index
    %c0_182 = arith.constant 0 : index
    %204 = vector.load %arg5[%c22_180, %c0_181, %c0_182] : memref<25x64x192xbf16, #tpu.memory_space<vmem>>, vector<1x64x192xbf16>
    %205 = vector.shape_cast %204 : vector<1x64x192xbf16> to vector<64x192xbf16>
    %cst_183 = arith.constant dense<0.000000e+00> : vector<32x192xf32>
    %206 = tpu.matmul %203, %205, %cst_183 {dimension_numbers = #tpu.dot_dimension_numbers<[1], [0], [0], [1], [0, 0, 1, 1], [], []>} : vector<32x64xbf16>, vector<64x192xbf16>, vector<32x192xf32> -> vector<32x192xf32>
    %207 = arith.addf %199, %206 : vector<32x192xf32>
    %c23 = arith.constant 23 : index
    %c0_184 = arith.constant 0 : index
    %c0_185 = arith.constant 0 : index
    %208 = vector.load %arg4[%c23, %c0_184, %c0_185] : memref<25x32x32xbf16, #tpu.memory_space<vmem>>, vector<1x32x32xbf16>
    %209 = vector.shape_cast %208 : vector<1x32x32xbf16> to vector<32x32xbf16>
    %cst_186 = arith.constant dense<0.000000e+00> : vector<32x64xf32>
    %210 = tpu.matmul %209, %24, %cst_186 {dimension_numbers = #tpu.dot_dimension_numbers<[1], [0], [0], [1], [0, 0, 1, 1], [], []>} : vector<32x32xbf16>, vector<32x64xbf16>, vector<32x64xf32> -> vector<32x64xf32>
    %211 = arith.truncf %210 : vector<32x64xf32> to vector<32x64xbf16>
    %c23_187 = arith.constant 23 : index
    %c0_188 = arith.constant 0 : index
    %c0_189 = arith.constant 0 : index
    %212 = vector.load %arg5[%c23_187, %c0_188, %c0_189] : memref<25x64x192xbf16, #tpu.memory_space<vmem>>, vector<1x64x192xbf16>
    %213 = vector.shape_cast %212 : vector<1x64x192xbf16> to vector<64x192xbf16>
    %cst_190 = arith.constant dense<0.000000e+00> : vector<32x192xf32>
    %214 = tpu.matmul %211, %213, %cst_190 {dimension_numbers = #tpu.dot_dimension_numbers<[1], [0], [0], [1], [0, 0, 1, 1], [], []>} : vector<32x64xbf16>, vector<64x192xbf16>, vector<32x192xf32> -> vector<32x192xf32>
    %215 = arith.addf %207, %214 : vector<32x192xf32>
    %c24 = arith.constant 24 : index
    %c0_191 = arith.constant 0 : index
    %c0_192 = arith.constant 0 : index
    %216 = vector.load %arg4[%c24, %c0_191, %c0_192] : memref<25x32x32xbf16, #tpu.memory_space<vmem>>, vector<1x32x32xbf16>
    %217 = vector.shape_cast %216 : vector<1x32x32xbf16> to vector<32x32xbf16>
    %cst_193 = arith.constant dense<0.000000e+00> : vector<32x64xf32>
    %218 = tpu.matmul %217, %24, %cst_193 {dimension_numbers = #tpu.dot_dimension_numbers<[1], [0], [0], [1], [0, 0, 1, 1], [], []>} : vector<32x32xbf16>, vector<32x64xbf16>, vector<32x64xf32> -> vector<32x64xf32>
    %219 = arith.truncf %218 : vector<32x64xf32> to vector<32x64xbf16>
    %c24_194 = arith.constant 24 : index
    %c0_195 = arith.constant 0 : index
    %c0_196 = arith.constant 0 : index
    %220 = vector.load %arg5[%c24_194, %c0_195, %c0_196] : memref<25x64x192xbf16, #tpu.memory_space<vmem>>, vector<1x64x192xbf16>
    %221 = vector.shape_cast %220 : vector<1x64x192xbf16> to vector<64x192xbf16>
    %cst_197 = arith.constant dense<0.000000e+00> : vector<32x192xf32>
    %222 = tpu.matmul %219, %221, %cst_197 {dimension_numbers = #tpu.dot_dimension_numbers<[1], [0], [0], [1], [0, 0, 1, 1], [], []>} : vector<32x64xbf16>, vector<64x192xbf16>, vector<32x192xf32> -> vector<32x192xf32>
    %223 = arith.addf %215, %222 : vector<32x192xf32>
    %c0_198 = arith.constant 0 : index
    %c0_199 = arith.constant 0 : index
    %224 = vector.load %arg6[%c0_198, %c0_199] : memref<1x192xf32, #tpu.memory_space<vmem>>, vector<1x192xf32>
    %225 = vector.broadcast %224 : vector<1x192xf32> to vector<32x192xf32>
    %226 = arith.addf %223, %225 : vector<32x192xf32>
    %cst_200 = arith.constant 0.000000e+00 : f32
    %227 = vector.broadcast %cst_200 : f32 to vector<32x192xf32>
    %228 = arith.maximumf %226, %227 : vector<32x192xf32>
    %229 = arith.truncf %228 : vector<32x192xf32> to vector<32x192xbf16>
    %c0_201 = arith.constant 0 : index
    %c0_202 = arith.constant 0 : index
    %c0_203 = arith.constant 0 : index
    %230 = vector.load %arg7[%c0_201, %c0_202, %c0_203] : memref<4x8x32xbf16, #tpu.memory_space<vmem>>, vector<1x8x32xbf16>
    %231 = vector.shape_cast %230 : vector<1x8x32xbf16> to vector<8x32xbf16>
    %cst_204 = arith.constant dense<0.000000e+00> : vector<8x192xf32>
    %232 = tpu.matmul %231, %229, %cst_204 {dimension_numbers = #tpu.dot_dimension_numbers<[1], [0], [0], [1], [0, 0, 1, 1], [], []>} : vector<8x32xbf16>, vector<32x192xbf16>, vector<8x192xf32> -> vector<8x192xf32>
    %c1_205 = arith.constant 1 : index
    %c0_206 = arith.constant 0 : index
    %c0_207 = arith.constant 0 : index
    %233 = vector.load %arg7[%c1_205, %c0_206, %c0_207] : memref<4x8x32xbf16, #tpu.memory_space<vmem>>, vector<1x8x32xbf16>
    %234 = vector.shape_cast %233 : vector<1x8x32xbf16> to vector<8x32xbf16>
    %cst_208 = arith.constant dense<0.000000e+00> : vector<8x192xf32>
    %235 = tpu.matmul %234, %229, %cst_208 {dimension_numbers = #tpu.dot_dimension_numbers<[1], [0], [0], [1], [0, 0, 1, 1], [], []>} : vector<8x32xbf16>, vector<32x192xbf16>, vector<8x192xf32> -> vector<8x192xf32>
    %c2_209 = arith.constant 2 : index
    %c0_210 = arith.constant 0 : index
    %c0_211 = arith.constant 0 : index
    %236 = vector.load %arg7[%c2_209, %c0_210, %c0_211] : memref<4x8x32xbf16, #tpu.memory_space<vmem>>, vector<1x8x32xbf16>
    %237 = vector.shape_cast %236 : vector<1x8x32xbf16> to vector<8x32xbf16>
    %cst_212 = arith.constant dense<0.000000e+00> : vector<8x192xf32>
    %238 = tpu.matmul %237, %229, %cst_212 {dimension_numbers = #tpu.dot_dimension_numbers<[1], [0], [0], [1], [0, 0, 1, 1], [], []>} : vector<8x32xbf16>, vector<32x192xbf16>, vector<8x192xf32> -> vector<8x192xf32>
    %c3_213 = arith.constant 3 : index
    %c0_214 = arith.constant 0 : index
    %c0_215 = arith.constant 0 : index
    %239 = vector.load %arg7[%c3_213, %c0_214, %c0_215] : memref<4x8x32xbf16, #tpu.memory_space<vmem>>, vector<1x8x32xbf16>
    %240 = vector.shape_cast %239 : vector<1x8x32xbf16> to vector<8x32xbf16>
    %cst_216 = arith.constant dense<0.000000e+00> : vector<8x192xf32>
    %241 = tpu.matmul %240, %229, %cst_216 {dimension_numbers = #tpu.dot_dimension_numbers<[1], [0], [0], [1], [0, 0, 1, 1], [], []>} : vector<8x32xbf16>, vector<32x192xbf16>, vector<8x192xf32> -> vector<8x192xf32>
    %242 = arith.maximumf %232, %235 : vector<8x192xf32>
    %243 = arith.maximumf %238, %241 : vector<8x192xf32>
    %244 = arith.maximumf %242, %243 : vector<8x192xf32>
    %245 = arith.truncf %244 : vector<8x192xf32> to vector<8x192xbf16>
    %c0_217 = arith.constant 0 : index
    %c0_218 = arith.constant 0 : index
    %c0_219 = arith.constant 0 : index
    %246 = vector.load %arg8[%c0_217, %c0_218, %c0_219] : memref<9x8x8xbf16, #tpu.memory_space<vmem>>, vector<1x8x8xbf16>
    %247 = vector.shape_cast %246 : vector<1x8x8xbf16> to vector<8x8xbf16>
    %cst_220 = arith.constant dense<0.000000e+00> : vector<8x192xf32>
    %248 = tpu.matmul %247, %245, %cst_220 {dimension_numbers = #tpu.dot_dimension_numbers<[1], [0], [0], [1], [0, 0, 1, 1], [], []>} : vector<8x8xbf16>, vector<8x192xbf16>, vector<8x192xf32> -> vector<8x192xf32>
    %249 = arith.truncf %248 : vector<8x192xf32> to vector<8x192xbf16>
    %c0_221 = arith.constant 0 : index
    %c0_222 = arith.constant 0 : index
    %c0_223 = arith.constant 0 : index
    %250 = vector.load %arg9[%c0_221, %c0_222, %c0_223] : memref<9x192x384xbf16, #tpu.memory_space<vmem>>, vector<1x192x384xbf16>
    %251 = vector.shape_cast %250 : vector<1x192x384xbf16> to vector<192x384xbf16>
    %cst_224 = arith.constant dense<0.000000e+00> : vector<8x384xf32>
    %252 = tpu.matmul %249, %251, %cst_224 {dimension_numbers = #tpu.dot_dimension_numbers<[1], [0], [0], [1], [0, 0, 1, 1], [], []>} : vector<8x192xbf16>, vector<192x384xbf16>, vector<8x384xf32> -> vector<8x384xf32>
    %c1_225 = arith.constant 1 : index
    %c0_226 = arith.constant 0 : index
    %c0_227 = arith.constant 0 : index
    %253 = vector.load %arg8[%c1_225, %c0_226, %c0_227] : memref<9x8x8xbf16, #tpu.memory_space<vmem>>, vector<1x8x8xbf16>
    %254 = vector.shape_cast %253 : vector<1x8x8xbf16> to vector<8x8xbf16>
    %cst_228 = arith.constant dense<0.000000e+00> : vector<8x192xf32>
    %255 = tpu.matmul %254, %245, %cst_228 {dimension_numbers = #tpu.dot_dimension_numbers<[1], [0], [0], [1], [0, 0, 1, 1], [], []>} : vector<8x8xbf16>, vector<8x192xbf16>, vector<8x192xf32> -> vector<8x192xf32>
    %256 = arith.truncf %255 : vector<8x192xf32> to vector<8x192xbf16>
    %c1_229 = arith.constant 1 : index
    %c0_230 = arith.constant 0 : index
    %c0_231 = arith.constant 0 : index
    %257 = vector.load %arg9[%c1_229, %c0_230, %c0_231] : memref<9x192x384xbf16, #tpu.memory_space<vmem>>, vector<1x192x384xbf16>
    %258 = vector.shape_cast %257 : vector<1x192x384xbf16> to vector<192x384xbf16>
    %cst_232 = arith.constant dense<0.000000e+00> : vector<8x384xf32>
    %259 = tpu.matmul %256, %258, %cst_232 {dimension_numbers = #tpu.dot_dimension_numbers<[1], [0], [0], [1], [0, 0, 1, 1], [], []>} : vector<8x192xbf16>, vector<192x384xbf16>, vector<8x384xf32> -> vector<8x384xf32>
    %260 = arith.addf %252, %259 : vector<8x384xf32>
    %c2_233 = arith.constant 2 : index
    %c0_234 = arith.constant 0 : index
    %c0_235 = arith.constant 0 : index
    %261 = vector.load %arg8[%c2_233, %c0_234, %c0_235] : memref<9x8x8xbf16, #tpu.memory_space<vmem>>, vector<1x8x8xbf16>
    %262 = vector.shape_cast %261 : vector<1x8x8xbf16> to vector<8x8xbf16>
    %cst_236 = arith.constant dense<0.000000e+00> : vector<8x192xf32>
    %263 = tpu.matmul %262, %245, %cst_236 {dimension_numbers = #tpu.dot_dimension_numbers<[1], [0], [0], [1], [0, 0, 1, 1], [], []>} : vector<8x8xbf16>, vector<8x192xbf16>, vector<8x192xf32> -> vector<8x192xf32>
    %264 = arith.truncf %263 : vector<8x192xf32> to vector<8x192xbf16>
    %c2_237 = arith.constant 2 : index
    %c0_238 = arith.constant 0 : index
    %c0_239 = arith.constant 0 : index
    %265 = vector.load %arg9[%c2_237, %c0_238, %c0_239] : memref<9x192x384xbf16, #tpu.memory_space<vmem>>, vector<1x192x384xbf16>
    %266 = vector.shape_cast %265 : vector<1x192x384xbf16> to vector<192x384xbf16>
    %cst_240 = arith.constant dense<0.000000e+00> : vector<8x384xf32>
    %267 = tpu.matmul %264, %266, %cst_240 {dimension_numbers = #tpu.dot_dimension_numbers<[1], [0], [0], [1], [0, 0, 1, 1], [], []>} : vector<8x192xbf16>, vector<192x384xbf16>, vector<8x384xf32> -> vector<8x384xf32>
    %268 = arith.addf %260, %267 : vector<8x384xf32>
    %c3_241 = arith.constant 3 : index
    %c0_242 = arith.constant 0 : index
    %c0_243 = arith.constant 0 : index
    %269 = vector.load %arg8[%c3_241, %c0_242, %c0_243] : memref<9x8x8xbf16, #tpu.memory_space<vmem>>, vector<1x8x8xbf16>
    %270 = vector.shape_cast %269 : vector<1x8x8xbf16> to vector<8x8xbf16>
    %cst_244 = arith.constant dense<0.000000e+00> : vector<8x192xf32>
    %271 = tpu.matmul %270, %245, %cst_244 {dimension_numbers = #tpu.dot_dimension_numbers<[1], [0], [0], [1], [0, 0, 1, 1], [], []>} : vector<8x8xbf16>, vector<8x192xbf16>, vector<8x192xf32> -> vector<8x192xf32>
    %272 = arith.truncf %271 : vector<8x192xf32> to vector<8x192xbf16>
    %c3_245 = arith.constant 3 : index
    %c0_246 = arith.constant 0 : index
    %c0_247 = arith.constant 0 : index
    %273 = vector.load %arg9[%c3_245, %c0_246, %c0_247] : memref<9x192x384xbf16, #tpu.memory_space<vmem>>, vector<1x192x384xbf16>
    %274 = vector.shape_cast %273 : vector<1x192x384xbf16> to vector<192x384xbf16>
    %cst_248 = arith.constant dense<0.000000e+00> : vector<8x384xf32>
    %275 = tpu.matmul %272, %274, %cst_248 {dimension_numbers = #tpu.dot_dimension_numbers<[1], [0], [0], [1], [0, 0, 1, 1], [], []>} : vector<8x192xbf16>, vector<192x384xbf16>, vector<8x384xf32> -> vector<8x384xf32>
    %276 = arith.addf %268, %275 : vector<8x384xf32>
    %c4_249 = arith.constant 4 : index
    %c0_250 = arith.constant 0 : index
    %c0_251 = arith.constant 0 : index
    %277 = vector.load %arg8[%c4_249, %c0_250, %c0_251] : memref<9x8x8xbf16, #tpu.memory_space<vmem>>, vector<1x8x8xbf16>
    %278 = vector.shape_cast %277 : vector<1x8x8xbf16> to vector<8x8xbf16>
    %cst_252 = arith.constant dense<0.000000e+00> : vector<8x192xf32>
    %279 = tpu.matmul %278, %245, %cst_252 {dimension_numbers = #tpu.dot_dimension_numbers<[1], [0], [0], [1], [0, 0, 1, 1], [], []>} : vector<8x8xbf16>, vector<8x192xbf16>, vector<8x192xf32> -> vector<8x192xf32>
    %280 = arith.truncf %279 : vector<8x192xf32> to vector<8x192xbf16>
    %c4_253 = arith.constant 4 : index
    %c0_254 = arith.constant 0 : index
    %c0_255 = arith.constant 0 : index
    %281 = vector.load %arg9[%c4_253, %c0_254, %c0_255] : memref<9x192x384xbf16, #tpu.memory_space<vmem>>, vector<1x192x384xbf16>
    %282 = vector.shape_cast %281 : vector<1x192x384xbf16> to vector<192x384xbf16>
    %cst_256 = arith.constant dense<0.000000e+00> : vector<8x384xf32>
    %283 = tpu.matmul %280, %282, %cst_256 {dimension_numbers = #tpu.dot_dimension_numbers<[1], [0], [0], [1], [0, 0, 1, 1], [], []>} : vector<8x192xbf16>, vector<192x384xbf16>, vector<8x384xf32> -> vector<8x384xf32>
    %284 = arith.addf %276, %283 : vector<8x384xf32>
    %c5_257 = arith.constant 5 : index
    %c0_258 = arith.constant 0 : index
    %c0_259 = arith.constant 0 : index
    %285 = vector.load %arg8[%c5_257, %c0_258, %c0_259] : memref<9x8x8xbf16, #tpu.memory_space<vmem>>, vector<1x8x8xbf16>
    %286 = vector.shape_cast %285 : vector<1x8x8xbf16> to vector<8x8xbf16>
    %cst_260 = arith.constant dense<0.000000e+00> : vector<8x192xf32>
    %287 = tpu.matmul %286, %245, %cst_260 {dimension_numbers = #tpu.dot_dimension_numbers<[1], [0], [0], [1], [0, 0, 1, 1], [], []>} : vector<8x8xbf16>, vector<8x192xbf16>, vector<8x192xf32> -> vector<8x192xf32>
    %288 = arith.truncf %287 : vector<8x192xf32> to vector<8x192xbf16>
    %c5_261 = arith.constant 5 : index
    %c0_262 = arith.constant 0 : index
    %c0_263 = arith.constant 0 : index
    %289 = vector.load %arg9[%c5_261, %c0_262, %c0_263] : memref<9x192x384xbf16, #tpu.memory_space<vmem>>, vector<1x192x384xbf16>
    %290 = vector.shape_cast %289 : vector<1x192x384xbf16> to vector<192x384xbf16>
    %cst_264 = arith.constant dense<0.000000e+00> : vector<8x384xf32>
    %291 = tpu.matmul %288, %290, %cst_264 {dimension_numbers = #tpu.dot_dimension_numbers<[1], [0], [0], [1], [0, 0, 1, 1], [], []>} : vector<8x192xbf16>, vector<192x384xbf16>, vector<8x384xf32> -> vector<8x384xf32>
    %292 = arith.addf %284, %291 : vector<8x384xf32>
    %c6_265 = arith.constant 6 : index
    %c0_266 = arith.constant 0 : index
    %c0_267 = arith.constant 0 : index
    %293 = vector.load %arg8[%c6_265, %c0_266, %c0_267] : memref<9x8x8xbf16, #tpu.memory_space<vmem>>, vector<1x8x8xbf16>
    %294 = vector.shape_cast %293 : vector<1x8x8xbf16> to vector<8x8xbf16>
    %cst_268 = arith.constant dense<0.000000e+00> : vector<8x192xf32>
    %295 = tpu.matmul %294, %245, %cst_268 {dimension_numbers = #tpu.dot_dimension_numbers<[1], [0], [0], [1], [0, 0, 1, 1], [], []>} : vector<8x8xbf16>, vector<8x192xbf16>, vector<8x192xf32> -> vector<8x192xf32>
    %296 = arith.truncf %295 : vector<8x192xf32> to vector<8x192xbf16>
    %c6_269 = arith.constant 6 : index
    %c0_270 = arith.constant 0 : index
    %c0_271 = arith.constant 0 : index
    %297 = vector.load %arg9[%c6_269, %c0_270, %c0_271] : memref<9x192x384xbf16, #tpu.memory_space<vmem>>, vector<1x192x384xbf16>
    %298 = vector.shape_cast %297 : vector<1x192x384xbf16> to vector<192x384xbf16>
    %cst_272 = arith.constant dense<0.000000e+00> : vector<8x384xf32>
    %299 = tpu.matmul %296, %298, %cst_272 {dimension_numbers = #tpu.dot_dimension_numbers<[1], [0], [0], [1], [0, 0, 1, 1], [], []>} : vector<8x192xbf16>, vector<192x384xbf16>, vector<8x384xf32> -> vector<8x384xf32>
    %300 = arith.addf %292, %299 : vector<8x384xf32>
    %c7_273 = arith.constant 7 : index
    %c0_274 = arith.constant 0 : index
    %c0_275 = arith.constant 0 : index
    %301 = vector.load %arg8[%c7_273, %c0_274, %c0_275] : memref<9x8x8xbf16, #tpu.memory_space<vmem>>, vector<1x8x8xbf16>
    %302 = vector.shape_cast %301 : vector<1x8x8xbf16> to vector<8x8xbf16>
    %cst_276 = arith.constant dense<0.000000e+00> : vector<8x192xf32>
    %303 = tpu.matmul %302, %245, %cst_276 {dimension_numbers = #tpu.dot_dimension_numbers<[1], [0], [0], [1], [0, 0, 1, 1], [], []>} : vector<8x8xbf16>, vector<8x192xbf16>, vector<8x192xf32> -> vector<8x192xf32>
    %304 = arith.truncf %303 : vector<8x192xf32> to vector<8x192xbf16>
    %c7_277 = arith.constant 7 : index
    %c0_278 = arith.constant 0 : index
    %c0_279 = arith.constant 0 : index
    %305 = vector.load %arg9[%c7_277, %c0_278, %c0_279] : memref<9x192x384xbf16, #tpu.memory_space<vmem>>, vector<1x192x384xbf16>
    %306 = vector.shape_cast %305 : vector<1x192x384xbf16> to vector<192x384xbf16>
    %cst_280 = arith.constant dense<0.000000e+00> : vector<8x384xf32>
    %307 = tpu.matmul %304, %306, %cst_280 {dimension_numbers = #tpu.dot_dimension_numbers<[1], [0], [0], [1], [0, 0, 1, 1], [], []>} : vector<8x192xbf16>, vector<192x384xbf16>, vector<8x384xf32> -> vector<8x384xf32>
    %308 = arith.addf %300, %307 : vector<8x384xf32>
    %c8_281 = arith.constant 8 : index
    %c0_282 = arith.constant 0 : index
    %c0_283 = arith.constant 0 : index
    %309 = vector.load %arg8[%c8_281, %c0_282, %c0_283] : memref<9x8x8xbf16, #tpu.memory_space<vmem>>, vector<1x8x8xbf16>
    %310 = vector.shape_cast %309 : vector<1x8x8xbf16> to vector<8x8xbf16>
    %cst_284 = arith.constant dense<0.000000e+00> : vector<8x192xf32>
    %311 = tpu.matmul %310, %245, %cst_284 {dimension_numbers = #tpu.dot_dimension_numbers<[1], [0], [0], [1], [0, 0, 1, 1], [], []>} : vector<8x8xbf16>, vector<8x192xbf16>, vector<8x192xf32> -> vector<8x192xf32>
    %312 = arith.truncf %311 : vector<8x192xf32> to vector<8x192xbf16>
    %c8_285 = arith.constant 8 : index
    %c0_286 = arith.constant 0 : index
    %c0_287 = arith.constant 0 : index
    %313 = vector.load %arg9[%c8_285, %c0_286, %c0_287] : memref<9x192x384xbf16, #tpu.memory_space<vmem>>, vector<1x192x384xbf16>
    %314 = vector.shape_cast %313 : vector<1x192x384xbf16> to vector<192x384xbf16>
    %cst_288 = arith.constant dense<0.000000e+00> : vector<8x384xf32>
    %315 = tpu.matmul %312, %314, %cst_288 {dimension_numbers = #tpu.dot_dimension_numbers<[1], [0], [0], [1], [0, 0, 1, 1], [], []>} : vector<8x192xbf16>, vector<192x384xbf16>, vector<8x384xf32> -> vector<8x384xf32>
    %316 = arith.addf %308, %315 : vector<8x384xf32>
    %c0_289 = arith.constant 0 : index
    %c0_290 = arith.constant 0 : index
    %317 = vector.load %arg10[%c0_289, %c0_290] : memref<1x384xf32, #tpu.memory_space<vmem>>, vector<1x384xf32>
    %318 = vector.broadcast %317 : vector<1x384xf32> to vector<8x384xf32>
    %319 = arith.addf %316, %318 : vector<8x384xf32>
    %cst_291 = arith.constant 0.000000e+00 : f32
    %320 = vector.broadcast %cst_291 : f32 to vector<8x384xf32>
    %321 = arith.maximumf %319, %320 : vector<8x384xf32>
    %322 = arith.truncf %321 : vector<8x384xf32> to vector<8x384xbf16>
    %c0_292 = arith.constant 0 : index
    %c0_293 = arith.constant 0 : index
    %c0_294 = arith.constant 0 : index
    %323 = vector.load %arg8[%c0_292, %c0_293, %c0_294] : memref<9x8x8xbf16, #tpu.memory_space<vmem>>, vector<1x8x8xbf16>
    %324 = vector.shape_cast %323 : vector<1x8x8xbf16> to vector<8x8xbf16>
    %cst_295 = arith.constant dense<0.000000e+00> : vector<8x384xf32>
    %325 = tpu.matmul %324, %322, %cst_295 {dimension_numbers = #tpu.dot_dimension_numbers<[1], [0], [0], [1], [0, 0, 1, 1], [], []>} : vector<8x8xbf16>, vector<8x384xbf16>, vector<8x384xf32> -> vector<8x384xf32>
    %326 = arith.truncf %325 : vector<8x384xf32> to vector<8x384xbf16>
    %c0_296 = arith.constant 0 : index
    %c0_297 = arith.constant 0 : index
    %c0_298 = arith.constant 0 : index
    %327 = vector.load %arg11[%c0_296, %c0_297, %c0_298] : memref<9x384x256xbf16, #tpu.memory_space<vmem>>, vector<1x384x256xbf16>
    %328 = vector.shape_cast %327 : vector<1x384x256xbf16> to vector<384x256xbf16>
    %cst_299 = arith.constant dense<0.000000e+00> : vector<8x256xf32>
    %329 = tpu.matmul %326, %328, %cst_299 {dimension_numbers = #tpu.dot_dimension_numbers<[1], [0], [0], [1], [0, 0, 1, 1], [], []>} : vector<8x384xbf16>, vector<384x256xbf16>, vector<8x256xf32> -> vector<8x256xf32>
    %c1_300 = arith.constant 1 : index
    %c0_301 = arith.constant 0 : index
    %c0_302 = arith.constant 0 : index
    %330 = vector.load %arg8[%c1_300, %c0_301, %c0_302] : memref<9x8x8xbf16, #tpu.memory_space<vmem>>, vector<1x8x8xbf16>
    %331 = vector.shape_cast %330 : vector<1x8x8xbf16> to vector<8x8xbf16>
    %cst_303 = arith.constant dense<0.000000e+00> : vector<8x384xf32>
    %332 = tpu.matmul %331, %322, %cst_303 {dimension_numbers = #tpu.dot_dimension_numbers<[1], [0], [0], [1], [0, 0, 1, 1], [], []>} : vector<8x8xbf16>, vector<8x384xbf16>, vector<8x384xf32> -> vector<8x384xf32>
    %333 = arith.truncf %332 : vector<8x384xf32> to vector<8x384xbf16>
    %c1_304 = arith.constant 1 : index
    %c0_305 = arith.constant 0 : index
    %c0_306 = arith.constant 0 : index
    %334 = vector.load %arg11[%c1_304, %c0_305, %c0_306] : memref<9x384x256xbf16, #tpu.memory_space<vmem>>, vector<1x384x256xbf16>
    %335 = vector.shape_cast %334 : vector<1x384x256xbf16> to vector<384x256xbf16>
    %cst_307 = arith.constant dense<0.000000e+00> : vector<8x256xf32>
    %336 = tpu.matmul %333, %335, %cst_307 {dimension_numbers = #tpu.dot_dimension_numbers<[1], [0], [0], [1], [0, 0, 1, 1], [], []>} : vector<8x384xbf16>, vector<384x256xbf16>, vector<8x256xf32> -> vector<8x256xf32>
    %337 = arith.addf %329, %336 : vector<8x256xf32>
    %c2_308 = arith.constant 2 : index
    %c0_309 = arith.constant 0 : index
    %c0_310 = arith.constant 0 : index
    %338 = vector.load %arg8[%c2_308, %c0_309, %c0_310] : memref<9x8x8xbf16, #tpu.memory_space<vmem>>, vector<1x8x8xbf16>
    %339 = vector.shape_cast %338 : vector<1x8x8xbf16> to vector<8x8xbf16>
    %cst_311 = arith.constant dense<0.000000e+00> : vector<8x384xf32>
    %340 = tpu.matmul %339, %322, %cst_311 {dimension_numbers = #tpu.dot_dimension_numbers<[1], [0], [0], [1], [0, 0, 1, 1], [], []>} : vector<8x8xbf16>, vector<8x384xbf16>, vector<8x384xf32> -> vector<8x384xf32>
    %341 = arith.truncf %340 : vector<8x384xf32> to vector<8x384xbf16>
    %c2_312 = arith.constant 2 : index
    %c0_313 = arith.constant 0 : index
    %c0_314 = arith.constant 0 : index
    %342 = vector.load %arg11[%c2_312, %c0_313, %c0_314] : memref<9x384x256xbf16, #tpu.memory_space<vmem>>, vector<1x384x256xbf16>
    %343 = vector.shape_cast %342 : vector<1x384x256xbf16> to vector<384x256xbf16>
    %cst_315 = arith.constant dense<0.000000e+00> : vector<8x256xf32>
    %344 = tpu.matmul %341, %343, %cst_315 {dimension_numbers = #tpu.dot_dimension_numbers<[1], [0], [0], [1], [0, 0, 1, 1], [], []>} : vector<8x384xbf16>, vector<384x256xbf16>, vector<8x256xf32> -> vector<8x256xf32>
    %345 = arith.addf %337, %344 : vector<8x256xf32>
    %c3_316 = arith.constant 3 : index
    %c0_317 = arith.constant 0 : index
    %c0_318 = arith.constant 0 : index
    %346 = vector.load %arg8[%c3_316, %c0_317, %c0_318] : memref<9x8x8xbf16, #tpu.memory_space<vmem>>, vector<1x8x8xbf16>
    %347 = vector.shape_cast %346 : vector<1x8x8xbf16> to vector<8x8xbf16>
    %cst_319 = arith.constant dense<0.000000e+00> : vector<8x384xf32>
    %348 = tpu.matmul %347, %322, %cst_319 {dimension_numbers = #tpu.dot_dimension_numbers<[1], [0], [0], [1], [0, 0, 1, 1], [], []>} : vector<8x8xbf16>, vector<8x384xbf16>, vector<8x384xf32> -> vector<8x384xf32>
    %349 = arith.truncf %348 : vector<8x384xf32> to vector<8x384xbf16>
    %c3_320 = arith.constant 3 : index
    %c0_321 = arith.constant 0 : index
    %c0_322 = arith.constant 0 : index
    %350 = vector.load %arg11[%c3_320, %c0_321, %c0_322] : memref<9x384x256xbf16, #tpu.memory_space<vmem>>, vector<1x384x256xbf16>
    %351 = vector.shape_cast %350 : vector<1x384x256xbf16> to vector<384x256xbf16>
    %cst_323 = arith.constant dense<0.000000e+00> : vector<8x256xf32>
    %352 = tpu.matmul %349, %351, %cst_323 {dimension_numbers = #tpu.dot_dimension_numbers<[1], [0], [0], [1], [0, 0, 1, 1], [], []>} : vector<8x384xbf16>, vector<384x256xbf16>, vector<8x256xf32> -> vector<8x256xf32>
    %353 = arith.addf %345, %352 : vector<8x256xf32>
    %c4_324 = arith.constant 4 : index
    %c0_325 = arith.constant 0 : index
    %c0_326 = arith.constant 0 : index
    %354 = vector.load %arg8[%c4_324, %c0_325, %c0_326] : memref<9x8x8xbf16, #tpu.memory_space<vmem>>, vector<1x8x8xbf16>
    %355 = vector.shape_cast %354 : vector<1x8x8xbf16> to vector<8x8xbf16>
    %cst_327 = arith.constant dense<0.000000e+00> : vector<8x384xf32>
    %356 = tpu.matmul %355, %322, %cst_327 {dimension_numbers = #tpu.dot_dimension_numbers<[1], [0], [0], [1], [0, 0, 1, 1], [], []>} : vector<8x8xbf16>, vector<8x384xbf16>, vector<8x384xf32> -> vector<8x384xf32>
    %357 = arith.truncf %356 : vector<8x384xf32> to vector<8x384xbf16>
    %c4_328 = arith.constant 4 : index
    %c0_329 = arith.constant 0 : index
    %c0_330 = arith.constant 0 : index
    %358 = vector.load %arg11[%c4_328, %c0_329, %c0_330] : memref<9x384x256xbf16, #tpu.memory_space<vmem>>, vector<1x384x256xbf16>
    %359 = vector.shape_cast %358 : vector<1x384x256xbf16> to vector<384x256xbf16>
    %cst_331 = arith.constant dense<0.000000e+00> : vector<8x256xf32>
    %360 = tpu.matmul %357, %359, %cst_331 {dimension_numbers = #tpu.dot_dimension_numbers<[1], [0], [0], [1], [0, 0, 1, 1], [], []>} : vector<8x384xbf16>, vector<384x256xbf16>, vector<8x256xf32> -> vector<8x256xf32>
    %361 = arith.addf %353, %360 : vector<8x256xf32>
    %c5_332 = arith.constant 5 : index
    %c0_333 = arith.constant 0 : index
    %c0_334 = arith.constant 0 : index
    %362 = vector.load %arg8[%c5_332, %c0_333, %c0_334] : memref<9x8x8xbf16, #tpu.memory_space<vmem>>, vector<1x8x8xbf16>
    %363 = vector.shape_cast %362 : vector<1x8x8xbf16> to vector<8x8xbf16>
    %cst_335 = arith.constant dense<0.000000e+00> : vector<8x384xf32>
    %364 = tpu.matmul %363, %322, %cst_335 {dimension_numbers = #tpu.dot_dimension_numbers<[1], [0], [0], [1], [0, 0, 1, 1], [], []>} : vector<8x8xbf16>, vector<8x384xbf16>, vector<8x384xf32> -> vector<8x384xf32>
    %365 = arith.truncf %364 : vector<8x384xf32> to vector<8x384xbf16>
    %c5_336 = arith.constant 5 : index
    %c0_337 = arith.constant 0 : index
    %c0_338 = arith.constant 0 : index
    %366 = vector.load %arg11[%c5_336, %c0_337, %c0_338] : memref<9x384x256xbf16, #tpu.memory_space<vmem>>, vector<1x384x256xbf16>
    %367 = vector.shape_cast %366 : vector<1x384x256xbf16> to vector<384x256xbf16>
    %cst_339 = arith.constant dense<0.000000e+00> : vector<8x256xf32>
    %368 = tpu.matmul %365, %367, %cst_339 {dimension_numbers = #tpu.dot_dimension_numbers<[1], [0], [0], [1], [0, 0, 1, 1], [], []>} : vector<8x384xbf16>, vector<384x256xbf16>, vector<8x256xf32> -> vector<8x256xf32>
    %369 = arith.addf %361, %368 : vector<8x256xf32>
    %c6_340 = arith.constant 6 : index
    %c0_341 = arith.constant 0 : index
    %c0_342 = arith.constant 0 : index
    %370 = vector.load %arg8[%c6_340, %c0_341, %c0_342] : memref<9x8x8xbf16, #tpu.memory_space<vmem>>, vector<1x8x8xbf16>
    %371 = vector.shape_cast %370 : vector<1x8x8xbf16> to vector<8x8xbf16>
    %cst_343 = arith.constant dense<0.000000e+00> : vector<8x384xf32>
    %372 = tpu.matmul %371, %322, %cst_343 {dimension_numbers = #tpu.dot_dimension_numbers<[1], [0], [0], [1], [0, 0, 1, 1], [], []>} : vector<8x8xbf16>, vector<8x384xbf16>, vector<8x384xf32> -> vector<8x384xf32>
    %373 = arith.truncf %372 : vector<8x384xf32> to vector<8x384xbf16>
    %c6_344 = arith.constant 6 : index
    %c0_345 = arith.constant 0 : index
    %c0_346 = arith.constant 0 : index
    %374 = vector.load %arg11[%c6_344, %c0_345, %c0_346] : memref<9x384x256xbf16, #tpu.memory_space<vmem>>, vector<1x384x256xbf16>
    %375 = vector.shape_cast %374 : vector<1x384x256xbf16> to vector<384x256xbf16>
    %cst_347 = arith.constant dense<0.000000e+00> : vector<8x256xf32>
    %376 = tpu.matmul %373, %375, %cst_347 {dimension_numbers = #tpu.dot_dimension_numbers<[1], [0], [0], [1], [0, 0, 1, 1], [], []>} : vector<8x384xbf16>, vector<384x256xbf16>, vector<8x256xf32> -> vector<8x256xf32>
    %377 = arith.addf %369, %376 : vector<8x256xf32>
    %c7_348 = arith.constant 7 : index
    %c0_349 = arith.constant 0 : index
    %c0_350 = arith.constant 0 : index
    %378 = vector.load %arg8[%c7_348, %c0_349, %c0_350] : memref<9x8x8xbf16, #tpu.memory_space<vmem>>, vector<1x8x8xbf16>
    %379 = vector.shape_cast %378 : vector<1x8x8xbf16> to vector<8x8xbf16>
    %cst_351 = arith.constant dense<0.000000e+00> : vector<8x384xf32>
    %380 = tpu.matmul %379, %322, %cst_351 {dimension_numbers = #tpu.dot_dimension_numbers<[1], [0], [0], [1], [0, 0, 1, 1], [], []>} : vector<8x8xbf16>, vector<8x384xbf16>, vector<8x384xf32> -> vector<8x384xf32>
    %381 = arith.truncf %380 : vector<8x384xf32> to vector<8x384xbf16>
    %c7_352 = arith.constant 7 : index
    %c0_353 = arith.constant 0 : index
    %c0_354 = arith.constant 0 : index
    %382 = vector.load %arg11[%c7_352, %c0_353, %c0_354] : memref<9x384x256xbf16, #tpu.memory_space<vmem>>, vector<1x384x256xbf16>
    %383 = vector.shape_cast %382 : vector<1x384x256xbf16> to vector<384x256xbf16>
    %cst_355 = arith.constant dense<0.000000e+00> : vector<8x256xf32>
    %384 = tpu.matmul %381, %383, %cst_355 {dimension_numbers = #tpu.dot_dimension_numbers<[1], [0], [0], [1], [0, 0, 1, 1], [], []>} : vector<8x384xbf16>, vector<384x256xbf16>, vector<8x256xf32> -> vector<8x256xf32>
    %385 = arith.addf %377, %384 : vector<8x256xf32>
    %c8_356 = arith.constant 8 : index
    %c0_357 = arith.constant 0 : index
    %c0_358 = arith.constant 0 : index
    %386 = vector.load %arg8[%c8_356, %c0_357, %c0_358] : memref<9x8x8xbf16, #tpu.memory_space<vmem>>, vector<1x8x8xbf16>
    %387 = vector.shape_cast %386 : vector<1x8x8xbf16> to vector<8x8xbf16>
    %cst_359 = arith.constant dense<0.000000e+00> : vector<8x384xf32>
    %388 = tpu.matmul %387, %322, %cst_359 {dimension_numbers = #tpu.dot_dimension_numbers<[1], [0], [0], [1], [0, 0, 1, 1], [], []>} : vector<8x8xbf16>, vector<8x384xbf16>, vector<8x384xf32> -> vector<8x384xf32>
    %389 = arith.truncf %388 : vector<8x384xf32> to vector<8x384xbf16>
    %c8_360 = arith.constant 8 : index
    %c0_361 = arith.constant 0 : index
    %c0_362 = arith.constant 0 : index
    %390 = vector.load %arg11[%c8_360, %c0_361, %c0_362] : memref<9x384x256xbf16, #tpu.memory_space<vmem>>, vector<1x384x256xbf16>
    %391 = vector.shape_cast %390 : vector<1x384x256xbf16> to vector<384x256xbf16>
    %cst_363 = arith.constant dense<0.000000e+00> : vector<8x256xf32>
    %392 = tpu.matmul %389, %391, %cst_363 {dimension_numbers = #tpu.dot_dimension_numbers<[1], [0], [0], [1], [0, 0, 1, 1], [], []>} : vector<8x384xbf16>, vector<384x256xbf16>, vector<8x256xf32> -> vector<8x256xf32>
    %393 = arith.addf %385, %392 : vector<8x256xf32>
    %c0_364 = arith.constant 0 : index
    %c0_365 = arith.constant 0 : index
    %394 = vector.load %arg12[%c0_364, %c0_365] : memref<1x256xf32, #tpu.memory_space<vmem>>, vector<1x256xf32>
    %395 = vector.broadcast %394 : vector<1x256xf32> to vector<8x256xf32>
    %396 = arith.addf %393, %395 : vector<8x256xf32>
    %cst_366 = arith.constant 0.000000e+00 : f32
    %397 = vector.broadcast %cst_366 : f32 to vector<8x256xf32>
    %398 = arith.maximumf %396, %397 : vector<8x256xf32>
    %399 = arith.truncf %398 : vector<8x256xf32> to vector<8x256xbf16>
    %c0_367 = arith.constant 0 : index
    %c0_368 = arith.constant 0 : index
    %c0_369 = arith.constant 0 : index
    %400 = vector.load %arg8[%c0_367, %c0_368, %c0_369] : memref<9x8x8xbf16, #tpu.memory_space<vmem>>, vector<1x8x8xbf16>
    %401 = vector.shape_cast %400 : vector<1x8x8xbf16> to vector<8x8xbf16>
    %cst_370 = arith.constant dense<0.000000e+00> : vector<8x256xf32>
    %402 = tpu.matmul %401, %399, %cst_370 {dimension_numbers = #tpu.dot_dimension_numbers<[1], [0], [0], [1], [0, 0, 1, 1], [], []>} : vector<8x8xbf16>, vector<8x256xbf16>, vector<8x256xf32> -> vector<8x256xf32>
    %403 = arith.truncf %402 : vector<8x256xf32> to vector<8x256xbf16>
    %c0_371 = arith.constant 0 : index
    %c0_372 = arith.constant 0 : index
    %c0_373 = arith.constant 0 : index
    %404 = vector.load %arg13[%c0_371, %c0_372, %c0_373] : memref<9x256x256xbf16, #tpu.memory_space<vmem>>, vector<1x256x256xbf16>
    %405 = vector.shape_cast %404 : vector<1x256x256xbf16> to vector<256x256xbf16>
    %cst_374 = arith.constant dense<0.000000e+00> : vector<8x256xf32>
    %406 = tpu.matmul %403, %405, %cst_374 {dimension_numbers = #tpu.dot_dimension_numbers<[1], [0], [0], [1], [0, 0, 1, 1], [], []>} : vector<8x256xbf16>, vector<256x256xbf16>, vector<8x256xf32> -> vector<8x256xf32>
    %c1_375 = arith.constant 1 : index
    %c0_376 = arith.constant 0 : index
    %c0_377 = arith.constant 0 : index
    %407 = vector.load %arg8[%c1_375, %c0_376, %c0_377] : memref<9x8x8xbf16, #tpu.memory_space<vmem>>, vector<1x8x8xbf16>
    %408 = vector.shape_cast %407 : vector<1x8x8xbf16> to vector<8x8xbf16>
    %cst_378 = arith.constant dense<0.000000e+00> : vector<8x256xf32>
    %409 = tpu.matmul %408, %399, %cst_378 {dimension_numbers = #tpu.dot_dimension_numbers<[1], [0], [0], [1], [0, 0, 1, 1], [], []>} : vector<8x8xbf16>, vector<8x256xbf16>, vector<8x256xf32> -> vector<8x256xf32>
    %410 = arith.truncf %409 : vector<8x256xf32> to vector<8x256xbf16>
    %c1_379 = arith.constant 1 : index
    %c0_380 = arith.constant 0 : index
    %c0_381 = arith.constant 0 : index
    %411 = vector.load %arg13[%c1_379, %c0_380, %c0_381] : memref<9x256x256xbf16, #tpu.memory_space<vmem>>, vector<1x256x256xbf16>
    %412 = vector.shape_cast %411 : vector<1x256x256xbf16> to vector<256x256xbf16>
    %cst_382 = arith.constant dense<0.000000e+00> : vector<8x256xf32>
    %413 = tpu.matmul %410, %412, %cst_382 {dimension_numbers = #tpu.dot_dimension_numbers<[1], [0], [0], [1], [0, 0, 1, 1], [], []>} : vector<8x256xbf16>, vector<256x256xbf16>, vector<8x256xf32> -> vector<8x256xf32>
    %414 = arith.addf %406, %413 : vector<8x256xf32>
    %c2_383 = arith.constant 2 : index
    %c0_384 = arith.constant 0 : index
    %c0_385 = arith.constant 0 : index
    %415 = vector.load %arg8[%c2_383, %c0_384, %c0_385] : memref<9x8x8xbf16, #tpu.memory_space<vmem>>, vector<1x8x8xbf16>
    %416 = vector.shape_cast %415 : vector<1x8x8xbf16> to vector<8x8xbf16>
    %cst_386 = arith.constant dense<0.000000e+00> : vector<8x256xf32>
    %417 = tpu.matmul %416, %399, %cst_386 {dimension_numbers = #tpu.dot_dimension_numbers<[1], [0], [0], [1], [0, 0, 1, 1], [], []>} : vector<8x8xbf16>, vector<8x256xbf16>, vector<8x256xf32> -> vector<8x256xf32>
    %418 = arith.truncf %417 : vector<8x256xf32> to vector<8x256xbf16>
    %c2_387 = arith.constant 2 : index
    %c0_388 = arith.constant 0 : index
    %c0_389 = arith.constant 0 : index
    %419 = vector.load %arg13[%c2_387, %c0_388, %c0_389] : memref<9x256x256xbf16, #tpu.memory_space<vmem>>, vector<1x256x256xbf16>
    %420 = vector.shape_cast %419 : vector<1x256x256xbf16> to vector<256x256xbf16>
    %cst_390 = arith.constant dense<0.000000e+00> : vector<8x256xf32>
    %421 = tpu.matmul %418, %420, %cst_390 {dimension_numbers = #tpu.dot_dimension_numbers<[1], [0], [0], [1], [0, 0, 1, 1], [], []>} : vector<8x256xbf16>, vector<256x256xbf16>, vector<8x256xf32> -> vector<8x256xf32>
    %422 = arith.addf %414, %421 : vector<8x256xf32>
    %c3_391 = arith.constant 3 : index
    %c0_392 = arith.constant 0 : index
    %c0_393 = arith.constant 0 : index
    %423 = vector.load %arg8[%c3_391, %c0_392, %c0_393] : memref<9x8x8xbf16, #tpu.memory_space<vmem>>, vector<1x8x8xbf16>
    %424 = vector.shape_cast %423 : vector<1x8x8xbf16> to vector<8x8xbf16>
    %cst_394 = arith.constant dense<0.000000e+00> : vector<8x256xf32>
    %425 = tpu.matmul %424, %399, %cst_394 {dimension_numbers = #tpu.dot_dimension_numbers<[1], [0], [0], [1], [0, 0, 1, 1], [], []>} : vector<8x8xbf16>, vector<8x256xbf16>, vector<8x256xf32> -> vector<8x256xf32>
    %426 = arith.truncf %425 : vector<8x256xf32> to vector<8x256xbf16>
    %c3_395 = arith.constant 3 : index
    %c0_396 = arith.constant 0 : index
    %c0_397 = arith.constant 0 : index
    %427 = vector.load %arg13[%c3_395, %c0_396, %c0_397] : memref<9x256x256xbf16, #tpu.memory_space<vmem>>, vector<1x256x256xbf16>
    %428 = vector.shape_cast %427 : vector<1x256x256xbf16> to vector<256x256xbf16>
    %cst_398 = arith.constant dense<0.000000e+00> : vector<8x256xf32>
    %429 = tpu.matmul %426, %428, %cst_398 {dimension_numbers = #tpu.dot_dimension_numbers<[1], [0], [0], [1], [0, 0, 1, 1], [], []>} : vector<8x256xbf16>, vector<256x256xbf16>, vector<8x256xf32> -> vector<8x256xf32>
    %430 = arith.addf %422, %429 : vector<8x256xf32>
    %c4_399 = arith.constant 4 : index
    %c0_400 = arith.constant 0 : index
    %c0_401 = arith.constant 0 : index
    %431 = vector.load %arg8[%c4_399, %c0_400, %c0_401] : memref<9x8x8xbf16, #tpu.memory_space<vmem>>, vector<1x8x8xbf16>
    %432 = vector.shape_cast %431 : vector<1x8x8xbf16> to vector<8x8xbf16>
    %cst_402 = arith.constant dense<0.000000e+00> : vector<8x256xf32>
    %433 = tpu.matmul %432, %399, %cst_402 {dimension_numbers = #tpu.dot_dimension_numbers<[1], [0], [0], [1], [0, 0, 1, 1], [], []>} : vector<8x8xbf16>, vector<8x256xbf16>, vector<8x256xf32> -> vector<8x256xf32>
    %434 = arith.truncf %433 : vector<8x256xf32> to vector<8x256xbf16>
    %c4_403 = arith.constant 4 : index
    %c0_404 = arith.constant 0 : index
    %c0_405 = arith.constant 0 : index
    %435 = vector.load %arg13[%c4_403, %c0_404, %c0_405] : memref<9x256x256xbf16, #tpu.memory_space<vmem>>, vector<1x256x256xbf16>
    %436 = vector.shape_cast %435 : vector<1x256x256xbf16> to vector<256x256xbf16>
    %cst_406 = arith.constant dense<0.000000e+00> : vector<8x256xf32>
    %437 = tpu.matmul %434, %436, %cst_406 {dimension_numbers = #tpu.dot_dimension_numbers<[1], [0], [0], [1], [0, 0, 1, 1], [], []>} : vector<8x256xbf16>, vector<256x256xbf16>, vector<8x256xf32> -> vector<8x256xf32>
    %438 = arith.addf %430, %437 : vector<8x256xf32>
    %c5_407 = arith.constant 5 : index
    %c0_408 = arith.constant 0 : index
    %c0_409 = arith.constant 0 : index
    %439 = vector.load %arg8[%c5_407, %c0_408, %c0_409] : memref<9x8x8xbf16, #tpu.memory_space<vmem>>, vector<1x8x8xbf16>
    %440 = vector.shape_cast %439 : vector<1x8x8xbf16> to vector<8x8xbf16>
    %cst_410 = arith.constant dense<0.000000e+00> : vector<8x256xf32>
    %441 = tpu.matmul %440, %399, %cst_410 {dimension_numbers = #tpu.dot_dimension_numbers<[1], [0], [0], [1], [0, 0, 1, 1], [], []>} : vector<8x8xbf16>, vector<8x256xbf16>, vector<8x256xf32> -> vector<8x256xf32>
    %442 = arith.truncf %441 : vector<8x256xf32> to vector<8x256xbf16>
    %c5_411 = arith.constant 5 : index
    %c0_412 = arith.constant 0 : index
    %c0_413 = arith.constant 0 : index
    %443 = vector.load %arg13[%c5_411, %c0_412, %c0_413] : memref<9x256x256xbf16, #tpu.memory_space<vmem>>, vector<1x256x256xbf16>
    %444 = vector.shape_cast %443 : vector<1x256x256xbf16> to vector<256x256xbf16>
    %cst_414 = arith.constant dense<0.000000e+00> : vector<8x256xf32>
    %445 = tpu.matmul %442, %444, %cst_414 {dimension_numbers = #tpu.dot_dimension_numbers<[1], [0], [0], [1], [0, 0, 1, 1], [], []>} : vector<8x256xbf16>, vector<256x256xbf16>, vector<8x256xf32> -> vector<8x256xf32>
    %446 = arith.addf %438, %445 : vector<8x256xf32>
    %c6_415 = arith.constant 6 : index
    %c0_416 = arith.constant 0 : index
    %c0_417 = arith.constant 0 : index
    %447 = vector.load %arg8[%c6_415, %c0_416, %c0_417] : memref<9x8x8xbf16, #tpu.memory_space<vmem>>, vector<1x8x8xbf16>
    %448 = vector.shape_cast %447 : vector<1x8x8xbf16> to vector<8x8xbf16>
    %cst_418 = arith.constant dense<0.000000e+00> : vector<8x256xf32>
    %449 = tpu.matmul %448, %399, %cst_418 {dimension_numbers = #tpu.dot_dimension_numbers<[1], [0], [0], [1], [0, 0, 1, 1], [], []>} : vector<8x8xbf16>, vector<8x256xbf16>, vector<8x256xf32> -> vector<8x256xf32>
    %450 = arith.truncf %449 : vector<8x256xf32> to vector<8x256xbf16>
    %c6_419 = arith.constant 6 : index
    %c0_420 = arith.constant 0 : index
    %c0_421 = arith.constant 0 : index
    %451 = vector.load %arg13[%c6_419, %c0_420, %c0_421] : memref<9x256x256xbf16, #tpu.memory_space<vmem>>, vector<1x256x256xbf16>
    %452 = vector.shape_cast %451 : vector<1x256x256xbf16> to vector<256x256xbf16>
    %cst_422 = arith.constant dense<0.000000e+00> : vector<8x256xf32>
    %453 = tpu.matmul %450, %452, %cst_422 {dimension_numbers = #tpu.dot_dimension_numbers<[1], [0], [0], [1], [0, 0, 1, 1], [], []>} : vector<8x256xbf16>, vector<256x256xbf16>, vector<8x256xf32> -> vector<8x256xf32>
    %454 = arith.addf %446, %453 : vector<8x256xf32>
    %c7_423 = arith.constant 7 : index
    %c0_424 = arith.constant 0 : index
    %c0_425 = arith.constant 0 : index
    %455 = vector.load %arg8[%c7_423, %c0_424, %c0_425] : memref<9x8x8xbf16, #tpu.memory_space<vmem>>, vector<1x8x8xbf16>
    %456 = vector.shape_cast %455 : vector<1x8x8xbf16> to vector<8x8xbf16>
    %cst_426 = arith.constant dense<0.000000e+00> : vector<8x256xf32>
    %457 = tpu.matmul %456, %399, %cst_426 {dimension_numbers = #tpu.dot_dimension_numbers<[1], [0], [0], [1], [0, 0, 1, 1], [], []>} : vector<8x8xbf16>, vector<8x256xbf16>, vector<8x256xf32> -> vector<8x256xf32>
    %458 = arith.truncf %457 : vector<8x256xf32> to vector<8x256xbf16>
    %c7_427 = arith.constant 7 : index
    %c0_428 = arith.constant 0 : index
    %c0_429 = arith.constant 0 : index
    %459 = vector.load %arg13[%c7_427, %c0_428, %c0_429] : memref<9x256x256xbf16, #tpu.memory_space<vmem>>, vector<1x256x256xbf16>
    %460 = vector.shape_cast %459 : vector<1x256x256xbf16> to vector<256x256xbf16>
    %cst_430 = arith.constant dense<0.000000e+00> : vector<8x256xf32>
    %461 = tpu.matmul %458, %460, %cst_430 {dimension_numbers = #tpu.dot_dimension_numbers<[1], [0], [0], [1], [0, 0, 1, 1], [], []>} : vector<8x256xbf16>, vector<256x256xbf16>, vector<8x256xf32> -> vector<8x256xf32>
    %462 = arith.addf %454, %461 : vector<8x256xf32>
    %c8_431 = arith.constant 8 : index
    %c0_432 = arith.constant 0 : index
    %c0_433 = arith.constant 0 : index
    %463 = vector.load %arg8[%c8_431, %c0_432, %c0_433] : memref<9x8x8xbf16, #tpu.memory_space<vmem>>, vector<1x8x8xbf16>
    %464 = vector.shape_cast %463 : vector<1x8x8xbf16> to vector<8x8xbf16>
    %cst_434 = arith.constant dense<0.000000e+00> : vector<8x256xf32>
    %465 = tpu.matmul %464, %399, %cst_434 {dimension_numbers = #tpu.dot_dimension_numbers<[1], [0], [0], [1], [0, 0, 1, 1], [], []>} : vector<8x8xbf16>, vector<8x256xbf16>, vector<8x256xf32> -> vector<8x256xf32>
    %466 = arith.truncf %465 : vector<8x256xf32> to vector<8x256xbf16>
    %c8_435 = arith.constant 8 : index
    %c0_436 = arith.constant 0 : index
    %c0_437 = arith.constant 0 : index
    %467 = vector.load %arg13[%c8_435, %c0_436, %c0_437] : memref<9x256x256xbf16, #tpu.memory_space<vmem>>, vector<1x256x256xbf16>
    %468 = vector.shape_cast %467 : vector<1x256x256xbf16> to vector<256x256xbf16>
    %cst_438 = arith.constant dense<0.000000e+00> : vector<8x256xf32>
    %469 = tpu.matmul %466, %468, %cst_438 {dimension_numbers = #tpu.dot_dimension_numbers<[1], [0], [0], [1], [0, 0, 1, 1], [], []>} : vector<8x256xbf16>, vector<256x256xbf16>, vector<8x256xf32> -> vector<8x256xf32>
    %470 = arith.addf %462, %469 : vector<8x256xf32>
    %c0_439 = arith.constant 0 : index
    %c0_440 = arith.constant 0 : index
    %471 = vector.load %arg14[%c0_439, %c0_440] : memref<1x256xf32, #tpu.memory_space<vmem>>, vector<1x256xf32>
    %472 = vector.broadcast %471 : vector<1x256xf32> to vector<8x256xf32>
    %473 = arith.addf %470, %472 : vector<8x256xf32>
    %cst_441 = arith.constant 0.000000e+00 : f32
    %474 = vector.broadcast %cst_441 : f32 to vector<8x256xf32>
    %475 = arith.maximumf %473, %474 : vector<8x256xf32>
    %476 = arith.truncf %475 : vector<8x256xf32> to vector<8x256xbf16>
    %c0_442 = arith.constant 0 : index
    %c0_443 = arith.constant 0 : index
    %c0_444 = arith.constant 0 : index
    %477 = vector.load %arg15[%c0_442, %c0_443, %c0_444] : memref<4x2x8xbf16, #tpu.memory_space<vmem>>, vector<1x2x8xbf16>
    %478 = vector.shape_cast %477 : vector<1x2x8xbf16> to vector<2x8xbf16>
    %cst_445 = arith.constant dense<0.000000e+00> : vector<2x256xf32>
    %479 = tpu.matmul %478, %476, %cst_445 {dimension_numbers = #tpu.dot_dimension_numbers<[1], [0], [0], [1], [0, 0, 1, 1], [], []>} : vector<2x8xbf16>, vector<8x256xbf16>, vector<2x256xf32> -> vector<2x256xf32>
    %c1_446 = arith.constant 1 : index
    %c0_447 = arith.constant 0 : index
    %c0_448 = arith.constant 0 : index
    %480 = vector.load %arg15[%c1_446, %c0_447, %c0_448] : memref<4x2x8xbf16, #tpu.memory_space<vmem>>, vector<1x2x8xbf16>
    %481 = vector.shape_cast %480 : vector<1x2x8xbf16> to vector<2x8xbf16>
    %cst_449 = arith.constant dense<0.000000e+00> : vector<2x256xf32>
    %482 = tpu.matmul %481, %476, %cst_449 {dimension_numbers = #tpu.dot_dimension_numbers<[1], [0], [0], [1], [0, 0, 1, 1], [], []>} : vector<2x8xbf16>, vector<8x256xbf16>, vector<2x256xf32> -> vector<2x256xf32>
    %c2_450 = arith.constant 2 : index
    %c0_451 = arith.constant 0 : index
    %c0_452 = arith.constant 0 : index
    %483 = vector.load %arg15[%c2_450, %c0_451, %c0_452] : memref<4x2x8xbf16, #tpu.memory_space<vmem>>, vector<1x2x8xbf16>
    %484 = vector.shape_cast %483 : vector<1x2x8xbf16> to vector<2x8xbf16>
    %cst_453 = arith.constant dense<0.000000e+00> : vector<2x256xf32>
    %485 = tpu.matmul %484, %476, %cst_453 {dimension_numbers = #tpu.dot_dimension_numbers<[1], [0], [0], [1], [0, 0, 1, 1], [], []>} : vector<2x8xbf16>, vector<8x256xbf16>, vector<2x256xf32> -> vector<2x256xf32>
    %c3_454 = arith.constant 3 : index
    %c0_455 = arith.constant 0 : index
    %c0_456 = arith.constant 0 : index
    %486 = vector.load %arg15[%c3_454, %c0_455, %c0_456] : memref<4x2x8xbf16, #tpu.memory_space<vmem>>, vector<1x2x8xbf16>
    %487 = vector.shape_cast %486 : vector<1x2x8xbf16> to vector<2x8xbf16>
    %cst_457 = arith.constant dense<0.000000e+00> : vector<2x256xf32>
    %488 = tpu.matmul %487, %476, %cst_457 {dimension_numbers = #tpu.dot_dimension_numbers<[1], [0], [0], [1], [0, 0, 1, 1], [], []>} : vector<2x8xbf16>, vector<8x256xbf16>, vector<2x256xf32> -> vector<2x256xf32>
    %489 = arith.maximumf %479, %482 : vector<2x256xf32>
    %490 = arith.maximumf %485, %488 : vector<2x256xf32>
    %491 = arith.maximumf %489, %490 : vector<2x256xf32>
    %492 = arith.truncf %491 : vector<2x256xf32> to vector<2x256xbf16>
    %c0_458 = arith.constant 0 : index
    %c0_459 = arith.constant 0 : index
    %493 = vector.load %arg16[%c0_458, %c0_459] : memref<256x128xbf16, #tpu.memory_space<vmem>>, vector<256x128xbf16>
    %cst_460 = arith.constant dense<0.000000e+00> : vector<2x128xf32>
    %494 = tpu.matmul %492, %493, %cst_460 {dimension_numbers = #tpu.dot_dimension_numbers<[1], [0], [0], [1], [0, 0, 1, 1], [], []>} : vector<2x256xbf16>, vector<256x128xbf16>, vector<2x128xf32> -> vector<2x128xf32>
    %c0_461 = arith.constant 0 : index
    %c0_462 = arith.constant 0 : index
    %495 = vector.load %arg17[%c0_461, %c0_462] : memref<1x128xf32, #tpu.memory_space<vmem>>, vector<1x128xf32>
    %496 = vector.broadcast %495 : vector<1x128xf32> to vector<2x128xf32>
    %497 = arith.addf %494, %496 : vector<2x128xf32>
    %c0_463 = arith.constant 0 : index
    %c0_464 = arith.constant 0 : index
    %498 = vector.load %arg18[%c0_463, %c0_464] : memref<2x128xf32, #tpu.memory_space<vmem>>, vector<2x128xf32>
    tpu.vector_store %arg18[%c0_463, %c0_464], %497 {strides = array<i32>} : memref<2x128xf32, #tpu.memory_space<vmem>>, vector<2x128xf32>,
    return
  }
}

</mosaic_0001>

<bundles_post_ra>
// kernel: alexnet2_forward.1
= control target key start
LH: loop header
LB: loop body
LE: loop exit
PB: predicated region body
PF: predicated region fallthrough
CT: control target
= control target key end

     0   :  { %s27287_s0 = inlined_call_operand.vmem [shape: bf16[128,384], index: 0, kind: input, shape index: {}]   ;;  %s27288_s1 = inlined_call_operand.vmem [shape: bf16[384,64], index: 1, kind: input, shape index: {}]   ;;  %s27289_s2 = inlined_call_operand.vmem [shape: f32[1,64], index: 2, kind: input, shape index: {}]   ;;  %s27290_s3 = inlined_call_operand.vmem [shape: bf16[4,32,128], index: 3, kind: input, shape index: {}]   ;;  %s27291_s4 = inlined_call_operand.vmem [shape: bf16[25,32,32], index: 4, kind: input, shape index: {}]   ;;  %s27292_s5 = inlined_call_operand.vmem [shape: bf16[25,64,192], index: 5, kind: input, shape index: {}]   ;;  %s27293_s6 = inlined_call_operand.vmem [shape: f32[1,192], index: 6, kind: input, shape index: {}]   ;;  %s27294_s7 = inlined_call_operand.vmem [shape: bf16[4,8,32], index: 7, kind: input, shape index: {}]   ;;  %s27295_s8 = inlined_call_operand.vmem [shape: bf16[9,8,8], index: 8, kind: input, shape index: {}]   ;;  %s27296_s9 = inlined_call_operand.vmem [shape: bf16[9,192,384], index: 9, kind: input, shape index: {}]   ;;  %s27297_s10 = inlined_call_operand.vmem [shape: f32[1,384], index: 10, kind: input, shape index: {}]   ;;  %s27298_s11 = inlined_call_operand.vmem [shape: bf16[9,384,256], index: 11, kind: input, shape index: {}]   ;;  %s27299_s12 = inlined_call_operand.vmem [shape: f32[1,256], index: 12, kind: input, shape index: {}]   ;;  %s27300_s13 = inlined_call_operand.vmem [shape: bf16[9,256,256], index: 13, kind: input, shape index: {}]   ;;  %s27301_s14 = inlined_call_operand.vmem [shape: f32[1,256], index: 14, kind: input, shape index: {}]   ;;  %s27302_s15 = inlined_call_operand.vmem [shape: bf16[4,2,8], index: 15, kind: input, shape index: {}]   ;;  %s27303_s16 = inlined_call_operand.vmem [shape: bf16[256,128], index: 16, kind: input, shape index: {}]   ;;  %s27304_s17 = inlined_call_operand.vmem [shape: f32[1,128], index: 17, kind: input, shape index: {}]   ;;  %s27305_s18 = inlined_call_operand.hbm [shape: f32[2,128], index: 18, kind: output, shape index: {}]  }
   0x1   :  { %27310 = sst [smem:[#allocation9_spill]] %s27287_s0 }
   0x2   :  { %27311 = sst [smem:[#allocation10_spill]] %s27288_s1 }
   0x3   :  { %27312 = sst [smem:[#allocation11_spill]] %s27289_s2 }
   0x4   :  { %s27313_s29 = sld [smem:[#allocation10_spill]]  ;;  %v19869_v48 = vld [vmem:[%s27290_s3] sm:$0xff]   ;;  %v19870_v49 = vld [vmem:[%s27290_s3 + $0x10] sm:$0xff]   ;;  %vm929_vm0 = vcmask 261120  }
   0x5   :  { %s27314_s19 = sld [smem:[#allocation9_spill]] }
   0x6   :  { %s27315_s1 = sld [smem:[#allocation11_spill]] }
   0xa   :  { %v19813_v0 = vld [vmem:[%s27313_s29 + $0x78] sm:$0xff]   ;;  %v19815_v2 = vld [vmem:[%s27313_s29 + $0x70] sm:$0xff]   ;;  %v19818_v5 = vld [vmem:[%s27313_s29 + $0x68] sm:$0xff]  }
   0xb   :  { %v19814_v1 = vld [vmem:[%s27313_s29 + $0x38] sm:$0xff]   ;;  %19183 = vmatprep.subr.bf16.mxu0 %v19813_v0  ;;  %v19817_v4 = vld [vmem:[%s27313_s29 + $0x30] sm:$0xff]   ;;  %v19820_v7 = vld [vmem:[%s27313_s29 + $0x28] sm:$0xff]  }
   0xc   :  { %19184 = vmatpush3.bf16.msra.mxu0 %v19814_v1  ;;  %v19816_v3 = vld [vmem:[%s27313_s29 + $0xb8] sm:$0xff]   ;;  %v19819_v6 = vld [vmem:[%s27313_s29 + $0xb0] sm:$0xff]   ;;  %v19821_v8 = vld [vmem:[%s27313_s29 + $0x60] sm:$0xff]  }
   0xd   :  { %19185 = vmatprep.subr.bf16.mxu0 %v19815_v2  ;;  %19443 = vmatprep.subr.bf16.mxu1 %v19816_v3  ;;  %v19822_v9 = vld [vmem:[%s27313_s29 + $0xa8] sm:$0xff]   ;;  %v19823_v10 = vld [vmem:[%s27313_s29 + $0x20] sm:$0xff]   ;;  %v19824_v11 = vld [vmem:[%s27313_s29 + $0x58] sm:$0xff]  }
   0xe   :  { %19444 = vmatpush3.bf16.msra.mxu1 %v19816_v3  ;;  %v19825_v12 = vld [vmem:[%s27313_s29 + $0xa0] sm:$0xff]   ;;  %v19826_v13 = vld [vmem:[%s27313_s29 + $0x18] sm:$0xff]   ;;  %v19827_v15 = vld [vmem:[%s27313_s29 + $0x50] sm:$0xff]  }
   0xf   :  { %19445 = vmatprep.subr.bf16.mxu1 %v19819_v6  ;;  %v19828_v14 = vld [vmem:[%s27313_s29 + $0x98] sm:$0xff]   ;;  %v19829_v16 = vld [vmem:[%s27313_s29 + $0x10] sm:$0xff]   ;;  %v19830_v18 = vld [vmem:[%s27313_s29 + $0x48] sm:$0xff]  }
  0x10   :  { %19186 = vmatpush3.bf16.msra.mxu0 %v19817_v4  ;;  %v19831_v17 = vld [vmem:[%s27313_s29 + $0x90] sm:$0xff]   ;;  %v19832_v19 = vld [vmem:[%s27313_s29 + $0x8] sm:$0xff]   ;;  %v19833_v20 = vld [vmem:[%s27313_s29 + $0x40] sm:$0xff]  }
  0x11   :  { %19187 = vmatprep.subr.bf16.mxu0 %v19818_v5  ;;  %v19834_v21 = vld [vmem:[%s27313_s29 + $0x88] sm:$0xff]   ;;  %v19838_v22 = vld [vmem:[%s27314_s19 + $0x4] ss:$12 sps:$4 sm:$0xff]   ;;  %v19845_v31 = vld [vmem:[%s27314_s19 + $0x34] ss:$12 sps:$4 sm:$0xff]  }
  0x12   :  { %19446 = vmatpush3.bf16.msra.mxu1 %v19819_v6  ;;  %v19835_v23 = vld [vmem:[%s27313_s29] sm:$0xff]   ;;  %452 = vmatprep.mubr.bf16.mxu0 %v19838_v22  ;;  %v19840_v24 = vld [vmem:[%s27314_s19 + $0x8] ss:$12 sps:$4 sm:$0xff]   ;;  %v19849_v32 = vld [vmem:[%s27314_s19 + $0x50] ss:$12 sps:$4 sm:$0xff]  }
  0x13   :  { %19447 = vmatprep.subr.bf16.mxu1 %v19822_v9  ;;  %v19839_v25 = vld [vmem:[%s27313_s29 + $0x80] sm:$0xff]   ;;  %19459 = vmatprep.mubr.bf16.mxu1 %v19840_v24  ;;  %v19842_v27 = vld [vmem:[%s27314_s19 + $0x1c] ss:$12 sps:$4 sm:$0xff]   ;;  %v19850_v35 = vld [vmem:[%s27314_s19 + $0x4c] ss:$12 sps:$4 sm:$0xff]  }
  0x14   :  { %19188 = vmatpush3.bf16.msra.mxu0 %v19820_v7  ;;  %v19836_v26 = vld [vmem:[%s27314_s19] ss:$12 sps:$4 sm:$0xff]   ;;  %v19848_v29 = vld [vmem:[%s27314_s19 + $0x38] ss:$12 sps:$4 sm:$0xff]   ;;  %v19856_v33 = vld [vmem:[%s27314_s19 + $0x68] ss:$12 sps:$4 sm:$0xff]  }
  0x15   :  { %19189 = vmatprep.subr.bf16.mxu0 %v19821_v8  ;;  %v19841_v28 = vld [vmem:[%s27314_s19 + $0x20] ss:$12 sps:$4 sm:$0xff]   ;;  %v19844_v30 = vld [vmem:[%s27314_s19 + $0x18] ss:$12 sps:$4 sm:$0xff]   ;;  %v19847_v34 = vld [vmem:[%s27314_s19 + $0x30] ss:$12 sps:$4 sm:$0xff]  }
  0x16   :  { %19448 = vmatpush3.bf16.msra.mxu1 %v19822_v9  ;;  %v19857_v36 = vld [vmem:[%s27314_s19 + $0x80] ss:$12 sps:$4 sm:$0xff]   ;;  %v19864_v37 = vld [vmem:[%s27314_s19 + $0x98] ss:$12 sps:$4 sm:$0xff]   ;;  %v19852_v38 = vld [vmem:[%s27314_s19 + $0x48] ss:$12 sps:$4 sm:$0xff]  }
  0x17   :  { %19449 = vmatprep.subr.bf16.mxu1 %v19825_v12  ;;  %v19853_v39 = vld [vmem:[%s27314_s19 + $0x64] ss:$12 sps:$4 sm:$0xff]   ;;  %v19855_v41 = vld [vmem:[%s27314_s19 + $0x60] ss:$12 sps:$4 sm:$0xff]   ;;  %v19858_v42 = vld [vmem:[%s27314_s19 + $0x7c] ss:$12 sps:$4 sm:$0xff]  }
  0x18   :  { %19190 = vmatpush3.bf16.msra.mxu0 %v19823_v10  ;;  %v19865_v40 = vld [vmem:[%s27314_s19 + $0xb0] ss:$12 sps:$4 sm:$0xff]   ;;  %v19860_v43 = vld [vmem:[%s27314_s19 + $0x78] ss:$12 sps:$4 sm:$0xff]   ;;  %v19861_v44 = vld [vmem:[%s27314_s19 + $0x94] ss:$12 sps:$4 sm:$0xff]  }
  0x19   :  { %19191 = vmatprep.subr.bf16.mxu0 %v19824_v11  ;;  %v19863_v45 = vld [vmem:[%s27314_s19 + $0x90] ss:$12 sps:$4 sm:$0xff]   ;;  %v19866_v46 = vld [vmem:[%s27314_s19 + $0xac] ss:$12 sps:$4 sm:$0xff]   ;;  %v19868_v47 = vld [vmem:[%s27314_s19 + $0xa8] ss:$12 sps:$4 sm:$0xff]  }
  0x1a   :  { %19450 = vmatpush3.bf16.msra.mxu1 %v19825_v12  ;;  %v22047_v51 = vld [vmem:[%s27315_s1] ss:$0 sm:$0xff] }
  0x1b   :  { %19451 = vmatprep.subr.bf16.mxu1 %v19828_v14 }
  0x1c   :  { %19192 = vmatpush3.bf16.msra.mxu0 %v19826_v13 }
  0x1d   :  { %19193 = vmatprep.subr.bf16.mxu0 %v19827_v15 }
  0x1e   :  { %19452 = vmatpush3.bf16.msra.mxu1 %v19828_v14 }
  0x1f   :  { %19453 = vmatprep.subr.bf16.mxu1 %v19831_v17 }
  0x20   :  { %19194 = vmatpush3.bf16.msra.mxu0 %v19829_v16 }
  0x21   :  { %19195 = vmatprep.subr.bf16.mxu0 %v19830_v18 }
  0x22   :  { %19454 = vmatpush3.bf16.msra.mxu1 %v19831_v17 }
  0x23   :  { %19455 = vmatprep.subr.bf16.mxu1 %v19834_v21 }
  0x24   :  { %19196 = vmatpush3.bf16.msra.mxu0 %v19832_v19 }
  0x25   :  { %19197 = vmatprep.subr.bf16.mxu0 %v19833_v20 }
  0x26   :  { %19456 = vmatpush3.bf16.msra.mxu1 %v19834_v21 }
  0x27   :  { %19457 = vmatprep.subr.bf16.mxu1 %v19839_v25 }
  0x28   :  { %19198 = vmatpush3.bf16.msra.mxu0 %v19835_v23 }
  0x2a   :  { %19458 = vmatpush3.bf16.msra.mxu1 %v19839_v25 }
  0x2b   :  { %453 = vmatmul.mubr.bf16.vlgmr.msra.gmra.mxu0 %v19836_v26 }
  0x2c   :  { %460 = vmatprep.mubr.bf16.mxu0 %v19842_v27 }
  0x2d   :  { %19460 = vmatmul.mubr.bf16.vlgmr.msra.gmra.mxu1 %v19841_v28 }
  0x2e   :  { %19463 = vmatprep.mubr.bf16.mxu1 %v19848_v29 }
  0x33   :  { %461 = vmatmul.mubr.bf16.gmra.mxu0 %v19844_v30 }
  0x34   :  { %468 = vmatprep.mubr.bf16.mxu0 %v19845_v31 }
  0x35   :  { %19464 = vmatmul.mubr.bf16.gmra.mxu1 %v19849_v32 }
  0x36   :  { %19467 = vmatprep.mubr.bf16.mxu1 %v19856_v33 }
  0x3b   :  { %469 = vmatmul.mubr.bf16.gmra.mxu0 %v19847_v34 }
  0x3c   :  { %476 = vmatprep.mubr.bf16.mxu0 %v19850_v35 }
  0x3d   :  { %19468 = vmatmul.mubr.bf16.gmra.mxu1 %v19857_v36 }
  0x3e   :  { %19471 = vmatprep.mubr.bf16.mxu1 %v19864_v37 }
  0x43   :  { %477 = vmatmul.mubr.bf16.gmra.mxu0 %v19852_v38 }
  0x44   :  { %484 = vmatprep.mubr.bf16.mxu0 %v19853_v39 }
  0x45   :  { %19472 = vmatmul.mubr.bf16.gmra.mxu1 %v19865_v40 }
  0x46   :  { %19491 = vmatprep.mubr.bf16.mxu1 %v19869_v48 }
  0x4b   :  { %485 = vmatmul.mubr.bf16.gmra.mxu0 %v19855_v41 }
  0x4c   :  { %492 = vmatprep.mubr.bf16.mxu0 %v19858_v42 }
  0x53   :  { %493 = vmatmul.mubr.bf16.gmra.mxu0 %v19860_v43 }
  0x54   :  { %500 = vmatprep.mubr.bf16.mxu0 %v19861_v44 }
  0x5b   :  { %501 = vmatmul.mubr.bf16.gmra.mxu0 %v19863_v45 }
  0x5c   :  { %508 = vmatprep.mubr.bf16.mxu0 %v19866_v46 }
  0x63   :  { %509 = vmatmul.mubr.bf16.gmra.mxu0 %v19868_v47 }
  0x64   :  { %19511 = vmatprep.mubr.bf16.mxu0 %v19870_v49 }
  0xeb   :  { %v19199_v50 = vpop.f32.mrf.mxu0 }
  0xed   :  { %v19200_v52 = vpop.f32.mrf.mxu0  ;;  %v19461_v54 = vpop.f32.mrf.mxu1 }
  0xee   :  { %v19201_v53 = vadd.f32 %v19200_v52, %v19199_v50 }
  0xef   :  { %v19202_v55 = vpop.f32.mrf.mxu0  ;;  %v551_v57 = vpop.f32.mrf.mxu1 }
  0xf0   :  { %v455_v56 = vadd.f32 %v19201_v53, %v22047_v51 }
  0xf1   :  { %v19203_v58 = vpop.f32.mrf.mxu0  ;;  %v19462_v60 = vpop.f32.mrf.mxu1 }
  0xf2   :  { %v19204_v59 = vadd.f32 %v19203_v58, %v19202_v55  ;;  %v552_v61 = vadd.f32 %v551_v57, %v455_v56 }
  0xf3   :  { %v19205_v62 = vpop.f32.mrf.mxu0  ;;  %v554_v0 = vpop.f32.mrf.mxu1 }
  0xf4   :  { %v458_v63 = vadd.f32 %v19204_v59, %v22047_v51  ;;  %v614_v4 = vmax.f32 %v552_v61, 0.0 }
  0xf5   :  { %v19206_v1 = vpop.f32.mrf.mxu0  ;;  %v22061_v19 = vpop.f32.mrf.mxu1 }
  0xf6   :  { %v19207_v2 = vadd.f32 %v19206_v1, %v19205_v62  ;;  %v555_v3 = vadd.f32 %v554_v0, %v458_v63 }
  0xf7   :  { %v19208_v5 = vpop.f32.mrf.mxu0  ;;  %v22065_v23 = vpop.f32.mrf.mxu1 }
  0xf8   :  { %v463_v6 = vadd.f32 %v19207_v2, %v22047_v51  ;;  %v615_v7 = vmax.f32 %v555_v3, 0.0 }
  0xf9   :  { %v19209_v8 = vpop.f32.mrf.mxu0  ;;  %v22067_v26 = vpop.f32.mrf.mxu1 }
  0xfa   :  { %v560_v9 = vadd.f32 %v19461_v54, %v463_v6  ;;  %v22052_v10 = vpack.c.bf16 %v615_v7, %v614_v4  ;;  %v19210_v11 = vadd.f32 %v19209_v8, %v19208_v5 }
  0xfb   :  { %v22054_v12 = vpop.f32.mrf.mxu0  ;;  %v22069_v29 = vpop.f32.mrf.mxu1 }
  0xfc   :  { %v616_v13 = vmax.f32 %v560_v9, 0.0  ;;  %v466_v14 = vadd.f32 %v19210_v11, %v22047_v51 }
  0xfd   :  { %v22057_v15 = vpop.f32.mrf.mxu0  ;;  %v19469_v32 = vpop.f32.mrf.mxu1 }
  0xfe   :  { %v563_v16 = vadd.f32 %v19462_v60, %v466_v14 }
  0xff   :  { %v22059_v17 = vpop.f32.mrf.mxu0  ;;  %v583_v34 = vpop.f32.mrf.mxu1 }
 0x100   :  { %v617_v18 = vmax.f32 %v563_v16, 0.0 }
 0x101   :  { %v19215_v20 = vpop.f32.mrf.mxu0  ;;  %v19470_v37 = vpop.f32.mrf.mxu1 }
 0x102   :  { %v22063_v21 = vpack.c.bf16 %v617_v18, %v616_v13 }
 0x103   :  { %v19217_v22 = vpop.f32.mrf.mxu0  ;;  %v586_v40 = vpop.f32.mrf.mxu1 }
 0x105   :  { %v19218_v24 = vpop.f32.mrf.mxu0  ;;  %v19473_v43 = vpop.f32.mrf.mxu1 }
 0x106   :  { %v19219_v18 = vadd.f32 %v19218_v24, %v19217_v22  ;;  %v19213_v22 = vadd.f32 %v22057_v15, %v22054_v12 }
 0x107   :  { %v19220_v25 = vpop.f32.mrf.mxu0  ;;  %v599_v46 = vpop.f32.mrf.mxu1 }
 0x108   :  { %v479_v24 = vadd.f32 %v19219_v18, %v22047_v51  ;;  %v471_v12 = vadd.f32 %v19213_v22, %v22047_v51 }
 0x109   :  { %v19221_v27 = vpop.f32.mrf.mxu0  ;;  %v19474_v49 = vpop.f32.mrf.mxu1 }
 0x10a   :  { %v19222_v8 = vadd.f32 %v19221_v27, %v19220_v25  ;;  %v576_v15 = vadd.f32 %v22061_v19, %v479_v24 }
 0x10b   :  { %v19223_v28 = vpop.f32.mrf.mxu0  ;;  %v602_v58 = vpop.f32.mrf.mxu1 }
 0x10d   :  { %v19224_v30 = vpop.f32.mrf.mxu0 }
 0x10e   :  { %v19225_v4 = vadd.f32 %v19224_v30, %v19223_v28  ;;  %v19216_v28 = vadd.f32 %v19215_v20, %v22059_v17  ;;  %v482_v30 = vadd.f32 %v19222_v8, %v22047_v51 }
 0x10f   :  { %v19226_v31 = vpop.f32.mrf.mxu0 }
 0x110   :  { %v474_v27 = vadd.f32 %v19216_v28, %v22047_v51 }
 0x111   :  { %v19227_v33 = vpop.f32.mrf.mxu0 }
 0x112   :  { %v19228_v63 = vadd.f32 %v19227_v33, %v19226_v31  ;;  %v487_v31 = vadd.f32 %v19225_v4, %v22047_v51 }
 0x113   :  { %v19229_v35 = vpop.f32.mrf.mxu0 }
 0x114   :  { %v490_v9 = vadd.f32 %v19228_v63, %v22047_v51  ;;  %v584_v17 = vadd.f32 %v583_v34, %v487_v31 }
 0x115   :  { %v19230_v36 = vpop.f32.mrf.mxu0 }
 0x116   :  { %v19231_v60 = vadd.f32 %v19230_v36, %v19229_v35  ;;  %v622_v34 = vmax.f32 %v584_v17, 0.0 }
 0x117   :  { %v19232_v38 = vpop.f32.mrf.mxu0 }
 0x118   :  { %v495_v5 = vadd.f32 %v19231_v60, %v22047_v51 }
 0x119   :  { %v19233_v39 = vpop.f32.mrf.mxu0 }
 0x11a   :  { %v19234_v55 = vadd.f32 %v19233_v39, %v19232_v38  ;;  %v592_v33 = vadd.f32 %v19469_v32, %v495_v5  ;;  %v587_v38 = vadd.f32 %v586_v40, %v490_v9  ;;  %v579_v32 = vadd.f32 %v22067_v26, %v482_v30 }
 0x11b   :  { %v19235_v41 = vpop.f32.mrf.mxu0  ;;  %v568_v26 = vadd.f32 %v22065_v23, %v471_v12  ;;  %v19871_v23 = vld [vmem:[%s27290_s3 + $0x8] sm:$0xff]  }
 0x11c   :  { %v498_v0 = vadd.f32 %v19234_v55, %v22047_v51  ;;  %v624_v20 = vmax.f32 %v592_v33, 0.0 }
 0x11d   :  { %v19236_v42 = vpop.f32.mrf.mxu0 }
 0x11e   :  { %v19237_v52 = vadd.f32 %v19236_v42, %v19235_v41  ;;  %v595_v11 = vadd.f32 %v19470_v37, %v498_v0  ;;  %v623_v37 = vmax.f32 %v587_v38, 0.0  ;;  %v571_v41 = vadd.f32 %v22069_v29, %v474_v27  ;;  %v19872_v29 = vld [vmem:[%s27290_s3 + $0x18] sm:$0xff]  }
 0x11f   :  { %v19238_v44 = vpop.f32.mrf.mxu0  ;;  %v621_v42 = vmax.f32 %v579_v32, 0.0 }
 0x120   :  { %v503_v61 = vadd.f32 %v19237_v52, %v22047_v51  ;;  %v625_v39 = vmax.f32 %v595_v11, 0.0  ;;  %v19893_v52 = vld [vmem:[%s27292_s5 + $0x30] ss:$8 sps:$4 sm:$0xff]  }
 0x121   :  { %v19239_v45 = vpop.f32.mrf.mxu0 }
 0x122   :  { %v19240_v48 = vadd.f32 %v19239_v45, %v19238_v44  ;;  %v600_v6 = vadd.f32 %v599_v46, %v503_v61  ;;  %v635_v40 = vpack.c.bf16 %v625_v39, %v624_v20  ;;  %v620_v44 = vmax.f32 %v576_v15, 0.0 }
 0x123   :  { %v19241_v47 = vpop.f32.mrf.mxu0  ;;  %v619_v45 = vmax.f32 %v571_v41, 0.0 }
 0x124   :  { %v506_v57 = vadd.f32 %v19240_v48, %v22047_v51  ;;  %v626_v35 = vmax.f32 %v600_v6, 0.0  ;;  %v633_v46 = vpack.c.bf16 %v621_v42, %v620_v44  ;;  %v19874_v48 = vld [vmem:[%s27290_s3 + $0x30] sm:$0xff]  }
 0x125   :  { %v19242_v50 = vpop.f32.mrf.mxu0 }
 0x126   :  { %v19243_v53 = vadd.f32 %v19242_v50, %v19241_v47  ;;  %v603_v2 = vadd.f32 %v602_v58, %v506_v57  ;;  %v19873_v47 = vld [vmem:[%s27290_s3 + $0x20] sm:$0xff]   ;;  %v19876_v50 = vld [vmem:[%s27290_s3 + $0x38] sm:$0xff]  }
 0x127   :  { %v19244_v54 = vpop.f32.mrf.mxu0 }
 0x128   :  { %v511_v56 = vadd.f32 %v19243_v53, %v22047_v51  ;;  %v627_v14 = vmax.f32 %v603_v2, 0.0  ;;  %v19895_v53 = vld [vmem:[%s27292_s5 + $0x34] ss:$8 sps:$4 sm:$0xff]  }
 0x129   :  { %v19245_v59 = vpop.f32.mrf.mxu0 }
 0x12a   :  { %v19246_v62 = vadd.f32 %v19245_v59, %v19244_v54  ;;  %v608_v1 = vadd.f32 %v19473_v43, %v511_v56  ;;  %v22083_v25 = vpack.c.bf16 %v627_v14, %v626_v35  ;;  %v634_v43 = vpack.c.bf16 %v623_v37, %v622_v34  ;;  %v19898_v54 = vld [vmem:[%s27292_s5 + $0x24] ss:$8 sps:$4 sm:$0xff]  }
 0x12c   :  { %v514_v3 = vadd.f32 %v19246_v62, %v22047_v51  ;;  %v628_v13 = vmax.f32 %v608_v1, 0.0  ;;  %v618_v51 = vmax.f32 %v568_v26, 0.0 }
 0x12e   :  { %v611_v7 = vadd.f32 %v19474_v49, %v514_v3  ;;  %v632_v19 = vpack.c.bf16 %v619_v45, %v618_v51  ;;  %v19875_v49 = vld [vmem:[%s27290_s3 + $0x28] sm:$0xff]  }
 0x130   :  { %v629_v16 = vmax.f32 %v611_v7, 0.0 }
 0x132   :  { %v22079_v36 = vpack.c.bf16 %v629_v16, %v628_v13 }
 0x134   :  { %19475 = vmatprep.subr.bf16.mxu1 %v22079_v36  ;;  %19495 = vmatprep.subr.bf16.mxu0 %v22079_v36 }
 0x135   :  { %19476 = vmatpush3.bf16.msra.mxu1 %v22079_v36  ;;  %19496 = vmatpush3.bf16.msra.mxu0 %v22079_v36 }
 0x136   :  { %19477 = vmatprep.subr.bf16.mxu1 %v22083_v25  ;;  %19497 = vmatprep.subr.bf16.mxu0 %v22083_v25 }
 0x139   :  { %19478 = vmatpush3.bf16.msra.mxu1 %v22083_v25  ;;  %19498 = vmatpush3.bf16.msra.mxu0 %v22083_v25 }
 0x13a   :  { %19479 = vmatprep.subr.bf16.mxu1 %v635_v40  ;;  %19499 = vmatprep.subr.bf16.mxu0 %v635_v40 }
 0x13d   :  { %19480 = vmatpush3.bf16.msra.mxu1 %v635_v40  ;;  %19500 = vmatpush3.bf16.msra.mxu0 %v635_v40 }
 0x13e   :  { %19481 = vmatprep.subr.bf16.mxu1 %v634_v43  ;;  %19501 = vmatprep.subr.bf16.mxu0 %v634_v43 }
 0x141   :  { %19482 = vmatpush3.bf16.msra.mxu1 %v634_v43  ;;  %19502 = vmatpush3.bf16.msra.mxu0 %v634_v43 }
 0x142   :  { %19483 = vmatprep.subr.bf16.mxu1 %v633_v46  ;;  %19503 = vmatprep.subr.bf16.mxu0 %v633_v46 }
 0x145   :  { %19484 = vmatpush3.bf16.msra.mxu1 %v633_v46  ;;  %19504 = vmatpush3.bf16.msra.mxu0 %v633_v46 }
 0x146   :  { %19485 = vmatprep.subr.bf16.mxu1 %v632_v19  ;;  %19505 = vmatprep.subr.bf16.mxu0 %v632_v19 }
 0x149   :  { %19486 = vmatpush3.bf16.msra.mxu1 %v632_v19  ;;  %19506 = vmatpush3.bf16.msra.mxu0 %v632_v19 }
 0x14a   :  { %19487 = vmatprep.subr.bf16.mxu1 %v22063_v21  ;;  %19507 = vmatprep.subr.bf16.mxu0 %v22063_v21 }
 0x14d   :  { %19488 = vmatpush3.bf16.msra.mxu1 %v22063_v21  ;;  %19508 = vmatpush3.bf16.msra.mxu0 %v22063_v21 }
 0x14e   :  { %19489 = vmatprep.subr.bf16.mxu1 %v22052_v10  ;;  %19509 = vmatprep.subr.bf16.mxu0 %v22052_v10 }
 0x151   :  { %19490 = vmatpush3.bf16.msra.mxu1 %v22052_v10  ;;  %19510 = vmatpush3.bf16.msra.mxu0 %v22052_v10 }
 0x152   :  { %19515 = vmatprep.subr.bf16.mxu1 %v22079_v36  ;;  %19535 = vmatprep.subr.bf16.mxu0 %v22079_v36 }
 0x154   :  { %19492 = vmatmul.mubr.bf16.vlgmr.msra.gmra.mxu1 %v19871_v23  ;;  %19512 = vmatmul.mubr.bf16.vlgmr.msra.gmra.mxu0 %v19872_v29 }
 0x155   :  { %19516 = vmatpush3.bf16.msra.mxu1 %v22079_v36  ;;  %19536 = vmatpush3.bf16.msra.mxu0 %v22079_v36 }
 0x156   :  { %19517 = vmatprep.subr.bf16.mxu1 %v22083_v25  ;;  %19537 = vmatprep.subr.bf16.mxu0 %v22083_v25 }
 0x157   :  { %19531 = vmatprep.mubr.bf16.mxu1 %v19873_v47  ;;  %19551 = vmatprep.mubr.bf16.mxu0 %v19874_v48 }
 0x159   :  { %19518 = vmatpush3.bf16.msra.mxu1 %v22083_v25  ;;  %19538 = vmatpush3.bf16.msra.mxu0 %v22083_v25 }
 0x15a   :  { %19519 = vmatprep.subr.bf16.mxu1 %v635_v40  ;;  %19539 = vmatprep.subr.bf16.mxu0 %v635_v40 }
 0x15d   :  { %19520 = vmatpush3.bf16.msra.mxu1 %v635_v40  ;;  %19540 = vmatpush3.bf16.msra.mxu0 %v635_v40 }
 0x15e   :  { %19521 = vmatprep.subr.bf16.mxu1 %v634_v43  ;;  %19541 = vmatprep.subr.bf16.mxu0 %v634_v43 }
 0x161   :  { %19522 = vmatpush3.bf16.msra.mxu1 %v634_v43  ;;  %19542 = vmatpush3.bf16.msra.mxu0 %v634_v43 }
 0x162   :  { %19523 = vmatprep.subr.bf16.mxu1 %v633_v46  ;;  %19543 = vmatprep.subr.bf16.mxu0 %v633_v46 }
 0x165   :  { %19524 = vmatpush3.bf16.msra.mxu1 %v633_v46  ;;  %19544 = vmatpush3.bf16.msra.mxu0 %v633_v46 }
 0x166   :  { %19525 = vmatprep.subr.bf16.mxu1 %v632_v19  ;;  %19545 = vmatprep.subr.bf16.mxu0 %v632_v19 }
 0x169   :  { %19526 = vmatpush3.bf16.msra.mxu1 %v632_v19  ;;  %19546 = vmatpush3.bf16.msra.mxu0 %v632_v19 }
 0x16a   :  { %19527 = vmatprep.subr.bf16.mxu1 %v22063_v21  ;;  %19547 = vmatprep.subr.bf16.mxu0 %v22063_v21 }
 0x16d   :  { %19528 = vmatpush3.bf16.msra.mxu1 %v22063_v21  ;;  %19548 = vmatpush3.bf16.msra.mxu0 %v22063_v21  ;;  %v19877_v21 = vld [vmem:[%s27291_s4] sm:$0xff]  }
 0x16e   :  { %19529 = vmatprep.subr.bf16.mxu1 %v22052_v10  ;;  %19549 = vmatprep.subr.bf16.mxu0 %v22052_v10 }
 0x171   :  { %19530 = vmatpush3.bf16.msra.mxu1 %v22052_v10  ;;  %19550 = vmatpush3.bf16.msra.mxu0 %v22052_v10  ;;  %v19896_v10 = vld [vmem:[%s27292_s5 + $0x20] ss:$8 sps:$4 sm:$0xff]  }
 0x172   :  { %1230 = vmatprep.subr.bf16.mxu0 %v19895_v53 }
 0x174   :  { %19532 = vmatmul.mubr.bf16.vlgmr.msra.gmra.mxu1 %v19875_v49  ;;  %19552 = vmatmul.mubr.bf16.vlgmr.msra.gmra.mxu0 %v19876_v50 }
 0x175   :  { %19559 = vmatprep.mubr.msk.bf16.mxu1 %vm929_vm0, %v19877_v21  ;;  %1231 = vmatpush1.bf16.msra.mxu0 %v19893_v52 }
 0x176   :  { %1232 = vmatprep.subr.bf16.mxu0 %v19898_v54 }
 0x179   :  { %1233 = vmatpush1.bf16.msra.mxu0 %v19896_v10 }
 0x214   :  { %v19493_v55 = vpop.f32.mrf.mxu1  ;;  %v19513_v56 = vpop.f32.mrf.mxu0 }
 0x216   :  { %v688_v57 = vpop.f32.mrf.mxu1  ;;  %v754_v58 = vpop.f32.mrf.mxu0 }
 0x218   :  { %v19494_v59 = vpop.f32.mrf.mxu1  ;;  %v19514_v60 = vpop.f32.mrf.mxu0 }
 0x219   :  { %23 = vsyncpa [#allocation3], 0  ;;  %v903_v6 = vmax.f32 %v19493_v55, %v19513_v56  ;;  %v904_v7 = vmax.f32 %v19494_v59, %v19514_v60  ;;  %v901_v11 = vmax.f32 %v688_v57, %v754_v58  ;;  %v19878_v38 = vld [vmem:[%s27291_s4 + $0x8] sm:$0xff]   ;;  %v19879_v39 = vld [vmem:[%s27291_s4 + $0x10] sm:$0xff]   ;;  %v27308_v43 = vmov 0   ;;  %s21798_s3 = smov [#allocation2]  }
 0x21a   :  { %v691_v61 = vpop.f32.mrf.mxu1  ;;  %v757_v62 = vpop.f32.mrf.mxu0  ;;  %v19883_v25 = vld [vmem:[%s27292_s5 + $0x74] ss:$8 sps:$4 sm:$0xff]   ;;  %v19881_v24 = vld [vmem:[%s27292_s5 + $0x70] ss:$8 sps:$4 sm:$0xff]   ;;  %v19886_v17 = vld [vmem:[%s27292_s5 + $0x64] ss:$8 sps:$4 sm:$0xff]   ;;  %1254 = vmatprep.mubr.bf16.mxu0 %v27308_v43 }
 0x21b   :  { %v902_v16 = vmax.f32 %v691_v61, %v757_v62  ;;  %v19880_v22 = vld [vmem:[%s27291_s4 + $0x18] sm:$0xff]   ;;  %v19884_v20 = vld [vmem:[%s27292_s5 + $0x60] ss:$8 sps:$4 sm:$0xff]   ;;  %v19892_v37 = vld [vmem:[%s27292_s5 + $0x44] ss:$8 sps:$4 sm:$0xff]   ;;  %vm1116_vm1 = vcmask 523264  }
 0x21c   :  { %v19889_v27 = vld [vmem:[%s27292_s5 + $0x54] ss:$8 sps:$4 sm:$0xff]   ;;  %v19887_v32 = vld [vmem:[%s27292_s5 + $0x50] ss:$8 sps:$4 sm:$0xff]   ;;  %v19890_v40 = vld [vmem:[%s27292_s5 + $0x40] ss:$8 sps:$4 sm:$0xff]  }
 0x21d   :  { %v19901_v12 = vld [vmem:[%s27292_s5 + $0x14] ss:$8 sps:$4 sm:$0xff]   ;;  %v19899_v15 = vld [vmem:[%s27292_s5 + $0x10] ss:$8 sps:$4 sm:$0xff]   ;;  %v19904_v34 = vld [vmem:[%s27292_s5 + $0x4] ss:$8 sps:$4 sm:$0xff]  }
 0x21e   :  { %1234 = vmatprep.subr.bf16.mxu0 %v19901_v12  ;;  %v19902_v41 = vld [vmem:[%s27292_s5] ss:$8 sps:$4 sm:$0xff]   ;;  %v19907_v42 = vld [vmem:[%s27292_s5 + $0xb4] ss:$8 sps:$4 sm:$0xff]   ;;  %v19905_v51 = vld [vmem:[%s27292_s5 + $0xb0] ss:$8 sps:$4 sm:$0xff]  }
 0x21f   :  { %1235 = vmatpush1.bf16.msra.mxu0 %v19899_v15  ;;  %v19910_v23 = vld [vmem:[%s27292_s5 + $0xa4] ss:$8 sps:$4 sm:$0xff]   ;;  %v19908_v48 = vld [vmem:[%s27292_s5 + $0xa0] ss:$8 sps:$4 sm:$0xff]   ;;  %v19913_v49 = vld [vmem:[%s27292_s5 + $0x94] ss:$8 sps:$4 sm:$0xff]  }
 0x220   :  { %1236 = vmatprep.subr.bf16.mxu0 %v19904_v34  ;;  %v19911_v52 = vld [vmem:[%s27292_s5 + $0x90] ss:$8 sps:$4 sm:$0xff]   ;;  %v19916_v54 = vld [vmem:[%s27292_s5 + $0x84] ss:$8 sps:$4 sm:$0xff]   ;;  %v19914_v55 = vld [vmem:[%s27292_s5 + $0x80] ss:$8 sps:$4 sm:$0xff]  }
 0x221   :  { %v19917_v56 = vld [vmem:[%s27291_s4 + $0x20] sm:$0xff]   ;;  %v19918_v58 = vld [vmem:[%s27291_s4 + $0x28] sm:$0xff]   ;;  %v19919_v59 = vld [vmem:[%s27291_s4 + $0x30] sm:$0xff]   ;;  %vm5827_vm2 = vcmask 1043456   ;;  %vm5823_vm3 = vcmask 64512   ;;  %vm21797_vm4 = vmmov 0  }
 0x222   :  { %v19920_v60 = vld [vmem:[%s27291_s4 + $0x38] sm:$0xff]   ;;  %s16276_s22 = sshll.u32 %s21798_s3, 4  ;;  %s16277_s22 = int_to_ptr.vmem [resolvable:$true] %s16276_s22 }
 0x223   :  { %1237 = vmatpush1.bf16.msra.mxu0 %v19902_v41  ;;  %v19923_v61 = vld [vmem:[%s27292_s5 + $0xf4] ss:$8 sps:$4 sm:$0xff]   ;;  %v19921_v62 = vld [vmem:[%s27292_s5 + $0xf0] ss:$8 sps:$4 sm:$0xff]   ;;  %s21773_s2 = scalar_lea.vmem %s16277_s22, 32  ;;  %p21778_p1 = scmp.lt.s32.totalorder %s16277_s22, %s16277_s22 }
 0x224   :  { %1410 = vmatprep.subr.bf16.mxu0 %v19907_v42  ;;  %p21774_p0 = scmp.ne.s32.totalorder %s16277_s22, %s21773_s2  ;;  %p21779_p2 = scmp.lt.s32.totalorder %s21773_s2, %s21773_s2 }
 0x226   :  { %p21780_p3 = por %p21779_p2, %p21778_p1 }
 0x228   :  { %p21781_p4 = pnand %p21780_p3, %p21774_p0 }
 0x234   :  { %v19533_v63 = vpop.f32.mrf.mxu1  ;;  %v19553_v0 = vpop.f32.mrf.mxu0 }
 0x235   :  { %v907_v3 = vmax.f32 %v19533_v63, %v19553_v0  ;;  %v19926_v63 = vld [vmem:[%s27292_s5 + $0xe4] ss:$8 sps:$4 sm:$0xff]   ;;  %v19924_v0 = vld [vmem:[%s27292_s5 + $0xe0] ss:$8 sps:$4 sm:$0xff]  }
 0x236   :  { %v820_v1 = vpop.f32.mrf.mxu1  ;;  %v886_v2 = vpop.f32.mrf.mxu0 }
 0x237   :  { %v905_v8 = vmax.f32 %v820_v1, %v886_v2  ;;  %v911_v18 = vmax.f32 %v903_v6, %v907_v3  ;;  %v19929_v1 = vld [vmem:[%s27292_s5 + $0xd4] ss:$8 sps:$4 sm:$0xff]   ;;  %v19927_v2 = vld [vmem:[%s27292_s5 + $0xd0] ss:$8 sps:$4 sm:$0xff]   ;;  %v19932_v3 = vld [vmem:[%s27292_s5 + $0xc4] ss:$8 sps:$4 sm:$0xff]  }
 0x238   :  { %v19534_v4 = vpop.f32.mrf.mxu1  ;;  %v19554_v5 = vpop.f32.mrf.mxu0 }
 0x239   :  { %v908_v9 = vmax.f32 %v19534_v4, %v19554_v5  ;;  %v909_v35 = vmax.f32 %v901_v11, %v905_v8  ;;  %v19930_v4 = vld [vmem:[%s27292_s5 + $0xc0] ss:$8 sps:$4 sm:$0xff]   ;;  %v19935_v5 = vld [vmem:[%s27292_s5 + $0x134] ss:$8 sps:$4 sm:$0xff]  }
 0x23a   :  { %v823_v13 = vpop.f32.mrf.mxu1  ;;  %v889_v14 = vpop.f32.mrf.mxu0 }
 0x23b   :  { %v912_v31 = vmax.f32 %v904_v7, %v908_v9  ;;  %v906_v33 = vmax.f32 %v823_v13, %v889_v14 }
 0x23d   :  { %v22160_v36 = vpack.c.bf16 %v912_v31, %v911_v18  ;;  %v910_v28 = vmax.f32 %v902_v16, %v906_v33 }
 0x23f   :  { %v22162_v30 = vpack.c.bf16 %v910_v28, %v909_v35  ;;  %19555 = vmatprep.subr.bf16.mxu1 %v22160_v36 }
 0x240   :  { %19556 = vmatpush3.bf16.msra.mxu1 %v22160_v36 }
 0x241   :  { %19557 = vmatprep.subr.bf16.mxu1 %v22162_v30 }
 0x244   :  { %19558 = vmatpush3.bf16.msra.mxu1 %v22162_v30 }
 0x245   :  { %19563 = vmatprep.subr.bf16.mxu1 %v22160_v36 }
 0x247   :  { %19560 = vmatmul.mubr.msk.bf16.vlgmr.msra.gmra.mxu1 %vm929_vm0, %v19878_v38 }
 0x248   :  { %19564 = vmatpush3.bf16.msra.mxu1 %v22160_v36  ;;  %19567 = vmatprep.mubr.msk.bf16.mxu1 %vm929_vm0, %v19879_v39 }
 0x249   :  { %19565 = vmatprep.subr.bf16.mxu1 %v22162_v30 }
 0x24c   :  { %19566 = vmatpush3.bf16.msra.mxu1 %v22162_v30 }
 0x24d   :  { %1131 = vmatprep.subr.bf16.mxu1 %v19883_v25 }
 0x24f   :  { %19568 = vmatmul.mubr.msk.bf16.vlgmr.msra.gmra.mxu1 %vm929_vm0, %v19880_v22 }
 0x250   :  { %1132 = vmatpush1.bf16.msra.mxu1 %v19881_v24  ;;  %1155 = vmatprep.mubr.bf16.mxu1 %v27308_v43 }
 0x251   :  { %1133 = vmatprep.subr.bf16.mxu1 %v19886_v17 }
 0x254   :  { %1134 = vmatpush1.bf16.msra.mxu1 %v19884_v20 }
 0x255   :  { %1135 = vmatprep.subr.bf16.mxu1 %v19889_v27 }
 0x258   :  { %1136 = vmatpush1.bf16.msra.mxu1 %v19887_v32 }
 0x259   :  { %1137 = vmatprep.subr.bf16.mxu1 %v19892_v37 }
 0x25c   :  { %1138 = vmatpush1.bf16.msra.mxu1 %v19890_v40 }
 0x25d   :  { %19571 = vmatprep.subr.bf16.mxu1 %v22160_v36 }
 0x307   :  { %v19561_v26 = vpop.f32.mrf.mxu1 }
 0x309   :  { %v970_v44 = vpop.f32.mrf.mxu1 }
 0x30b   :  { %v19562_v45 = vpop.f32.mrf.mxu1 }
 0x30c   :  { %v986_v53 = vpack.c.bf16 %v19562_v45, %v19561_v26 }
 0x30d   :  { %v973_v46 = vpop.f32.mrf.mxu1 }
 0x30e   :  { %v985_v19 = vpack.c.bf16 %v973_v46, %v970_v44  ;;  %v19933_v44 = vld [vmem:[%s27292_s5 + $0x130] ss:$8 sps:$4 sm:$0xff]  }
 0x30f   :  { %v19569_v29 = vpop.f32.mrf.mxu1 }
 0x310   :  { %16391 = vmatmul.mubr.msk.bf16.vlgmr.msra.gmra.mxu0 %vm1116_vm1, %v985_v19  ;;  %v19939_v19 = vld [vmem:[%s27291_s4 + $0x40] sm:$0xff]  }
 0x311   :  { %1411 = vmatpush1.bf16.msra.mxu0 %v19905_v51  ;;  %v1050_v47 = vpop.f32.mrf.mxu1  ;;  %1264 = vmatprep.mubr.bf16.mxu0 %v27308_v43  ;;  %v19938_v51 = vld [vmem:[%s27292_s5 + $0x124] ss:$8 sps:$4 sm:$0xff]  }
 0x312   :  { %1412 = vmatprep.subr.bf16.mxu0 %v19910_v23  ;;  %v19936_v23 = vld [vmem:[%s27292_s5 + $0x120] ss:$8 sps:$4 sm:$0xff]  }
 0x313   :  { %v19570_v50 = vpop.f32.mrf.mxu1 }
 0x314   :  { %v1066_v57 = vpack.c.bf16 %v19570_v50, %v19569_v29  ;;  %v19942_v29 = vld [vmem:[%s27292_s5 + $0x114] ss:$8 sps:$4 sm:$0xff]   ;;  %v19946_v50 = vld [vmem:[%s27292_s5 + $0x104] ss:$8 sps:$4 sm:$0xff]  }
 0x315   :  { %1413 = vmatpush1.bf16.msra.mxu0 %v19908_v48  ;;  %v1053_v21 = vpop.f32.mrf.mxu1  ;;  %v19943_v48 = vld [vmem:[%s27291_s4 + $0x48] sm:$0xff]  }
 0x316   :  { %v1065_v10 = vpack.c.bf16 %v1053_v21, %v1050_v47  ;;  %1414 = vmatprep.subr.bf16.mxu0 %v19913_v49  ;;  %v19940_v49 = vld [vmem:[%s27292_s5 + $0x110] ss:$8 sps:$4 sm:$0xff]  }
 0x317   :  { %v19947_v21 = vld [vmem:[%s27291_s4 + $0x50] sm:$0xff]  }
 0x318   :  { %16381 = vmatmul.mubr.msk.bf16.vlgmr.msra.gmra.mxu1 %vm1116_vm1, %v1065_v10  ;;  %16392 = vmatmul.mubr.msk.bf16.gmra.mxu0 %vm1116_vm1, %v986_v53  ;;  %v19948_v53 = vld [vmem:[%s27291_s4 + $0x58] sm:$0xff]  }
 0x319   :  { %19572 = vmatpush3.bf16.msra.mxu1 %v22160_v36  ;;  %1415 = vmatpush1.bf16.msra.mxu0 %v19911_v52  ;;  %v19944_v52 = vld [vmem:[%s27292_s5 + $0x100] ss:$8 sps:$4 sm:$0xff]   ;;  %v19951_v10 = vld [vmem:[%s27292_s5 + $0x174] ss:$8 sps:$4 sm:$0xff]  }
 0x31a   :  { %19573 = vmatprep.subr.bf16.mxu1 %v22162_v30  ;;  %1416 = vmatprep.subr.bf16.mxu0 %v19916_v54  ;;  %v19949_v54 = vld [vmem:[%s27292_s5 + $0x170] ss:$8 sps:$4 sm:$0xff]  }
 0x31b   :  { %1165 = vmatprep.mubr.bf16.mxu1 %v27308_v43  ;;  %1434 = vmatprep.mubr.bf16.mxu0 %v27308_v43 }
 0x31d   :  { %19574 = vmatpush3.bf16.msra.mxu1 %v22162_v30  ;;  %1417 = vmatpush1.bf16.msra.mxu0 %v19914_v55  ;;  %v19954_v55 = vld [vmem:[%s27292_s5 + $0x164] ss:$8 sps:$4 sm:$0xff]  }
 0x31e   :  { %19579 = vmatprep.subr.bf16.mxu1 %v22160_v36  ;;  %19587 = vmatprep.subr.bf16.mxu0 %v22160_v36 }
 0x320   :  { %16382 = vmatmul.mubr.msk.bf16.gmra.mxu1 %vm1116_vm1, %v1066_v57  ;;  %v19957_v57 = vld [vmem:[%s27292_s5 + $0x154] ss:$8 sps:$4 sm:$0xff]  }
 0x321   :  { %19575 = vmatprep.mubr.msk.bf16.mxu1 %vm929_vm0, %v19917_v56  ;;  %v19952_v56 = vld [vmem:[%s27292_s5 + $0x160] ss:$8 sps:$4 sm:$0xff]  }
 0x328   :  { %19576 = vmatmul.mubr.msk.bf16.vlgmr.msra.gmra.mxu1 %vm929_vm0, %v19918_v58  ;;  %v19955_v58 = vld [vmem:[%s27292_s5 + $0x150] ss:$8 sps:$4 sm:$0xff]  }
 0x329   :  { %19580 = vmatpush3.bf16.msra.mxu1 %v22160_v36  ;;  %19583 = vmatprep.mubr.msk.bf16.mxu1 %vm929_vm0, %v19919_v59  ;;  %v19960_v59 = vld [vmem:[%s27292_s5 + $0x144] ss:$8 sps:$4 sm:$0xff]  }
 0x32a   :  { %19581 = vmatprep.subr.bf16.mxu1 %v22162_v30 }
 0x32d   :  { %19582 = vmatpush3.bf16.msra.mxu1 %v22162_v30 }
 0x32e   :  { %1598 = vmatprep.subr.bf16.mxu1 %v19923_v61  ;;  %v19963_v61 = vld [vmem:[%s27292_s5 + $0x1b4] ss:$8 sps:$4 sm:$0xff]  }
 0x330   :  { %19584 = vmatmul.mubr.msk.bf16.vlgmr.msra.gmra.mxu1 %vm929_vm0, %v19920_v60  ;;  %v19958_v60 = vld [vmem:[%s27292_s5 + $0x140] ss:$8 sps:$4 sm:$0xff]  }
 0x331   :  { %1622 = vmatprep.mubr.bf16.mxu1 %v27308_v43  ;;  %1599 = vmatpush1.bf16.msra.mxu1 %v19921_v62 }
 0x332   :  { %1600 = vmatprep.subr.bf16.mxu1 %v19926_v63 }
 0x335   :  { %1601 = vmatpush1.bf16.msra.mxu1 %v19924_v0 }
 0x336   :  { %1602 = vmatprep.subr.bf16.mxu1 %v19929_v1 }
 0x339   :  { %1603 = vmatpush1.bf16.msra.mxu1 %v19927_v2 }
 0x33a   :  { %1604 = vmatprep.subr.bf16.mxu1 %v19932_v3 }
 0x33d   :  { %1605 = vmatpush1.bf16.msra.mxu1 %v19930_v4 }
 0x33e   :  { %1786 = vmatprep.subr.bf16.mxu1 %v19935_v5 }
 0x3d0   :  { %v1256_v6 = vpop.f32.mrf.mxu0 }
 0x3d2   :  { %v1258_v7 = vpop.f32.mrf.mxu0 }
 0x3d4   :  { %v1260_v8 = vpop.f32.mrf.mxu0 }
 0x3d6   :  { %v22306_v11 = vpop.f32.mrf.mxu0 }
 0x3d8   :  { %v1157_v9 = vpop.f32.mrf.mxu1  ;;  %v1266_v31 = vpop.f32.mrf.mxu0 }
 0x3d9   :  { %v22308_v13 = vadd.f32 %v1256_v6, %v1157_v9 }
 0x3da   :  { %v1159_v14 = vpop.f32.mrf.mxu1  ;;  %v1268_v38 = vpop.f32.mrf.mxu0 }
 0x3db   :  { %v22310_v16 = vadd.f32 %v1258_v7, %v1159_v14 }
 0x3dc   :  { %v1161_v18 = vpop.f32.mrf.mxu1  ;;  %v1270_v24 = vpop.f32.mrf.mxu0 }
 0x3dd   :  { %v22312_v33 = vadd.f32 %v1260_v8, %v1161_v18 }
 0x3de   :  { %v22314_v35 = vpop.f32.mrf.mxu1  ;;  %v22404_v62 = vpop.f32.mrf.mxu0 }
 0x3e0   :  { %v1167_v28 = vpop.f32.mrf.mxu1 }
 0x3e1   :  { %v22316_v39 = vadd.f32 %v1266_v31, %v1167_v28 }
 0x3e2   :  { %v1169_v25 = vpop.f32.mrf.mxu1 }
 0x3e3   :  { %v22318_v22 = vadd.f32 %v1268_v38, %v1169_v25 }
 0x3e4   :  { %v1171_v17 = vpop.f32.mrf.mxu1 }
 0x3e5   :  { %v22320_v20 = vadd.f32 %v1270_v24, %v1171_v17 }
 0x3e6   :  { %v22322_v27 = vpop.f32.mrf.mxu1 }
 0x3e8   :  { %v19577_v32 = vpop.f32.mrf.mxu1 }
 0x3ea   :  { %v1330_v37 = vpop.f32.mrf.mxu1 }
 0x3ec   :  { %v19578_v40 = vpop.f32.mrf.mxu1 }
 0x3ed   :  { %v1346_v45 = vpack.c.bf16 %v19578_v40, %v19577_v32 }
 0x3ee   :  { %v1333_v12 = vpop.f32.mrf.mxu1 }
 0x3ef   :  { %v1345_v15 = vpack.c.bf16 %v1333_v12, %v1330_v37 }
 0x3f0   :  { %v19585_v34 = vpop.f32.mrf.mxu1 }
 0x3f1   :  { %16417 = vmatmul.mubr.msk.bf16.vlgmr.msra.gmra.mxu0 %vm1116_vm1, %v1345_v15 }
 0x3f2   :  { %19588 = vmatpush3.bf16.msra.mxu0 %v22160_v36  ;;  %v1518_v41 = vpop.f32.mrf.mxu1  ;;  %1444 = vmatprep.mubr.bf16.mxu0 %v27308_v43 }
 0x3f3   :  { %19589 = vmatprep.subr.bf16.mxu0 %v22162_v30 }
 0x3f4   :  { %v19586_v42 = vpop.f32.mrf.mxu1 }
 0x3f5   :  { %v1534_v47 = vpack.c.bf16 %v19586_v42, %v19585_v34 }
 0x3f6   :  { %19590 = vmatpush3.bf16.msra.mxu0 %v22162_v30  ;;  %v1521_v26 = vpop.f32.mrf.mxu1 }
 0x3f7   :  { %v1533_v46 = vpack.c.bf16 %v1521_v26, %v1518_v41  ;;  %19595 = vmatprep.subr.bf16.mxu0 %v22160_v36 }
 0x3f9   :  { %16418 = vmatmul.mubr.msk.bf16.gmra.mxu0 %vm1116_vm1, %v1346_v45  ;;  %16443 = vmatmul.mubr.msk.bf16.vlgmr.msra.gmra.mxu1 %vm1116_vm1, %v1533_v46  ;;  %v19961_v46 = vld [vmem:[%s27292_s5 + $0x1b0] ss:$8 sps:$4 sm:$0xff]  }
 0x3fa   :  { %1787 = vmatpush1.bf16.msra.mxu1 %v19933_v44  ;;  %1632 = vmatprep.mubr.bf16.mxu1 %v27308_v43 }
 0x3fb   :  { %1788 = vmatprep.subr.bf16.mxu1 %v19938_v51  ;;  %19591 = vmatprep.mubr.msk.bf16.mxu0 %vm929_vm0, %v19939_v19 }
 0x3fe   :  { %1789 = vmatpush1.bf16.msra.mxu1 %v19936_v23  ;;  %v19966_v23 = vld [vmem:[%s27292_s5 + $0x1a4] ss:$8 sps:$4 sm:$0xff]  }
 0x3ff   :  { %1790 = vmatprep.subr.bf16.mxu1 %v19942_v29  ;;  %v19967_v29 = vld [vmem:[%s27291_s4 + $0x60] sm:$0xff]  }
 0x401   :  { %16444 = vmatmul.mubr.msk.bf16.gmra.mxu1 %vm1116_vm1, %v1534_v47  ;;  %19592 = vmatmul.mubr.msk.bf16.vlgmr.msra.gmra.mxu0 %vm929_vm0, %v19943_v48  ;;  %v19964_v47 = vld [vmem:[%s27292_s5 + $0x1a0] ss:$8 sps:$4 sm:$0xff]   ;;  %v19970_v48 = vld [vmem:[%s27292_s5 + $0x194] ss:$8 sps:$4 sm:$0xff]  }
 0x402   :  { %1791 = vmatpush1.bf16.msra.mxu1 %v19940_v49  ;;  %19596 = vmatpush3.bf16.msra.mxu0 %v22160_v36 }
 0x403   :  { %19597 = vmatprep.subr.bf16.mxu0 %v22162_v30  ;;  %1792 = vmatprep.subr.bf16.mxu1 %v19946_v50  ;;  %v19971_v50 = vld [vmem:[%s27291_s4 + $0x68] sm:$0xff]  }
 0x404   :  { %19599 = vmatprep.mubr.msk.bf16.mxu0 %vm929_vm0, %v19947_v21  ;;  %1810 = vmatprep.mubr.bf16.mxu1 %v27308_v43  ;;  %v19968_v21 = vld [vmem:[%s27292_s5 + $0x190] ss:$8 sps:$4 sm:$0xff]  }
 0x406   :  { %1793 = vmatpush1.bf16.msra.mxu1 %v19944_v52  ;;  %19598 = vmatpush3.bf16.msra.mxu0 %v22162_v30  ;;  %v19974_v52 = vld [vmem:[%s27292_s5 + $0x184] ss:$8 sps:$4 sm:$0xff]  }
 0x407   :  { %19603 = vmatprep.subr.bf16.mxu1 %v22160_v36  ;;  %1974 = vmatprep.subr.bf16.mxu0 %v19951_v10  ;;  %v19972_v10 = vld [vmem:[%s27292_s5 + $0x180] ss:$8 sps:$4 sm:$0xff]  }
 0x409   :  { %19600 = vmatmul.mubr.msk.bf16.vlgmr.msra.gmra.mxu0 %vm929_vm0, %v19948_v53  ;;  %v19975_v53 = vld [vmem:[%s27291_s4 + $0x70] sm:$0xff]  }
 0x40a   :  { %1998 = vmatprep.mubr.bf16.mxu0 %v27308_v43  ;;  %1975 = vmatpush1.bf16.msra.mxu0 %v19949_v54  ;;  %v19976_v54 = vld [vmem:[%s27291_s4 + $0x78] sm:$0xff]  }
 0x40b   :  { %1976 = vmatprep.subr.bf16.mxu0 %v19954_v55  ;;  %v19979_v55 = vld [vmem:[%s27292_s5 + $0x1f4] ss:$8 sps:$4 sm:$0xff]  }
 0x40e   :  { %1977 = vmatpush1.bf16.msra.mxu0 %v19952_v56  ;;  %v19977_v56 = vld [vmem:[%s27292_s5 + $0x1f0] ss:$8 sps:$4 sm:$0xff]  }
 0x40f   :  { %1978 = vmatprep.subr.bf16.mxu0 %v19957_v57  ;;  %v19982_v57 = vld [vmem:[%s27292_s5 + $0x1e4] ss:$8 sps:$4 sm:$0xff]  }
 0x412   :  { %1979 = vmatpush1.bf16.msra.mxu0 %v19955_v58  ;;  %v19980_v58 = vld [vmem:[%s27292_s5 + $0x1e0] ss:$8 sps:$4 sm:$0xff]  }
 0x413   :  { %1980 = vmatprep.subr.bf16.mxu0 %v19960_v59  ;;  %v19985_v59 = vld [vmem:[%s27292_s5 + $0x1d4] ss:$8 sps:$4 sm:$0xff]  }
 0x416   :  { %1981 = vmatpush1.bf16.msra.mxu0 %v19958_v60  ;;  %v19983_v60 = vld [vmem:[%s27292_s5 + $0x1d0] ss:$8 sps:$4 sm:$0xff]  }
 0x417   :  { %2162 = vmatprep.subr.bf16.mxu0 %v19963_v61  ;;  %v19988_v61 = vld [vmem:[%s27292_s5 + $0x1c4] ss:$8 sps:$4 sm:$0xff]  }
 0x4b1   :  { %v1436_v63 = vpop.f32.mrf.mxu0 }
 0x4b2   :  { %v1455_v0 = vadd.f32 %v1436_v63, %v22308_v13  ;;  %v19986_v63 = vld [vmem:[%s27292_s5 + $0x1c0] ss:$8 sps:$4 sm:$0xff]  }
 0x4b3   :  { %v1438_v1 = vpop.f32.mrf.mxu0 }
 0x4b4   :  { %v1456_v2 = vadd.f32 %v1438_v1, %v22310_v16 }
 0x4b5   :  { %v1440_v3 = vpop.f32.mrf.mxu0 }
 0x4b6   :  { %v1457_v4 = vadd.f32 %v1440_v3, %v22312_v33 }
 0x4b7   :  { %v22409_v5 = vpop.f32.mrf.mxu0 }
 0x4b9   :  { %v1446_v6 = vpop.f32.mrf.mxu0  ;;  %v1624_v7 = vpop.f32.mrf.mxu1 }
 0x4ba   :  { %v1459_v8 = vadd.f32 %v1446_v6, %v22316_v39  ;;  %v22412_v9 = vadd.f32 %v1624_v7, %v1455_v0  ;;  %v19991_v0 = vld [vmem:[%s27292_s5 + $0x234] ss:$8 sps:$4 sm:$0xff]  }
 0x4bb   :  { %v1448_v14 = vpop.f32.mrf.mxu0  ;;  %v1626_v18 = vpop.f32.mrf.mxu1 }
 0x4bc   :  { %v1460_v31 = vadd.f32 %v1448_v14, %v22318_v22  ;;  %v22415_v28 = vadd.f32 %v1626_v18, %v1456_v2 }
 0x4bd   :  { %v1450_v13 = vpop.f32.mrf.mxu0  ;;  %v1628_v38 = vpop.f32.mrf.mxu1 }
 0x4be   :  { %v1461_v16 = vadd.f32 %v1450_v13, %v22320_v20  ;;  %v22418_v25 = vadd.f32 %v1628_v38, %v1457_v4 }
 0x4bf   :  { %v22420_v33 = vpop.f32.mrf.mxu0  ;;  %v22422_v24 = vpop.f32.mrf.mxu1 }
 0x4c1   :  { %v1634_v17 = vpop.f32.mrf.mxu1  ;;  %v19593_v39 = vpop.f32.mrf.mxu0 }
 0x4c2   :  { %v22424_v32 = vadd.f32 %v1634_v17, %v1459_v8 }
 0x4c3   :  { %v1636_v37 = vpop.f32.mrf.mxu1  ;;  %v1706_v40 = vpop.f32.mrf.mxu0 }
 0x4c4   :  { %v22426_v12 = vadd.f32 %v1636_v37, %v1460_v31 }
 0x4c5   :  { %v1638_v22 = vpop.f32.mrf.mxu1  ;;  %v19594_v15 = vpop.f32.mrf.mxu0 }
 0x4c6   :  { %v22428_v34 = vadd.f32 %v1638_v22, %v1461_v16  ;;  %v1722_v51 = vpack.c.bf16 %v19594_v15, %v19593_v39 }
 0x4c7   :  { %v1709_v41 = vpop.f32.mrf.mxu0  ;;  %v22510_v1 = vpop.f32.mrf.mxu1 }
 0x4c8   :  { %v1721_v20 = vpack.c.bf16 %v1709_v41, %v1706_v40 }
 0x4c9   :  { %v19601_v42 = vpop.f32.mrf.mxu0 }
 0x4ca   :  { %16469 = vmatmul.mubr.msk.bf16.vlgmr.msra.gmra.mxu1 %vm1116_vm1, %v1721_v20 }
 0x4cb   :  { %19604 = vmatpush3.bf16.msra.mxu1 %v22160_v36  ;;  %v1894_v26 = vpop.f32.mrf.mxu0  ;;  %1820 = vmatprep.mubr.bf16.mxu1 %v27308_v43 }
 0x4cc   :  { %19605 = vmatprep.subr.bf16.mxu1 %v22162_v30 }
 0x4cd   :  { %v19602_v44 = vpop.f32.mrf.mxu0 }
 0x4ce   :  { %v1910_v49 = vpack.c.bf16 %v19602_v44, %v19601_v42 }
 0x4cf   :  { %19606 = vmatpush3.bf16.msra.mxu1 %v22162_v30  ;;  %v1897_v45 = vpop.f32.mrf.mxu0 }
 0x4d0   :  { %v1909_v19 = vpack.c.bf16 %v1897_v45, %v1894_v26  ;;  %19611 = vmatprep.subr.bf16.mxu1 %v22160_v36 }
 0x4d2   :  { %16470 = vmatmul.mubr.msk.bf16.gmra.mxu1 %vm1116_vm1, %v1722_v51  ;;  %16495 = vmatmul.mubr.msk.bf16.vlgmr.msra.gmra.mxu0 %vm1116_vm1, %v1909_v19 }
 0x4d3   :  { %2163 = vmatpush1.bf16.msra.mxu0 %v19961_v46  ;;  %2008 = vmatprep.mubr.bf16.mxu0 %v27308_v43 }
 0x4d4   :  { %2164 = vmatprep.subr.bf16.mxu0 %v19966_v23  ;;  %19607 = vmatprep.mubr.msk.bf16.mxu1 %vm929_vm0, %v19967_v29 }
 0x4d7   :  { %2165 = vmatpush1.bf16.msra.mxu0 %v19964_v47 }
 0x4d8   :  { %2166 = vmatprep.subr.bf16.mxu0 %v19970_v48  ;;  %v19989_v48 = vld [vmem:[%s27292_s5 + $0x230] ss:$8 sps:$4 sm:$0xff]  }
 0x4da   :  { %16496 = vmatmul.mubr.msk.bf16.gmra.mxu0 %vm1116_vm1, %v1910_v49  ;;  %19608 = vmatmul.mubr.msk.bf16.vlgmr.msra.gmra.mxu1 %vm929_vm0, %v19971_v50 }
 0x4db   :  { %2167 = vmatpush1.bf16.msra.mxu0 %v19968_v21  ;;  %19612 = vmatpush3.bf16.msra.mxu1 %v22160_v36  ;;  %v19994_v21 = vld [vmem:[%s27292_s5 + $0x224] ss:$8 sps:$4 sm:$0xff]  }
 0x4dc   :  { %19613 = vmatprep.subr.bf16.mxu1 %v22162_v30  ;;  %2168 = vmatprep.subr.bf16.mxu0 %v19974_v52  ;;  %v19995_v52 = vld [vmem:[%s27291_s4 + $0x80] sm:$0xff]  }
 0x4dd   :  { %19615 = vmatprep.mubr.msk.bf16.mxu1 %vm929_vm0, %v19975_v53  ;;  %2186 = vmatprep.mubr.bf16.mxu0 %v27308_v43  ;;  %v19992_v53 = vld [vmem:[%s27292_s5 + $0x220] ss:$8 sps:$4 sm:$0xff]  }
 0x4df   :  { %2169 = vmatpush1.bf16.msra.mxu0 %v19972_v10  ;;  %19614 = vmatpush3.bf16.msra.mxu1 %v22162_v30  ;;  %v19998_v10 = vld [vmem:[%s27292_s5 + $0x214] ss:$8 sps:$4 sm:$0xff]  }
 0x4e0   :  { %19619 = vmatprep.subr.bf16.mxu0 %v22160_v36  ;;  %2350 = vmatprep.subr.bf16.mxu1 %v19979_v55  ;;  %v19999_v55 = vld [vmem:[%s27291_s4 + $0x88] sm:$0xff]  }
 0x4e2   :  { %19616 = vmatmul.mubr.msk.bf16.vlgmr.msra.gmra.mxu1 %vm929_vm0, %v19976_v54 }
 0x4e3   :  { %2374 = vmatprep.mubr.bf16.mxu1 %v27308_v43  ;;  %2351 = vmatpush1.bf16.msra.mxu1 %v19977_v56  ;;  %v19996_v56 = vld [vmem:[%s27292_s5 + $0x210] ss:$8 sps:$4 sm:$0xff]  }
 0x4e4   :  { %2352 = vmatprep.subr.bf16.mxu1 %v19982_v57  ;;  %v20002_v57 = vld [vmem:[%s27292_s5 + $0x204] ss:$8 sps:$4 sm:$0xff]  }
 0x4e7   :  { %2353 = vmatpush1.bf16.msra.mxu1 %v19980_v58  ;;  %v20003_v58 = vld [vmem:[%s27291_s4 + $0x90] sm:$0xff]  }
 0x4e8   :  { %2354 = vmatprep.subr.bf16.mxu1 %v19985_v59  ;;  %v20000_v59 = vld [vmem:[%s27292_s5 + $0x200] ss:$8 sps:$4 sm:$0xff]  }
 0x4eb   :  { %2355 = vmatpush1.bf16.msra.mxu1 %v19983_v60  ;;  %v20004_v60 = vld [vmem:[%s27291_s4 + $0x98] sm:$0xff]  }
 0x4ec   :  { %2356 = vmatprep.subr.bf16.mxu1 %v19988_v61  ;;  %v20007_v61 = vld [vmem:[%s27292_s5 + $0x274] ss:$8 sps:$4 sm:$0xff]  }
 0x4ef   :  { %2357 = vmatpush1.bf16.msra.mxu1 %v19986_v63  ;;  %v20005_v63 = vld [vmem:[%s27292_s5 + $0x270] ss:$8 sps:$4 sm:$0xff]  }
 0x4f0   :  { %2538 = vmatprep.subr.bf16.mxu1 %v19991_v0  ;;  %v20010_v0 = vld [vmem:[%s27292_s5 + $0x264] ss:$8 sps:$4 sm:$0xff]  }
 0x58a   :  { %v1812_v2 = vpop.f32.mrf.mxu1 }
 0x58b   :  { %v1831_v3 = vadd.f32 %v1812_v2, %v22412_v9  ;;  %v20008_v2 = vld [vmem:[%s27292_s5 + $0x260] ss:$8 sps:$4 sm:$0xff]  }
 0x58c   :  { %v1814_v4 = vpop.f32.mrf.mxu1 }
 0x58d   :  { %v1832_v6 = vadd.f32 %v1814_v4, %v22415_v28  ;;  %v20011_v4 = vld [vmem:[%s27292_s5 + $0x250] ss:$8 sps:$4 sm:$0xff]  }
 0x58e   :  { %v1816_v7 = vpop.f32.mrf.mxu1 }
 0x58f   :  { %v1833_v8 = vadd.f32 %v1816_v7, %v22418_v25  ;;  %v20014_v7 = vld [vmem:[%s27292_s5 + $0x240] ss:$8 sps:$4 sm:$0xff]  }
 0x590   :  { %v22515_v14 = vpop.f32.mrf.mxu1 }
 0x592   :  { %v1822_v18 = vpop.f32.mrf.mxu1  ;;  %v2000_v31 = vpop.f32.mrf.mxu0 }
 0x593   :  { %v1835_v13 = vadd.f32 %v1822_v18, %v22424_v32  ;;  %v22518_v38 = vadd.f32 %v2000_v31, %v1831_v3  ;;  %v20013_v3 = vld [vmem:[%s27292_s5 + $0x254] ss:$8 sps:$4 sm:$0xff]  }
 0x594   :  { %v1824_v16 = vpop.f32.mrf.mxu1  ;;  %v2002_v17 = vpop.f32.mrf.mxu0 }
 0x595   :  { %v1836_v39 = vadd.f32 %v1824_v16, %v22426_v12  ;;  %v22521_v37 = vadd.f32 %v2002_v17, %v1832_v6  ;;  %v20016_v6 = vld [vmem:[%s27292_s5 + $0x244] ss:$8 sps:$4 sm:$0xff]  }
 0x596   :  { %v1826_v9 = vpop.f32.mrf.mxu1  ;;  %v2004_v40 = vpop.f32.mrf.mxu0 }
 0x597   :  { %v1837_v28 = vadd.f32 %v1826_v9, %v22428_v34  ;;  %v22524_v22 = vadd.f32 %v2004_v40, %v1833_v8  ;;  %v20019_v8 = vld [vmem:[%s27292_s5 + $0x2b4] ss:$8 sps:$4 sm:$0xff]  }
 0x598   :  { %v22526_v25 = vpop.f32.mrf.mxu1  ;;  %v22528_v15 = vpop.f32.mrf.mxu0 }
 0x59a   :  { %v2010_v41 = vpop.f32.mrf.mxu0  ;;  %v19609_v32 = vpop.f32.mrf.mxu1 }
 0x59b   :  { %v22530_v20 = vadd.f32 %v2010_v41, %v1835_v13 }
 0x59c   :  { %v2012_v42 = vpop.f32.mrf.mxu0  ;;  %v2082_v26 = vpop.f32.mrf.mxu1 }
 0x59d   :  { %v22532_v44 = vadd.f32 %v2012_v42, %v1836_v39 }
 0x59e   :  { %v2014_v12 = vpop.f32.mrf.mxu0  ;;  %v19610_v45 = vpop.f32.mrf.mxu1 }
 0x59f   :  { %v22534_v46 = vadd.f32 %v2014_v12, %v1837_v28  ;;  %v2098_v49 = vpack.c.bf16 %v19610_v45, %v19609_v32 }
 0x5a0   :  { %v2085_v51 = vpop.f32.mrf.mxu1  ;;  %v22616_v18 = vpop.f32.mrf.mxu0 }
 0x5a1   :  { %v2097_v34 = vpack.c.bf16 %v2085_v51, %v2082_v26 }
 0x5a2   :  { %v19617_v19 = vpop.f32.mrf.mxu1 }
 0x5a3   :  { %16521 = vmatmul.mubr.msk.bf16.vlgmr.msra.gmra.mxu0 %vm1116_vm1, %v2097_v34 }
 0x5a4   :  { %19620 = vmatpush3.bf16.msra.mxu0 %v22160_v36  ;;  %v2270_v23 = vpop.f32.mrf.mxu1  ;;  %2196 = vmatprep.mubr.bf16.mxu0 %v27308_v43 }
 0x5a5   :  { %19621 = vmatprep.subr.bf16.mxu0 %v22162_v30 }
 0x5a6   :  { %v19618_v29 = vpop.f32.mrf.mxu1 }
 0x5a7   :  { %v2286_v54 = vpack.c.bf16 %v19618_v29, %v19617_v19 }
 0x5a8   :  { %19622 = vmatpush3.bf16.msra.mxu0 %v22162_v30  ;;  %v2273_v47 = vpop.f32.mrf.mxu1 }
 0x5a9   :  { %v2285_v50 = vpack.c.bf16 %v2273_v47, %v2270_v23  ;;  %19627 = vmatprep.subr.bf16.mxu0 %v22160_v36 }
 0x5ab   :  { %16522 = vmatmul.mubr.msk.bf16.gmra.mxu0 %vm1116_vm1, %v2098_v49  ;;  %16547 = vmatmul.mubr.msk.bf16.vlgmr.msra.gmra.mxu1 %vm1116_vm1, %v2285_v50 }
 0x5ac   :  { %2539 = vmatpush1.bf16.msra.mxu1 %v19989_v48  ;;  %2384 = vmatprep.mubr.bf16.mxu1 %v27308_v43 }
 0x5ad   :  { %2540 = vmatprep.subr.bf16.mxu1 %v19994_v21  ;;  %19623 = vmatprep.mubr.msk.bf16.mxu0 %vm929_vm0, %v19995_v52 }
 0x5b0   :  { %2541 = vmatpush1.bf16.msra.mxu1 %v19992_v53 }
 0x5b1   :  { %2542 = vmatprep.subr.bf16.mxu1 %v19998_v10 }
 0x5b3   :  { %16548 = vmatmul.mubr.msk.bf16.gmra.mxu1 %vm1116_vm1, %v2286_v54  ;;  %19624 = vmatmul.mubr.msk.bf16.vlgmr.msra.gmra.mxu0 %vm929_vm0, %v19999_v55 }
 0x5b4   :  { %2543 = vmatpush1.bf16.msra.mxu1 %v19996_v56  ;;  %19628 = vmatpush3.bf16.msra.mxu0 %v22160_v36 }
 0x5b5   :  { %19629 = vmatprep.subr.bf16.mxu0 %v22162_v30  ;;  %2544 = vmatprep.subr.bf16.mxu1 %v20002_v57  ;;  %v20017_v57 = vld [vmem:[%s27292_s5 + $0x2b0] ss:$8 sps:$4 sm:$0xff]  }
 0x5b6   :  { %19631 = vmatprep.mubr.msk.bf16.mxu0 %vm929_vm0, %v20003_v58  ;;  %2562 = vmatprep.mubr.bf16.mxu1 %v27308_v43 }
 0x5b8   :  { %2545 = vmatpush1.bf16.msra.mxu1 %v20000_v59  ;;  %19630 = vmatpush3.bf16.msra.mxu0 %v22162_v30 }
 0x5b9   :  { %19635 = vmatprep.subr.bf16.mxu1 %v22160_v36  ;;  %2726 = vmatprep.subr.bf16.mxu0 %v20007_v61  ;;  %v20023_v61 = vld [vmem:[%s27291_s4 + $0xa0] sm:$0xff]  }
 0x5bb   :  { %19632 = vmatmul.mubr.msk.bf16.vlgmr.msra.gmra.mxu0 %vm929_vm0, %v20004_v60  ;;  %v20022_v60 = vld [vmem:[%s27292_s5 + $0x2a4] ss:$8 sps:$4 sm:$0xff]  }
 0x5bc   :  { %2750 = vmatprep.mubr.bf16.mxu0 %v27308_v43  ;;  %2727 = vmatpush1.bf16.msra.mxu0 %v20005_v63  ;;  %v20020_v63 = vld [vmem:[%s27292_s5 + $0x2a0] ss:$8 sps:$4 sm:$0xff]  }
 0x5bd   :  { %2728 = vmatprep.subr.bf16.mxu0 %v20010_v0  ;;  %v20026_v0 = vld [vmem:[%s27292_s5 + $0x294] ss:$8 sps:$4 sm:$0xff]  }
 0x5c0   :  { %2729 = vmatpush1.bf16.msra.mxu0 %v20008_v2 }
 0x5c1   :  { %2730 = vmatprep.subr.bf16.mxu0 %v20013_v3  ;;  %v20027_v3 = vld [vmem:[%s27291_s4 + $0xa8] sm:$0xff]  }
 0x5c4   :  { %2731 = vmatpush1.bf16.msra.mxu0 %v20011_v4  ;;  %v20024_v4 = vld [vmem:[%s27292_s5 + $0x290] ss:$8 sps:$4 sm:$0xff]  }
 0x5c5   :  { %2732 = vmatprep.subr.bf16.mxu0 %v20016_v6  ;;  %v20030_v6 = vld [vmem:[%s27292_s5 + $0x284] ss:$8 sps:$4 sm:$0xff]  }
 0x5c8   :  { %2733 = vmatpush1.bf16.msra.mxu0 %v20014_v7  ;;  %v20031_v7 = vld [vmem:[%s27291_s4 + $0xb0] sm:$0xff]  }
 0x5c9   :  { %2914 = vmatprep.subr.bf16.mxu0 %v20019_v8  ;;  %v20028_v8 = vld [vmem:[%s27292_s5 + $0x280] ss:$8 sps:$4 sm:$0xff]  }
 0x663   :  { %v2188_v31 = vpop.f32.mrf.mxu0 }
 0x664   :  { %v2207_v13 = vadd.f32 %v2188_v31, %v22518_v38  ;;  %v20032_v31 = vld [vmem:[%s27291_s4 + $0xb8] sm:$0xff]  }
 0x665   :  { %v2190_v16 = vpop.f32.mrf.mxu0 }
 0x666   :  { %v2208_v17 = vadd.f32 %v2190_v16, %v22521_v37  ;;  %v20033_v16 = vld [vmem:[%s27292_s5 + $0x2f0] ss:$8 sps:$4 sm:$0xff]  }
 0x667   :  { %v2192_v39 = vpop.f32.mrf.mxu0 }
 0x668   :  { %v2209_v9 = vadd.f32 %v2192_v39, %v22524_v22  ;;  %v20036_v39 = vld [vmem:[%s27292_s5 + $0x2e0] ss:$8 sps:$4 sm:$0xff]  }
 0x669   :  { %v22621_v40 = vpop.f32.mrf.mxu0 }
 0x66b   :  { %v2198_v28 = vpop.f32.mrf.mxu0  ;;  %v2376_v41 = vpop.f32.mrf.mxu1 }
 0x66c   :  { %v2211_v32 = vadd.f32 %v2198_v28, %v22530_v20  ;;  %v22624_v42 = vadd.f32 %v2376_v41, %v2207_v13  ;;  %v20035_v13 = vld [vmem:[%s27292_s5 + $0x2f4] ss:$8 sps:$4 sm:$0xff]   ;;  %v20039_v28 = vld [vmem:[%s27292_s5 + $0x2d0] ss:$8 sps:$4 sm:$0xff]   ;;  %v20044_v41 = vld [vmem:[%s27292_s5 + $0x2c4] ss:$8 sps:$4 sm:$0xff]  }
 0x66d   :  { %v2200_v26 = vpop.f32.mrf.mxu0  ;;  %v2378_v12 = vpop.f32.mrf.mxu1 }
 0x66e   :  { %v2212_v45 = vadd.f32 %v2200_v26, %v22532_v44  ;;  %v22627_v51 = vadd.f32 %v2378_v12, %v2208_v17  ;;  %v20038_v17 = vld [vmem:[%s27292_s5 + $0x2e4] ss:$8 sps:$4 sm:$0xff]   ;;  %v20047_v26 = vld [vmem:[%s27292_s5 + $0x334] ss:$8 sps:$4 sm:$0xff]  }
 0x66f   :  { %v2202_v38 = vpop.f32.mrf.mxu0  ;;  %v2380_v34 = vpop.f32.mrf.mxu1 }
 0x670   :  { %v2213_v37 = vadd.f32 %v2202_v38, %v22534_v46  ;;  %v22630_v19 = vadd.f32 %v2380_v34, %v2209_v9  ;;  %v20041_v9 = vld [vmem:[%s27292_s5 + $0x2d4] ss:$8 sps:$4 sm:$0xff]  }
 0x671   :  { %v22632_v22 = vpop.f32.mrf.mxu0  ;;  %v22634_v23 = vpop.f32.mrf.mxu1 }
 0x673   :  { %v2386_v29 = vpop.f32.mrf.mxu1  ;;  %v19625_v20 = vpop.f32.mrf.mxu0 }
 0x674   :  { %v22636_v47 = vadd.f32 %v2386_v29, %v2211_v32  ;;  %v20042_v32 = vld [vmem:[%s27292_s5 + $0x2c0] ss:$8 sps:$4 sm:$0xff]  }
 0x675   :  { %v2388_v48 = vpop.f32.mrf.mxu1  ;;  %v2458_v49 = vpop.f32.mrf.mxu0 }
 0x676   :  { %v22638_v50 = vadd.f32 %v2388_v48, %v2212_v45 }
 0x677   :  { %v2390_v44 = vpop.f32.mrf.mxu1  ;;  %v19626_v21 = vpop.f32.mrf.mxu0 }
 0x678   :  { %v22640_v52 = vadd.f32 %v2390_v44, %v2213_v37  ;;  %v2474_v58 = vpack.c.bf16 %v19626_v21, %v19625_v20 }
 0x679   :  { %v2461_v53 = vpop.f32.mrf.mxu0  ;;  %v22722_v12 = vpop.f32.mrf.mxu1 }
 0x67a   :  { %v2473_v46 = vpack.c.bf16 %v2461_v53, %v2458_v49 }
 0x67b   :  { %v19633_v10 = vpop.f32.mrf.mxu0 }
 0x67c   :  { %16573 = vmatmul.mubr.msk.bf16.vlgmr.msra.gmra.mxu1 %vm1116_vm1, %v2473_v46 }
 0x67d   :  { %19636 = vmatpush3.bf16.msra.mxu1 %v22160_v36  ;;  %v2646_v54 = vpop.f32.mrf.mxu0  ;;  %2572 = vmatprep.mubr.bf16.mxu1 %v27308_v43 }
 0x67e   :  { %19637 = vmatprep.subr.bf16.mxu1 %v22162_v30 }
 0x67f   :  { %v19634_v55 = vpop.f32.mrf.mxu0 }
 0x680   :  { %v2662_v2 = vpack.c.bf16 %v19634_v55, %v19633_v10 }
 0x681   :  { %19638 = vmatpush3.bf16.msra.mxu1 %v22162_v30  ;;  %v2649_v56 = vpop.f32.mrf.mxu0 }
 0x682   :  { %v2661_v59 = vpack.c.bf16 %v2649_v56, %v2646_v54  ;;  %19643 = vmatprep.subr.bf16.mxu1 %v22160_v36 }
 0x684   :  { %16574 = vmatmul.mubr.msk.bf16.gmra.mxu1 %vm1116_vm1, %v2474_v58  ;;  %16599 = vmatmul.mubr.msk.bf16.vlgmr.msra.gmra.mxu0 %vm1116_vm1, %v2661_v59 }
 0x685   :  { %2915 = vmatpush1.bf16.msra.mxu0 %v20017_v57  ;;  %2760 = vmatprep.mubr.bf16.mxu0 %v27308_v43 }
 0x686   :  { %2916 = vmatprep.subr.bf16.mxu0 %v20022_v60  ;;  %19639 = vmatprep.mubr.msk.bf16.mxu1 %vm929_vm0, %v20023_v61 }
 0x689   :  { %2917 = vmatpush1.bf16.msra.mxu0 %v20020_v63 }
 0x68a   :  { %2918 = vmatprep.subr.bf16.mxu0 %v20026_v0 }
 0x68c   :  { %16600 = vmatmul.mubr.msk.bf16.gmra.mxu0 %vm1116_vm1, %v2662_v2  ;;  %19640 = vmatmul.mubr.msk.bf16.vlgmr.msra.gmra.mxu1 %vm929_vm0, %v20027_v3 }
 0x68d   :  { %2919 = vmatpush1.bf16.msra.mxu0 %v20024_v4  ;;  %19644 = vmatpush3.bf16.msra.mxu1 %v22160_v36 }
 0x68e   :  { %19645 = vmatprep.subr.bf16.mxu1 %v22162_v30  ;;  %2920 = vmatprep.subr.bf16.mxu0 %v20030_v6 }
 0x68f   :  { %19647 = vmatprep.mubr.msk.bf16.mxu1 %vm929_vm0, %v20031_v7  ;;  %2938 = vmatprep.mubr.bf16.mxu0 %v27308_v43 }
 0x691   :  { %2921 = vmatpush1.bf16.msra.mxu0 %v20028_v8  ;;  %19646 = vmatpush3.bf16.msra.mxu1 %v22162_v30 }
 0x692   :  { %19651 = vmatprep.subr.bf16.mxu0 %v22160_v36  ;;  %3102 = vmatprep.subr.bf16.mxu1 %v20035_v13  ;;  %v20045_v13 = vld [vmem:[%s27292_s5 + $0x330] ss:$8 sps:$4 sm:$0xff]  }
 0x694   :  { %19648 = vmatmul.mubr.msk.bf16.vlgmr.msra.gmra.mxu1 %vm929_vm0, %v20032_v31 }
 0x695   :  { %3126 = vmatprep.mubr.bf16.mxu1 %v27308_v43  ;;  %3103 = vmatpush1.bf16.msra.mxu1 %v20033_v16 }
 0x696   :  { %3104 = vmatprep.subr.bf16.mxu1 %v20038_v17 }
 0x699   :  { %3105 = vmatpush1.bf16.msra.mxu1 %v20036_v39  ;;  %v20050_v39 = vld [vmem:[%s27292_s5 + $0x324] ss:$8 sps:$4 sm:$0xff]  }
 0x69a   :  { %3106 = vmatprep.subr.bf16.mxu1 %v20041_v9  ;;  %v20051_v9 = vld [vmem:[%s27291_s4 + $0xc0] sm:$0xff]  }
 0x69d   :  { %3107 = vmatpush1.bf16.msra.mxu1 %v20039_v28  ;;  %v20048_v28 = vld [vmem:[%s27292_s5 + $0x320] ss:$8 sps:$4 sm:$0xff]  }
 0x69e   :  { %3108 = vmatprep.subr.bf16.mxu1 %v20044_v41  ;;  %v20054_v41 = vld [vmem:[%s27292_s5 + $0x314] ss:$8 sps:$4 sm:$0xff]  }
 0x6a1   :  { %3109 = vmatpush1.bf16.msra.mxu1 %v20042_v32 }
 0x6a2   :  { %3290 = vmatprep.subr.bf16.mxu1 %v20047_v26  ;;  %v20055_v26 = vld [vmem:[%s27291_s4 + $0xc8] sm:$0xff]  }
 0x73c   :  { %v2564_v45 = vpop.f32.mrf.mxu1 }
 0x73d   :  { %v2583_v38 = vadd.f32 %v2564_v45, %v22624_v42  ;;  %v20052_v45 = vld [vmem:[%s27292_s5 + $0x310] ss:$8 sps:$4 sm:$0xff]  }
 0x73e   :  { %v2566_v34 = vpop.f32.mrf.mxu1 }
 0x73f   :  { %v2584_v37 = vadd.f32 %v2566_v34, %v22627_v51  ;;  %v20059_v34 = vld [vmem:[%s27291_s4 + $0xd0] sm:$0xff]  }
 0x740   :  { %v2568_v29 = vpop.f32.mrf.mxu1 }
 0x741   :  { %v2585_v20 = vadd.f32 %v2568_v29, %v22630_v19  ;;  %v20060_v29 = vld [vmem:[%s27291_s4 + $0xd8] sm:$0xff]  }
 0x742   :  { %v22727_v48 = vpop.f32.mrf.mxu1 }
 0x744   :  { %v2574_v49 = vpop.f32.mrf.mxu1  ;;  %v2752_v44 = vpop.f32.mrf.mxu0 }
 0x745   :  { %v2587_v21 = vadd.f32 %v2574_v49, %v22636_v47  ;;  %v22730_v53 = vadd.f32 %v2752_v44, %v2583_v38  ;;  %v20058_v38 = vld [vmem:[%s27292_s5 + $0x304] ss:$8 sps:$4 sm:$0xff]   ;;  %v20061_v49 = vld [vmem:[%s27292_s5 + $0x370] ss:$8 sps:$4 sm:$0xff]  }
 0x746   :  { %v2576_v46 = vpop.f32.mrf.mxu1  ;;  %v2754_v10 = vpop.f32.mrf.mxu0  ;;  %v20066_v44 = vld [vmem:[%s27292_s5 + $0x364] ss:$8 sps:$4 sm:$0xff]  }
 0x747   :  { %v2588_v54 = vadd.f32 %v2576_v46, %v22638_v50  ;;  %v22733_v55 = vadd.f32 %v2754_v10, %v2584_v37  ;;  %v20056_v37 = vld [vmem:[%s27292_s5 + $0x300] ss:$8 sps:$4 sm:$0xff]   ;;  %v20069_v46 = vld [vmem:[%s27292_s5 + $0x354] ss:$8 sps:$4 sm:$0xff]   ;;  %v20067_v10 = vld [vmem:[%s27292_s5 + $0x350] ss:$8 sps:$4 sm:$0xff]  }
 0x748   :  { %v2578_v42 = vpop.f32.mrf.mxu1  ;;  %v2756_v56 = vpop.f32.mrf.mxu0 }
 0x749   :  { %v2589_v51 = vadd.f32 %v2578_v42, %v22640_v52  ;;  %v22736_v57 = vadd.f32 %v2756_v56, %v2585_v20  ;;  %v20063_v20 = vld [vmem:[%s27292_s5 + $0x374] ss:$8 sps:$4 sm:$0xff]   ;;  %v20070_v42 = vld [vmem:[%s27292_s5 + $0x340] ss:$8 sps:$4 sm:$0xff]  }
 0x74a   :  { %v22738_v19 = vpop.f32.mrf.mxu1  ;;  %v22740_v58 = vpop.f32.mrf.mxu0  ;;  %v20075_v56 = vld [vmem:[%s27292_s5 + $0x3b4] ss:$8 sps:$4 sm:$0xff]  }
 0x74c   :  { %v2762_v59 = vpop.f32.mrf.mxu0  ;;  %v19641_v47 = vpop.f32.mrf.mxu1 }
 0x74d   :  { %v22742_v60 = vadd.f32 %v2762_v59, %v2587_v21  ;;  %v20064_v21 = vld [vmem:[%s27292_s5 + $0x360] ss:$8 sps:$4 sm:$0xff]  }
 0x74e   :  { %v2764_v61 = vpop.f32.mrf.mxu0  ;;  %v2834_v63 = vpop.f32.mrf.mxu1 }
 0x74f   :  { %v22744_v0 = vadd.f32 %v2764_v61, %v2588_v54  ;;  %v20072_v54 = vld [vmem:[%s27292_s5 + $0x344] ss:$8 sps:$4 sm:$0xff]  }
 0x750   :  { %v2766_v50 = vpop.f32.mrf.mxu0  ;;  %v19642_v2 = vpop.f32.mrf.mxu1 }
 0x751   :  { %v22746_v3 = vadd.f32 %v2766_v50, %v2589_v51  ;;  %v2850_v16 = vpack.c.bf16 %v19642_v2, %v19641_v47 }
 0x752   :  { %v2837_v4 = vpop.f32.mrf.mxu1  ;;  %v22828_v51 = vpop.f32.mrf.mxu0 }
 0x753   :  { %v2849_v52 = vpack.c.bf16 %v2837_v4, %v2834_v63 }
 0x754   :  { %v19649_v6 = vpop.f32.mrf.mxu1 }
 0x755   :  { %16625 = vmatmul.mubr.msk.bf16.vlgmr.msra.gmra.mxu0 %vm1116_vm1, %v2849_v52 }
 0x756   :  { %19652 = vmatpush3.bf16.msra.mxu0 %v22160_v36  ;;  %v3022_v7 = vpop.f32.mrf.mxu1  ;;  %2948 = vmatprep.mubr.bf16.mxu0 %v27308_v43 }
 0x757   :  { %19653 = vmatprep.subr.bf16.mxu0 %v22162_v30 }
 0x758   :  { %v19650_v8 = vpop.f32.mrf.mxu1 }
 0x759   :  { %v3038_v32 = vpack.c.bf16 %v19650_v8, %v19649_v6 }
 0x75a   :  { %19654 = vmatpush3.bf16.msra.mxu0 %v22162_v30  ;;  %v3025_v31 = vpop.f32.mrf.mxu1 }
 0x75b   :  { %v3037_v17 = vpack.c.bf16 %v3025_v31, %v3022_v7  ;;  %19659 = vmatprep.subr.bf16.mxu0 %v22160_v36 }
 0x75d   :  { %16626 = vmatmul.mubr.msk.bf16.gmra.mxu0 %vm1116_vm1, %v2850_v16  ;;  %16651 = vmatmul.mubr.msk.bf16.vlgmr.msra.gmra.mxu1 %vm1116_vm1, %v3037_v17 }
 0x75e   :  { %3291 = vmatpush1.bf16.msra.mxu1 %v20045_v13  ;;  %3136 = vmatprep.mubr.bf16.mxu1 %v27308_v43 }
 0x75f   :  { %3292 = vmatprep.subr.bf16.mxu1 %v20050_v39  ;;  %19655 = vmatprep.mubr.msk.bf16.mxu0 %vm929_vm0, %v20051_v9 }
 0x762   :  { %3293 = vmatpush1.bf16.msra.mxu1 %v20048_v28 }
 0x763   :  { %3294 = vmatprep.subr.bf16.mxu1 %v20054_v41 }
 0x765   :  { %16652 = vmatmul.mubr.msk.bf16.gmra.mxu1 %vm1116_vm1, %v3038_v32  ;;  %19656 = vmatmul.mubr.msk.bf16.vlgmr.msra.gmra.mxu0 %vm929_vm0, %v20055_v26 }
 0x766   :  { %3295 = vmatpush1.bf16.msra.mxu1 %v20052_v45  ;;  %19660 = vmatpush3.bf16.msra.mxu0 %v22160_v36 }
 0x767   :  { %19661 = vmatprep.subr.bf16.mxu0 %v22162_v30  ;;  %3296 = vmatprep.subr.bf16.mxu1 %v20058_v38 }
 0x768   :  { %19663 = vmatprep.mubr.msk.bf16.mxu0 %vm929_vm0, %v20059_v34  ;;  %3314 = vmatprep.mubr.bf16.mxu1 %v27308_v43 }
 0x76a   :  { %3297 = vmatpush1.bf16.msra.mxu1 %v20056_v37  ;;  %19662 = vmatpush3.bf16.msra.mxu0 %v22162_v30 }
 0x76b   :  { %19667 = vmatprep.subr.bf16.mxu1 %v22160_v36  ;;  %3478 = vmatprep.subr.bf16.mxu0 %v20063_v20 }
 0x76d   :  { %19664 = vmatmul.mubr.msk.bf16.vlgmr.msra.gmra.mxu0 %vm929_vm0, %v20060_v29 }
 0x76e   :  { %3502 = vmatprep.mubr.bf16.mxu0 %v27308_v43  ;;  %3479 = vmatpush1.bf16.msra.mxu0 %v20061_v49 }
 0x76f   :  { %3480 = vmatprep.subr.bf16.mxu0 %v20066_v44 }
 0x772   :  { %3481 = vmatpush1.bf16.msra.mxu0 %v20064_v21 }
 0x773   :  { %3482 = vmatprep.subr.bf16.mxu0 %v20069_v46  ;;  %v20073_v46 = vld [vmem:[%s27292_s5 + $0x3b0] ss:$8 sps:$4 sm:$0xff]  }
 0x776   :  { %3483 = vmatpush1.bf16.msra.mxu0 %v20067_v10 }
 0x777   :  { %3484 = vmatprep.subr.bf16.mxu0 %v20072_v54 }
 0x77a   :  { %3485 = vmatpush1.bf16.msra.mxu0 %v20070_v42  ;;  %v20078_v42 = vld [vmem:[%s27292_s5 + $0x3a4] ss:$8 sps:$4 sm:$0xff]  }
 0x77b   :  { %3666 = vmatprep.subr.bf16.mxu0 %v20075_v56  ;;  %v20079_v56 = vld [vmem:[%s27291_s4 + $0xe0] sm:$0xff]  }
 0x815   :  { %v2940_v59 = vpop.f32.mrf.mxu0 }
 0x816   :  { %v2959_v47 = vadd.f32 %v2940_v59, %v22730_v53  ;;  %v20076_v59 = vld [vmem:[%s27292_s5 + $0x3a0] ss:$8 sps:$4 sm:$0xff]  }
 0x817   :  { %v2942_v61 = vpop.f32.mrf.mxu0 }
 0x818   :  { %v2960_v63 = vadd.f32 %v2942_v61, %v22733_v55 }
 0x819   :  { %v2944_v50 = vpop.f32.mrf.mxu0 }
 0x81a   :  { %v2961_v2 = vadd.f32 %v2944_v50, %v22736_v57  ;;  %v20080_v50 = vld [vmem:[%s27292_s5 + $0x390] ss:$8 sps:$4 sm:$0xff]  }
 0x81b   :  { %v22833_v4 = vpop.f32.mrf.mxu0 }
 0x81d   :  { %v2950_v52 = vpop.f32.mrf.mxu0  ;;  %v3128_v6 = vpop.f32.mrf.mxu1 }
 0x81e   :  { %v2963_v7 = vadd.f32 %v2950_v52, %v22742_v60  ;;  %v22836_v8 = vadd.f32 %v3128_v6, %v2959_v47  ;;  %v20082_v47 = vld [vmem:[%s27292_s5 + $0x394] ss:$8 sps:$4 sm:$0xff]   ;;  %v20084_v6 = vld [vmem:[%s27292_s5 + $0x380] ss:$8 sps:$4 sm:$0xff]  }
 0x81f   :  { %v2952_v31 = vpop.f32.mrf.mxu0  ;;  %v3130_v13 = vpop.f32.mrf.mxu1  ;;  %v20087_v52 = vld [vmem:[%s27291_s4 + $0xf0] sm:$0xff]  }
 0x820   :  { %v2964_v16 = vadd.f32 %v2952_v31, %v22744_v0  ;;  %v22839_v17 = vadd.f32 %v3130_v13, %v2960_v63  ;;  %v20083_v63 = vld [vmem:[%s27291_s4 + $0xe8] sm:$0xff]   ;;  %v20091_v31 = vld [vmem:[%s27292_s5 + $0x3f4] ss:$8 sps:$4 sm:$0xff]   ;;  %v20089_v13 = vld [vmem:[%s27292_s5 + $0x3f0] ss:$8 sps:$4 sm:$0xff]  }
 0x821   :  { %v2954_v53 = vpop.f32.mrf.mxu0  ;;  %v3132_v39 = vpop.f32.mrf.mxu1 }
 0x822   :  { %v2965_v55 = vadd.f32 %v2954_v53, %v22746_v3  ;;  %v22842_v9 = vadd.f32 %v3132_v39, %v2961_v2  ;;  %v20086_v2 = vld [vmem:[%s27292_s5 + $0x384] ss:$8 sps:$4 sm:$0xff]   ;;  %v20092_v53 = vld [vmem:[%s27292_s5 + $0x3e0] ss:$8 sps:$4 sm:$0xff]   ;;  %v20097_v39 = vld [vmem:[%s27292_s5 + $0x3d4] ss:$8 sps:$4 sm:$0xff]  }
 0x823   :  { %v22844_v57 = vpop.f32.mrf.mxu0  ;;  %v22846_v28 = vpop.f32.mrf.mxu1 }
 0x825   :  { %v3138_v41 = vpop.f32.mrf.mxu1  ;;  %v19657_v60 = vpop.f32.mrf.mxu0 }
 0x826   :  { %v22848_v32 = vadd.f32 %v3138_v41, %v2963_v7  ;;  %v20088_v7 = vld [vmem:[%s27291_s4 + $0xf8] sm:$0xff]   ;;  %v20100_v41 = vld [vmem:[%s27292_s5 + $0x3c4] ss:$8 sps:$4 sm:$0xff]  }
 0x827   :  { %v3140_v26 = vpop.f32.mrf.mxu1  ;;  %v3210_v45 = vpop.f32.mrf.mxu0 }
 0x828   :  { %v22850_v38 = vadd.f32 %v3140_v26, %v2964_v16  ;;  %v20094_v16 = vld [vmem:[%s27292_s5 + $0x3e4] ss:$8 sps:$4 sm:$0xff]   ;;  %v20103_v26 = vld [vmem:[%s27292_s5 + $0x434] ss:$8 sps:$4 sm:$0xff]  }
 0x829   :  { %v3142_v0 = vpop.f32.mrf.mxu1  ;;  %v19658_v34 = vpop.f32.mrf.mxu0 }
 0x82a   :  { %v22852_v37 = vadd.f32 %v3142_v0, %v2965_v55  ;;  %v3226_v10 = vpack.c.bf16 %v19658_v34, %v19657_v60  ;;  %v20095_v55 = vld [vmem:[%s27292_s5 + $0x3d0] ss:$8 sps:$4 sm:$0xff]   ;;  %v20098_v60 = vld [vmem:[%s27292_s5 + $0x3c0] ss:$8 sps:$4 sm:$0xff]  }
 0x82b   :  { %v3213_v29 = vpop.f32.mrf.mxu0 }
 0x82c   :  { %v3225_v3 = vpack.c.bf16 %v3213_v29, %v3210_v45  ;;  %v22934_v45 = vpop.f32.mrf.mxu1 }
 0x82d   :  { %v19665_v20 = vpop.f32.mrf.mxu0 }
 0x82e   :  { %16677 = vmatmul.mubr.msk.bf16.vlgmr.msra.gmra.mxu1 %vm1116_vm1, %v3225_v3 }
 0x82f   :  { %19668 = vmatpush3.bf16.msra.mxu1 %v22160_v36  ;;  %v3398_v49 = vpop.f32.mrf.mxu0  ;;  %3324 = vmatprep.mubr.bf16.mxu1 %v27308_v43 }
 0x830   :  { %19669 = vmatprep.subr.bf16.mxu1 %v22162_v30 }
 0x831   :  { %v19666_v44 = vpop.f32.mrf.mxu0 }
 0x832   :  { %v3414_v61 = vpack.c.bf16 %v19666_v44, %v19665_v20 }
 0x833   :  { %19670 = vmatpush3.bf16.msra.mxu1 %v22162_v30  ;;  %v3401_v21 = vpop.f32.mrf.mxu0 }
 0x834   :  { %v3413_v54 = vpack.c.bf16 %v3401_v21, %v3398_v49  ;;  %19675 = vmatprep.subr.bf16.mxu1 %v22160_v36 }
 0x836   :  { %16678 = vmatmul.mubr.msk.bf16.gmra.mxu1 %vm1116_vm1, %v3226_v10  ;;  %16703 = vmatmul.mubr.msk.bf16.vlgmr.msra.gmra.mxu0 %vm1116_vm1, %v3413_v54 }
 0x837   :  { %3667 = vmatpush1.bf16.msra.mxu0 %v20073_v46  ;;  %3512 = vmatprep.mubr.bf16.mxu0 %v27308_v43 }
 0x838   :  { %3668 = vmatprep.subr.bf16.mxu0 %v20078_v42  ;;  %19671 = vmatprep.mubr.msk.bf16.mxu1 %vm929_vm0, %v20079_v56 }
 0x83b   :  { %3669 = vmatpush1.bf16.msra.mxu0 %v20076_v59 }
 0x83c   :  { %3670 = vmatprep.subr.bf16.mxu0 %v20082_v47 }
 0x83e   :  { %16704 = vmatmul.mubr.msk.bf16.gmra.mxu0 %vm1116_vm1, %v3414_v61  ;;  %19672 = vmatmul.mubr.msk.bf16.vlgmr.msra.gmra.mxu1 %vm929_vm0, %v20083_v63 }
 0x83f   :  { %3671 = vmatpush1.bf16.msra.mxu0 %v20080_v50  ;;  %19676 = vmatpush3.bf16.msra.mxu1 %v22160_v36 }
 0x840   :  { %19677 = vmatprep.subr.bf16.mxu1 %v22162_v30  ;;  %3672 = vmatprep.subr.bf16.mxu0 %v20086_v2 }
 0x841   :  { %19679 = vmatprep.mubr.msk.bf16.mxu1 %vm929_vm0, %v20087_v52  ;;  %3690 = vmatprep.mubr.bf16.mxu0 %v27308_v43 }
 0x843   :  { %3673 = vmatpush1.bf16.msra.mxu0 %v20084_v6  ;;  %19678 = vmatpush3.bf16.msra.mxu1 %v22162_v30 }
 0x844   :  { %19683 = vmatprep.subr.bf16.mxu0 %v22160_v36  ;;  %3854 = vmatprep.subr.bf16.mxu1 %v20091_v31 }
 0x846   :  { %19680 = vmatmul.mubr.msk.bf16.vlgmr.msra.gmra.mxu1 %vm929_vm0, %v20088_v7 }
 0x847   :  { %3878 = vmatprep.mubr.bf16.mxu1 %v27308_v43  ;;  %3855 = vmatpush1.bf16.msra.mxu1 %v20089_v13 }
 0x848   :  { %3856 = vmatprep.subr.bf16.mxu1 %v20094_v16 }
 0x84b   :  { %3857 = vmatpush1.bf16.msra.mxu1 %v20092_v53 }
 0x84c   :  { %3858 = vmatprep.subr.bf16.mxu1 %v20097_v39 }
 0x84f   :  { %3859 = vmatpush1.bf16.msra.mxu1 %v20095_v55 }
 0x850   :  { %3860 = vmatprep.subr.bf16.mxu1 %v20100_v41 }
 0x853   :  { %3861 = vmatpush1.bf16.msra.mxu1 %v20098_v60 }
 0x854   :  { %4042 = vmatprep.subr.bf16.mxu1 %v20103_v26  ;;  %v20101_v26 = vld [vmem:[%s27292_s5 + $0x430] ss:$8 sps:$4 sm:$0xff]  }
 0x8ee   :  { %v3316_v0 = vpop.f32.mrf.mxu1 }
 0x8ef   :  { %v3335_v34 = vadd.f32 %v3316_v0, %v22836_v8 }
 0x8f0   :  { %v3318_v29 = vpop.f32.mrf.mxu1 }
 0x8f1   :  { %v3336_v3 = vadd.f32 %v3318_v29, %v22839_v17  ;;  %v20106_v29 = vld [vmem:[%s27292_s5 + $0x424] ss:$8 sps:$4 sm:$0xff]  }
 0x8f2   :  { %v3320_v20 = vpop.f32.mrf.mxu1 }
 0x8f3   :  { %v3337_v49 = vadd.f32 %v3320_v20, %v22842_v9  ;;  %v20104_v20 = vld [vmem:[%s27292_s5 + $0x420] ss:$8 sps:$4 sm:$0xff]  }
 0x8f4   :  { %v22939_v44 = vpop.f32.mrf.mxu1 }
 0x8f6   :  { %v3326_v21 = vpop.f32.mrf.mxu1  ;;  %v3504_v46 = vpop.f32.mrf.mxu0 }
 0x8f7   :  { %v3339_v10 = vadd.f32 %v3326_v21, %v22848_v32  ;;  %v22942_v54 = vadd.f32 %v3504_v46, %v3335_v34  ;;  %v20111_v46 = vld [vmem:[%s27291_s4 + $0x108] sm:$0xff]  }
 0x8f8   :  { %v3328_v42 = vpop.f32.mrf.mxu1  ;;  %v3506_v56 = vpop.f32.mrf.mxu0 }
 0x8f9   :  { %v3340_v59 = vadd.f32 %v3328_v42, %v22850_v38  ;;  %v22945_v47 = vadd.f32 %v3506_v56, %v3336_v3  ;;  %v20107_v3 = vld [vmem:[%s27291_s4 + $0x100] sm:$0xff]   ;;  %v20115_v56 = vld [vmem:[%s27291_s4 + $0x110] sm:$0xff]  }
 0x8fa   :  { %v3330_v8 = vpop.f32.mrf.mxu1  ;;  %v3508_v61 = vpop.f32.mrf.mxu0  ;;  %v20114_v42 = vld [vmem:[%s27292_s5 + $0x404] ss:$8 sps:$4 sm:$0xff]  }
 0x8fb   :  { %v3341_v17 = vadd.f32 %v3330_v8, %v22852_v37  ;;  %v22948_v63 = vadd.f32 %v3508_v61, %v3337_v49  ;;  %v20110_v49 = vld [vmem:[%s27292_s5 + $0x414] ss:$8 sps:$4 sm:$0xff]  }
 0x8fc   :  { %v22950_v9 = vpop.f32.mrf.mxu1  ;;  %v22952_v50 = vpop.f32.mrf.mxu0  ;;  %v20116_v8 = vld [vmem:[%s27291_s4 + $0x118] sm:$0xff]  }
 0x8fd   :  { %v20119_v61 = vld [vmem:[%s27292_s5 + $0x474] ss:$8 sps:$4 sm:$0xff]  }
 0x8fe   :  { %v3514_v2 = vpop.f32.mrf.mxu0  ;;  %v19673_v32 = vpop.f32.mrf.mxu1 }
 0x8ff   :  { %v22954_v52 = vadd.f32 %v3514_v2, %v3339_v10  ;;  %v20108_v10 = vld [vmem:[%s27292_s5 + $0x410] ss:$8 sps:$4 sm:$0xff]   ;;  %v20122_v2 = vld [vmem:[%s27292_s5 + $0x464] ss:$8 sps:$4 sm:$0xff]  }
 0x900   :  { %v3516_v6 = vpop.f32.mrf.mxu0  ;;  %v3586_v7 = vpop.f32.mrf.mxu1 }
 0x901   :  { %v22956_v31 = vadd.f32 %v3516_v6, %v3340_v59  ;;  %v20112_v59 = vld [vmem:[%s27292_s5 + $0x400] ss:$8 sps:$4 sm:$0xff]   ;;  %v20125_v6 = vld [vmem:[%s27292_s5 + $0x454] ss:$8 sps:$4 sm:$0xff]  }
 0x902   :  { %v3518_v38 = vpop.f32.mrf.mxu0  ;;  %v19674_v13 = vpop.f32.mrf.mxu1 }
 0x903   :  { %v22958_v16 = vadd.f32 %v3518_v38, %v3341_v17  ;;  %v3602_v0 = vpack.c.bf16 %v19674_v13, %v19673_v32  ;;  %v20117_v17 = vld [vmem:[%s27292_s5 + $0x470] ss:$8 sps:$4 sm:$0xff]   ;;  %v20120_v32 = vld [vmem:[%s27292_s5 + $0x460] ss:$8 sps:$4 sm:$0xff]   ;;  %v20128_v38 = vld [vmem:[%s27292_s5 + $0x444] ss:$8 sps:$4 sm:$0xff]  }
 0x904   :  { %v3589_v53 = vpop.f32.mrf.mxu1  ;;  %v20126_v13 = vld [vmem:[%s27292_s5 + $0x440] ss:$8 sps:$4 sm:$0xff]  }
 0x905   :  { %v3601_v37 = vpack.c.bf16 %v3589_v53, %v3586_v7  ;;  %v20123_v7 = vld [vmem:[%s27292_s5 + $0x450] ss:$8 sps:$4 sm:$0xff]   ;;  %v20131_v53 = vld [vmem:[%s27292_s5 + $0x4b4] ss:$8 sps:$4 sm:$0xff]  }
 0x906   :  { %v19681_v39 = vpop.f32.mrf.mxu1 }
 0x907   :  { %16729 = vmatmul.mubr.msk.bf16.vlgmr.msra.gmra.mxu0 %vm1116_vm1, %v3601_v37  ;;  %v23040_v37 = vpop.f32.mrf.mxu0 }
 0x908   :  { %19684 = vmatpush3.bf16.msra.mxu0 %v22160_v36  ;;  %v3774_v55 = vpop.f32.mrf.mxu1  ;;  %3700 = vmatprep.mubr.bf16.mxu0 %v27308_v43 }
 0x909   :  { %19685 = vmatprep.subr.bf16.mxu0 %v22162_v30 }
 0x90a   :  { %v19682_v41 = vpop.f32.mrf.mxu1 }
 0x90b   :  { %v3790_v21 = vpack.c.bf16 %v19682_v41, %v19681_v39 }
 0x90c   :  { %19686 = vmatpush3.bf16.msra.mxu0 %v22162_v30  ;;  %v3777_v60 = vpop.f32.mrf.mxu1 }
 0x90d   :  { %v3789_v34 = vpack.c.bf16 %v3777_v60, %v3774_v55  ;;  %19691 = vmatprep.subr.bf16.mxu0 %v22160_v36 }
 0x90f   :  { %16730 = vmatmul.mubr.msk.bf16.gmra.mxu0 %vm1116_vm1, %v3602_v0  ;;  %16755 = vmatmul.mubr.msk.bf16.vlgmr.msra.gmra.mxu1 %vm1116_vm1, %v3789_v34 }
 0x910   :  { %4043 = vmatpush1.bf16.msra.mxu1 %v20101_v26  ;;  %3888 = vmatprep.mubr.bf16.mxu1 %v27308_v43 }
 0x911   :  { %4044 = vmatprep.subr.bf16.mxu1 %v20106_v29  ;;  %19687 = vmatprep.mubr.msk.bf16.mxu0 %vm929_vm0, %v20107_v3 }
 0x914   :  { %4045 = vmatpush1.bf16.msra.mxu1 %v20104_v20 }
 0x915   :  { %4046 = vmatprep.subr.bf16.mxu1 %v20110_v49 }
 0x917   :  { %16756 = vmatmul.mubr.msk.bf16.gmra.mxu1 %vm1116_vm1, %v3790_v21  ;;  %19688 = vmatmul.mubr.msk.bf16.vlgmr.msra.gmra.mxu0 %vm929_vm0, %v20111_v46 }
 0x918   :  { %4047 = vmatpush1.bf16.msra.mxu1 %v20108_v10  ;;  %19692 = vmatpush3.bf16.msra.mxu0 %v22160_v36 }
 0x919   :  { %19693 = vmatprep.subr.bf16.mxu0 %v22162_v30  ;;  %4048 = vmatprep.subr.bf16.mxu1 %v20114_v42 }
 0x91a   :  { %19695 = vmatprep.mubr.msk.bf16.mxu0 %vm929_vm0, %v20115_v56  ;;  %4066 = vmatprep.mubr.bf16.mxu1 %v27308_v43 }
 0x91c   :  { %4049 = vmatpush1.bf16.msra.mxu1 %v20112_v59  ;;  %19694 = vmatpush3.bf16.msra.mxu0 %v22162_v30 }
 0x91d   :  { %19699 = vmatprep.subr.bf16.mxu1 %v22160_v36  ;;  %4230 = vmatprep.subr.bf16.mxu0 %v20119_v61 }
 0x91f   :  { %19696 = vmatmul.mubr.msk.bf16.vlgmr.msra.gmra.mxu0 %vm929_vm0, %v20116_v8 }
 0x920   :  { %4254 = vmatprep.mubr.bf16.mxu0 %v27308_v43  ;;  %4231 = vmatpush1.bf16.msra.mxu0 %v20117_v17 }
 0x921   :  { %4232 = vmatprep.subr.bf16.mxu0 %v20122_v2 }
 0x924   :  { %4233 = vmatpush1.bf16.msra.mxu0 %v20120_v32 }
 0x925   :  { %4234 = vmatprep.subr.bf16.mxu0 %v20125_v6 }
 0x928   :  { %4235 = vmatpush1.bf16.msra.mxu0 %v20123_v7 }
 0x929   :  { %4236 = vmatprep.subr.bf16.mxu0 %v20128_v38 }
 0x92c   :  { %4237 = vmatpush1.bf16.msra.mxu0 %v20126_v13 }
 0x92d   :  { %4418 = vmatprep.subr.bf16.mxu0 %v20131_v53 }
 0x9c7   :  { %v3692_v39 = vpop.f32.mrf.mxu0 }
 0x9c8   :  { %v3711_v55 = vadd.f32 %v3692_v39, %v22942_v54 }
 0x9c9   :  { %v3694_v41 = vpop.f32.mrf.mxu0 }
 0x9ca   :  { %v3712_v60 = vadd.f32 %v3694_v41, %v22945_v47 }
 0x9cb   :  { %v3696_v26 = vpop.f32.mrf.mxu0 }
 0x9cc   :  { %v3713_v0 = vadd.f32 %v3696_v26, %v22948_v63 }
 0x9cd   :  { %v23045_v34 = vpop.f32.mrf.mxu0 }
 0x9cf   :  { %v3702_v29 = vpop.f32.mrf.mxu0  ;;  %v3880_v3 = vpop.f32.mrf.mxu1 }
 0x9d0   :  { %v3715_v20 = vadd.f32 %v3702_v29, %v22954_v52  ;;  %v23048_v49 = vadd.f32 %v3880_v3, %v3711_v55  ;;  %v20134_v29 = vld [vmem:[%s27292_s5 + $0x4a4] ss:$8 sps:$4 sm:$0xff]  }
 0x9d1   :  { %v3704_v21 = vpop.f32.mrf.mxu0  ;;  %v3882_v46 = vpop.f32.mrf.mxu1  ;;  %v20135_v3 = vld [vmem:[%s27291_s4 + $0x120] sm:$0xff]  }
 0x9d2   :  { %v3716_v10 = vadd.f32 %v3704_v21, %v22956_v31  ;;  %v23051_v42 = vadd.f32 %v3882_v46, %v3712_v60  ;;  %v20129_v60 = vld [vmem:[%s27292_s5 + $0x4b0] ss:$8 sps:$4 sm:$0xff]   ;;  %v20138_v21 = vld [vmem:[%s27292_s5 + $0x494] ss:$8 sps:$4 sm:$0xff]  }
 0x9d3   :  { %v3706_v54 = vpop.f32.mrf.mxu0  ;;  %v3884_v56 = vpop.f32.mrf.mxu1 }
 0x9d4   :  { %v3717_v47 = vadd.f32 %v3706_v54, %v22958_v16  ;;  %v23054_v59 = vadd.f32 %v3884_v56, %v3713_v0  ;;  %v20136_v54 = vld [vmem:[%s27292_s5 + $0x490] ss:$8 sps:$4 sm:$0xff]   ;;  %v20142_v56 = vld [vmem:[%s27292_s5 + $0x484] ss:$8 sps:$4 sm:$0xff]  }
 0x9d5   :  { %v23056_v63 = vpop.f32.mrf.mxu0  ;;  %v23058_v8 = vpop.f32.mrf.mxu1 }
 0x9d7   :  { %v3890_v61 = vpop.f32.mrf.mxu1  ;;  %v19689_v52 = vpop.f32.mrf.mxu0 }
 0x9d8   :  { %v23060_v17 = vadd.f32 %v3890_v61, %v3715_v20  ;;  %v20132_v20 = vld [vmem:[%s27292_s5 + $0x4a0] ss:$8 sps:$4 sm:$0xff]  }
 0x9d9   :  { %v3892_v2 = vpop.f32.mrf.mxu1  ;;  %v3962_v32 = vpop.f32.mrf.mxu0  ;;  %v20140_v61 = vld [vmem:[%s27292_s5 + $0x480] ss:$8 sps:$4 sm:$0xff]  }
 0x9da   :  { %v23062_v6 = vadd.f32 %v3892_v2, %v3716_v10  ;;  %v20139_v10 = vld [vmem:[%s27291_s4 + $0x128] sm:$0xff]   ;;  %v20147_v2 = vld [vmem:[%s27292_s5 + $0x4f4] ss:$8 sps:$4 sm:$0xff]  }
 0x9db   :  { %v3894_v31 = vpop.f32.mrf.mxu1  ;;  %v19690_v7 = vpop.f32.mrf.mxu0 }
 0x9dc   :  { %v23064_v38 = vadd.f32 %v3894_v31, %v3717_v47  ;;  %v3978_v26 = vpack.c.bf16 %v19690_v7, %v19689_v52  ;;  %v20143_v47 = vld [vmem:[%s27291_s4 + $0x130] sm:$0xff]   ;;  %v20144_v52 = vld [vmem:[%s27291_s4 + $0x138] sm:$0xff]   ;;  %v20150_v31 = vld [vmem:[%s27292_s5 + $0x4e4] ss:$8 sps:$4 sm:$0xff]  }
 0x9dd   :  { %v3965_v13 = vpop.f32.mrf.mxu0  ;;  %v20148_v7 = vld [vmem:[%s27292_s5 + $0x4e0] ss:$8 sps:$4 sm:$0xff]  }
 0x9de   :  { %v3977_v16 = vpack.c.bf16 %v3965_v13, %v3962_v32  ;;  %v20145_v32 = vld [vmem:[%s27292_s5 + $0x4f0] ss:$8 sps:$4 sm:$0xff]   ;;  %v20153_v13 = vld [vmem:[%s27292_s5 + $0x4d4] ss:$8 sps:$4 sm:$0xff]  }
 0x9df   :  { %v19697_v53 = vpop.f32.mrf.mxu0 }
 0x9e0   :  { %16781 = vmatmul.mubr.msk.bf16.vlgmr.msra.gmra.mxu1 %vm1116_vm1, %v3977_v16  ;;  %v20151_v16 = vld [vmem:[%s27292_s5 + $0x4d0] ss:$8 sps:$4 sm:$0xff]  }
 0x9e1   :  { %19700 = vmatpush3.bf16.msra.mxu1 %v22160_v36  ;;  %v4150_v39 = vpop.f32.mrf.mxu0  ;;  %4076 = vmatprep.mubr.bf16.mxu1 %v27308_v43 }
 0x9e2   :  { %19701 = vmatprep.subr.bf16.mxu1 %v22162_v30 }
 0x9e3   :  { %v19698_v55 = vpop.f32.mrf.mxu0 }
 0x9e4   :  { %v4166_v46 = vpack.c.bf16 %v19698_v55, %v19697_v53  ;;  %v20156_v53 = vld [vmem:[%s27292_s5 + $0x4c4] ss:$8 sps:$4 sm:$0xff]   ;;  %v20159_v55 = vld [vmem:[%s27292_s5 + $0x534] ss:$8 sps:$4 sm:$0xff]  }
 0x9e5   :  { %19702 = vmatpush3.bf16.msra.mxu1 %v22162_v30  ;;  %v4153_v41 = vpop.f32.mrf.mxu0 }
 0x9e6   :  { %v4165_v0 = vpack.c.bf16 %v4153_v41, %v4150_v39  ;;  %19707 = vmatprep.subr.bf16.mxu1 %v22160_v36  ;;  %v20154_v39 = vld [vmem:[%s27292_s5 + $0x4c0] ss:$8 sps:$4 sm:$0xff]   ;;  %v23146_v41 = vpop.f32.mrf.mxu1 }
 0x9e8   :  { %16782 = vmatmul.mubr.msk.bf16.gmra.mxu1 %vm1116_vm1, %v3978_v26  ;;  %16807 = vmatmul.mubr.msk.bf16.vlgmr.msra.gmra.mxu0 %vm1116_vm1, %v4165_v0 }
 0x9e9   :  { %4419 = vmatpush1.bf16.msra.mxu0 %v20129_v60  ;;  %4264 = vmatprep.mubr.bf16.mxu0 %v27308_v43 }
 0x9ea   :  { %4420 = vmatprep.subr.bf16.mxu0 %v20134_v29  ;;  %19703 = vmatprep.mubr.msk.bf16.mxu1 %vm929_vm0, %v20135_v3 }
 0x9ed   :  { %4421 = vmatpush1.bf16.msra.mxu0 %v20132_v20 }
 0x9ee   :  { %4422 = vmatprep.subr.bf16.mxu0 %v20138_v21 }
 0x9f0   :  { %16808 = vmatmul.mubr.msk.bf16.gmra.mxu0 %vm1116_vm1, %v4166_v46  ;;  %19704 = vmatmul.mubr.msk.bf16.vlgmr.msra.gmra.mxu1 %vm929_vm0, %v20139_v10 }
 0x9f1   :  { %4423 = vmatpush1.bf16.msra.mxu0 %v20136_v54  ;;  %19708 = vmatpush3.bf16.msra.mxu1 %v22160_v36 }
 0x9f2   :  { %19709 = vmatprep.subr.bf16.mxu1 %v22162_v30  ;;  %4424 = vmatprep.subr.bf16.mxu0 %v20142_v56 }
 0x9f3   :  { %19711 = vmatprep.mubr.msk.bf16.mxu1 %vm929_vm0, %v20143_v47  ;;  %4442 = vmatprep.mubr.bf16.mxu0 %v27308_v43 }
 0x9f5   :  { %4425 = vmatpush1.bf16.msra.mxu0 %v20140_v61  ;;  %19710 = vmatpush3.bf16.msra.mxu1 %v22162_v30 }
 0x9f6   :  { %19715 = vmatprep.subr.bf16.mxu0 %v22160_v36  ;;  %4606 = vmatprep.subr.bf16.mxu1 %v20147_v2 }
 0x9f8   :  { %19712 = vmatmul.mubr.msk.bf16.vlgmr.msra.gmra.mxu1 %vm929_vm0, %v20144_v52 }
 0x9f9   :  { %4630 = vmatprep.mubr.bf16.mxu1 %v27308_v43  ;;  %4607 = vmatpush1.bf16.msra.mxu1 %v20145_v32 }
 0x9fa   :  { %4608 = vmatprep.subr.bf16.mxu1 %v20150_v31 }
 0x9fd   :  { %4609 = vmatpush1.bf16.msra.mxu1 %v20148_v7 }
 0x9fe   :  { %4610 = vmatprep.subr.bf16.mxu1 %v20153_v13 }
 0xa01   :  { %4611 = vmatpush1.bf16.msra.mxu1 %v20151_v16 }
 0xa02   :  { %4612 = vmatprep.subr.bf16.mxu1 %v20156_v53 }
 0xa05   :  { %4613 = vmatpush1.bf16.msra.mxu1 %v20154_v39 }
 0xa06   :  { %4794 = vmatprep.subr.bf16.mxu1 %v20159_v55 }
 0xaa0   :  { %v4068_v60 = vpop.f32.mrf.mxu1 }
 0xaa1   :  { %v4087_v26 = vadd.f32 %v4068_v60, %v23048_v49 }
 0xaa2   :  { %v4070_v0 = vpop.f32.mrf.mxu1 }
 0xaa3   :  { %v4088_v29 = vadd.f32 %v4070_v0, %v23051_v42 }
 0xaa4   :  { %v4072_v3 = vpop.f32.mrf.mxu1 }
 0xaa5   :  { %v4089_v20 = vadd.f32 %v4072_v3, %v23054_v59 }
 0xaa6   :  { %v23151_v21 = vpop.f32.mrf.mxu1 }
 0xaa8   :  { %v4078_v46 = vpop.f32.mrf.mxu1  ;;  %v4256_v10 = vpop.f32.mrf.mxu0 }
 0xaa9   :  { %v4091_v54 = vadd.f32 %v4078_v46, %v23060_v17  ;;  %v23154_v56 = vadd.f32 %v4256_v10, %v4087_v26  ;;  %v20157_v10 = vld [vmem:[%s27292_s5 + $0x530] ss:$8 sps:$4 sm:$0xff]  }
 0xaaa   :  { %v4080_v47 = vpop.f32.mrf.mxu1  ;;  %v4258_v61 = vpop.f32.mrf.mxu0 }
 0xaab   :  { %v4092_v52 = vadd.f32 %v4080_v47, %v23062_v6  ;;  %v23157_v2 = vadd.f32 %v4258_v61, %v4088_v29  ;;  %v20162_v61 = vld [vmem:[%s27292_s5 + $0x524] ss:$8 sps:$4 sm:$0xff]  }
 0xaac   :  { %v4082_v49 = vpop.f32.mrf.mxu1  ;;  %v4260_v32 = vpop.f32.mrf.mxu0 }
 0xaad   :  { %v4093_v42 = vadd.f32 %v4082_v49, %v23064_v38  ;;  %v23160_v31 = vadd.f32 %v4260_v32, %v4089_v20  ;;  %v20160_v49 = vld [vmem:[%s27292_s5 + $0x520] ss:$8 sps:$4 sm:$0xff]   ;;  %v20166_v32 = vld [vmem:[%s27292_s5 + $0x514] ss:$8 sps:$4 sm:$0xff]  }
 0xaae   :  { %v23162_v59 = vpop.f32.mrf.mxu1  ;;  %v23164_v7 = vpop.f32.mrf.mxu0 }
 0xab0   :  { %v4266_v13 = vpop.f32.mrf.mxu0  ;;  %v19705_v17 = vpop.f32.mrf.mxu1 }
 0xab1   :  { %v23166_v16 = vadd.f32 %v4266_v13, %v4091_v54  ;;  %v20167_v13 = vld [vmem:[%s27291_s4 + $0x148] sm:$0xff]  }
 0xab2   :  { %v4268_v53 = vpop.f32.mrf.mxu0  ;;  %v4338_v39 = vpop.f32.mrf.mxu1 }
 0xab3   :  { %v23168_v55 = vadd.f32 %v4268_v53, %v4092_v52  ;;  %v20163_v52 = vld [vmem:[%s27291_s4 + $0x140] sm:$0xff]  }
 0xab4   :  { %v4270_v6 = vpop.f32.mrf.mxu0  ;;  %v19706_v60 = vpop.f32.mrf.mxu1  ;;  %v20170_v53 = vld [vmem:[%s27292_s5 + $0x504] ss:$8 sps:$4 sm:$0xff]  }
 0xab5   :  { %v23170_v26 = vadd.f32 %v4270_v6, %v4093_v42  ;;  %v4354_v54 = vpack.c.bf16 %v19706_v60, %v19705_v17  ;;  %v20164_v17 = vld [vmem:[%s27292_s5 + $0x510] ss:$8 sps:$4 sm:$0xff]   ;;  %v20168_v6 = vld [vmem:[%s27292_s5 + $0x500] ss:$8 sps:$4 sm:$0xff]  }
 0xab6   :  { %v4341_v0 = vpop.f32.mrf.mxu1  ;;  %v20172_v60 = vld [vmem:[%s27291_s4 + $0x158] sm:$0xff]  }
 0xab7   :  { %v4353_v38 = vpack.c.bf16 %v4341_v0, %v4338_v39  ;;  %v20171_v39 = vld [vmem:[%s27291_s4 + $0x150] sm:$0xff]  }
 0xab8   :  { %v19713_v29 = vpop.f32.mrf.mxu1  ;;  %v20175_v0 = vld [vmem:[%s27292_s5 + $0x574] ss:$8 sps:$4 sm:$0xff]  }
 0xab9   :  { %16833 = vmatmul.mubr.msk.bf16.vlgmr.msra.gmra.mxu0 %vm1116_vm1, %v4353_v38  ;;  %v20173_v38 = vld [vmem:[%s27292_s5 + $0x570] ss:$8 sps:$4 sm:$0xff]  }
 0xaba   :  { %19716 = vmatpush3.bf16.msra.mxu0 %v22160_v36  ;;  %v4526_v3 = vpop.f32.mrf.mxu1  ;;  %4452 = vmatprep.mubr.bf16.mxu0 %v27308_v43 }
 0xabb   :  { %19717 = vmatprep.subr.bf16.mxu0 %v22162_v30 }
 0xabc   :  { %v19714_v20 = vpop.f32.mrf.mxu1 }
 0xabd   :  { %v4542_v42 = vpack.c.bf16 %v19714_v20, %v19713_v29  ;;  %v20178_v29 = vld [vmem:[%s27292_s5 + $0x564] ss:$8 sps:$4 sm:$0xff]   ;;  %v20181_v20 = vld [vmem:[%s27292_s5 + $0x554] ss:$8 sps:$4 sm:$0xff]  }
 0xabe   :  { %19718 = vmatpush3.bf16.msra.mxu0 %v22162_v30  ;;  %v4529_v46 = vpop.f32.mrf.mxu1 }
 0xabf   :  { %v4541_v47 = vpack.c.bf16 %v4529_v46, %v4526_v3  ;;  %19723 = vmatprep.subr.bf16.mxu0 %v22160_v36  ;;  %v20176_v3 = vld [vmem:[%s27292_s5 + $0x560] ss:$8 sps:$4 sm:$0xff]   ;;  %v20179_v46 = vld [vmem:[%s27292_s5 + $0x550] ss:$8 sps:$4 sm:$0xff]  }
 0xac1   :  { %16834 = vmatmul.mubr.msk.bf16.gmra.mxu0 %vm1116_vm1, %v4354_v54  ;;  %16859 = vmatmul.mubr.msk.bf16.vlgmr.msra.gmra.mxu1 %vm1116_vm1, %v4541_v47  ;;  %v20182_v54 = vld [vmem:[%s27292_s5 + $0x540] ss:$8 sps:$4 sm:$0xff]   ;;  %v20187_v47 = vld [vmem:[%s27292_s5 + $0x5b4] ss:$8 sps:$4 sm:$0xff]  }
 0xac2   :  { %4795 = vmatpush1.bf16.msra.mxu1 %v20157_v10  ;;  %4640 = vmatprep.mubr.bf16.mxu1 %v27308_v43  ;;  %v20184_v10 = vld [vmem:[%s27292_s5 + $0x544] ss:$8 sps:$4 sm:$0xff]  }
 0xac3   :  { %4796 = vmatprep.subr.bf16.mxu1 %v20162_v61  ;;  %19719 = vmatprep.mubr.msk.bf16.mxu0 %vm929_vm0, %v20163_v52  ;;  %v23252_v61 = vpop.f32.mrf.mxu0 }
 0xac6   :  { %4797 = vmatpush1.bf16.msra.mxu1 %v20160_v49 }
 0xac7   :  { %4798 = vmatprep.subr.bf16.mxu1 %v20166_v32 }
 0xac9   :  { %16860 = vmatmul.mubr.msk.bf16.gmra.mxu1 %vm1116_vm1, %v4542_v42  ;;  %19720 = vmatmul.mubr.msk.bf16.vlgmr.msra.gmra.mxu0 %vm929_vm0, %v20167_v13 }
 0xaca   :  { %4799 = vmatpush1.bf16.msra.mxu1 %v20164_v17  ;;  %19724 = vmatpush3.bf16.msra.mxu0 %v22160_v36 }
 0xacb   :  { %19725 = vmatprep.subr.bf16.mxu0 %v22162_v30  ;;  %4800 = vmatprep.subr.bf16.mxu1 %v20170_v53 }
 0xacc   :  { %19727 = vmatprep.mubr.msk.bf16.mxu0 %vm929_vm0, %v20171_v39  ;;  %4818 = vmatprep.mubr.bf16.mxu1 %v27308_v43 }
 0xace   :  { %4801 = vmatpush1.bf16.msra.mxu1 %v20168_v6  ;;  %19726 = vmatpush3.bf16.msra.mxu0 %v22162_v30 }
 0xacf   :  { %19731 = vmatprep.subr.bf16.mxu1 %v22160_v36  ;;  %4982 = vmatprep.subr.bf16.mxu0 %v20175_v0 }
 0xad1   :  { %19728 = vmatmul.mubr.msk.bf16.vlgmr.msra.gmra.mxu0 %vm929_vm0, %v20172_v60 }
 0xad2   :  { %5006 = vmatprep.mubr.bf16.mxu0 %v27308_v43  ;;  %4983 = vmatpush1.bf16.msra.mxu0 %v20173_v38 }
 0xad3   :  { %4984 = vmatprep.subr.bf16.mxu0 %v20178_v29 }
 0xad6   :  { %4985 = vmatpush1.bf16.msra.mxu0 %v20176_v3 }
 0xad7   :  { %4986 = vmatprep.subr.bf16.mxu0 %v20181_v20 }
 0xada   :  { %4987 = vmatpush1.bf16.msra.mxu0 %v20179_v46 }
 0xadb   :  { %4988 = vmatprep.subr.bf16.mxu0 %v20184_v10 }
 0xade   :  { %4989 = vmatpush1.bf16.msra.mxu0 %v20182_v54 }
 0xadf   :  { %5170 = vmatprep.subr.bf16.mxu0 %v20187_v47 }
 0xb79   :  { %v4444_v52 = vpop.f32.mrf.mxu0 }
 0xb7a   :  { %v4463_v49 = vadd.f32 %v4444_v52, %v23154_v56 }
 0xb7b   :  { %v4446_v32 = vpop.f32.mrf.mxu0 }
 0xb7c   :  { %v4464_v42 = vadd.f32 %v4446_v32, %v23157_v2 }
 0xb7d   :  { %v4448_v13 = vpop.f32.mrf.mxu0 }
 0xb7e   :  { %v4465_v17 = vadd.f32 %v4448_v13, %v23160_v31 }
 0xb7f   :  { %v23257_v53 = vpop.f32.mrf.mxu0 }
 0xb81   :  { %v4454_v39 = vpop.f32.mrf.mxu0  ;;  %v4632_v6 = vpop.f32.mrf.mxu1 }
 0xb82   :  { %v4467_v60 = vadd.f32 %v4454_v39, %v23166_v16  ;;  %v23260_v0 = vadd.f32 %v4632_v6, %v4463_v49 }
 0xb83   :  { %v4456_v38 = vpop.f32.mrf.mxu0  ;;  %v4634_v29 = vpop.f32.mrf.mxu1 }
 0xb84   :  { %v4468_v3 = vadd.f32 %v4456_v38, %v23168_v55  ;;  %v23263_v20 = vadd.f32 %v4634_v29, %v4464_v42 }
 0xb85   :  { %v4458_v56 = vpop.f32.mrf.mxu0  ;;  %v4636_v46 = vpop.f32.mrf.mxu1 }
 0xb86   :  { %v4469_v2 = vadd.f32 %v4458_v56, %v23170_v26  ;;  %v23266_v10 = vadd.f32 %v4636_v46, %v4465_v17 }
 0xb87   :  { %v23268_v31 = vpop.f32.mrf.mxu0  ;;  %v23270_v54 = vpop.f32.mrf.mxu1 }
 0xb88   :  { %27316 = vst [vmem:[#allocation5_spill] sm:$0xff] %v23268_v31  ;;  %27317 = vst [vmem:[#allocation6_spill] sm:$0xff] %v23270_v54 }
 0xb89   :  { %v4642_v47 = vpop.f32.mrf.mxu1  ;;  %v19721_v16 = vpop.f32.mrf.mxu0 }
 0xb8a   :  { %v23272_v52 = vadd.f32 %v4642_v47, %v4467_v60  ;;  %v20191_v47 = vld [vmem:[%s27291_s4 + $0x160] sm:$0xff]  }
 0xb8b   :  { %v4644_v49 = vpop.f32.mrf.mxu1  ;;  %v4714_v32 = vpop.f32.mrf.mxu0 }
 0xb8c   :  { %v23274_v13 = vadd.f32 %v4644_v49, %v4468_v3  ;;  %v20185_v3 = vld [vmem:[%s27292_s5 + $0x5b0] ss:$8 sps:$4 sm:$0xff]   ;;  %v20194_v49 = vld [vmem:[%s27292_s5 + $0x594] ss:$8 sps:$4 sm:$0xff]  }
 0xb8d   :  { %v4646_v55 = vpop.f32.mrf.mxu1  ;;  %v19722_v42 = vpop.f32.mrf.mxu0 }
 0xb8e   :  { %v23276_v39 = vadd.f32 %v4646_v55, %v4469_v2  ;;  %v4730_v56 = vpack.c.bf16 %v19722_v42, %v19721_v16  ;;  %v20190_v2 = vld [vmem:[%s27292_s5 + $0x5a4] ss:$8 sps:$4 sm:$0xff]   ;;  %v20188_v16 = vld [vmem:[%s27292_s5 + $0x5a0] ss:$8 sps:$4 sm:$0xff]   ;;  %v20192_v42 = vld [vmem:[%s27292_s5 + $0x590] ss:$8 sps:$4 sm:$0xff]  }
 0xb8f   :  { %v4717_v6 = vpop.f32.mrf.mxu0  ;;  %v20195_v55 = vld [vmem:[%s27291_s4 + $0x168] sm:$0xff]  }
 0xb90   :  { %v4729_v26 = vpack.c.bf16 %v4717_v6, %v4714_v32  ;;  %v20198_v6 = vld [vmem:[%s27292_s5 + $0x584] ss:$8 sps:$4 sm:$0xff]  }
 0xb91   :  { %v19729_v17 = vpop.f32.mrf.mxu0 }
 0xb92   :  { %16885 = vmatmul.mubr.msk.bf16.vlgmr.msra.gmra.mxu1 %vm1116_vm1, %v4729_v26  ;;  %v20199_v26 = vld [vmem:[%s27291_s4 + $0x170] sm:$0xff]  }
 0xb93   :  { %19732 = vmatpush3.bf16.msra.mxu1 %v22160_v36  ;;  %v4902_v38 = vpop.f32.mrf.mxu0  ;;  %4828 = vmatprep.mubr.bf16.mxu1 %v27308_v43 }
 0xb94   :  { %19733 = vmatprep.subr.bf16.mxu1 %v22162_v30 }
 0xb95   :  { %v19730_v60 = vpop.f32.mrf.mxu0 }
 0xb96   :  { %v4918_v32 = vpack.c.bf16 %v19730_v60, %v19729_v17  ;;  %v20196_v17 = vld [vmem:[%s27292_s5 + $0x580] ss:$8 sps:$4 sm:$0xff]   ;;  %v20203_v60 = vld [vmem:[%s27292_s5 + $0x5f4] ss:$8 sps:$4 sm:$0xff]  }
 0xb97   :  { %19734 = vmatpush3.bf16.msra.mxu1 %v22162_v30  ;;  %v4905_v29 = vpop.f32.mrf.mxu0 }
 0xb98   :  { %v4917_v46 = vpack.c.bf16 %v4905_v29, %v4902_v38  ;;  %19739 = vmatprep.subr.bf16.mxu1 %v22160_v36  ;;  %v20200_v38 = vld [vmem:[%s27291_s4 + $0x178] sm:$0xff]  }
 0xb99   :  { %v20201_v29 = vld [vmem:[%s27292_s5 + $0x5f0] ss:$8 sps:$4 sm:$0xff]  }
 0xb9a   :  { %16886 = vmatmul.mubr.msk.bf16.gmra.mxu1 %vm1116_vm1, %v4730_v56  ;;  %16911 = vmatmul.mubr.msk.bf16.vlgmr.msra.gmra.mxu0 %vm1116_vm1, %v4917_v46  ;;  %v20204_v56 = vld [vmem:[%s27292_s5 + $0x5e0] ss:$8 sps:$4 sm:$0xff]   ;;  %v20209_v46 = vld [vmem:[%s27292_s5 + $0x5d4] ss:$8 sps:$4 sm:$0xff]  }
 0xb9b   :  { %5171 = vmatpush1.bf16.msra.mxu0 %v20185_v3  ;;  %5016 = vmatprep.mubr.bf16.mxu0 %v27308_v43  ;;  %v20206_v3 = vld [vmem:[%s27292_s5 + $0x5e4] ss:$8 sps:$4 sm:$0xff]  }
 0xb9c   :  { %5172 = vmatprep.subr.bf16.mxu0 %v20190_v2  ;;  %19735 = vmatprep.mubr.msk.bf16.mxu1 %vm929_vm0, %v20191_v47  ;;  %v20207_v2 = vld [vmem:[%s27292_s5 + $0x5d0] ss:$8 sps:$4 sm:$0xff]   ;;  %v20212_v47 = vld [vmem:[%s27292_s5 + $0x5c4] ss:$8 sps:$4 sm:$0xff]  }
 0xb9f   :  { %5173 = vmatpush1.bf16.msra.mxu0 %v20188_v16  ;;  %v20210_v16 = vld [vmem:[%s27292_s5 + $0x5c0] ss:$8 sps:$4 sm:$0xff]  }
 0xba0   :  { %5174 = vmatprep.subr.bf16.mxu0 %v20194_v49  ;;  %v23355_v49 = vpop.f32.mrf.mxu1 }
 0xba1   :  { %27318 = vst [vmem:[#allocation7_spill] sm:$0xff] %v23355_v49 }
 0xba2   :  { %16912 = vmatmul.mubr.msk.bf16.gmra.mxu0 %vm1116_vm1, %v4918_v32  ;;  %19736 = vmatmul.mubr.msk.bf16.vlgmr.msra.gmra.mxu1 %vm929_vm0, %v20195_v55 }
 0xba3   :  { %5175 = vmatpush1.bf16.msra.mxu0 %v20192_v42  ;;  %19740 = vmatpush3.bf16.msra.mxu1 %v22160_v36 }
 0xba4   :  { %19741 = vmatprep.subr.bf16.mxu1 %v22162_v30  ;;  %5176 = vmatprep.subr.bf16.mxu0 %v20198_v6 }
 0xba5   :  { %19743 = vmatprep.mubr.msk.bf16.mxu1 %vm929_vm0, %v20199_v26  ;;  %5194 = vmatprep.mubr.bf16.mxu0 %v27308_v43 }
 0xba7   :  { %5177 = vmatpush1.bf16.msra.mxu0 %v20196_v17  ;;  %19742 = vmatpush3.bf16.msra.mxu1 %v22162_v30 }
 0xba8   :  { %19747 = vmatprep.subr.bf16.mxu0 %v22160_v36  ;;  %5358 = vmatprep.subr.bf16.mxu1 %v20203_v60 }
 0xbaa   :  { %19744 = vmatmul.mubr.msk.bf16.vlgmr.msra.gmra.mxu1 %vm929_vm0, %v20200_v38 }
 0xbab   :  { %5382 = vmatprep.mubr.bf16.mxu1 %v27308_v43  ;;  %5359 = vmatpush1.bf16.msra.mxu1 %v20201_v29 }
 0xbac   :  { %5360 = vmatprep.subr.bf16.mxu1 %v20206_v3 }
 0xbaf   :  { %5361 = vmatpush1.bf16.msra.mxu1 %v20204_v56 }
 0xbb0   :  { %5362 = vmatprep.subr.bf16.mxu1 %v20209_v46 }
 0xbb3   :  { %5363 = vmatpush1.bf16.msra.mxu1 %v20207_v2 }
 0xbb4   :  { %5364 = vmatprep.subr.bf16.mxu1 %v20212_v47 }
 0xbb7   :  { %5365 = vmatpush1.bf16.msra.mxu1 %v20210_v16 }
 0xc52   :  { %v4820_v32 = vpop.f32.mrf.mxu1 }
 0xc53   :  { %v4839_v55 = vadd.f32 %v4820_v32, %v23260_v0 }
 0xc54   :  { %v4822_v42 = vpop.f32.mrf.mxu1 }
 0xc55   :  { %v4840_v6 = vadd.f32 %v4822_v42, %v23263_v20 }
 0xc56   :  { %v4824_v26 = vpop.f32.mrf.mxu1 }
 0xc57   :  { %v4841_v17 = vadd.f32 %v4824_v26, %v23266_v10 }
 0xc58   :  { %v23360_v38 = vpop.f32.mrf.mxu1 }
 0xc59   :  { %27319 = vst [vmem:[#allocation8_spill] sm:$0xff] %v23360_v38 }
 0xc5a   :  { %v4830_v60 = vpop.f32.mrf.mxu1  ;;  %v5008_v29 = vpop.f32.mrf.mxu0 }
 0xc5b   :  { %v4843_v3 = vadd.f32 %v4830_v60, %v23272_v52  ;;  %v5027_v56 = vadd.f32 %v5008_v29, %v4839_v55 }
 0xc5c   :  { %v4832_v46 = vpop.f32.mrf.mxu1  ;;  %v5010_v2 = vpop.f32.mrf.mxu0 }
 0xc5d   :  { %v4844_v47 = vadd.f32 %v4832_v46, %v23274_v13  ;;  %v5028_v16 = vadd.f32 %v5010_v2, %v4840_v6 }
 0xc5e   :  { %v4834_v43 = vpop.f32.mrf.mxu1  ;;  %v5012_v0 = vpop.f32.mrf.mxu0 }
 0xc5f   :  { %v4845_v32 = vadd.f32 %v4834_v43, %v23276_v39  ;;  %v5029_v20 = vadd.f32 %v5012_v0, %v4841_v17  ;;  %v27320_v39 = vmov 0   ;;  %v20215_v0 = vld [vmem:[%s27292_s5 + $0x630] ss:$8 sps:$4 sm:$0xff]  }
 0xc60   :  { %v23365_v42 = vpop.f32.mrf.mxu1  ;;  %v23367_v10 = vpop.f32.mrf.mxu0 }
 0xc62   :  { %v5018_v26 = vpop.f32.mrf.mxu0  ;;  %v19737_v49 = vpop.f32.mrf.mxu1 }
 0xc63   :  { %v5031_v38 = vadd.f32 %v5018_v26, %v4843_v3  ;;  %v20218_v26 = vld [vmem:[%s27292_s5 + $0x620] ss:$8 sps:$4 sm:$0xff]  }
 0xc64   :  { %v5020_v31 = vpop.f32.mrf.mxu0  ;;  %v5090_v52 = vpop.f32.mrf.mxu1 }
 0xc65   :  { %v5032_v55 = vadd.f32 %v5020_v31, %v4844_v47  ;;  %v20213_v31 = vld [vmem:[%s27291_s4 + $0x180] sm:$0xff]  }
 0xc66   :  { %v5022_v60 = vpop.f32.mrf.mxu0  ;;  %v19738_v29 = vpop.f32.mrf.mxu1 }
 0xc67   :  { %v5033_v54 = vadd.f32 %v5022_v60, %v4845_v32  ;;  %v5106_v2 = vpack.c.bf16 %v19738_v29, %v19737_v49  ;;  %v20217_v49 = vld [vmem:[%s27292_s5 + $0x634] ss:$8 sps:$4 sm:$0xff]   ;;  %v20220_v32 = vld [vmem:[%s27292_s5 + $0x624] ss:$8 sps:$4 sm:$0xff]   ;;  %v20221_v60 = vld [vmem:[%s27292_s5 + $0x610] ss:$8 sps:$4 sm:$0xff]  }
 0xc68   :  { %v5093_v13 = vpop.f32.mrf.mxu1  ;;  %5546 = vmatprep.subr.bf16.mxu1 %v20217_v49  ;;  %v20226_v29 = vld [vmem:[%s27292_s5 + $0x604] ss:$8 sps:$4 sm:$0xff]  }
 0xc69   :  { %v5105_v6 = vpack.c.bf16 %v5093_v13, %v5090_v52  ;;  %v20223_v52 = vld [vmem:[%s27292_s5 + $0x614] ss:$8 sps:$4 sm:$0xff]   ;;  %v20224_v13 = vld [vmem:[%s27292_s5 + $0x600] ss:$8 sps:$4 sm:$0xff]  }
 0xc6a   :  { %v19745_v46 = vpop.f32.mrf.mxu1 }
 0xc6b   :  { %16937 = vmatmul.mubr.msk.bf16.vlgmr.msra.gmra.mxu0 %vm1116_vm1, %v5105_v6  ;;  %v23412_v6 = vpop.f32.mrf.mxu0 }
 0xc6c   :  { %19748 = vmatpush3.bf16.msra.mxu0 %v22160_v36  ;;  %v5278_v43 = vpop.f32.mrf.mxu1  ;;  %5204 = vmatprep.mubr.bf16.mxu0 %v27320_v39 }
 0xc6d   :  { %19749 = vmatprep.subr.bf16.mxu0 %v22162_v30 }
 0xc6e   :  { %v19746_v17 = vpop.f32.mrf.mxu1 }
 0xc6f   :  { %v5294_v36 = vpack.c.bf16 %v19746_v17, %v19745_v46 }
 0xc70   :  { %19750 = vmatpush3.bf16.msra.mxu0 %v22162_v30  ;;  %v5281_v3 = vpop.f32.mrf.mxu1  ;;  %v20214_v30 = vld [vmem:[%s27291_s4 + $0x188] sm:$0xff]  }
 0xc71   :  { %v5293_v47 = vpack.c.bf16 %v5281_v3, %v5278_v43 }
 0xc73   :  { %16938 = vmatmul.mubr.msk.bf16.gmra.mxu0 %vm1116_vm1, %v5106_v2  ;;  %16963 = vmatmul.mubr.msk.bf16.vlgmr.msra.gmra.mxu1 %vm1116_vm1, %v5293_v47 }
 0xc74   :  { %5392 = vmatprep.mubr.bf16.mxu1 %v27320_v39  ;;  %19751 = vmatprep.mubr.msk.bf16.mxu0 %vm929_vm0, %v20213_v31 }
 0xc75   :  { %5547 = vmatpush1.bf16.msra.mxu1 %v20215_v0 }
 0xc76   :  { %5548 = vmatprep.subr.bf16.mxu1 %v20220_v32 }
 0xc79   :  { %5549 = vmatpush1.bf16.msra.mxu1 %v20218_v26 }
 0xc7a   :  { %5550 = vmatprep.subr.bf16.mxu1 %v20223_v52 }
 0xc7b   :  { %16964 = vmatmul.mubr.msk.bf16.gmra.mxu1 %vm1116_vm1, %v5294_v36  ;;  %19752 = vmatmul.mubr.msk.bf16.vlgmr.msra.gmra.mxu0 %vm929_vm0, %v20214_v30 }
 0xc7c   :  { %5570 = vmatprep.mubr.bf16.mxu1 %v27320_v39  ;;  %5667 = vmatprep.mubr.bf16.mxu0 %v27320_v39 }
 0xc7d   :  { %5551 = vmatpush1.bf16.msra.mxu1 %v20221_v60 }
 0xc7e   :  { %5552 = vmatprep.subr.bf16.mxu1 %v20226_v29 }
 0xc81   :  { %5553 = vmatpush1.bf16.msra.mxu1 %v20224_v13 }
 0xd2b   :  { %v5196_v46 = vpop.f32.mrf.mxu0 }
 0xd2c   :  { %v23414_v43 = vadd.f32 %v5196_v46, %v5027_v56 }
 0xd2d   :  { %v5198_v17 = vpop.f32.mrf.mxu0 }
 0xd2e   :  { %v23416_v3 = vadd.f32 %v5198_v17, %v5028_v16 }
 0xd2f   :  { %v5200_v31 = vpop.f32.mrf.mxu0 }
 0xd30   :  { %v23418_v2 = vadd.f32 %v5200_v31, %v5029_v20 }
 0xd31   :  { %v23420_v47 = vpop.f32.mrf.mxu0 }
 0xd33   :  { %v5206_v36 = vpop.f32.mrf.mxu0 }
 0xd34   :  { %v23422_v30 = vadd.f32 %v5206_v36, %v5031_v38  ;;  %v5384_v36 = vpop.f32.mrf.mxu1 }
 0xd35   :  { %v5208_v49 = vpop.f32.mrf.mxu0 }
 0xd36   :  { %v23424_v0 = vadd.f32 %v5208_v49, %v5032_v55  ;;  %v1273_v55 = vadd.f32 %v22404_v62, %v22322_v27 }
 0xd37   :  { %v5210_v32 = vpop.f32.mrf.mxu0 }
 0xd38   :  { %v23426_v26 = vadd.f32 %v5210_v32, %v5033_v54  ;;  %v1263_v54 = vadd.f32 %v22306_v11, %v22314_v35  ;;  %v1462_v17 = vadd.f32 %v22420_v33, %v1273_v55  ;;  %v23446_v35 = vpop.f32.mrf.mxu1 }
 0xd39   :  { %v23428_v52 = vpop.f32.mrf.mxu0 }
 0xd3a   :  { %v1458_v38 = vadd.f32 %v22409_v5, %v1263_v54  ;;  %v1650_v49 = vadd.f32 %v22510_v1, %v1462_v17  ;;  %v27322_v17 = vld [vmem:[#allocation5_spill] sm:$0xff] }
 0xd3b   :  { %v19753_v56 = vpop.f32.mrf.mxu0 }
 0xd3c   :  { %v1646_v46 = vadd.f32 %v22422_v24, %v1458_v38  ;;  %v5388_v24 = vpop.f32.mrf.mxu1  ;;  %v27321_v38 = vld [vmem:[#allocation6_spill] sm:$0xff] }
 0xd3d   :  { %v5466_v60 = vpop.f32.mrf.mxu0 }
 0xd3e   :  { %v1834_v31 = vadd.f32 %v22515_v14, %v1646_v46 }
 0xd3f   :  { %v19754_v16 = vpop.f32.mrf.mxu0 }
 0xd40   :  { %v5482_v20 = vpack.c.bf16 %v19754_v16, %v19753_v56  ;;  %v2022_v32 = vadd.f32 %v22528_v15, %v1834_v31  ;;  %v1838_v56 = vadd.f32 %v22526_v25, %v1650_v49 }
 0xd41   :  { %v5469_v29 = vpop.f32.mrf.mxu0 }
 0xd42   :  { %v5481_v13 = vpack.c.bf16 %v5469_v29, %v5466_v60  ;;  %v2210_v11 = vadd.f32 %v22621_v40, %v2022_v32  ;;  %v2026_v5 = vadd.f32 %v22616_v18, %v1838_v56  ;;  %v5390_v40 = vpop.f32.mrf.mxu1  ;;  %v5601_v29 = vlaneseq  ;;  %v27324_v56 = vld [vmem:[#allocation7_spill] sm:$0xff] }
 0xd43   :  { %v5405_v32 = vadd.f32 %v5388_v24, %v23418_v2 }
 0xd44   :  { %16989 = vmatmul.mubr.msk.bf16.vlgmr.msra.gmra.mxu1 %vm1116_vm1, %v5481_v13  ;;  %v2398_v27 = vadd.f32 %v22634_v23, %v2210_v11  ;;  %v2214_v62 = vadd.f32 %v22632_v22, %v2026_v5  ;;  %v5394_v16 = vpop.f32.mrf.mxu1 }
 0xd45   :  { %5580 = vmatprep.mubr.bf16.mxu1 %v27320_v39 }
 0xd46   :  { %v2586_v33 = vadd.f32 %v22727_v48, %v2398_v27  ;;  %v2402_v14 = vadd.f32 %v22722_v12, %v2214_v62 }
 0xd48   :  { %v2774_v1 = vadd.f32 %v22740_v58, %v2586_v33  ;;  %v2590_v15 = vadd.f32 %v22738_v19, %v2402_v14  ;;  %v5407_v14 = vadd.f32 %v5394_v16, %v23422_v30 }
 0xd4a   :  { %v2962_v25 = vadd.f32 %v22833_v4, %v2774_v1  ;;  %v2778_v60 = vadd.f32 %v22828_v51, %v2590_v15  ;;  %v5396_v4 = vpop.f32.mrf.mxu1 }
 0xd4b   :  { %v5408_v2 = vadd.f32 %v5396_v4, %v23424_v0 }
 0xd4c   :  { %16990 = vmatmul.mubr.msk.bf16.gmra.mxu1 %vm1116_vm1, %v5482_v20  ;;  %v3150_v18 = vadd.f32 %v22846_v28, %v2962_v25  ;;  %v2966_v23 = vadd.f32 %v22844_v57, %v2778_v60  ;;  %v23466_v28 = vshrl.u32 %v5601_v29, 7  ;;  %v5398_v20 = vpop.f32.mrf.mxu1 }
 0xd4d   :  { %5805 = vmatprep.mubr.bf16.mxu1 %v27320_v39  ;;  %v5409_v30 = vadd.f32 %v5398_v20, %v23426_v26 }
 0xd4e   :  { %v3338_v22 = vadd.f32 %v22939_v44, %v3150_v18  ;;  %v3154_v48 = vadd.f32 %v22934_v45, %v2966_v23  ;;  %v5400_v54 = vpop.f32.mrf.mxu1 }
 0xd50   :  { %v3526_v12 = vadd.f32 %v22952_v50, %v3338_v22  ;;  %v3342_v58 = vadd.f32 %v22950_v9, %v3154_v48  ;;  %v23473_v9 = vsub.s32 0, %v23466_v28 }
 0xd52   :  { %v3714_v19 = vadd.f32 %v23045_v34, %v3526_v12  ;;  %v3530_v13 = vadd.f32 %v23040_v37, %v3342_v58 }
 0xd54   :  { %v3902_v51 = vadd.f32 %v23058_v8, %v3714_v19  ;;  %v3718_v57 = vadd.f32 %v23056_v63, %v3530_v13  ;;  %v5599_v8 = vld [vmem:[%s27293_s6] sm:$0x3]  ;;  %v5403_v63 = vadd.f32 %v5384_v36, %v23414_v43 }
 0xd55   :  { %v5604_v46 = vrot.slane %v5599_v8, %v23473_v9 }
 0xd56   :  { %v4090_v44 = vadd.f32 %v23151_v21, %v3902_v51  ;;  %v3906_v45 = vadd.f32 %v23146_v41, %v3718_v57 }
 0xd58   :  { %v4278_v50 = vadd.f32 %v23164_v7, %v4090_v44  ;;  %v4094_v34 = vadd.f32 %v23162_v59, %v3906_v45  ;;  %v27323_v59 = vld [vmem:[#allocation8_spill] sm:$0xff] }
 0xd5a   :  { %v4466_v37 = vadd.f32 %v23257_v53, %v4278_v50  ;;  %v4282_v21 = vadd.f32 %v23252_v61, %v4094_v34 }
 0xd5c   :  { %v4654_v41 = vadd.f32 %v27321_v38, %v4466_v37  ;;  %v4470_v31 = vadd.f32 %v27322_v17, %v4282_v21  ;;  %v16996_v21 = vld [vmem:[%s27294_s7 + $0xc] sm:$0xf]  ;;  %v16992_v38 = vld [vmem:[%s27294_s7 + $0x4] sm:$0xf] }
 0xd5e   :  { %v4842_v49 = vadd.f32 %v27323_v59, %v4654_v41  ;;  %v4658_v11 = vadd.f32 %v27324_v56, %v4470_v31  ;;  %v16994_v41 = vld [vmem:[%s27294_s7 + $0x8] sm:$0xf] }
 0xd60   :  { %v5030_v5 = vadd.f32 %v23367_v10, %v4842_v49  ;;  %v4846_v27 = vadd.f32 %v23365_v42, %v4658_v11  ;;  %v23495_v10 = vsub.s32 1, %v23466_v28  ;;  %v5404_v42 = vadd.f32 %v23446_v35, %v23416_v3 }
 0xd62   :  { %v5218_v62 = vadd.f32 %v23420_v47, %v5030_v5  ;;  %v5034_v15 = vadd.f32 %v23412_v6, %v4846_v27  ;;  %v5608_v29 = vrot.slane %v5599_v8, %v23495_v10  ;;  %v5631_v8 = vld [vmem:[%s27294_s7] sm:$0xf] }
 0xd64   :  { %v5406_v25 = vadd.f32 %v5390_v40, %v5218_v62  ;;  %v5222_v47 = vadd.f32 %v23428_v52, %v5034_v15 }
 0xd66   :  { %v5410_v48 = vadd.f32 %v5400_v54, %v5222_v47  ;;  %v20227_v47 = vld [vmem:[%s27296_s9 + $0x1c8] ss:$12 sps:$4 sm:$0xff]  }
 0xe04   :  { %v5572_v55 = vpop.f32.mrf.mxu1 }
 0xe05   :  { %v5591_v7 = vadd.f32 %v5572_v55, %v5403_v63 }
 0xe06   :  { %v5574_v53 = vpop.f32.mrf.mxu1 }
 0xe07   :  { %v5611_v36 = vadd.f32 %v5604_v46, %v5591_v7  ;;  %v5592_v12 = vadd.f32 %v5574_v53, %v5404_v42  ;;  %v5822_v42 = vld [vmem:[%s27295_s8] sm:$0xf] }
 0xe08   :  { %v5576_v43 = vpop.f32.mrf.mxu1 }
 0xe09   :  { %v5593_v61 = vadd.f32 %v5576_v43, %v5405_v32  ;;  %v5619_v60 = vmax.f32 %v5611_v36, 0.0  ;;  %v5612_v35 = vadd.f32 %v5608_v29, %v5592_v12  ;;  %v20241_v12 = vld [vmem:[%s27296_s9 + $0x184] ss:$12 sps:$4 sm:$0xff]  }
 0xe0a   :  { %v5578_v33 = vpop.f32.mrf.mxu1 }
 0xe0b   :  { %v5613_v1 = vadd.f32 %v5604_v46, %v5593_v61  ;;  %v5594_v6 = vadd.f32 %v5578_v33, %v5406_v25  ;;  %v5620_v37 = vmax.f32 %v5612_v35, 0.0  ;;  %v20253_v35 = vld [vmem:[%s27296_s9 + $0x13c] ss:$12 sps:$4 sm:$0xff]  }
 0xe0c   :  { %v5582_v24 = vpop.f32.mrf.mxu1 }
 0xe0d   :  { %v5621_v18 = vmax.f32 %v5613_v1, 0.0  ;;  %v5595_v23 = vadd.f32 %v5582_v24, %v5407_v14  ;;  %v5614_v13 = vadd.f32 %v5608_v29, %v5594_v6  ;;  %v20234_v6 = vld [vmem:[%s27296_s9 + $0x1b8] ss:$12 sps:$4 sm:$0xff]  }
 0xe0e   :  { %v5584_v22 = vpop.f32.mrf.mxu1 }
 0xe0f   :  { %v5627_v16 = vpack.c.bf16 %v5621_v18, %v5619_v60  ;;  %v5596_v40 = vadd.f32 %v5584_v22, %v5408_v2  ;;  %v5615_v58 = vadd.f32 %v5604_v46, %v5595_v23  ;;  %v5622_v26 = vmax.f32 %v5614_v13, 0.0  ;;  %v20229_v60 = vld [vmem:[%s27296_s9 + $0x1cc] ss:$12 sps:$4 sm:$0xff]   ;;  %v17000_v23 = vld [vmem:[%s27295_s8 + $0x4] sm:$0xf] }
 0xe10   :  { %v5586_v0 = vpop.f32.mrf.mxu1  ;;  %v20230_v22 = vld [vmem:[%s27296_s9 + $0x1d0] ss:$12 sps:$4 sm:$0xff]  }
 0xe11   :  { %v5597_v19 = vadd.f32 %v5586_v0, %v5409_v30  ;;  %v5616_v51 = vadd.f32 %v5608_v29, %v5596_v40  ;;  %v5623_v52 = vmax.f32 %v5615_v58, 0.0  ;;  %v5628_v63 = vpack.c.bf16 %v5622_v26, %v5620_v37  ;;  %v20233_v30 = vld [vmem:[%s27296_s9 + $0x1b4] ss:$12 sps:$4 sm:$0xff]   ;;  %v20237_v40 = vld [vmem:[%s27296_s9 + $0x19c] ss:$12 sps:$4 sm:$0xff]  }
 0xe12   :  { %v5588_v4 = vpop.f32.mrf.mxu1  ;;  %v20238_v0 = vld [vmem:[%s27296_s9 + $0x1a0] ss:$12 sps:$4 sm:$0xff]   ;;  %v20242_v58 = vld [vmem:[%s27296_s9 + $0x188] ss:$12 sps:$4 sm:$0xff]   ;;  %v20246_v13 = vld [vmem:[%s27296_s9 + $0x170] ss:$12 sps:$4 sm:$0xff]  }
 0xe13   :  { %v5617_v57 = vadd.f32 %v5604_v46, %v5597_v19  ;;  %v5598_v3 = vadd.f32 %v5588_v4, %v5410_v48  ;;  %v5624_v20 = vmax.f32 %v5616_v51, 0.0  ;;  %v20235_v48 = vld [vmem:[%s27296_s9 + $0x198] ss:$12 sps:$4 sm:$0xff]   ;;  %v20243_v4 = vld [vmem:[%s27296_s9 + $0x168] ss:$12 sps:$4 sm:$0xff]  }
 0xe14   :  { %v20245_v19 = vld [vmem:[%s27296_s9 + $0x16c] ss:$12 sps:$4 sm:$0xff]   ;;  %v20249_v51 = vld [vmem:[%s27296_s9 + $0x154] ss:$12 sps:$4 sm:$0xff]   ;;  %v20262_v37 = vld [vmem:[%s27296_s9 + $0x230] ss:$12 sps:$4 sm:$0xff]  }
 0xe15   :  { %v5625_v44 = vmax.f32 %v5617_v57, 0.0  ;;  %v5618_v45 = vadd.f32 %v5608_v29, %v5598_v3  ;;  %v20239_v29 = vld [vmem:[%s27296_s9 + $0x180] ss:$12 sps:$4 sm:$0xff]   ;;  %v20247_v57 = vld [vmem:[%s27296_s9 + $0x150] ss:$12 sps:$4 sm:$0xff]  }
 0xe16   :  { %v20250_v3 = vld [vmem:[%s27296_s9 + $0x158] ss:$12 sps:$4 sm:$0xff]   ;;  %v20255_v26 = vld [vmem:[%s27296_s9 + $0x120] ss:$12 sps:$4 sm:$0xff]  }
 0xe17   :  { %v5629_v50 = vpack.c.bf16 %v5625_v44, %v5623_v52  ;;  %v5626_v34 = vmax.f32 %v5618_v45, 0.0  ;;  %v20251_v52 = vld [vmem:[%s27296_s9 + $0x138] ss:$12 sps:$4 sm:$0xff]   ;;  %v20254_v44 = vld [vmem:[%s27296_s9 + $0x140] ss:$12 sps:$4 sm:$0xff]  }
 0xe18   :  { %v20257_v45 = vld [vmem:[%s27296_s9 + $0x124] ss:$12 sps:$4 sm:$0xff]  }
 0xe19   :  { %v5630_v54 = vpack.c.bf16 %v5626_v34, %v5624_v20  ;;  %v20258_v20 = vld [vmem:[%s27296_s9 + $0x128] ss:$12 sps:$4 sm:$0xff]  }
 0xe1a   :  { %v20259_v34 = vld [vmem:[%s27296_s9 + $0x228] ss:$12 sps:$4 sm:$0xff]  }
 0xe1b   :  { %5647 = vmatprep.subr.bf16.mxu0 %v5630_v54  ;;  %5785 = vmatprep.subr.bf16.mxu1 %v5630_v54 }
 0xe1c   :  { %5648 = vmatpush1.bf16.msra.mxu0 %v5629_v50  ;;  %5786 = vmatpush1.bf16.msra.mxu1 %v5629_v50 }
 0xe1d   :  { %5649 = vmatprep.subr.bf16.mxu0 %v5628_v63  ;;  %5787 = vmatprep.subr.bf16.mxu1 %v5628_v63 }
 0xe20   :  { %5650 = vmatpush1.bf16.msra.mxu0 %v5627_v16  ;;  %5788 = vmatpush1.bf16.msra.mxu1 %v5627_v16 }
 0xe21   :  { %5693 = vmatprep.subr.bf16.mxu0 %v5630_v54 }
 0xe23   :  { %16991 = vmatmul.mubr.msk.bf16.vlgmr.msra.gmra.mxu0 %vm929_vm0, %v5631_v8  ;;  %16997 = vmatmul.mubr.msk.bf16.vlgmr.msra.gmra.mxu1 %vm929_vm0, %v16996_v21  ;;  %v20266_v8 = vld [vmem:[%s27296_s9 + $0x218] ss:$12 sps:$4 sm:$0xff]   ;;  %v20269_v21 = vld [vmem:[%s27296_s9 + $0x1fc] ss:$12 sps:$4 sm:$0xff]  }
 0xe24   :  { %5694 = vmatpush1.bf16.msra.mxu0 %v5629_v50  ;;  %5713 = vmatprep.mubr.bf16.mxu0 %v27320_v39 }
 0xe25   :  { %5695 = vmatprep.subr.bf16.mxu0 %v5628_v63  ;;  %5962 = vmatprep.mubr.bf16.mxu1 %v27320_v39 }
 0xe28   :  { %5696 = vmatpush1.bf16.msra.mxu0 %v5627_v16 }
 0xe29   :  { %5739 = vmatprep.subr.bf16.mxu0 %v5630_v54  ;;  %v20265_v54 = vld [vmem:[%s27296_s9 + $0x214] ss:$12 sps:$4 sm:$0xff]  }
 0xe2b   :  { %16993 = vmatmul.mubr.msk.bf16.vlgmr.msra.gmra.mxu0 %vm929_vm0, %v16992_v38  ;;  %v20267_v38 = vld [vmem:[%s27296_s9 + $0x1f8] ss:$12 sps:$4 sm:$0xff]  }
 0xe2c   :  { %5740 = vmatpush1.bf16.msra.mxu0 %v5629_v50  ;;  %5759 = vmatprep.mubr.bf16.mxu0 %v27320_v39  ;;  %v20261_v50 = vld [vmem:[%s27296_s9 + $0x22c] ss:$12 sps:$4 sm:$0xff]  }
 0xe2d   :  { %5741 = vmatprep.subr.bf16.mxu0 %v5628_v63  ;;  %v20263_v63 = vld [vmem:[%s27296_s9 + $0x210] ss:$12 sps:$4 sm:$0xff]  }
 0xe30   :  { %5742 = vmatpush1.bf16.msra.mxu0 %v5627_v16  ;;  %v20231_v16 = vld [vmem:[%s27296_s9 + $0x1b0] ss:$12 sps:$4 sm:$0xff]  }
 0xe33   :  { %16995 = vmatmul.mubr.msk.bf16.vlgmr.msra.gmra.mxu0 %vm929_vm0, %v16994_v41  ;;  %v20270_v41 = vld [vmem:[%s27296_s9 + $0x200] ss:$12 sps:$4 sm:$0xff]  }
 0xe34   :  { %5866 = vmatprep.mubr.bf16.mxu0 %v27320_v39 }
 0xee3   :  { %v5669_v55 = vpop.f32.mrf.mxu0  ;;  %v5807_v7 = vpop.f32.mrf.mxu1 }
 0xee5   :  { %v5671_v46 = vpop.f32.mrf.mxu0  ;;  %v5809_v17 = vpop.f32.mrf.mxu1 }
 0xee7   :  { %v5673_v31 = vpop.f32.mrf.mxu0  ;;  %v5811_v59 = vpop.f32.mrf.mxu1 }
 0xee9   :  { %v5674_v49 = vpop.f32.mrf.mxu0  ;;  %v5812_v53 = vpop.f32.mrf.mxu1 }
 0xeeb   :  { %v5715_v32 = vpop.f32.mrf.mxu0 }
 0xeec   :  { %v5814_v36 = vmax.f32 %v5669_v55, %v5715_v32  ;;  %v20273_v55 = vld [vmem:[%s27296_s9 + $0x1e4] ss:$12 sps:$4 sm:$0xff]  }
 0xeed   :  { %v5717_v56 = vpop.f32.mrf.mxu0 }
 0xeee   :  { %v5815_v62 = vmax.f32 %v5671_v46, %v5717_v56  ;;  %v20274_v46 = vld [vmem:[%s27296_s9 + $0x1e8] ss:$12 sps:$4 sm:$0xff]  }
 0xeef   :  { %v5719_v11 = vpop.f32.mrf.mxu0  ;;  %v20275_v56 = vld [vmem:[%s27296_s9 + $0xa8] ss:$12 sps:$4 sm:$0xff]  }
 0xef0   :  { %v20278_v11 = vld [vmem:[%s27296_s9 + $0xb0] ss:$12 sps:$4 sm:$0xff]  }
 0xef1   :  { %v5720_v5 = vpop.f32.mrf.mxu0 }
 0xef3   :  { %v5761_v43 = vpop.f32.mrf.mxu0 }
 0xef4   :  { %v5816_v61 = vmax.f32 %v5761_v43, %v5807_v7  ;;  %v20271_v7 = vld [vmem:[%s27296_s9 + $0x1e0] ss:$12 sps:$4 sm:$0xff]  }
 0xef5   :  { %v5763_v27 = vpop.f32.mrf.mxu0  ;;  %v20281_v43 = vld [vmem:[%s27296_s9 + $0x94] ss:$12 sps:$4 sm:$0xff]  }
 0xef6   :  { %v5818_v33 = vmax.f32 %v5814_v36, %v5816_v61  ;;  %v5817_v14 = vmax.f32 %v5763_v27, %v5809_v17  ;;  %v20277_v17 = vld [vmem:[%s27296_s9 + $0xac] ss:$12 sps:$4 sm:$0xff]  }
 0xef7   :  { %v5765_v1 = vpop.f32.mrf.mxu0 }
 0xef8   :  { %v5820_v15 = vpack.c.bf16 %v5818_v33, %v5818_v33  ;;  %v5819_v25 = vmax.f32 %v5815_v62, %v5817_v14  ;;  %v20279_v14 = vld [vmem:[%s27296_s9 + $0x90] ss:$12 sps:$4 sm:$0xff]   ;;  %v20282_v1 = vld [vmem:[%s27296_s9 + $0x98] ss:$12 sps:$4 sm:$0xff]  }
 0xef9   :  { %v5766_v2 = vpop.f32.mrf.mxu0 }
 0xefa   :  { %v23522_v24 = vpack.c.bf16 %v5819_v25, %v5819_v25  ;;  %v23528_v18 = vsel %vm5827_vm2, %v5820_v15, 0  ;;  %v20285_v15 = vld [vmem:[%s27296_s9 + $0x7c] ss:$12 sps:$4 sm:$0xff]   ;;  %v20283_v25 = vld [vmem:[%s27296_s9 + $0x78] ss:$12 sps:$4 sm:$0xff]  }
 0xefb   :  { %v20286_v2 = vld [vmem:[%s27296_s9 + $0x80] ss:$12 sps:$4 sm:$0xff]  }
 0xefc   :  { %17001 = vmatprep.subr.msk.bf16.mxu1 %vm5827_vm2, %v23522_v24  ;;  %16998 = vmatprep.subr.msk.bf16.mxu0 %vm5827_vm2, %v23522_v24 }
 0xefd   :  { %5945 = vmatpush1.bf16.msra.mxu1 %v23528_v18  ;;  %5849 = vmatpush1.bf16.msra.mxu0 %v23528_v18 }
 0xefe   :  { %6217 = vmatprep.subr.bf16.mxu0 %v20229_v60  ;;  %6258 = vmatprep.subr.bf16.mxu1 %v27320_v39  ;;  %v20289_v60 = vld [vmem:[%s27296_s9 + $0x64] ss:$12 sps:$4 sm:$0xff]  }
 0xf00   :  { %17002 = vmatmul.mubr.msk.bf16.vlgmr.msra.gmra.mxu1 %vm5823_vm3, %v17000_v23  ;;  %16999 = vmatmul.mubr.msk.bf16.vlgmr.msra.gmra.mxu0 %vm5823_vm3, %v5822_v42  ;;  %v20287_v23 = vld [vmem:[%s27296_s9 + $0x60] ss:$12 sps:$4 sm:$0xff]   ;;  %v20290_v42 = vld [vmem:[%s27296_s9 + $0x68] ss:$12 sps:$4 sm:$0xff]  }
 0xf01   :  { %6218 = vmatpush1.bf16.msra.mxu0 %v20227_v47  ;;  %6259 = vmatpush1.bf16.msra.mxu1 %v20230_v22  ;;  %v20293_v47 = vld [vmem:[%s27296_s9 + $0x4c] ss:$12 sps:$4 sm:$0xff]   ;;  %v20291_v22 = vld [vmem:[%s27296_s9 + $0x48] ss:$12 sps:$4 sm:$0xff]  }
 0xf02   :  { %6219 = vmatprep.subr.bf16.mxu0 %v20233_v30  ;;  %6260 = vmatprep.subr.bf16.mxu1 %v27320_v39  ;;  %v20294_v30 = vld [vmem:[%s27296_s9 + $0x50] ss:$12 sps:$4 sm:$0xff]  }
 0xf05   :  { %6220 = vmatpush1.bf16.msra.mxu0 %v20231_v16  ;;  %6261 = vmatpush1.bf16.msra.mxu1 %v20234_v6  ;;  %v20297_v16 = vld [vmem:[%s27296_s9 + $0x34] ss:$12 sps:$4 sm:$0xff]   ;;  %v20295_v6 = vld [vmem:[%s27296_s9 + $0x30] ss:$12 sps:$4 sm:$0xff]  }
 0xf06   :  { %6221 = vmatprep.subr.bf16.mxu0 %v20237_v40  ;;  %6262 = vmatprep.subr.bf16.mxu1 %v27320_v39  ;;  %v20298_v40 = vld [vmem:[%s27296_s9 + $0x38] ss:$12 sps:$4 sm:$0xff]  }
 0xf09   :  { %6222 = vmatpush1.bf16.msra.mxu0 %v20235_v48  ;;  %6263 = vmatpush1.bf16.msra.mxu1 %v20238_v0  ;;  %v20301_v48 = vld [vmem:[%s27296_s9 + $0x1c] ss:$12 sps:$4 sm:$0xff]   ;;  %v20299_v0 = vld [vmem:[%s27296_s9 + $0x18] ss:$12 sps:$4 sm:$0xff]  }
 0xf0a   :  { %6223 = vmatprep.subr.bf16.mxu0 %v20241_v12  ;;  %6264 = vmatprep.subr.bf16.mxu1 %v27320_v39  ;;  %v20302_v12 = vld [vmem:[%s27296_s9 + $0x20] ss:$12 sps:$4 sm:$0xff]  }
 0xf0d   :  { %6224 = vmatpush1.bf16.msra.mxu0 %v20239_v29  ;;  %6265 = vmatpush1.bf16.msra.mxu1 %v20242_v58  ;;  %v20305_v29 = vld [vmem:[%s27296_s9 + $0x4] ss:$12 sps:$4 sm:$0xff]   ;;  %v20303_v58 = vld [vmem:[%s27296_s9] ss:$12 sps:$4 sm:$0xff]  }
 0xf0e   :  { %6225 = vmatprep.subr.bf16.mxu0 %v20245_v19  ;;  %6266 = vmatprep.subr.bf16.mxu1 %v27320_v39  ;;  %v20306_v19 = vld [vmem:[%s27296_s9 + $0x8] ss:$12 sps:$4 sm:$0xff]  }
 0xf11   :  { %6226 = vmatpush1.bf16.msra.mxu0 %v20243_v4  ;;  %6267 = vmatpush1.bf16.msra.mxu1 %v20246_v13  ;;  %v20309_v4 = vld [vmem:[%s27296_s9 + $0x10c] ss:$12 sps:$4 sm:$0xff]   ;;  %v20307_v13 = vld [vmem:[%s27296_s9 + $0x108] ss:$12 sps:$4 sm:$0xff]  }
 0xf12   :  { %6227 = vmatprep.subr.bf16.mxu0 %v20249_v51  ;;  %6268 = vmatprep.subr.bf16.mxu1 %v27320_v39  ;;  %v20310_v51 = vld [vmem:[%s27296_s9 + $0x110] ss:$12 sps:$4 sm:$0xff]  }
 0xf15   :  { %6228 = vmatpush1.bf16.msra.mxu0 %v20247_v57  ;;  %6269 = vmatpush1.bf16.msra.mxu1 %v20250_v3  ;;  %v20313_v57 = vld [vmem:[%s27296_s9 + $0xf4] ss:$12 sps:$4 sm:$0xff]   ;;  %v20311_v3 = vld [vmem:[%s27296_s9 + $0xf0] ss:$12 sps:$4 sm:$0xff]  }
 0xf16   :  { %6229 = vmatprep.subr.bf16.mxu0 %v20253_v35  ;;  %6270 = vmatprep.subr.bf16.mxu1 %v27320_v39  ;;  %v20314_v35 = vld [vmem:[%s27296_s9 + $0xf8] ss:$12 sps:$4 sm:$0xff]  }
 0xf19   :  { %6230 = vmatpush1.bf16.msra.mxu0 %v20251_v52  ;;  %6271 = vmatpush1.bf16.msra.mxu1 %v20254_v44  ;;  %v20317_v52 = vld [vmem:[%s27296_s9 + $0xdc] ss:$12 sps:$4 sm:$0xff]   ;;  %v20315_v44 = vld [vmem:[%s27296_s9 + $0xd8] ss:$12 sps:$4 sm:$0xff]  }
 0xf1a   :  { %6231 = vmatprep.subr.bf16.mxu0 %v20257_v45  ;;  %6272 = vmatprep.subr.bf16.mxu1 %v27320_v39  ;;  %v20318_v45 = vld [vmem:[%s27296_s9 + $0xe0] ss:$12 sps:$4 sm:$0xff]  }
 0xf1d   :  { %6232 = vmatpush1.bf16.msra.mxu0 %v20255_v26  ;;  %6273 = vmatpush1.bf16.msra.mxu1 %v20258_v20  ;;  %v20321_v26 = vld [vmem:[%s27296_s9 + $0xc4] ss:$12 sps:$4 sm:$0xff]   ;;  %v20319_v20 = vld [vmem:[%s27296_s9 + $0xc0] ss:$12 sps:$4 sm:$0xff]  }
 0xf1e   :  { %6241 = vmatprep.subr.bf16.mxu0 %v20261_v50  ;;  %6282 = vmatprep.subr.bf16.mxu1 %v27320_v39  ;;  %v20322_v50 = vld [vmem:[%s27296_s9 + $0xc8] ss:$12 sps:$4 sm:$0xff]  }
 0xf21   :  { %6242 = vmatpush2.bf16.msra.mxu0 %v20259_v34  ;;  %6283 = vmatpush2.bf16.msra.mxu1 %v20262_v37  ;;  %v20325_v34 = vld [vmem:[%s27296_s9 + $0x2ec] ss:$12 sps:$4 sm:$0xff]   ;;  %v20323_v37 = vld [vmem:[%s27296_s9 + $0x2e8] ss:$12 sps:$4 sm:$0xff]  }
 0xf22   :  { %6243 = vmatprep.subr.bf16.mxu0 %v20265_v54  ;;  %6284 = vmatprep.subr.bf16.mxu1 %v27320_v39 }
 0xf25   :  { %6244 = vmatpush2.bf16.msra.mxu0 %v20263_v63  ;;  %6285 = vmatpush2.bf16.msra.mxu1 %v20266_v8  ;;  %v20328_v63 = vld [vmem:[%s27296_s9 + $0x2d4] ss:$12 sps:$4 sm:$0xff]   ;;  %v20326_v8 = vld [vmem:[%s27296_s9 + $0x2d0] ss:$12 sps:$4 sm:$0xff]  }
 0xf26   :  { %6245 = vmatprep.subr.bf16.mxu0 %v20269_v21  ;;  %6286 = vmatprep.subr.bf16.mxu1 %v27320_v39  ;;  %v20331_v21 = vld [vmem:[%s27296_s9 + $0x2bc] ss:$12 sps:$4 sm:$0xff]  }
 0xf29   :  { %6246 = vmatpush2.bf16.msra.mxu0 %v20267_v38  ;;  %6287 = vmatpush2.bf16.msra.mxu1 %v20270_v41  ;;  %v17127_v38 = vld [vmem:[%s27295_s8 + $0x8] sm:$0xf]  ;;  %v20329_v41 = vld [vmem:[%s27296_s9 + $0x2b8] ss:$12 sps:$4 sm:$0xff]  }
 0xf2a   :  { %6288 = vmatprep.subr.bf16.mxu1 %v27320_v39  ;;  %6247 = vmatprep.subr.bf16.mxu0 %v20273_v55  ;;  %v20359_v55 = vld [vmem:[%s27296_s9 + $0x2f0] ss:$12 sps:$4 sm:$0xff]  }
 0xf2d   :  { %6248 = vmatpush2.bf16.msra.mxu0 %v20271_v7  ;;  %6289 = vmatpush2.bf16.msra.mxu1 %v20274_v46  ;;  %v20334_v7 = vld [vmem:[%s27296_s9 + $0x2a4] ss:$12 sps:$4 sm:$0xff]   ;;  %v20332_v46 = vld [vmem:[%s27296_s9 + $0x2a0] ss:$12 sps:$4 sm:$0xff]  }
 0xf2e   :  { %6534 = vmatprep.subr.bf16.mxu1 %v27320_v39  ;;  %6493 = vmatprep.subr.bf16.mxu0 %v20277_v17  ;;  %v20360_v17 = vld [vmem:[%s27296_s9 + $0x2d8] ss:$12 sps:$4 sm:$0xff]  }
 0xfc0   :  { %v5964_v31 = vpop.f32.mrf.mxu1  ;;  %v23665_v59 = vpop.f32.mrf.mxu0 }
 0xfc1   :  { %v5971_v5 = vpack.c.bf16 %v5964_v31, %v5964_v31  ;;  %v5875_v54 = vpack.c.bf16 %v23665_v59, %v23665_v59  ;;  %v20337_v31 = vld [vmem:[%s27296_s9 + $0x28c] ss:$12 sps:$4 sm:$0xff]   ;;  %v20335_v59 = vld [vmem:[%s27296_s9 + $0x288] ss:$12 sps:$4 sm:$0xff]  }
 0xfc2   :  { %v5966_v49 = vpop.f32.mrf.mxu1  ;;  %v5870_v53 = vpop.f32.mrf.mxu0 }
 0xfc3   :  { %v5972_v32 = vpack.c.bf16 %v5966_v49, %v5966_v49  ;;  %v5876_v27 = vpack.c.bf16 %v5870_v53, %v5870_v53  ;;  %v20340_v49 = vld [vmem:[%s27296_s9 + $0x274] ss:$12 sps:$4 sm:$0xff]   ;;  %v20338_v53 = vld [vmem:[%s27296_s9 + $0x270] ss:$12 sps:$4 sm:$0xff]  }
 0xfc4   :  { %v5968_v36 = vpop.f32.mrf.mxu1  ;;  %v5872_v61 = vpop.f32.mrf.mxu0 }
 0xfc5   :  { %17087 = vmatprep.mubr.msk.bf16.mxu0 %vm1116_vm1, %v5972_v32  ;;  %17088 = vmatprep.mubr.msk.bf16.mxu1 %vm1116_vm1, %v5972_v32  ;;  %v20343_v32 = vld [vmem:[%s27296_s9 + $0x25c] ss:$12 sps:$4 sm:$0xff]   ;;  %v20344_v61 = vld [vmem:[%s27296_s9 + $0x240] ss:$12 sps:$4 sm:$0xff]  }
 0xfc6   :  { %6250 = vmatmul.mubr.bf16.vlgmr.msra.gmra.mxu0 %v5971_v5  ;;  %6291 = vmatmul.mubr.bf16.vlgmr.msra.gmra.mxu1 %v5971_v5  ;;  %v5969_v62 = vpop.f32.mrf.mxu1  ;;  %v5873_v33 = vpop.f32.mrf.mxu0  ;;  %v20346_v5 = vld [vmem:[%s27296_s9 + $0x244] ss:$12 sps:$4 sm:$0xff]  }
 0xfc7   :  { %6494 = vmatpush1.bf16.msra.mxu0 %v20275_v56  ;;  %6535 = vmatpush1.bf16.msra.mxu1 %v20278_v11  ;;  %v20361_v56 = vld [vmem:[%s27296_s9 + $0x2c0] ss:$12 sps:$4 sm:$0xff]   ;;  %v20341_v11 = vld [vmem:[%s27296_s9 + $0x258] ss:$12 sps:$4 sm:$0xff]   ;;  %v20363_v36 = vld [vmem:[%s27296_s9 + $0x290] ss:$12 sps:$4 sm:$0xff]  }
 0xfc8   :  { %6495 = vmatprep.subr.bf16.mxu0 %v20281_v43  ;;  %6536 = vmatprep.subr.bf16.mxu1 %v27320_v39  ;;  %v20362_v43 = vld [vmem:[%s27296_s9 + $0x2a8] ss:$12 sps:$4 sm:$0xff]   ;;  %v20364_v62 = vld [vmem:[%s27296_s9 + $0x278] ss:$12 sps:$4 sm:$0xff]  }
 0xfc9   :  { %17125 = vmatprep.mubr.msk.bf16.mxu0 %vm1116_vm1, %v5876_v27  ;;  %17126 = vmatprep.mubr.msk.bf16.mxu1 %vm1116_vm1, %v5876_v27  ;;  %v20349_v27 = vld [vmem:[%s27296_s9 + $0x34c] ss:$12 sps:$4 sm:$0xff]   ;;  %v20347_v33 = vld [vmem:[%s27296_s9 + $0x348] ss:$12 sps:$4 sm:$0xff]  }
 0xfcb   :  { %6496 = vmatpush1.bf16.msra.mxu0 %v20279_v14  ;;  %6537 = vmatpush1.bf16.msra.mxu1 %v20282_v1  ;;  %v20352_v14 = vld [vmem:[%s27296_s9 + $0x334] ss:$12 sps:$4 sm:$0xff]  }
 0xfcc   :  { %6497 = vmatprep.subr.bf16.mxu0 %v20285_v15  ;;  %6538 = vmatprep.subr.bf16.mxu1 %v27320_v39  ;;  %v20365_v1 = vld [vmem:[%s27296_s9 + $0x260] ss:$12 sps:$4 sm:$0xff]   ;;  %v20350_v15 = vld [vmem:[%s27296_s9 + $0x330] ss:$12 sps:$4 sm:$0xff]  }
 0xfcf   :  { %6498 = vmatpush1.bf16.msra.mxu0 %v20283_v25  ;;  %6539 = vmatpush1.bf16.msra.mxu1 %v20286_v2  ;;  %v20355_v25 = vld [vmem:[%s27296_s9 + $0x31c] ss:$12 sps:$4 sm:$0xff]  }
 0xfd0   :  { %6499 = vmatprep.subr.bf16.mxu0 %v20289_v60  ;;  %6540 = vmatprep.subr.bf16.mxu1 %v27320_v39  ;;  %v20366_v2 = vld [vmem:[%s27296_s9 + $0x248] ss:$12 sps:$4 sm:$0xff]   ;;  %v20353_v60 = vld [vmem:[%s27296_s9 + $0x318] ss:$12 sps:$4 sm:$0xff]  }
 0xfd3   :  { %6500 = vmatpush1.bf16.msra.mxu0 %v20287_v23  ;;  %6541 = vmatpush1.bf16.msra.mxu1 %v20290_v42  ;;  %v20358_v23 = vld [vmem:[%s27296_s9 + $0x304] ss:$12 sps:$4 sm:$0xff]  }
 0xfd4   :  { %6501 = vmatprep.subr.bf16.mxu0 %v20293_v47  ;;  %6542 = vmatprep.subr.bf16.mxu1 %v27320_v39  ;;  %v20367_v42 = vld [vmem:[%s27296_s9 + $0x350] ss:$12 sps:$4 sm:$0xff]   ;;  %v20356_v47 = vld [vmem:[%s27296_s9 + $0x300] ss:$12 sps:$4 sm:$0xff]  }
 0xfd7   :  { %6502 = vmatpush1.bf16.msra.mxu0 %v20291_v22  ;;  %6543 = vmatpush1.bf16.msra.mxu1 %v20294_v30  ;;  %v20368_v22 = vld [vmem:[%s27296_s9 + $0x338] ss:$12 sps:$4 sm:$0xff]   ;;  %v20369_v30 = vld [vmem:[%s27296_s9 + $0x320] ss:$12 sps:$4 sm:$0xff]  }
 0xfd8   :  { %6503 = vmatprep.subr.bf16.mxu0 %v20297_v16  ;;  %6544 = vmatprep.subr.bf16.mxu1 %v27320_v39  ;;  %v20370_v16 = vld [vmem:[%s27296_s9 + $0x308] ss:$12 sps:$4 sm:$0xff]  }
 0xfdb   :  { %6504 = vmatpush1.bf16.msra.mxu0 %v20295_v6  ;;  %6545 = vmatpush1.bf16.msra.mxu1 %v20298_v40  ;;  %v20373_v6 = vld [vmem:[%s27296_s9 + $0x40c] ss:$12 sps:$4 sm:$0xff]  }
 0xfdc   :  { %6505 = vmatprep.subr.bf16.mxu0 %v20301_v48  ;;  %6546 = vmatprep.subr.bf16.mxu1 %v27320_v39 }
 0xfdf   :  { %6506 = vmatpush1.bf16.msra.mxu0 %v20299_v0  ;;  %6547 = vmatpush1.bf16.msra.mxu1 %v20302_v12 }
 0xfe0   :  { %6507 = vmatprep.subr.bf16.mxu0 %v20305_v29  ;;  %6548 = vmatprep.subr.bf16.mxu1 %v27320_v39 }
 0xfe3   :  { %6508 = vmatpush1.bf16.msra.mxu0 %v20303_v58  ;;  %6549 = vmatpush1.bf16.msra.mxu1 %v20306_v19 }
 0xfe4   :  { %6517 = vmatprep.subr.bf16.mxu0 %v20309_v4  ;;  %6558 = vmatprep.subr.bf16.mxu1 %v27320_v39 }
 0xfe7   :  { %6518 = vmatpush2.bf16.msra.mxu0 %v20307_v13  ;;  %6559 = vmatpush2.bf16.msra.mxu1 %v20310_v51 }
 0xfe8   :  { %6519 = vmatprep.subr.bf16.mxu0 %v20313_v57  ;;  %6560 = vmatprep.subr.bf16.mxu1 %v27320_v39 }
 0xfeb   :  { %6520 = vmatpush2.bf16.msra.mxu0 %v20311_v3  ;;  %6561 = vmatpush2.bf16.msra.mxu1 %v20314_v35 }
 0xfec   :  { %6521 = vmatprep.subr.bf16.mxu0 %v20317_v52  ;;  %6562 = vmatprep.subr.bf16.mxu1 %v27320_v39 }
 0xfef   :  { %6522 = vmatpush2.bf16.msra.mxu0 %v20315_v44  ;;  %6563 = vmatpush2.bf16.msra.mxu1 %v20318_v45 }
 0xff0   :  { %6523 = vmatprep.subr.bf16.mxu0 %v20321_v26  ;;  %6564 = vmatprep.subr.bf16.mxu1 %v27320_v39 }
 0xff3   :  { %6524 = vmatpush2.bf16.msra.mxu0 %v20319_v20  ;;  %6565 = vmatpush2.bf16.msra.mxu1 %v20322_v50 }
 0xff4   :  { %17128 = vmatprep.subr.msk.bf16.mxu0 %vm5827_vm2, %v23522_v24  ;;  %6866 = vmatprep.subr.bf16.mxu1 %v20325_v34 }
 0xff6   :  { %6526 = vmatmul.mubr.bf16.vlgmr.msra.gmra.mxu0 %v5875_v54  ;;  %6567 = vmatmul.mubr.bf16.vlgmr.msra.gmra.mxu1 %v5875_v54 }
 0xff7   :  { %6594 = vmatpush1.bf16.msra.mxu0 %v23528_v18  ;;  %6867 = vmatpush1.bf16.msra.mxu1 %v20323_v37 }
 0xff8   :  { %6868 = vmatprep.subr.bf16.mxu1 %v20328_v63  ;;  %6611 = vmatprep.mubr.bf16.mxu0 %v27320_v39  ;;  %v20371_v63 = vld [vmem:[%s27296_s9 + $0x408] ss:$12 sps:$4 sm:$0xff]  }
 0xff9   :  { %6907 = vmatprep.subr.bf16.mxu0 %v27320_v39 }
 0xffb   :  { %6869 = vmatpush1.bf16.msra.mxu1 %v20326_v8 }
 0xffc   :  { %6870 = vmatprep.subr.bf16.mxu1 %v20331_v21  ;;  %v20376_v21 = vld [vmem:[%s27296_s9 + $0x3f4] ss:$12 sps:$4 sm:$0xff]  }
 0xffe   :  { %17129 = vmatmul.mubr.msk.bf16.vlgmr.msra.gmra.mxu0 %vm5823_vm3, %v17127_v38 }
 0xfff   :  { %6871 = vmatpush1.bf16.msra.mxu1 %v20329_v41  ;;  %6908 = vmatpush1.bf16.msra.mxu0 %v20359_v55  ;;  %v20374_v55 = vld [vmem:[%s27296_s9 + $0x3f0] ss:$12 sps:$4 sm:$0xff]  }
0x1000   :  { %6872 = vmatprep.subr.bf16.mxu1 %v20334_v7  ;;  %6909 = vmatprep.subr.bf16.mxu0 %v27320_v39  ;;  %v20379_v7 = vld [vmem:[%s27296_s9 + $0x3dc] ss:$12 sps:$4 sm:$0xff]  }
0x1003   :  { %6873 = vmatpush1.bf16.msra.mxu1 %v20332_v46  ;;  %6910 = vmatpush1.bf16.msra.mxu0 %v20360_v17  ;;  %v20377_v46 = vld [vmem:[%s27296_s9 + $0x3d8] ss:$12 sps:$4 sm:$0xff]   ;;  %v17216_v17 = vld [vmem:[%s27295_s8 + $0xc] sm:$0xf] }
0x1004   :  { %6874 = vmatprep.subr.bf16.mxu1 %v20337_v31  ;;  %6911 = vmatprep.subr.bf16.mxu0 %v27320_v39  ;;  %v20407_v31 = vld [vmem:[%s27296_s9 + $0x410] ss:$12 sps:$4 sm:$0xff]  }
0x1007   :  { %6875 = vmatpush1.bf16.msra.mxu1 %v20335_v59  ;;  %6912 = vmatpush1.bf16.msra.mxu0 %v20361_v56  ;;  %v20382_v59 = vld [vmem:[%s27296_s9 + $0x3c4] ss:$12 sps:$4 sm:$0xff]   ;;  %v20383_v56 = vld [vmem:[%s27296_s9 + $0x3a8] ss:$12 sps:$4 sm:$0xff]  }
0x1008   :  { %6876 = vmatprep.subr.bf16.mxu1 %v20340_v49  ;;  %6913 = vmatprep.subr.bf16.mxu0 %v27320_v39  ;;  %v20380_v49 = vld [vmem:[%s27296_s9 + $0x3c0] ss:$12 sps:$4 sm:$0xff]  }
0x100b   :  { %6877 = vmatpush1.bf16.msra.mxu1 %v20338_v53  ;;  %6914 = vmatpush1.bf16.msra.mxu0 %v20362_v43  ;;  %v20408_v53 = vld [vmem:[%s27296_s9 + $0x3f8] ss:$12 sps:$4 sm:$0xff]   ;;  %v20386_v43 = vld [vmem:[%s27296_s9 + $0x390] ss:$12 sps:$4 sm:$0xff]  }
0x100c   :  { %6878 = vmatprep.subr.bf16.mxu1 %v20343_v32  ;;  %6915 = vmatprep.subr.bf16.mxu0 %v27320_v39  ;;  %v20385_v32 = vld [vmem:[%s27296_s9 + $0x3ac] ss:$12 sps:$4 sm:$0xff]  }
0x100f   :  { %6879 = vmatpush1.bf16.msra.mxu1 %v20341_v11  ;;  %6916 = vmatpush1.bf16.msra.mxu0 %v20363_v36  ;;  %v20409_v11 = vld [vmem:[%s27296_s9 + $0x3e0] ss:$12 sps:$4 sm:$0xff]   ;;  %v20410_v36 = vld [vmem:[%s27296_s9 + $0x3c8] ss:$12 sps:$4 sm:$0xff]  }
0x1010   :  { %6880 = vmatprep.subr.bf16.mxu1 %v20346_v5  ;;  %6917 = vmatprep.subr.bf16.mxu0 %v27320_v39  ;;  %v20388_v5 = vld [vmem:[%s27296_s9 + $0x394] ss:$12 sps:$4 sm:$0xff]  }
0x1013   :  { %6881 = vmatpush1.bf16.msra.mxu1 %v20344_v61  ;;  %6918 = vmatpush1.bf16.msra.mxu0 %v20364_v62  ;;  %v20391_v61 = vld [vmem:[%s27296_s9 + $0x37c] ss:$12 sps:$4 sm:$0xff]  }
0x1014   :  { %6890 = vmatprep.subr.bf16.mxu1 %v20349_v27  ;;  %6919 = vmatprep.subr.bf16.mxu0 %v27320_v39  ;;  %v20389_v27 = vld [vmem:[%s27296_s9 + $0x378] ss:$12 sps:$4 sm:$0xff]   ;;  %v20411_v62 = vld [vmem:[%s27296_s9 + $0x3b0] ss:$12 sps:$4 sm:$0xff]  }
0x1017   :  { %6891 = vmatpush2.bf16.msra.mxu1 %v20347_v33  ;;  %6920 = vmatpush1.bf16.msra.mxu0 %v20365_v1  ;;  %v20394_v33 = vld [vmem:[%s27296_s9 + $0x364] ss:$12 sps:$4 sm:$0xff]  }
0x1018   :  { %6892 = vmatprep.subr.bf16.mxu1 %v20352_v14  ;;  %6921 = vmatprep.subr.bf16.mxu0 %v27320_v39  ;;  %v20392_v14 = vld [vmem:[%s27296_s9 + $0x360] ss:$12 sps:$4 sm:$0xff]   ;;  %v20412_v1 = vld [vmem:[%s27296_s9 + $0x398] ss:$12 sps:$4 sm:$0xff]  }
0x101b   :  { %6893 = vmatpush2.bf16.msra.mxu1 %v20350_v15  ;;  %6922 = vmatpush1.bf16.msra.mxu0 %v20366_v2  ;;  %v20397_v15 = vld [vmem:[%s27296_s9 + $0x46c] ss:$12 sps:$4 sm:$0xff]  }
0x101c   :  { %6894 = vmatprep.subr.bf16.mxu1 %v20355_v25  ;;  %6931 = vmatprep.subr.bf16.mxu0 %v27320_v39  ;;  %v20395_v25 = vld [vmem:[%s27296_s9 + $0x468] ss:$12 sps:$4 sm:$0xff]   ;;  %v20413_v2 = vld [vmem:[%s27296_s9 + $0x380] ss:$12 sps:$4 sm:$0xff]  }
0x101f   :  { %6895 = vmatpush2.bf16.msra.mxu1 %v20353_v60  ;;  %6932 = vmatpush2.bf16.msra.mxu0 %v20367_v42  ;;  %v20400_v60 = vld [vmem:[%s27296_s9 + $0x454] ss:$12 sps:$4 sm:$0xff]  }
0x1020   :  { %6896 = vmatprep.subr.bf16.mxu1 %v20358_v23  ;;  %6933 = vmatprep.subr.bf16.mxu0 %v27320_v39  ;;  %v20398_v23 = vld [vmem:[%s27296_s9 + $0x450] ss:$12 sps:$4 sm:$0xff]   ;;  %v20414_v42 = vld [vmem:[%s27296_s9 + $0x368] ss:$12 sps:$4 sm:$0xff]  }
0x1023   :  { %6897 = vmatpush2.bf16.msra.mxu1 %v20356_v47  ;;  %6934 = vmatpush2.bf16.msra.mxu0 %v20368_v22  ;;  %v20403_v47 = vld [vmem:[%s27296_s9 + $0x43c] ss:$12 sps:$4 sm:$0xff]   ;;  %v20401_v22 = vld [vmem:[%s27296_s9 + $0x438] ss:$12 sps:$4 sm:$0xff]  }
0x1024   :  { %17217 = vmatprep.subr.msk.bf16.mxu1 %vm5827_vm2, %v23522_v24  ;;  %6935 = vmatprep.subr.bf16.mxu0 %v27320_v39 }
0x1027   :  { %6936 = vmatpush2.bf16.msra.mxu0 %v20369_v30  ;;  %v20415_v30 = vld [vmem:[%s27296_s9 + $0x470] ss:$12 sps:$4 sm:$0xff]  }
0x1028   :  { %6937 = vmatprep.subr.bf16.mxu0 %v27320_v39 }
0x102b   :  { %6938 = vmatpush2.bf16.msra.mxu0 %v20370_v16  ;;  %v20406_v16 = vld [vmem:[%s27296_s9 + $0x424] ss:$12 sps:$4 sm:$0xff]  }
0x102c   :  { %7242 = vmatprep.subr.bf16.mxu0 %v20373_v6  ;;  %v20404_v6 = vld [vmem:[%s27296_s9 + $0x420] ss:$12 sps:$4 sm:$0xff]  }
0x1086   :  { %v6251_v40 = vpop.f32.mrf.mxu0  ;;  %v6292_v48 = vpop.f32.mrf.mxu1 }
0x1088   :  { %v6253_v0 = vpop.f32.mrf.mxu0  ;;  %v6294_v12 = vpop.f32.mrf.mxu1 }
0x1089   :  { %v20421_v12 = vld [vmem:[%s27296_s9 + $0x52c] ss:$12 sps:$4 sm:$0xff]  }
0x108a   :  { %v6255_v29 = vpop.f32.mrf.mxu0  ;;  %v6295_v58 = vpop.f32.mrf.mxu1 }
0x108c   :  { %v6256_v19 = vpop.f32.mrf.mxu0  ;;  %v6296_v4 = vpop.f32.mrf.mxu1 }
0x10b6   :  { %v6527_v13 = vpop.f32.mrf.mxu0  ;;  %v6568_v51 = vpop.f32.mrf.mxu1 }
0x10b7   :  { %v23922_v57 = vadd.f32 %v6527_v13, %v6251_v40  ;;  %v23924_v3 = vadd.f32 %v6568_v51, %v6292_v48  ;;  %v20416_v40 = vld [vmem:[%s27296_s9 + $0x458] ss:$12 sps:$4 sm:$0xff]   ;;  %v20417_v48 = vld [vmem:[%s27296_s9 + $0x440] ss:$12 sps:$4 sm:$0xff]  }
0x10b8   :  { %v6529_v35 = vpop.f32.mrf.mxu0  ;;  %v6570_v52 = vpop.f32.mrf.mxu1 }
0x10b9   :  { %v23926_v44 = vadd.f32 %v6529_v35, %v6253_v0  ;;  %v20418_v0 = vld [vmem:[%s27296_s9 + $0x428] ss:$12 sps:$4 sm:$0xff]  }
0x10ba   :  { %v6531_v45 = vpop.f32.mrf.mxu0  ;;  %v6571_v26 = vpop.f32.mrf.mxu1 }
0x10bc   :  { %v6532_v20 = vpop.f32.mrf.mxu0  ;;  %v6572_v50 = vpop.f32.mrf.mxu1 }
0x10be   :  { %v6613_v34 = vpop.f32.mrf.mxu0 }
0x10bf   :  { %v6620_v8 = vpack.c.bf16 %v6613_v34, %v6613_v34 }
0x10c0   :  { %v6615_v37 = vpop.f32.mrf.mxu0 }
0x10c1   :  { %v6621_v54 = vpack.c.bf16 %v6615_v37, %v6615_v37 }
0x10c2   :  { %v6617_v38 = vpop.f32.mrf.mxu0 }
0x10c3   :  { %17214 = vmatprep.mubr.msk.bf16.mxu1 %vm1116_vm1, %v6621_v54  ;;  %17215 = vmatprep.mubr.msk.bf16.mxu0 %vm1116_vm1, %v6621_v54  ;;  %v20425_v38 = vld [vmem:[%s27296_s9 + $0x4f8] ss:$12 sps:$4 sm:$0xff]  }
0x10c4   :  { %6899 = vmatmul.mubr.bf16.vlgmr.msra.gmra.mxu1 %v6620_v8  ;;  %6940 = vmatmul.mubr.bf16.vlgmr.msra.gmra.mxu0 %v6620_v8  ;;  %v6618_v41 = vpop.f32.mrf.mxu0  ;;  %v20422_v8 = vld [vmem:[%s27296_s9 + $0x510] ss:$12 sps:$4 sm:$0xff]  }
0x10c5   :  { %6970 = vmatpush1.bf16.msra.mxu1 %v23528_v18  ;;  %7243 = vmatpush1.bf16.msra.mxu0 %v20371_v63  ;;  %v17305_v41 = vld [vmem:[%s27295_s8 + $0x10] sm:$0xf] }
0x10c6   :  { %7244 = vmatprep.subr.bf16.mxu0 %v20376_v21  ;;  %6987 = vmatprep.mubr.bf16.mxu1 %v27320_v39  ;;  %v20427_v21 = vld [vmem:[%s27296_s9 + $0x4fc] ss:$12 sps:$4 sm:$0xff]  }
0x10c7   :  { %7283 = vmatprep.subr.bf16.mxu1 %v27320_v39 }
0x10c9   :  { %7245 = vmatpush1.bf16.msra.mxu0 %v20374_v55  ;;  %v20455_v55 = vld [vmem:[%s27296_s9 + $0x530] ss:$12 sps:$4 sm:$0xff]  }
0x10ca   :  { %7246 = vmatprep.subr.bf16.mxu0 %v20379_v7  ;;  %v20430_v7 = vld [vmem:[%s27296_s9 + $0x4e4] ss:$12 sps:$4 sm:$0xff]  }
0x10cc   :  { %17218 = vmatmul.mubr.msk.bf16.vlgmr.msra.gmra.mxu1 %vm5823_vm3, %v17216_v17  ;;  %v20456_v17 = vld [vmem:[%s27296_s9 + $0x518] ss:$12 sps:$4 sm:$0xff]  }
0x10cd   :  { %7247 = vmatpush1.bf16.msra.mxu0 %v20377_v46  ;;  %7284 = vmatpush1.bf16.msra.mxu1 %v20407_v31  ;;  %v20428_v46 = vld [vmem:[%s27296_s9 + $0x4e0] ss:$12 sps:$4 sm:$0xff]  }
0x10ce   :  { %7248 = vmatprep.subr.bf16.mxu0 %v20382_v59  ;;  %7285 = vmatprep.subr.bf16.mxu1 %v27320_v39  ;;  %v20433_v31 = vld [vmem:[%s27296_s9 + $0x4cc] ss:$12 sps:$4 sm:$0xff]   ;;  %v20431_v59 = vld [vmem:[%s27296_s9 + $0x4c8] ss:$12 sps:$4 sm:$0xff]  }
0x10d1   :  { %7249 = vmatpush1.bf16.msra.mxu0 %v20380_v49  ;;  %7286 = vmatpush1.bf16.msra.mxu1 %v20408_v53  ;;  %v20457_v49 = vld [vmem:[%s27296_s9 + $0x500] ss:$12 sps:$4 sm:$0xff]  }
0x10d2   :  { %7250 = vmatprep.subr.bf16.mxu0 %v20385_v32  ;;  %7287 = vmatprep.subr.bf16.mxu1 %v27320_v39  ;;  %v20436_v53 = vld [vmem:[%s27296_s9 + $0x4b4] ss:$12 sps:$4 sm:$0xff]   ;;  %v20434_v32 = vld [vmem:[%s27296_s9 + $0x4b0] ss:$12 sps:$4 sm:$0xff]  }
0x10d5   :  { %7251 = vmatpush1.bf16.msra.mxu0 %v20383_v56  ;;  %7288 = vmatpush1.bf16.msra.mxu1 %v20409_v11  ;;  %v20458_v56 = vld [vmem:[%s27296_s9 + $0x4e8] ss:$12 sps:$4 sm:$0xff]  }
0x10d6   :  { %7252 = vmatprep.subr.bf16.mxu0 %v20388_v5  ;;  %7289 = vmatprep.subr.bf16.mxu1 %v27320_v39  ;;  %v20439_v11 = vld [vmem:[%s27296_s9 + $0x49c] ss:$12 sps:$4 sm:$0xff]   ;;  %v20437_v5 = vld [vmem:[%s27296_s9 + $0x498] ss:$12 sps:$4 sm:$0xff]  }
0x10d9   :  { %7253 = vmatpush1.bf16.msra.mxu0 %v20386_v43  ;;  %7290 = vmatpush1.bf16.msra.mxu1 %v20410_v36  ;;  %v20459_v43 = vld [vmem:[%s27296_s9 + $0x4d0] ss:$12 sps:$4 sm:$0xff]  }
0x10da   :  { %7254 = vmatprep.subr.bf16.mxu0 %v20391_v61  ;;  %7291 = vmatprep.subr.bf16.mxu1 %v27320_v39  ;;  %v20442_v36 = vld [vmem:[%s27296_s9 + $0x484] ss:$12 sps:$4 sm:$0xff]   ;;  %v20440_v61 = vld [vmem:[%s27296_s9 + $0x480] ss:$12 sps:$4 sm:$0xff]  }
0x10dd   :  { %7255 = vmatpush1.bf16.msra.mxu0 %v20389_v27  ;;  %7292 = vmatpush1.bf16.msra.mxu1 %v20411_v62  ;;  %v20460_v27 = vld [vmem:[%s27296_s9 + $0x4b8] ss:$12 sps:$4 sm:$0xff]  }
0x10de   :  { %7256 = vmatprep.subr.bf16.mxu0 %v20394_v33  ;;  %7293 = vmatprep.subr.bf16.mxu1 %v27320_v39  ;;  %v20445_v62 = vld [vmem:[%s27296_s9 + $0x58c] ss:$12 sps:$4 sm:$0xff]   ;;  %v20443_v33 = vld [vmem:[%s27296_s9 + $0x588] ss:$12 sps:$4 sm:$0xff]  }
0x10e1   :  { %7257 = vmatpush1.bf16.msra.mxu0 %v20392_v14  ;;  %7294 = vmatpush1.bf16.msra.mxu1 %v20412_v1  ;;  %v20461_v14 = vld [vmem:[%s27296_s9 + $0x4a0] ss:$12 sps:$4 sm:$0xff]  }
0x10e2   :  { %7266 = vmatprep.subr.bf16.mxu0 %v20397_v15  ;;  %7295 = vmatprep.subr.bf16.mxu1 %v27320_v39  ;;  %v20448_v1 = vld [vmem:[%s27296_s9 + $0x574] ss:$12 sps:$4 sm:$0xff]   ;;  %v20446_v15 = vld [vmem:[%s27296_s9 + $0x570] ss:$12 sps:$4 sm:$0xff]  }
0x10e5   :  { %7267 = vmatpush2.bf16.msra.mxu0 %v20395_v25  ;;  %7296 = vmatpush1.bf16.msra.mxu1 %v20413_v2  ;;  %v20462_v25 = vld [vmem:[%s27296_s9 + $0x488] ss:$12 sps:$4 sm:$0xff]  }
0x10e6   :  { %7268 = vmatprep.subr.bf16.mxu0 %v20400_v60  ;;  %7297 = vmatprep.subr.bf16.mxu1 %v27320_v39  ;;  %v20451_v2 = vld [vmem:[%s27296_s9 + $0x55c] ss:$12 sps:$4 sm:$0xff]   ;;  %v20449_v60 = vld [vmem:[%s27296_s9 + $0x558] ss:$12 sps:$4 sm:$0xff]  }
0x10e9   :  { %7269 = vmatpush2.bf16.msra.mxu0 %v20398_v23  ;;  %7298 = vmatpush1.bf16.msra.mxu1 %v20414_v42  ;;  %v20463_v23 = vld [vmem:[%s27296_s9 + $0x590] ss:$12 sps:$4 sm:$0xff]  }
0x10ea   :  { %7270 = vmatprep.subr.bf16.mxu0 %v20403_v47  ;;  %7307 = vmatprep.subr.bf16.mxu1 %v27320_v39  ;;  %v20454_v42 = vld [vmem:[%s27296_s9 + $0x544] ss:$12 sps:$4 sm:$0xff]   ;;  %v20452_v47 = vld [vmem:[%s27296_s9 + $0x540] ss:$12 sps:$4 sm:$0xff]  }
0x10ed   :  { %7271 = vmatpush2.bf16.msra.mxu0 %v20401_v22  ;;  %7308 = vmatpush2.bf16.msra.mxu1 %v20415_v30  ;;  %v20464_v22 = vld [vmem:[%s27296_s9 + $0x578] ss:$12 sps:$4 sm:$0xff]   ;;  %v20465_v30 = vld [vmem:[%s27296_s9 + $0x560] ss:$12 sps:$4 sm:$0xff]  }
0x10ee   :  { %7272 = vmatprep.subr.bf16.mxu0 %v20406_v16  ;;  %7309 = vmatprep.subr.bf16.mxu1 %v27320_v39  ;;  %v20466_v16 = vld [vmem:[%s27296_s9 + $0x548] ss:$12 sps:$4 sm:$0xff]  }
0x10f1   :  { %7273 = vmatpush2.bf16.msra.mxu0 %v20404_v6  ;;  %7310 = vmatpush2.bf16.msra.mxu1 %v20416_v40  ;;  %v20469_v6 = vld [vmem:[%s27296_s9 + $0x64c] ss:$12 sps:$4 sm:$0xff]  }
0x10f2   :  { %17306 = vmatprep.subr.msk.bf16.mxu0 %vm5827_vm2, %v23522_v24  ;;  %7311 = vmatprep.subr.bf16.mxu1 %v27320_v39 }
0x10f5   :  { %7312 = vmatpush2.bf16.msra.mxu1 %v20417_v48 }
0x10f6   :  { %7313 = vmatprep.subr.bf16.mxu1 %v27320_v39 }
0x10f9   :  { %7314 = vmatpush2.bf16.msra.mxu1 %v20418_v0 }
0x10fa   :  { %7618 = vmatprep.subr.bf16.mxu1 %v20421_v12 }
0x1184   :  { %v6900_v29 = vpop.f32.mrf.mxu1  ;;  %v6941_v58 = vpop.f32.mrf.mxu0 }
0x1185   :  { %v24059_v19 = vadd.f32 %v6900_v29, %v23922_v57  ;;  %v24062_v4 = vadd.f32 %v6941_v58, %v23924_v3  ;;  %v20419_v57 = vld [vmem:[%s27296_s9 + $0x528] ss:$12 sps:$4 sm:$0xff]  }
0x1186   :  { %v6902_v13 = vpop.f32.mrf.mxu1  ;;  %v6943_v51 = vpop.f32.mrf.mxu0  ;;  %v20424_v3 = vld [vmem:[%s27296_s9 + $0x514] ss:$12 sps:$4 sm:$0xff]  }
0x1187   :  { %v24065_v35 = vadd.f32 %v6902_v13, %v23926_v44 }
0x1188   :  { %v6904_v52 = vpop.f32.mrf.mxu1  ;;  %v6944_v45 = vpop.f32.mrf.mxu0 }
0x118a   :  { %v6905_v26 = vpop.f32.mrf.mxu1  ;;  %v6945_v20 = vpop.f32.mrf.mxu0 }
0x118c   :  { %v6989_v50 = vpop.f32.mrf.mxu1 }
0x118d   :  { %v6996_v54 = vpack.c.bf16 %v6989_v50, %v6989_v50 }
0x118e   :  { %v6991_v34 = vpop.f32.mrf.mxu1 }
0x118f   :  { %v6997_v37 = vpack.c.bf16 %v6991_v34, %v6991_v34 }
0x1190   :  { %v6993_v63 = vpop.f32.mrf.mxu1 }
0x1191   :  { %17303 = vmatprep.mubr.msk.bf16.mxu0 %vm1116_vm1, %v6997_v37  ;;  %17304 = vmatprep.mubr.msk.bf16.mxu1 %vm1116_vm1, %v6997_v37  ;;  %v20473_v63 = vld [vmem:[%s27296_s9 + $0x618] ss:$12 sps:$4 sm:$0xff]  }
0x1192   :  { %7275 = vmatmul.mubr.bf16.vlgmr.msra.gmra.mxu0 %v6996_v54  ;;  %7316 = vmatmul.mubr.bf16.vlgmr.msra.gmra.mxu1 %v6996_v54  ;;  %v6994_v44 = vpop.f32.mrf.mxu1  ;;  %v20470_v54 = vld [vmem:[%s27296_s9 + $0x630] ss:$12 sps:$4 sm:$0xff]  }
0x1193   :  { %7346 = vmatpush1.bf16.msra.mxu0 %v23528_v18  ;;  %7619 = vmatpush1.bf16.msra.mxu1 %v20419_v57  ;;  %v17394_v44 = vld [vmem:[%s27295_s8 + $0x14] sm:$0xf] }
0x1194   :  { %7620 = vmatprep.subr.bf16.mxu1 %v20424_v3  ;;  %7363 = vmatprep.mubr.bf16.mxu0 %v27320_v39  ;;  %v20475_v3 = vld [vmem:[%s27296_s9 + $0x61c] ss:$12 sps:$4 sm:$0xff]  }
0x1195   :  { %7659 = vmatprep.subr.bf16.mxu0 %v27320_v39 }
0x1197   :  { %7621 = vmatpush1.bf16.msra.mxu1 %v20422_v8  ;;  %v20503_v8 = vld [vmem:[%s27296_s9 + $0x650] ss:$12 sps:$4 sm:$0xff]  }
0x1198   :  { %7622 = vmatprep.subr.bf16.mxu1 %v20427_v21  ;;  %v20478_v21 = vld [vmem:[%s27296_s9 + $0x604] ss:$12 sps:$4 sm:$0xff]  }
0x119a   :  { %17307 = vmatmul.mubr.msk.bf16.vlgmr.msra.gmra.mxu0 %vm5823_vm3, %v17305_v41  ;;  %v20504_v41 = vld [vmem:[%s27296_s9 + $0x638] ss:$12 sps:$4 sm:$0xff]  }
0x119b   :  { %7623 = vmatpush1.bf16.msra.mxu1 %v20425_v38  ;;  %7660 = vmatpush1.bf16.msra.mxu0 %v20455_v55  ;;  %v20476_v38 = vld [vmem:[%s27296_s9 + $0x600] ss:$12 sps:$4 sm:$0xff]  }
0x119c   :  { %7624 = vmatprep.subr.bf16.mxu1 %v20430_v7  ;;  %7661 = vmatprep.subr.bf16.mxu0 %v27320_v39  ;;  %v20481_v55 = vld [vmem:[%s27296_s9 + $0x5ec] ss:$12 sps:$4 sm:$0xff]   ;;  %v20479_v7 = vld [vmem:[%s27296_s9 + $0x5e8] ss:$12 sps:$4 sm:$0xff]  }
0x119f   :  { %7625 = vmatpush1.bf16.msra.mxu1 %v20428_v46  ;;  %7662 = vmatpush1.bf16.msra.mxu0 %v20456_v17  ;;  %v20505_v46 = vld [vmem:[%s27296_s9 + $0x620] ss:$12 sps:$4 sm:$0xff]  }
0x11a0   :  { %7626 = vmatprep.subr.bf16.mxu1 %v20433_v31  ;;  %7663 = vmatprep.subr.bf16.mxu0 %v27320_v39  ;;  %v20484_v17 = vld [vmem:[%s27296_s9 + $0x5d4] ss:$12 sps:$4 sm:$0xff]   ;;  %v20482_v31 = vld [vmem:[%s27296_s9 + $0x5d0] ss:$12 sps:$4 sm:$0xff]  }
0x11a3   :  { %7627 = vmatpush1.bf16.msra.mxu1 %v20431_v59  ;;  %7664 = vmatpush1.bf16.msra.mxu0 %v20457_v49  ;;  %v20506_v59 = vld [vmem:[%s27296_s9 + $0x608] ss:$12 sps:$4 sm:$0xff]  }
0x11a4   :  { %7628 = vmatprep.subr.bf16.mxu1 %v20436_v53  ;;  %7665 = vmatprep.subr.bf16.mxu0 %v27320_v39  ;;  %v20487_v49 = vld [vmem:[%s27296_s9 + $0x5bc] ss:$12 sps:$4 sm:$0xff]   ;;  %v20485_v53 = vld [vmem:[%s27296_s9 + $0x5b8] ss:$12 sps:$4 sm:$0xff]  }
0x11a7   :  { %7629 = vmatpush1.bf16.msra.mxu1 %v20434_v32  ;;  %7666 = vmatpush1.bf16.msra.mxu0 %v20458_v56  ;;  %v20507_v32 = vld [vmem:[%s27296_s9 + $0x5f0] ss:$12 sps:$4 sm:$0xff]  }
0x11a8   :  { %7630 = vmatprep.subr.bf16.mxu1 %v20439_v11  ;;  %7667 = vmatprep.subr.bf16.mxu0 %v27320_v39  ;;  %v20490_v56 = vld [vmem:[%s27296_s9 + $0x5a4] ss:$12 sps:$4 sm:$0xff]   ;;  %v20488_v11 = vld [vmem:[%s27296_s9 + $0x5a0] ss:$12 sps:$4 sm:$0xff]  }
0x11ab   :  { %7631 = vmatpush1.bf16.msra.mxu1 %v20437_v5  ;;  %7668 = vmatpush1.bf16.msra.mxu0 %v20459_v43  ;;  %v20508_v5 = vld [vmem:[%s27296_s9 + $0x5d8] ss:$12 sps:$4 sm:$0xff]  }
0x11ac   :  { %7632 = vmatprep.subr.bf16.mxu1 %v20442_v36  ;;  %7669 = vmatprep.subr.bf16.mxu0 %v27320_v39  ;;  %v20493_v43 = vld [vmem:[%s27296_s9 + $0x6ac] ss:$12 sps:$4 sm:$0xff]   ;;  %v20491_v36 = vld [vmem:[%s27296_s9 + $0x6a8] ss:$12 sps:$4 sm:$0xff]  }
0x11af   :  { %7633 = vmatpush1.bf16.msra.mxu1 %v20440_v61  ;;  %7670 = vmatpush1.bf16.msra.mxu0 %v20460_v27  ;;  %v20509_v61 = vld [vmem:[%s27296_s9 + $0x5c0] ss:$12 sps:$4 sm:$0xff]  }
0x11b0   :  { %7642 = vmatprep.subr.bf16.mxu1 %v20445_v62  ;;  %7671 = vmatprep.subr.bf16.mxu0 %v27320_v39  ;;  %v20496_v27 = vld [vmem:[%s27296_s9 + $0x694] ss:$12 sps:$4 sm:$0xff]   ;;  %v20494_v62 = vld [vmem:[%s27296_s9 + $0x690] ss:$12 sps:$4 sm:$0xff]  }
0x11b3   :  { %7643 = vmatpush2.bf16.msra.mxu1 %v20443_v33  ;;  %7672 = vmatpush1.bf16.msra.mxu0 %v20461_v14  ;;  %v20510_v33 = vld [vmem:[%s27296_s9 + $0x5a8] ss:$12 sps:$4 sm:$0xff]  }
0x11b4   :  { %7644 = vmatprep.subr.bf16.mxu1 %v20448_v1  ;;  %7673 = vmatprep.subr.bf16.mxu0 %v27320_v39  ;;  %v20499_v14 = vld [vmem:[%s27296_s9 + $0x67c] ss:$12 sps:$4 sm:$0xff]   ;;  %v20497_v1 = vld [vmem:[%s27296_s9 + $0x678] ss:$12 sps:$4 sm:$0xff]  }
0x11b7   :  { %7645 = vmatpush2.bf16.msra.mxu1 %v20446_v15  ;;  %7674 = vmatpush1.bf16.msra.mxu0 %v20462_v25  ;;  %v20511_v15 = vld [vmem:[%s27296_s9 + $0x6b0] ss:$12 sps:$4 sm:$0xff]  }
0x11b8   :  { %7646 = vmatprep.subr.bf16.mxu1 %v20451_v2  ;;  %7683 = vmatprep.subr.bf16.mxu0 %v27320_v39  ;;  %v20502_v25 = vld [vmem:[%s27296_s9 + $0x664] ss:$12 sps:$4 sm:$0xff]   ;;  %v20500_v2 = vld [vmem:[%s27296_s9 + $0x660] ss:$12 sps:$4 sm:$0xff]  }
0x11bb   :  { %7647 = vmatpush2.bf16.msra.mxu1 %v20449_v60  ;;  %7684 = vmatpush2.bf16.msra.mxu0 %v20463_v23  ;;  %v20512_v60 = vld [vmem:[%s27296_s9 + $0x698] ss:$12 sps:$4 sm:$0xff]   ;;  %v20513_v23 = vld [vmem:[%s27296_s9 + $0x680] ss:$12 sps:$4 sm:$0xff]  }
0x11bc   :  { %7648 = vmatprep.subr.bf16.mxu1 %v20454_v42  ;;  %7685 = vmatprep.subr.bf16.mxu0 %v27320_v39  ;;  %v20514_v42 = vld [vmem:[%s27296_s9 + $0x668] ss:$12 sps:$4 sm:$0xff]  }
0x11bf   :  { %7649 = vmatpush2.bf16.msra.mxu1 %v20452_v47  ;;  %7686 = vmatpush2.bf16.msra.mxu0 %v20464_v22  ;;  %v20517_v47 = vld [vmem:[%s27296_s9 + $0x76c] ss:$12 sps:$4 sm:$0xff]  }
0x11c0   :  { %17395 = vmatprep.subr.msk.bf16.mxu1 %vm5827_vm2, %v23522_v24  ;;  %7687 = vmatprep.subr.bf16.mxu0 %v27320_v39 }
0x11c3   :  { %7688 = vmatpush2.bf16.msra.mxu0 %v20465_v30 }
0x11c4   :  { %7689 = vmatprep.subr.bf16.mxu0 %v27320_v39 }
0x11c7   :  { %7690 = vmatpush2.bf16.msra.mxu0 %v20466_v16 }
0x11c8   :  { %7994 = vmatprep.subr.bf16.mxu0 %v20469_v6 }
0x1252   :  { %v7276_v40 = vpop.f32.mrf.mxu0  ;;  %v7317_v48 = vpop.f32.mrf.mxu1 }
0x1253   :  { %v24198_v0 = vadd.f32 %v7276_v40, %v24059_v19  ;;  %v24201_v12 = vadd.f32 %v7317_v48, %v24062_v4  ;;  %v20467_v19 = vld [vmem:[%s27296_s9 + $0x648] ss:$12 sps:$4 sm:$0xff]  }
0x1254   :  { %v7278_v29 = vpop.f32.mrf.mxu0  ;;  %v7319_v58 = vpop.f32.mrf.mxu1  ;;  %v20472_v4 = vld [vmem:[%s27296_s9 + $0x634] ss:$12 sps:$4 sm:$0xff]  }
0x1255   :  { %v24204_v13 = vadd.f32 %v7278_v29, %v24065_v35 }
0x1256   :  { %v7280_v51 = vpop.f32.mrf.mxu0  ;;  %v7320_v52 = vpop.f32.mrf.mxu1 }
0x1258   :  { %v7281_v45 = vpop.f32.mrf.mxu0  ;;  %v7321_v26 = vpop.f32.mrf.mxu1 }
0x125a   :  { %v7365_v20 = vpop.f32.mrf.mxu0 }
0x125b   :  { %v7372_v37 = vpack.c.bf16 %v7365_v20, %v7365_v20 }
0x125c   :  { %v7367_v50 = vpop.f32.mrf.mxu0 }
0x125d   :  { %v7373_v34 = vpack.c.bf16 %v7367_v50, %v7367_v50 }
0x125e   :  { %v7369_v57 = vpop.f32.mrf.mxu0 }
0x125f   :  { %17392 = vmatprep.mubr.msk.bf16.mxu1 %vm1116_vm1, %v7373_v34  ;;  %17393 = vmatprep.mubr.msk.bf16.mxu0 %vm1116_vm1, %v7373_v34  ;;  %v20521_v57 = vld [vmem:[%s27296_s9 + $0x738] ss:$12 sps:$4 sm:$0xff]  }
0x1260   :  { %7651 = vmatmul.mubr.bf16.vlgmr.msra.gmra.mxu1 %v7372_v37  ;;  %7692 = vmatmul.mubr.bf16.vlgmr.msra.gmra.mxu0 %v7372_v37  ;;  %v7370_v35 = vpop.f32.mrf.mxu0  ;;  %v20518_v37 = vld [vmem:[%s27296_s9 + $0x750] ss:$12 sps:$4 sm:$0xff]  }
0x1261   :  { %7722 = vmatpush1.bf16.msra.mxu1 %v23528_v18  ;;  %7995 = vmatpush1.bf16.msra.mxu0 %v20467_v19  ;;  %v17483_v35 = vld [vmem:[%s27295_s8 + $0x18] sm:$0xf] }
0x1262   :  { %7996 = vmatprep.subr.bf16.mxu0 %v20472_v4  ;;  %7739 = vmatprep.mubr.bf16.mxu1 %v27320_v39  ;;  %v20523_v4 = vld [vmem:[%s27296_s9 + $0x73c] ss:$12 sps:$4 sm:$0xff]  }
0x1263   :  { %8035 = vmatprep.subr.bf16.mxu1 %v27320_v39 }
0x1265   :  { %7997 = vmatpush1.bf16.msra.mxu0 %v20470_v54  ;;  %v20551_v54 = vld [vmem:[%s27296_s9 + $0x770] ss:$12 sps:$4 sm:$0xff]  }
0x1266   :  { %7998 = vmatprep.subr.bf16.mxu0 %v20475_v3  ;;  %v20526_v3 = vld [vmem:[%s27296_s9 + $0x724] ss:$12 sps:$4 sm:$0xff]  }
0x1268   :  { %17396 = vmatmul.mubr.msk.bf16.vlgmr.msra.gmra.mxu1 %vm5823_vm3, %v17394_v44  ;;  %v20552_v44 = vld [vmem:[%s27296_s9 + $0x758] ss:$12 sps:$4 sm:$0xff]  }
0x1269   :  { %7999 = vmatpush1.bf16.msra.mxu0 %v20473_v63  ;;  %8036 = vmatpush1.bf16.msra.mxu1 %v20503_v8  ;;  %v20524_v63 = vld [vmem:[%s27296_s9 + $0x720] ss:$12 sps:$4 sm:$0xff]  }
0x126a   :  { %8000 = vmatprep.subr.bf16.mxu0 %v20478_v21  ;;  %8037 = vmatprep.subr.bf16.mxu1 %v27320_v39  ;;  %v20529_v8 = vld [vmem:[%s27296_s9 + $0x70c] ss:$12 sps:$4 sm:$0xff]   ;;  %v20527_v21 = vld [vmem:[%s27296_s9 + $0x708] ss:$12 sps:$4 sm:$0xff]  }
0x126d   :  { %8001 = vmatpush1.bf16.msra.mxu0 %v20476_v38  ;;  %8038 = vmatpush1.bf16.msra.mxu1 %v20504_v41  ;;  %v20553_v38 = vld [vmem:[%s27296_s9 + $0x740] ss:$12 sps:$4 sm:$0xff]  }
0x126e   :  { %8002 = vmatprep.subr.bf16.mxu0 %v20481_v55  ;;  %8039 = vmatprep.subr.bf16.mxu1 %v27320_v39  ;;  %v20532_v41 = vld [vmem:[%s27296_s9 + $0x6f4] ss:$12 sps:$4 sm:$0xff]   ;;  %v20530_v55 = vld [vmem:[%s27296_s9 + $0x6f0] ss:$12 sps:$4 sm:$0xff]  }
0x1271   :  { %8003 = vmatpush1.bf16.msra.mxu0 %v20479_v7  ;;  %8040 = vmatpush1.bf16.msra.mxu1 %v20505_v46  ;;  %v20554_v7 = vld [vmem:[%s27296_s9 + $0x728] ss:$12 sps:$4 sm:$0xff]  }
0x1272   :  { %8004 = vmatprep.subr.bf16.mxu0 %v20484_v17  ;;  %8041 = vmatprep.subr.bf16.mxu1 %v27320_v39  ;;  %v20535_v46 = vld [vmem:[%s27296_s9 + $0x6dc] ss:$12 sps:$4 sm:$0xff]   ;;  %v20533_v17 = vld [vmem:[%s27296_s9 + $0x6d8] ss:$12 sps:$4 sm:$0xff]  }
0x1275   :  { %8005 = vmatpush1.bf16.msra.mxu0 %v20482_v31  ;;  %8042 = vmatpush1.bf16.msra.mxu1 %v20506_v59  ;;  %v20555_v31 = vld [vmem:[%s27296_s9 + $0x710] ss:$12 sps:$4 sm:$0xff]  }
0x1276   :  { %8006 = vmatprep.subr.bf16.mxu0 %v20487_v49  ;;  %8043 = vmatprep.subr.bf16.mxu1 %v27320_v39  ;;  %v20538_v59 = vld [vmem:[%s27296_s9 + $0x6c4] ss:$12 sps:$4 sm:$0xff]   ;;  %v20536_v49 = vld [vmem:[%s27296_s9 + $0x6c0] ss:$12 sps:$4 sm:$0xff]  }
0x1279   :  { %8007 = vmatpush1.bf16.msra.mxu0 %v20485_v53  ;;  %8044 = vmatpush1.bf16.msra.mxu1 %v20507_v32  ;;  %v20556_v53 = vld [vmem:[%s27296_s9 + $0x6f8] ss:$12 sps:$4 sm:$0xff]  }
0x127a   :  { %8008 = vmatprep.subr.bf16.mxu0 %v20490_v56  ;;  %8045 = vmatprep.subr.bf16.mxu1 %v27320_v39  ;;  %v20541_v32 = vld [vmem:[%s27296_s9 + $0x7cc] ss:$12 sps:$4 sm:$0xff]   ;;  %v20539_v56 = vld [vmem:[%s27296_s9 + $0x7c8] ss:$12 sps:$4 sm:$0xff]  }
0x127d   :  { %8009 = vmatpush1.bf16.msra.mxu0 %v20488_v11  ;;  %8046 = vmatpush1.bf16.msra.mxu1 %v20508_v5  ;;  %v20557_v11 = vld [vmem:[%s27296_s9 + $0x6e0] ss:$12 sps:$4 sm:$0xff]  }
0x127e   :  { %8018 = vmatprep.subr.bf16.mxu0 %v20493_v43  ;;  %8047 = vmatprep.subr.bf16.mxu1 %v27320_v39  ;;  %v20544_v5 = vld [vmem:[%s27296_s9 + $0x7b4] ss:$12 sps:$4 sm:$0xff]   ;;  %v20542_v43 = vld [vmem:[%s27296_s9 + $0x7b0] ss:$12 sps:$4 sm:$0xff]  }
0x1281   :  { %8019 = vmatpush2.bf16.msra.mxu0 %v20491_v36  ;;  %8048 = vmatpush1.bf16.msra.mxu1 %v20509_v61  ;;  %v20558_v36 = vld [vmem:[%s27296_s9 + $0x6c8] ss:$12 sps:$4 sm:$0xff]  }
0x1282   :  { %8020 = vmatprep.subr.bf16.mxu0 %v20496_v27  ;;  %8049 = vmatprep.subr.bf16.mxu1 %v27320_v39  ;;  %v20547_v61 = vld [vmem:[%s27296_s9 + $0x79c] ss:$12 sps:$4 sm:$0xff]   ;;  %v20545_v27 = vld [vmem:[%s27296_s9 + $0x798] ss:$12 sps:$4 sm:$0xff]  }
0x1285   :  { %8021 = vmatpush2.bf16.msra.mxu0 %v20494_v62  ;;  %8050 = vmatpush1.bf16.msra.mxu1 %v20510_v33  ;;  %v20559_v62 = vld [vmem:[%s27296_s9 + $0x7d0] ss:$12 sps:$4 sm:$0xff]  }
0x1286   :  { %8022 = vmatprep.subr.bf16.mxu0 %v20499_v14  ;;  %8059 = vmatprep.subr.bf16.mxu1 %v27320_v39  ;;  %v20550_v33 = vld [vmem:[%s27296_s9 + $0x784] ss:$12 sps:$4 sm:$0xff]   ;;  %v20548_v14 = vld [vmem:[%s27296_s9 + $0x780] ss:$12 sps:$4 sm:$0xff]  }
0x1289   :  { %8023 = vmatpush2.bf16.msra.mxu0 %v20497_v1  ;;  %8060 = vmatpush2.bf16.msra.mxu1 %v20511_v15  ;;  %v20560_v1 = vld [vmem:[%s27296_s9 + $0x7b8] ss:$12 sps:$4 sm:$0xff]   ;;  %v20561_v15 = vld [vmem:[%s27296_s9 + $0x7a0] ss:$12 sps:$4 sm:$0xff]  }
0x128a   :  { %8024 = vmatprep.subr.bf16.mxu0 %v20502_v25  ;;  %8061 = vmatprep.subr.bf16.mxu1 %v27320_v39  ;;  %v20562_v25 = vld [vmem:[%s27296_s9 + $0x788] ss:$12 sps:$4 sm:$0xff]  }
0x128d   :  { %8025 = vmatpush2.bf16.msra.mxu0 %v20500_v2  ;;  %8062 = vmatpush2.bf16.msra.mxu1 %v20512_v60  ;;  %v20565_v2 = vld [vmem:[%s27296_s9 + $0x88c] ss:$12 sps:$4 sm:$0xff]  }
0x128e   :  { %17484 = vmatprep.subr.msk.bf16.mxu0 %vm5827_vm2, %v23522_v24  ;;  %8063 = vmatprep.subr.bf16.mxu1 %v27320_v39 }
0x1291   :  { %8064 = vmatpush2.bf16.msra.mxu1 %v20513_v23 }
0x1292   :  { %8065 = vmatprep.subr.bf16.mxu1 %v27320_v39 }
0x1295   :  { %8066 = vmatpush2.bf16.msra.mxu1 %v20514_v42 }
0x1296   :  { %8370 = vmatprep.subr.bf16.mxu1 %v20517_v47 }
0x1320   :  { %v7652_v22 = vpop.f32.mrf.mxu1  ;;  %v7693_v30 = vpop.f32.mrf.mxu0 }
0x1321   :  { %v24337_v16 = vadd.f32 %v7652_v22, %v24198_v0  ;;  %v24340_v6 = vadd.f32 %v7693_v30, %v24201_v12  ;;  %v20515_v0 = vld [vmem:[%s27296_s9 + $0x768] ss:$12 sps:$4 sm:$0xff]  }
0x1322   :  { %v7654_v40 = vpop.f32.mrf.mxu1  ;;  %v7695_v48 = vpop.f32.mrf.mxu0  ;;  %v20520_v12 = vld [vmem:[%s27296_s9 + $0x754] ss:$12 sps:$4 sm:$0xff]  }
0x1323   :  { %v24343_v29 = vadd.f32 %v7654_v40, %v24204_v13 }
0x1324   :  { %v7656_v58 = vpop.f32.mrf.mxu1  ;;  %v7696_v51 = vpop.f32.mrf.mxu0 }
0x1326   :  { %v7657_v52 = vpop.f32.mrf.mxu1  ;;  %v7697_v45 = vpop.f32.mrf.mxu0 }
0x1328   :  { %v7741_v26 = vpop.f32.mrf.mxu1 }
0x1329   :  { %v7748_v34 = vpack.c.bf16 %v7741_v26, %v7741_v26 }
0x132a   :  { %v7743_v20 = vpop.f32.mrf.mxu1 }
0x132b   :  { %v7749_v50 = vpack.c.bf16 %v7743_v20, %v7743_v20 }
0x132c   :  { %v7745_v19 = vpop.f32.mrf.mxu1 }
0x132d   :  { %17481 = vmatprep.mubr.msk.bf16.mxu0 %vm1116_vm1, %v7749_v50  ;;  %17482 = vmatprep.mubr.msk.bf16.mxu1 %vm1116_vm1, %v7749_v50  ;;  %v20569_v19 = vld [vmem:[%s27296_s9 + $0x858] ss:$12 sps:$4 sm:$0xff]  }
0x132e   :  { %8027 = vmatmul.mubr.bf16.vlgmr.msra.gmra.mxu0 %v7748_v34  ;;  %8068 = vmatmul.mubr.bf16.vlgmr.msra.gmra.mxu1 %v7748_v34  ;;  %v7746_v13 = vpop.f32.mrf.mxu1  ;;  %v20566_v34 = vld [vmem:[%s27296_s9 + $0x870] ss:$12 sps:$4 sm:$0xff]  }
0x132f   :  { %8098 = vmatpush1.bf16.msra.mxu0 %v23528_v18  ;;  %8371 = vmatpush1.bf16.msra.mxu1 %v20515_v0  ;;  %v17572_v13 = vld [vmem:[%s27295_s8 + $0x1c] sm:$0xf] }
0x1330   :  { %8372 = vmatprep.subr.bf16.mxu1 %v20520_v12  ;;  %8115 = vmatprep.mubr.bf16.mxu0 %v27320_v39  ;;  %v20571_v12 = vld [vmem:[%s27296_s9 + $0x85c] ss:$12 sps:$4 sm:$0xff]  }
0x1331   :  { %8411 = vmatprep.subr.bf16.mxu0 %v27320_v39 }
0x1333   :  { %8373 = vmatpush1.bf16.msra.mxu1 %v20518_v37  ;;  %v20599_v37 = vld [vmem:[%s27296_s9 + $0x890] ss:$12 sps:$4 sm:$0xff]  }
0x1334   :  { %8374 = vmatprep.subr.bf16.mxu1 %v20523_v4  ;;  %v20574_v4 = vld [vmem:[%s27296_s9 + $0x844] ss:$12 sps:$4 sm:$0xff]  }
0x1336   :  { %17485 = vmatmul.mubr.msk.bf16.vlgmr.msra.gmra.mxu0 %vm5823_vm3, %v17483_v35  ;;  %v20600_v35 = vld [vmem:[%s27296_s9 + $0x878] ss:$12 sps:$4 sm:$0xff]  }
0x1337   :  { %8375 = vmatpush1.bf16.msra.mxu1 %v20521_v57  ;;  %8412 = vmatpush1.bf16.msra.mxu0 %v20551_v54  ;;  %v20572_v57 = vld [vmem:[%s27296_s9 + $0x840] ss:$12 sps:$4 sm:$0xff]  }
0x1338   :  { %8376 = vmatprep.subr.bf16.mxu1 %v20526_v3  ;;  %8413 = vmatprep.subr.bf16.mxu0 %v27320_v39  ;;  %v20577_v54 = vld [vmem:[%s27296_s9 + $0x82c] ss:$12 sps:$4 sm:$0xff]   ;;  %v20575_v3 = vld [vmem:[%s27296_s9 + $0x828] ss:$12 sps:$4 sm:$0xff]  }
0x133b   :  { %8377 = vmatpush1.bf16.msra.mxu1 %v20524_v63  ;;  %8414 = vmatpush1.bf16.msra.mxu0 %v20552_v44  ;;  %v20601_v63 = vld [vmem:[%s27296_s9 + $0x860] ss:$12 sps:$4 sm:$0xff]  }
0x133c   :  { %8378 = vmatprep.subr.bf16.mxu1 %v20529_v8  ;;  %8415 = vmatprep.subr.bf16.mxu0 %v27320_v39  ;;  %v20580_v44 = vld [vmem:[%s27296_s9 + $0x814] ss:$12 sps:$4 sm:$0xff]   ;;  %v20578_v8 = vld [vmem:[%s27296_s9 + $0x810] ss:$12 sps:$4 sm:$0xff]  }
0x133f   :  { %8379 = vmatpush1.bf16.msra.mxu1 %v20527_v21  ;;  %8416 = vmatpush1.bf16.msra.mxu0 %v20553_v38  ;;  %v20602_v21 = vld [vmem:[%s27296_s9 + $0x848] ss:$12 sps:$4 sm:$0xff]  }
0x1340   :  { %8380 = vmatprep.subr.bf16.mxu1 %v20532_v41  ;;  %8417 = vmatprep.subr.bf16.mxu0 %v27320_v39  ;;  %v20583_v38 = vld [vmem:[%s27296_s9 + $0x7fc] ss:$12 sps:$4 sm:$0xff]   ;;  %v20581_v41 = vld [vmem:[%s27296_s9 + $0x7f8] ss:$12 sps:$4 sm:$0xff]  }
0x1343   :  { %8381 = vmatpush1.bf16.msra.mxu1 %v20530_v55  ;;  %8418 = vmatpush1.bf16.msra.mxu0 %v20554_v7  ;;  %v20603_v55 = vld [vmem:[%s27296_s9 + $0x830] ss:$12 sps:$4 sm:$0xff]  }
0x1344   :  { %8382 = vmatprep.subr.bf16.mxu1 %v20535_v46  ;;  %8419 = vmatprep.subr.bf16.mxu0 %v27320_v39  ;;  %v20586_v7 = vld [vmem:[%s27296_s9 + $0x7e4] ss:$12 sps:$4 sm:$0xff]   ;;  %v20584_v46 = vld [vmem:[%s27296_s9 + $0x7e0] ss:$12 sps:$4 sm:$0xff]  }
0x1347   :  { %8383 = vmatpush1.bf16.msra.mxu1 %v20533_v17  ;;  %8420 = vmatpush1.bf16.msra.mxu0 %v20555_v31  ;;  %v20604_v17 = vld [vmem:[%s27296_s9 + $0x818] ss:$12 sps:$4 sm:$0xff]  }
0x1348   :  { %8384 = vmatprep.subr.bf16.mxu1 %v20538_v59  ;;  %8421 = vmatprep.subr.bf16.mxu0 %v27320_v39  ;;  %v20589_v31 = vld [vmem:[%s27296_s9 + $0x8ec] ss:$12 sps:$4 sm:$0xff]   ;;  %v20587_v59 = vld [vmem:[%s27296_s9 + $0x8e8] ss:$12 sps:$4 sm:$0xff]  }
0x134b   :  { %8385 = vmatpush1.bf16.msra.mxu1 %v20536_v49  ;;  %8422 = vmatpush1.bf16.msra.mxu0 %v20556_v53  ;;  %v20605_v49 = vld [vmem:[%s27296_s9 + $0x800] ss:$12 sps:$4 sm:$0xff]  }
0x134c   :  { %8394 = vmatprep.subr.bf16.mxu1 %v20541_v32  ;;  %8423 = vmatprep.subr.bf16.mxu0 %v27320_v39  ;;  %v20592_v53 = vld [vmem:[%s27296_s9 + $0x8d4] ss:$12 sps:$4 sm:$0xff]   ;;  %v20590_v32 = vld [vmem:[%s27296_s9 + $0x8d0] ss:$12 sps:$4 sm:$0xff]  }
0x134f   :  { %8395 = vmatpush2.bf16.msra.mxu1 %v20539_v56  ;;  %8424 = vmatpush1.bf16.msra.mxu0 %v20557_v11  ;;  %v20606_v56 = vld [vmem:[%s27296_s9 + $0x7e8] ss:$12 sps:$4 sm:$0xff]  }
0x1350   :  { %8396 = vmatprep.subr.bf16.mxu1 %v20544_v5  ;;  %8425 = vmatprep.subr.bf16.mxu0 %v27320_v39  ;;  %v20595_v11 = vld [vmem:[%s27296_s9 + $0x8bc] ss:$12 sps:$4 sm:$0xff]   ;;  %v20593_v5 = vld [vmem:[%s27296_s9 + $0x8b8] ss:$12 sps:$4 sm:$0xff]  }
0x1353   :  { %8397 = vmatpush2.bf16.msra.mxu1 %v20542_v43  ;;  %8426 = vmatpush1.bf16.msra.mxu0 %v20558_v36  ;;  %v20607_v43 = vld [vmem:[%s27296_s9 + $0x8f0] ss:$12 sps:$4 sm:$0xff]  }
0x1354   :  { %8398 = vmatprep.subr.bf16.mxu1 %v20547_v61  ;;  %8435 = vmatprep.subr.bf16.mxu0 %v27320_v39  ;;  %v20598_v36 = vld [vmem:[%s27296_s9 + $0x8a4] ss:$12 sps:$4 sm:$0xff]   ;;  %v20596_v61 = vld [vmem:[%s27296_s9 + $0x8a0] ss:$12 sps:$4 sm:$0xff]  }
0x1357   :  { %8399 = vmatpush2.bf16.msra.mxu1 %v20545_v27  ;;  %8436 = vmatpush2.bf16.msra.mxu0 %v20559_v62  ;;  %v20608_v27 = vld [vmem:[%s27296_s9 + $0x8d8] ss:$12 sps:$4 sm:$0xff]   ;;  %v20609_v62 = vld [vmem:[%s27296_s9 + $0x8c0] ss:$12 sps:$4 sm:$0xff]  }
0x1358   :  { %8400 = vmatprep.subr.bf16.mxu1 %v20550_v33  ;;  %8437 = vmatprep.subr.bf16.mxu0 %v27320_v39  ;;  %v20610_v33 = vld [vmem:[%s27296_s9 + $0x8a8] ss:$12 sps:$4 sm:$0xff]  }
0x135b   :  { %8401 = vmatpush2.bf16.msra.mxu1 %v20548_v14  ;;  %8438 = vmatpush2.bf16.msra.mxu0 %v20560_v1 }
0x135c   :  { %17573 = vmatprep.subr.msk.bf16.mxu1 %vm5827_vm2, %v23522_v24  ;;  %8439 = vmatprep.subr.bf16.mxu0 %v27320_v39 }
0x135f   :  { %8440 = vmatpush2.bf16.msra.mxu0 %v20561_v15 }
0x1360   :  { %8441 = vmatprep.subr.bf16.mxu0 %v27320_v39 }
0x1363   :  { %8442 = vmatpush2.bf16.msra.mxu0 %v20562_v25 }
0x1364   :  { %8746 = vmatprep.subr.bf16.mxu0 %v20565_v2 }
0x13ee   :  { %v8028_v60 = vpop.f32.mrf.mxu0  ;;  %v8069_v23 = vpop.f32.mrf.mxu1 }
0x13ef   :  { %v24476_v42 = vadd.f32 %v8028_v60, %v24337_v16  ;;  %v24479_v47 = vadd.f32 %v8069_v23, %v24340_v6  ;;  %v20563_v16 = vld [vmem:[%s27296_s9 + $0x888] ss:$12 sps:$4 sm:$0xff]  }
0x13f0   :  { %v8030_v22 = vpop.f32.mrf.mxu0  ;;  %v8071_v30 = vpop.f32.mrf.mxu1  ;;  %v20568_v6 = vld [vmem:[%s27296_s9 + $0x874] ss:$12 sps:$4 sm:$0xff]  }
0x13f1   :  { %v24482_v40 = vadd.f32 %v8030_v22, %v24343_v29 }
0x13f2   :  { %v8032_v48 = vpop.f32.mrf.mxu0  ;;  %v8072_v58 = vpop.f32.mrf.mxu1 }
0x13f4   :  { %v8033_v51 = vpop.f32.mrf.mxu0  ;;  %v8073_v52 = vpop.f32.mrf.mxu1 }
0x13f6   :  { %v8117_v45 = vpop.f32.mrf.mxu0 }
0x13f7   :  { %v8124_v50 = vpack.c.bf16 %v8117_v45, %v8117_v45 }
0x13f8   :  { %v8119_v26 = vpop.f32.mrf.mxu0 }
0x13f9   :  { %v8125_v20 = vpack.c.bf16 %v8119_v26, %v8119_v26 }
0x13fa   :  { %v8121_v0 = vpop.f32.mrf.mxu0 }
0x13fb   :  { %17570 = vmatprep.mubr.msk.bf16.mxu1 %vm1116_vm1, %v8125_v20  ;;  %17571 = vmatprep.mubr.msk.bf16.mxu0 %vm1116_vm1, %v8125_v20  ;;  %v20619_v0 = vld [vmem:[%s27296_s9 + $0x978] ss:$12 sps:$4 sm:$0xff]  }
0x13fc   :  { %8403 = vmatmul.mubr.bf16.vlgmr.msra.gmra.mxu1 %v8124_v50  ;;  %8444 = vmatmul.mubr.bf16.vlgmr.msra.gmra.mxu0 %v8124_v50  ;;  %v8122_v29 = vpop.f32.mrf.mxu0  ;;  %v20621_v50 = vld [vmem:[%s27296_s9 + $0x97c] ss:$12 sps:$4 sm:$0xff]  }
0x13fd   :  { %8474 = vmatpush1.bf16.msra.mxu1 %v23528_v18  ;;  %8747 = vmatpush1.bf16.msra.mxu0 %v20563_v16  ;;  %v20615_v16 = vld [vmem:[%s27296_s9 + $0x990] ss:$12 sps:$4 sm:$0xff]  }
0x13fe   :  { %8748 = vmatprep.subr.bf16.mxu0 %v20568_v6  ;;  %8491 = vmatprep.mubr.bf16.mxu1 %v27320_v39  ;;  %v17661_v6 = vld [vmem:[%s27295_s8 + $0x20] sm:$0xf]  ;;  %v20625_v29 = vld [vmem:[%s27296_s9 + $0x964] ss:$12 sps:$4 sm:$0xff]  }
0x13ff   :  { %8787 = vmatprep.subr.bf16.mxu1 %v27320_v39 }
0x1401   :  { %8749 = vmatpush1.bf16.msra.mxu0 %v20566_v34  ;;  %v20618_v34 = vld [vmem:[%s27296_s9 + $0x998] ss:$12 sps:$4 sm:$0xff]  }
0x1402   :  { %8750 = vmatprep.subr.bf16.mxu0 %v20571_v12  ;;  %v20623_v12 = vld [vmem:[%s27296_s9 + $0x960] ss:$12 sps:$4 sm:$0xff]  }
0x1404   :  { %17574 = vmatmul.mubr.msk.bf16.vlgmr.msra.gmra.mxu1 %vm5823_vm3, %v17572_v13  ;;  %v20622_v13 = vld [vmem:[%s27296_s9 + $0x980] ss:$12 sps:$4 sm:$0xff]  }
0x1405   :  { %8751 = vmatpush1.bf16.msra.mxu0 %v20569_v19  ;;  %8788 = vmatpush1.bf16.msra.mxu1 %v20599_v37  ;;  %v20629_v19 = vld [vmem:[%s27296_s9 + $0x94c] ss:$12 sps:$4 sm:$0xff]   ;;  %v20627_v37 = vld [vmem:[%s27296_s9 + $0x948] ss:$12 sps:$4 sm:$0xff]  }
0x1406   :  { %8752 = vmatprep.subr.bf16.mxu0 %v20574_v4  ;;  %8789 = vmatprep.subr.bf16.mxu1 %v27320_v39  ;;  %v20633_v4 = vld [vmem:[%s27296_s9 + $0x934] ss:$12 sps:$4 sm:$0xff]  }
0x1409   :  { %8753 = vmatpush1.bf16.msra.mxu0 %v20572_v57  ;;  %8790 = vmatpush1.bf16.msra.mxu1 %v20600_v35  ;;  %v20626_v57 = vld [vmem:[%s27296_s9 + $0x968] ss:$12 sps:$4 sm:$0xff]   ;;  %v20631_v35 = vld [vmem:[%s27296_s9 + $0x930] ss:$12 sps:$4 sm:$0xff]  }
0x140a   :  { %8754 = vmatprep.subr.bf16.mxu0 %v20577_v54  ;;  %8791 = vmatprep.subr.bf16.mxu1 %v27320_v39  ;;  %v20637_v54 = vld [vmem:[%s27296_s9 + $0x91c] ss:$12 sps:$4 sm:$0xff]  }
0x140d   :  { %8755 = vmatpush1.bf16.msra.mxu0 %v20575_v3  ;;  %8792 = vmatpush1.bf16.msra.mxu1 %v20601_v63  ;;  %v20630_v3 = vld [vmem:[%s27296_s9 + $0x950] ss:$12 sps:$4 sm:$0xff]   ;;  %v20635_v63 = vld [vmem:[%s27296_s9 + $0x918] ss:$12 sps:$4 sm:$0xff]  }
0x140e   :  { %8756 = vmatprep.subr.bf16.mxu0 %v20580_v44  ;;  %8793 = vmatprep.subr.bf16.mxu1 %v27320_v39  ;;  %v20641_v44 = vld [vmem:[%s27296_s9 + $0x904] ss:$12 sps:$4 sm:$0xff]  }
0x1411   :  { %8757 = vmatpush1.bf16.msra.mxu0 %v20578_v8  ;;  %8794 = vmatpush1.bf16.msra.mxu1 %v20602_v21  ;;  %v20634_v8 = vld [vmem:[%s27296_s9 + $0x938] ss:$12 sps:$4 sm:$0xff]   ;;  %v20639_v21 = vld [vmem:[%s27296_s9 + $0x900] ss:$12 sps:$4 sm:$0xff]  }
0x1412   :  { %8758 = vmatprep.subr.bf16.mxu0 %v20583_v38  ;;  %8795 = vmatprep.subr.bf16.mxu1 %v27320_v39  ;;  %v20645_v38 = vld [vmem:[%s27296_s9 + $0xa0c] ss:$12 sps:$4 sm:$0xff]  }
0x1415   :  { %8759 = vmatpush1.bf16.msra.mxu0 %v20581_v41  ;;  %8796 = vmatpush1.bf16.msra.mxu1 %v20603_v55  ;;  %v20638_v41 = vld [vmem:[%s27296_s9 + $0x920] ss:$12 sps:$4 sm:$0xff]   ;;  %v20643_v55 = vld [vmem:[%s27296_s9 + $0xa08] ss:$12 sps:$4 sm:$0xff]  }
0x1416   :  { %8760 = vmatprep.subr.bf16.mxu0 %v20586_v7  ;;  %8797 = vmatprep.subr.bf16.mxu1 %v27320_v39  ;;  %v20642_v7 = vld [vmem:[%s27296_s9 + $0x908] ss:$12 sps:$4 sm:$0xff]  }
0x1419   :  { %8761 = vmatpush1.bf16.msra.mxu0 %v20584_v46  ;;  %8798 = vmatpush1.bf16.msra.mxu1 %v20604_v17  ;;  %v20646_v46 = vld [vmem:[%s27296_s9 + $0xa10] ss:$12 sps:$4 sm:$0xff]   ;;  %v20649_v17 = vld [vmem:[%s27296_s9 + $0x9f4] ss:$12 sps:$4 sm:$0xff]  }
0x141a   :  { %8770 = vmatprep.subr.bf16.mxu0 %v20589_v31  ;;  %8799 = vmatprep.subr.bf16.mxu1 %v27320_v39  ;;  %v20647_v31 = vld [vmem:[%s27296_s9 + $0x9f0] ss:$12 sps:$4 sm:$0xff]  }
0x141d   :  { %8771 = vmatpush2.bf16.msra.mxu0 %v20587_v59  ;;  %8800 = vmatpush1.bf16.msra.mxu1 %v20605_v49  ;;  %v20650_v59 = vld [vmem:[%s27296_s9 + $0x9f8] ss:$12 sps:$4 sm:$0xff]   ;;  %v20653_v49 = vld [vmem:[%s27296_s9 + $0x9dc] ss:$12 sps:$4 sm:$0xff]  }
0x141e   :  { %8772 = vmatprep.subr.bf16.mxu0 %v20592_v53  ;;  %8801 = vmatprep.subr.bf16.mxu1 %v27320_v39  ;;  %v20651_v53 = vld [vmem:[%s27296_s9 + $0x9d8] ss:$12 sps:$4 sm:$0xff]  }
0x1421   :  { %8773 = vmatpush2.bf16.msra.mxu0 %v20590_v32  ;;  %8802 = vmatpush1.bf16.msra.mxu1 %v20606_v56  ;;  %v20654_v32 = vld [vmem:[%s27296_s9 + $0x9e0] ss:$12 sps:$4 sm:$0xff]   ;;  %v20657_v56 = vld [vmem:[%s27296_s9 + $0x9c4] ss:$12 sps:$4 sm:$0xff]  }
0x1422   :  { %8774 = vmatprep.subr.bf16.mxu0 %v20595_v11  ;;  %8811 = vmatprep.subr.bf16.mxu1 %v27320_v39  ;;  %v20655_v11 = vld [vmem:[%s27296_s9 + $0x9c0] ss:$12 sps:$4 sm:$0xff]  }
0x1425   :  { %8775 = vmatpush2.bf16.msra.mxu0 %v20593_v5  ;;  %8812 = vmatpush2.bf16.msra.mxu1 %v20607_v43  ;;  %v20658_v5 = vld [vmem:[%s27296_s9 + $0x9c8] ss:$12 sps:$4 sm:$0xff]  }
0x1426   :  { %8776 = vmatprep.subr.bf16.mxu0 %v20598_v36  ;;  %8813 = vmatprep.subr.bf16.mxu1 %v27320_v39 }
0x1429   :  { %8777 = vmatpush2.bf16.msra.mxu0 %v20596_v61  ;;  %8814 = vmatpush2.bf16.msra.mxu1 %v20608_v27 }
0x142a   :  { %17662 = vmatprep.subr.msk.bf16.mxu0 %vm5827_vm2, %v23522_v24  ;;  %8815 = vmatprep.subr.bf16.mxu1 %v27320_v39  ;;  %v20613_v24 = vld [vmem:[%s27296_s9 + $0x9ac] ss:$12 sps:$4 sm:$0xff]  }
0x142d   :  { %8816 = vmatpush2.bf16.msra.mxu1 %v20609_v62 }
0x142e   :  { %8817 = vmatprep.subr.bf16.mxu1 %v27320_v39 }
0x1431   :  { %8818 = vmatpush2.bf16.msra.mxu1 %v20610_v33 }
0x1432   :  { %9122 = vmatprep.subr.bf16.mxu1 %v20613_v24 }
0x14bc   :  { %v8404_v14 = vpop.f32.mrf.mxu1  ;;  %v8445_v1 = vpop.f32.mrf.mxu0 }
0x14bd   :  { %v24615_v15 = vadd.f32 %v8404_v14, %v24476_v42  ;;  %v24618_v25 = vadd.f32 %v8445_v1, %v24479_v47  ;;  %v20611_v42 = vld [vmem:[%s27296_s9 + $0x9a8] ss:$12 sps:$4 sm:$0xff]  }
0x14be   :  { %v8406_v2 = vpop.f32.mrf.mxu1  ;;  %v8447_v60 = vpop.f32.mrf.mxu0  ;;  %v20617_v47 = vld [vmem:[%s27296_s9 + $0x994] ss:$12 sps:$4 sm:$0xff]  }
0x14bf   :  { %v24621_v23 = vadd.f32 %v8406_v2, %v24482_v40 }
0x14c0   :  { %v8408_v22 = vpop.f32.mrf.mxu1  ;;  %v8448_v30 = vpop.f32.mrf.mxu0 }
0x14c2   :  { %v8409_v48 = vpop.f32.mrf.mxu1  ;;  %v8449_v58 = vpop.f32.mrf.mxu0 }
0x14c4   :  { %v8493_v51 = vpop.f32.mrf.mxu1 }
0x14c5   :  { %v8500_v26 = vpack.c.bf16 %v8493_v51, %v8493_v51 }
0x14c6   :  { %v8495_v52 = vpop.f32.mrf.mxu1 }
0x14c7   :  { %v8501_v45 = vpack.c.bf16 %v8495_v52, %v8495_v52  ;;  %v9206_v52 = vld [vmem:[%s27297_s10] sm:$0x7] }
0x14c8   :  { %v8497_v20 = vpop.f32.mrf.mxu1 }
0x14c9   :  { %17659 = vmatprep.mubr.msk.bf16.mxu0 %vm1116_vm1, %v8501_v45  ;;  %17660 = vmatprep.mubr.msk.bf16.mxu1 %vm1116_vm1, %v8501_v45  ;;  %v9211_v45 = vrot.slane %v9206_v52, %v23473_v9 }
0x14ca   :  { %8779 = vmatmul.mubr.bf16.vlgmr.msra.gmra.mxu0 %v8500_v26  ;;  %8820 = vmatmul.mubr.bf16.vlgmr.msra.gmra.mxu1 %v8500_v26  ;;  %v8498_v40 = vpop.f32.mrf.mxu1 }
0x14cb   :  { %8850 = vmatpush1.bf16.msra.mxu0 %v23528_v18  ;;  %8867 = vmatprep.mubr.bf16.mxu0 %v27320_v39  ;;  %v20614_v18 = vld [vmem:[%s27296_s9 + $0x9b0] ss:$12 sps:$4 sm:$0xff]  }
0x14cc   :  { %9163 = vmatprep.subr.bf16.mxu0 %v27320_v39  ;;  %9123 = vmatpush1.bf16.msra.mxu1 %v20611_v42 }
0x14cd   :  { %9124 = vmatprep.subr.bf16.mxu1 %v20617_v47 }
0x14d0   :  { %9125 = vmatpush1.bf16.msra.mxu1 %v20615_v16  ;;  %v9215_v16 = vrot.slane %v9206_v52, %v23495_v10 }
0x14d1   :  { %9126 = vmatprep.subr.bf16.mxu1 %v20621_v50 }
0x14d2   :  { %17663 = vmatmul.mubr.msk.bf16.vlgmr.msra.gmra.mxu0 %vm5823_vm3, %v17661_v6 }
0x14d3   :  { %9164 = vmatpush1.bf16.msra.mxu0 %v20614_v18 }
0x14d4   :  { %9165 = vmatprep.subr.bf16.mxu0 %v27320_v39  ;;  %9127 = vmatpush1.bf16.msra.mxu1 %v20619_v0 }
0x14d5   :  { %9128 = vmatprep.subr.bf16.mxu1 %v20625_v29 }
0x14d7   :  { %9166 = vmatpush1.bf16.msra.mxu0 %v20618_v34 }
0x14d8   :  { %9167 = vmatprep.subr.bf16.mxu0 %v27320_v39  ;;  %9129 = vmatpush1.bf16.msra.mxu1 %v20623_v12 }
0x14d9   :  { %9130 = vmatprep.subr.bf16.mxu1 %v20629_v19 }
0x14db   :  { %9168 = vmatpush1.bf16.msra.mxu0 %v20622_v13 }
0x14dc   :  { %9169 = vmatprep.subr.bf16.mxu0 %v27320_v39  ;;  %9131 = vmatpush1.bf16.msra.mxu1 %v20627_v37 }
0x14dd   :  { %9132 = vmatprep.subr.bf16.mxu1 %v20633_v4 }
0x14df   :  { %9170 = vmatpush1.bf16.msra.mxu0 %v20626_v57 }
0x14e0   :  { %9171 = vmatprep.subr.bf16.mxu0 %v27320_v39  ;;  %9133 = vmatpush1.bf16.msra.mxu1 %v20631_v35 }
0x14e1   :  { %9134 = vmatprep.subr.bf16.mxu1 %v20637_v54 }
0x14e3   :  { %9172 = vmatpush1.bf16.msra.mxu0 %v20630_v3 }
0x14e4   :  { %9173 = vmatprep.subr.bf16.mxu0 %v27320_v39  ;;  %9135 = vmatpush1.bf16.msra.mxu1 %v20635_v63 }
0x14e5   :  { %9136 = vmatprep.subr.bf16.mxu1 %v20641_v44 }
0x14e7   :  { %9174 = vmatpush1.bf16.msra.mxu0 %v20634_v8  ;;  %v20682_v8 = vld [vmem:[%s27298_s11 + $0x2f4] ss:$8 sps:$4 sm:$0xff]  }
0x14e8   :  { %9175 = vmatprep.subr.bf16.mxu0 %v27320_v39  ;;  %9137 = vmatpush1.bf16.msra.mxu1 %v20639_v21  ;;  %v21755_v21 = vld [vmem:[%s27295_s8] sm:$0xf] }
0x14e9   :  { %9146 = vmatprep.subr.bf16.mxu1 %v20645_v38  ;;  %v20661_v38 = vld [vmem:[%s27298_s11 + $0x1f4] ss:$8 sps:$4 sm:$0xff]  }
0x14eb   :  { %9176 = vmatpush1.bf16.msra.mxu0 %v20638_v41  ;;  %v20680_v41 = vld [vmem:[%s27298_s11 + $0x2f0] ss:$8 sps:$4 sm:$0xff]  }
0x14ec   :  { %9177 = vmatprep.subr.bf16.mxu0 %v27320_v39  ;;  %9147 = vmatpush2.bf16.msra.mxu1 %v20643_v55  ;;  %v20688_v55 = vld [vmem:[%s27298_s11 + $0x2e4] ss:$8 sps:$4 sm:$0xff]  }
0x14ed   :  { %9148 = vmatprep.subr.bf16.mxu1 %v20649_v17  ;;  %v20664_v17 = vld [vmem:[%s27298_s11 + $0x1e4] ss:$8 sps:$4 sm:$0xff]  }
0x14ef   :  { %9178 = vmatpush1.bf16.msra.mxu0 %v20642_v7  ;;  %v20659_v7 = vld [vmem:[%s27298_s11 + $0x1f0] ss:$8 sps:$4 sm:$0xff]  }
0x14f0   :  { %9187 = vmatprep.subr.bf16.mxu0 %v27320_v39  ;;  %9149 = vmatpush2.bf16.msra.mxu1 %v20647_v31  ;;  %v20686_v31 = vld [vmem:[%s27298_s11 + $0x2e0] ss:$8 sps:$4 sm:$0xff]  }
0x14f1   :  { %9150 = vmatprep.subr.bf16.mxu1 %v20653_v49  ;;  %v20662_v49 = vld [vmem:[%s27298_s11 + $0x1e0] ss:$8 sps:$4 sm:$0xff]  }
0x14f3   :  { %9188 = vmatpush2.bf16.msra.mxu0 %v20646_v46  ;;  %v21756_v46 = vld [vmem:[%s27295_s8 + $0x4] sm:$0xf] }
0x14f4   :  { %9189 = vmatprep.subr.bf16.mxu0 %v27320_v39  ;;  %9151 = vmatpush2.bf16.msra.mxu1 %v20651_v53  ;;  %v20667_v53 = vld [vmem:[%s27298_s11 + $0x1d4] ss:$8 sps:$4 sm:$0xff]  }
0x14f5   :  { %9152 = vmatprep.subr.bf16.mxu1 %v20657_v56  ;;  %v20700_v56 = vld [vmem:[%s27298_s11 + $0x2c4] ss:$8 sps:$4 sm:$0xff]  }
0x14f7   :  { %9190 = vmatpush2.bf16.msra.mxu0 %v20650_v59  ;;  %v20694_v59 = vld [vmem:[%s27298_s11 + $0x2d4] ss:$8 sps:$4 sm:$0xff]  }
0x14f8   :  { %9191 = vmatprep.subr.bf16.mxu0 %v27320_v39  ;;  %9153 = vmatpush2.bf16.msra.mxu1 %v20655_v11  ;;  %v20665_v11 = vld [vmem:[%s27298_s11 + $0x1d0] ss:$8 sps:$4 sm:$0xff]  }
0x14fb   :  { %9192 = vmatpush2.bf16.msra.mxu0 %v20654_v32  ;;  %v20692_v32 = vld [vmem:[%s27298_s11 + $0x2d0] ss:$8 sps:$4 sm:$0xff]  }
0x14fc   :  { %9193 = vmatprep.subr.bf16.mxu0 %v27320_v39 }
0x14ff   :  { %9194 = vmatpush2.bf16.msra.mxu0 %v20658_v5  ;;  %v20670_v5 = vld [vmem:[%s27298_s11 + $0x1c4] ss:$8 sps:$4 sm:$0xff]  }
0x158a   :  { %v8780_v43 = vpop.f32.mrf.mxu0  ;;  %v8821_v36 = vpop.f32.mrf.mxu1 }
0x158b   :  { %v8827_v61 = vadd.f32 %v8780_v43, %v24615_v15  ;;  %v8829_v27 = vadd.f32 %v8821_v36, %v24618_v25  ;;  %v21796_v25 = vmov 0.0   ;;  %v20698_v43 = vld [vmem:[%s27298_s11 + $0x2c0] ss:$8 sps:$4 sm:$0xff]   ;;  %v20706_v36 = vld [vmem:[%s27298_s11 + $0x2b4] ss:$8 sps:$4 sm:$0xff]  }
0x158c   :  { %v8782_v62 = vpop.f32.mrf.mxu0  ;;  %v8823_v33 = vpop.f32.mrf.mxu1  ;;  %19755 = vmatprep.subr.bf16.mxu0 %v21796_v25 }
0x158d   :  { %v8828_v24 = vadd.f32 %v8782_v62, %v24621_v23  ;;  %v9218_v23 = vsub.s32 2, %v23466_v28  ;;  %v20704_v62 = vld [vmem:[%s27298_s11 + $0x2b0] ss:$8 sps:$4 sm:$0xff]   ;;  %v20712_v33 = vld [vmem:[%s27298_s11 + $0x2a4] ss:$8 sps:$4 sm:$0xff]  }
0x158e   :  { %v8784_v14 = vpop.f32.mrf.mxu0  ;;  %v8824_v1 = vpop.f32.mrf.mxu1 }
0x158f   :  { %v9219_v26 = vrot.slane %v9206_v52, %v9218_v23  ;;  %v20676_v14 = vld [vmem:[%s27298_s11 + $0x1a4] ss:$8 sps:$4 sm:$0xff]   ;;  %v20710_v1 = vld [vmem:[%s27298_s11 + $0x2a0] ss:$8 sps:$4 sm:$0xff]   ;;  %v20703_v52 = vld [vmem:[%s27298_s11 + $0x254] ss:$8 sps:$4 sm:$0xff]  }
0x1590   :  { %v8785_v2 = vpop.f32.mrf.mxu0  ;;  %v8825_v60 = vpop.f32.mrf.mxu1  ;;  %v20695_v23 = vld [vmem:[%s27298_s11 + $0x260] ss:$8 sps:$4 sm:$0xff]  }
0x1591   :  { %v20674_v2 = vld [vmem:[%s27298_s11 + $0x1a0] ss:$8 sps:$4 sm:$0xff]   ;;  %v20679_v60 = vld [vmem:[%s27298_s11 + $0x194] ss:$8 sps:$4 sm:$0xff]  }
0x1592   :  { %v8869_v22 = vpop.f32.mrf.mxu0 }
0x1593   :  { %v8876_v58 = vpack.c.bf16 %v8869_v22, %v8869_v22  ;;  %v20677_v22 = vld [vmem:[%s27298_s11 + $0x190] ss:$8 sps:$4 sm:$0xff]  }
0x1594   :  { %v8871_v30 = vpop.f32.mrf.mxu0 }
0x1595   :  { %v8877_v48 = vpack.c.bf16 %v8871_v30, %v8871_v30  ;;  %v20685_v30 = vld [vmem:[%s27298_s11 + $0x184] ss:$8 sps:$4 sm:$0xff]  }
0x1596   :  { %v8873_v51 = vpop.f32.mrf.mxu0 }
0x1597   :  { %17748 = vmatprep.mubr.msk.bf16.mxu1 %vm1116_vm1, %v8877_v48  ;;  %17749 = vmatprep.mubr.msk.bf16.mxu0 %vm1116_vm1, %v8877_v48  ;;  %v20683_v48 = vld [vmem:[%s27298_s11 + $0x180] ss:$8 sps:$4 sm:$0xff]   ;;  %v20689_v51 = vld [vmem:[%s27298_s11 + $0x270] ss:$8 sps:$4 sm:$0xff]  }
0x1598   :  { %9155 = vmatmul.mubr.bf16.vlgmr.msra.gmra.mxu1 %v8876_v58  ;;  %9196 = vmatmul.mubr.bf16.vlgmr.msra.gmra.mxu0 %v8876_v58  ;;  %v8874_v15 = vpop.f32.mrf.mxu0  ;;  %v20691_v58 = vld [vmem:[%s27298_s11 + $0x274] ss:$8 sps:$4 sm:$0xff]  }
0x1599   :  { %9273 = vmatprep.mubr.bf16.mxu1 %v27320_v39  ;;  %19757 = vmatprep.mubr.msk.bf16.mxu0 %vm21797_vm4, %v21796_v25  ;;  %v20697_v15 = vld [vmem:[%s27298_s11 + $0x264] ss:$8 sps:$4 sm:$0xff]  }
0x1658   :  { %v9156_v20 = vpop.f32.mrf.mxu1  ;;  %v9197_v42 = vpop.f32.mrf.mxu0 }
0x1659   :  { %v9203_v47 = vadd.f32 %v9156_v20, %v8827_v61  ;;  %v9205_v40 = vadd.f32 %v9197_v42, %v8829_v27  ;;  %v20668_v61 = vld [vmem:[%s27298_s11 + $0x1c0] ss:$8 sps:$4 sm:$0xff]   ;;  %v20673_v27 = vld [vmem:[%s27298_s11 + $0x1b4] ss:$8 sps:$4 sm:$0xff]  }
0x165a   :  { %v9158_v50 = vpop.f32.mrf.mxu1  ;;  %v9199_v6 = vpop.f32.mrf.mxu0  ;;  %v20707_v20 = vld [vmem:[%s27298_s11 + $0x240] ss:$8 sps:$4 sm:$0xff]   ;;  %v20715_v42 = vld [vmem:[%s27298_s11 + $0x234] ss:$8 sps:$4 sm:$0xff]  }
0x165b   :  { %v9223_v18 = vadd.f32 %v9211_v45, %v9203_v47  ;;  %v9225_v0 = vadd.f32 %v9219_v26, %v9205_v40  ;;  %v9204_v29 = vadd.f32 %v9158_v50, %v8828_v24  ;;  %v20671_v24 = vld [vmem:[%s27298_s11 + $0x1b0] ss:$8 sps:$4 sm:$0xff]   ;;  %v20709_v26 = vld [vmem:[%s27298_s11 + $0x244] ss:$8 sps:$4 sm:$0xff]   ;;  %v20718_v40 = vld [vmem:[%s27298_s11 + $0x294] ss:$8 sps:$4 sm:$0xff]  }
0x165c   :  { %v9160_v34 = vpop.f32.mrf.mxu1  ;;  %v9200_v28 = vpop.f32.mrf.mxu0  ;;  %v20701_v45 = vld [vmem:[%s27298_s11 + $0x250] ss:$8 sps:$4 sm:$0xff]   ;;  %v20721_v50 = vld [vmem:[%s27298_s11 + $0x224] ss:$8 sps:$4 sm:$0xff]   ;;  %v20719_v6 = vld [vmem:[%s27298_s11 + $0x220] ss:$8 sps:$4 sm:$0xff]  }
0x165d   :  { %v9226_v12 = vmax.f32 %v9223_v18, 0.0  ;;  %v9228_v19 = vmax.f32 %v9225_v0, 0.0  ;;  %v9224_v13 = vadd.f32 %v9215_v16, %v9204_v29  ;;  %v20713_v47 = vld [vmem:[%s27298_s11 + $0x230] ss:$8 sps:$4 sm:$0xff]   ;;  %v20724_v18 = vld [vmem:[%s27298_s11 + $0x284] ss:$8 sps:$4 sm:$0xff]  }
0x165e   :  { %v9161_v37 = vpop.f32.mrf.mxu1  ;;  %v9201_v4 = vpop.f32.mrf.mxu0  ;;  %v20716_v16 = vld [vmem:[%s27298_s11 + $0x290] ss:$8 sps:$4 sm:$0xff]   ;;  %v20722_v0 = vld [vmem:[%s27298_s11 + $0x280] ss:$8 sps:$4 sm:$0xff]   ;;  %v20727_v34 = vld [vmem:[%s27298_s11 + $0x214] ss:$8 sps:$4 sm:$0xff]  }
0x165f   :  { %v9229_v57 = vpack.c.bf16 %v9226_v12, %v9226_v12  ;;  %v9231_v35 = vpack.c.bf16 %v9228_v19, %v9228_v19  ;;  %v9227_v54 = vmax.f32 %v9224_v13, 0.0  ;;  %v20725_v29 = vld [vmem:[%s27298_s11 + $0x210] ss:$8 sps:$4 sm:$0xff]   ;;  %v20730_v28 = vld [vmem:[%s27298_s11 + $0x74] ss:$8 sps:$4 sm:$0xff]  }
0x1660   :  { %v20733_v12 = vld [vmem:[%s27298_s11 + $0x204] ss:$8 sps:$4 sm:$0xff]   ;;  %v20731_v19 = vld [vmem:[%s27298_s11 + $0x200] ss:$8 sps:$4 sm:$0xff]   ;;  %v20739_v13 = vld [vmem:[%s27298_s11 + $0x174] ss:$8 sps:$4 sm:$0xff]  }
0x1661   :  { %v24764_v3 = vsel %vm5827_vm2, %v9231_v35, 0  ;;  %v24766_v63 = vpack.c.bf16 %v9227_v54, %v9227_v54  ;;  %v24770_v44 = vsel %vm5827_vm2, %v9229_v57, 0 }
0x1662   :  { %19756 = vmatpush3.bf16.msra.mxu0 %v24764_v3 }
0x1663   :  { %17750 = vmatprep.subr.msk.bf16.mxu1 %vm5827_vm2, %v24766_v63  ;;  %19761 = vmatprep.subr.bf16.mxu0 %v21796_v25 }
0x1664   :  { %9256 = vmatpush1.bf16.msra.mxu1 %v24770_v44 }
0x1665   :  { %19758 = vmatmul.mubr.msk.bf16.vlgmr.msra.gmra.mxu0 %vm5823_vm3, %v21755_v21  ;;  %17753 = vmatprep.subr.msk.bf16.mxu1 %vm5827_vm2, %v24766_v63 }
0x1666   :  { %19762 = vmatpush3.bf16.msra.mxu0 %v24764_v3  ;;  %19763 = vmatprep.mubr.msk.bf16.mxu0 %vm21797_vm4, %v21796_v25 }
0x1667   :  { %17751 = vmatmul.mubr.msk.bf16.vlgmr.msra.gmra.mxu1 %vm5823_vm3, %v21755_v21  ;;  %9787 = vmatprep.subr.bf16.mxu0 %v20682_v8 }
0x1668   :  { %9388 = vmatpush1.bf16.msra.mxu1 %v24770_v44  ;;  %9405 = vmatprep.mubr.bf16.mxu1 %v27320_v39 }
0x1669   :  { %9746 = vmatprep.subr.bf16.mxu1 %v20661_v38 }
0x166d   :  { %19764 = vmatmul.mubr.msk.bf16.vlgmr.msra.gmra.mxu0 %vm5823_vm3, %v21756_v46 }
0x166e   :  { %9788 = vmatpush1.bf16.msra.mxu0 %v20680_v41  ;;  %9819 = vmatprep.mubr.bf16.mxu0 %v27320_v39 }
0x166f   :  { %17754 = vmatmul.mubr.msk.bf16.vlgmr.msra.gmra.mxu1 %vm5823_vm3, %v21756_v46  ;;  %9789 = vmatprep.subr.bf16.mxu0 %v20688_v55 }
0x1670   :  { %9747 = vmatpush1.bf16.msra.mxu1 %v20659_v7  ;;  %v20728_v7 = vld [vmem:[%s27298_s11 + $0x70] ss:$8 sps:$4 sm:$0xff]  }
0x1671   :  { %9748 = vmatprep.subr.bf16.mxu1 %v20664_v17  ;;  %v20736_v17 = vld [vmem:[%s27298_s11 + $0x64] ss:$8 sps:$4 sm:$0xff]  }
0x1672   :  { %9790 = vmatpush1.bf16.msra.mxu0 %v20686_v31 }
0x1673   :  { %9791 = vmatprep.subr.bf16.mxu0 %v20694_v59 }
0x1674   :  { %9749 = vmatpush1.bf16.msra.mxu1 %v20662_v49 }
0x1675   :  { %9750 = vmatprep.subr.bf16.mxu1 %v20667_v53 }
0x1676   :  { %9792 = vmatpush1.bf16.msra.mxu0 %v20692_v32  ;;  %v20734_v32 = vld [vmem:[%s27298_s11 + $0x60] ss:$8 sps:$4 sm:$0xff]  }
0x1677   :  { %9793 = vmatprep.subr.bf16.mxu0 %v20700_v56 }
0x1678   :  { %9751 = vmatpush1.bf16.msra.mxu1 %v20665_v11 }
0x1679   :  { %9752 = vmatprep.subr.bf16.mxu1 %v20670_v5  ;;  %v20737_v5 = vld [vmem:[%s27298_s11 + $0x170] ss:$8 sps:$4 sm:$0xff]  }
0x167a   :  { %9794 = vmatpush1.bf16.msra.mxu0 %v20698_v43  ;;  %v20742_v43 = vld [vmem:[%s27298_s11 + $0x54] ss:$8 sps:$4 sm:$0xff]  }
0x167b   :  { %9795 = vmatprep.subr.bf16.mxu0 %v20706_v36  ;;  %v20745_v36 = vld [vmem:[%s27298_s11 + $0x164] ss:$8 sps:$4 sm:$0xff]  }
0x167c   :  { %9753 = vmatpush1.bf16.msra.mxu1 %v20668_v61 }
0x167d   :  { %9754 = vmatprep.subr.bf16.mxu1 %v20673_v27 }
0x167e   :  { %9796 = vmatpush1.bf16.msra.mxu0 %v20704_v62  ;;  %v20740_v62 = vld [vmem:[%s27298_s11 + $0x50] ss:$8 sps:$4 sm:$0xff]  }
0x167f   :  { %9797 = vmatprep.subr.bf16.mxu0 %v20712_v33 }
0x1680   :  { %9755 = vmatpush1.bf16.msra.mxu1 %v20671_v24  ;;  %v20743_v24 = vld [vmem:[%s27298_s11 + $0x160] ss:$8 sps:$4 sm:$0xff]  }
0x1681   :  { %9756 = vmatprep.subr.bf16.mxu1 %v20676_v14  ;;  %v20748_v14 = vld [vmem:[%s27298_s11 + $0x44] ss:$8 sps:$4 sm:$0xff]  }
0x1682   :  { %9798 = vmatpush1.bf16.msra.mxu0 %v20710_v1  ;;  %v20751_v1 = vld [vmem:[%s27298_s11 + $0x154] ss:$8 sps:$4 sm:$0xff]  }
0x1683   :  { %9799 = vmatprep.subr.bf16.mxu0 %v20718_v40  ;;  %v20775_v40 = vld [vmem:[%s27298_s11 + $0x114] ss:$8 sps:$4 sm:$0xff]  }
0x1684   :  { %9757 = vmatpush1.bf16.msra.mxu1 %v20674_v2  ;;  %v20746_v2 = vld [vmem:[%s27298_s11 + $0x40] ss:$8 sps:$4 sm:$0xff]  }
0x1685   :  { %9758 = vmatprep.subr.bf16.mxu1 %v20679_v60  ;;  %v20749_v60 = vld [vmem:[%s27298_s11 + $0x150] ss:$8 sps:$4 sm:$0xff]  }
0x1686   :  { %9800 = vmatpush1.bf16.msra.mxu0 %v20716_v16  ;;  %v20770_v16 = vld [vmem:[%s27298_s11] ss:$8 sps:$4 sm:$0xff]  }
0x1687   :  { %9801 = vmatprep.subr.bf16.mxu0 %v20724_v18  ;;  %v20781_v18 = vld [vmem:[%s27298_s11 + $0x104] ss:$8 sps:$4 sm:$0xff]  }
0x1688   :  { %9759 = vmatpush1.bf16.msra.mxu1 %v20677_v22  ;;  %v20754_v22 = vld [vmem:[%s27298_s11 + $0x34] ss:$8 sps:$4 sm:$0xff]  }
0x1689   :  { %9760 = vmatprep.subr.bf16.mxu1 %v20685_v30  ;;  %v20757_v30 = vld [vmem:[%s27298_s11 + $0x144] ss:$8 sps:$4 sm:$0xff]  }
0x168a   :  { %9802 = vmatpush1.bf16.msra.mxu0 %v20722_v0  ;;  %v20776_v0 = vld [vmem:[%s27298_s11 + $0xf0] ss:$8 sps:$4 sm:$0xff]  }
0x168b   :  { %10068 = vmatprep.subr.bf16.mxu0 %v20730_v28  ;;  %v20782_v28 = vld [vmem:[%s27298_s11 + $0xe0] ss:$8 sps:$4 sm:$0xff]  }
0x168c   :  { %9761 = vmatpush1.bf16.msra.mxu1 %v20683_v48  ;;  %v20752_v48 = vld [vmem:[%s27298_s11 + $0x30] ss:$8 sps:$4 sm:$0xff]  }
0x168d   :  { %9762 = vmatprep.subr.bf16.mxu1 %v20691_v58  ;;  %v20755_v58 = vld [vmem:[%s27298_s11 + $0x140] ss:$8 sps:$4 sm:$0xff]  }
0x1690   :  { %9763 = vmatpush2.bf16.msra.mxu1 %v20689_v51  ;;  %v20760_v51 = vld [vmem:[%s27298_s11 + $0x24] ss:$8 sps:$4 sm:$0xff]  }
0x1691   :  { %9764 = vmatprep.subr.bf16.mxu1 %v20697_v15  ;;  %v20763_v15 = vld [vmem:[%s27298_s11 + $0x134] ss:$8 sps:$4 sm:$0xff]  }
0x1694   :  { %9765 = vmatpush2.bf16.msra.mxu1 %v20695_v23  ;;  %v20758_v23 = vld [vmem:[%s27298_s11 + $0x20] ss:$8 sps:$4 sm:$0xff]  }
0x1695   :  { %9766 = vmatprep.subr.bf16.mxu1 %v20703_v52  ;;  %v20761_v52 = vld [vmem:[%s27298_s11 + $0x130] ss:$8 sps:$4 sm:$0xff]  }
0x1698   :  { %9767 = vmatpush2.bf16.msra.mxu1 %v20701_v45  ;;  %v20766_v45 = vld [vmem:[%s27298_s11 + $0x14] ss:$8 sps:$4 sm:$0xff]  }
0x1699   :  { %9768 = vmatprep.subr.bf16.mxu1 %v20709_v26  ;;  %v20769_v26 = vld [vmem:[%s27298_s11 + $0x124] ss:$8 sps:$4 sm:$0xff]  }
0x169c   :  { %9769 = vmatpush2.bf16.msra.mxu1 %v20707_v20  ;;  %v20764_v20 = vld [vmem:[%s27298_s11 + $0x10] ss:$8 sps:$4 sm:$0xff]  }
0x169d   :  { %9770 = vmatprep.subr.bf16.mxu1 %v20715_v42  ;;  %v20767_v42 = vld [vmem:[%s27298_s11 + $0x120] ss:$8 sps:$4 sm:$0xff]  }
0x16a0   :  { %9771 = vmatpush2.bf16.msra.mxu1 %v20713_v47  ;;  %v20772_v47 = vld [vmem:[%s27298_s11 + $0x4] ss:$8 sps:$4 sm:$0xff]  }
0x16a1   :  { %9772 = vmatprep.subr.bf16.mxu1 %v20721_v50  ;;  %v20773_v50 = vld [vmem:[%s27298_s11 + $0x110] ss:$8 sps:$4 sm:$0xff]  }
0x16a4   :  { %9773 = vmatpush2.bf16.msra.mxu1 %v20719_v6  ;;  %v20778_v6 = vld [vmem:[%s27298_s11 + $0xf4] ss:$8 sps:$4 sm:$0xff]  }
0x16a5   :  { %9774 = vmatprep.subr.bf16.mxu1 %v20727_v34  ;;  %v20784_v34 = vld [vmem:[%s27298_s11 + $0xe4] ss:$8 sps:$4 sm:$0xff]  }
0x16a8   :  { %9775 = vmatpush2.bf16.msra.mxu1 %v20725_v29  ;;  %v20779_v29 = vld [vmem:[%s27298_s11 + $0x100] ss:$8 sps:$4 sm:$0xff]  }
0x16a9   :  { %9776 = vmatprep.subr.bf16.mxu1 %v20733_v12  ;;  %v20787_v12 = vld [vmem:[%s27298_s11 + $0xd4] ss:$8 sps:$4 sm:$0xff]  }
0x16ac   :  { %9777 = vmatpush2.bf16.msra.mxu1 %v20731_v19 }
0x16ad   :  { %10109 = vmatprep.subr.bf16.mxu1 %v20739_v13  ;;  %v20829_v13 = vld [vmem:[%s27298_s11 + $0x374] ss:$8 sps:$4 sm:$0xff]  }
0x1725   :  { %v24944_v37 = vpop.f32.mrf.mxu0 }
0x1726   :  { %v9324_v19 = vpack.c.bf16 %v24944_v37, %v24944_v37  ;;  %v20790_v37 = vld [vmem:[%s27298_s11 + $0xc4] ss:$8 sps:$4 sm:$0xff]  }
0x1727   :  { %v24946_v4 = vpop.f32.mrf.mxu1  ;;  %v19759_v57 = vpop.f32.mrf.mxu0 }
0x1728   :  { %v20785_v57 = vld [vmem:[%s27298_s11 + $0xd0] ss:$8 sps:$4 sm:$0xff]  }
0x1729   :  { %v9277_v35 = vpop.f32.mrf.mxu1  ;;  %v9319_v54 = vpop.f32.mrf.mxu0 }
0x172a   :  { %v9323_v38 = vpack.c.bf16 %v9277_v35, %v9277_v35  ;;  %v20788_v35 = vld [vmem:[%s27298_s11 + $0xc0] ss:$8 sps:$4 sm:$0xff]   ;;  %v20793_v54 = vld [vmem:[%s27298_s11 + $0xb4] ss:$8 sps:$4 sm:$0xff]  }
0x172b   :  { %v9279_v8 = vpop.f32.mrf.mxu1  ;;  %v19760_v21 = vpop.f32.mrf.mxu0 }
0x172c   :  { %v20827_v8 = vld [vmem:[%s27298_s11 + $0x370] ss:$8 sps:$4 sm:$0xff]   ;;  %v20832_v21 = vld [vmem:[%s27298_s11 + $0x364] ss:$8 sps:$4 sm:$0xff]  }
0x172d   :  { %v9280_v41 = vpop.f32.mrf.mxu1  ;;  %v9448_v55 = vpop.f32.mrf.mxu0 }
0x172e   :  { %v9456_v46 = vpack.c.bf16 %v9448_v55, %v9448_v55  ;;  %v20791_v41 = vld [vmem:[%s27298_s11 + $0xb0] ss:$8 sps:$4 sm:$0xff]   ;;  %v20796_v55 = vld [vmem:[%s27298_s11 + $0xa4] ss:$8 sps:$4 sm:$0xff]  }
0x172f   :  { %v9407_v31 = vpop.f32.mrf.mxu1  ;;  %v19765_v59 = vpop.f32.mrf.mxu0 }
0x1730   :  { %9820 = vmatmul.mubr.bf16.vlgmr.msra.gmra.mxu0 %v9456_v46  ;;  %v9454_v49 = vpack.c.bf16 %v9407_v31, %v9407_v31  ;;  %v20835_v46 = vld [vmem:[%s27298_s11 + $0x354] ss:$8 sps:$4 sm:$0xff]   ;;  %v20833_v59 = vld [vmem:[%s27298_s11 + $0x350] ss:$8 sps:$4 sm:$0xff]  }
0x1731   :  { %10069 = vmatpush1.bf16.msra.mxu0 %v20728_v7  ;;  %v9409_v53 = vpop.f32.mrf.mxu1  ;;  %v9451_v56 = vpop.f32.mrf.mxu0  ;;  %10100 = vmatprep.mubr.bf16.mxu0 %v9323_v38  ;;  %v21757_v38 = vld [vmem:[%s27295_s8 + $0x8] sm:$0xf]  ;;  %v20799_v31 = vld [vmem:[%s27298_s11 + $0x94] ss:$8 sps:$4 sm:$0xff]  }
0x1732   :  { %v9455_v11 = vpack.c.bf16 %v9409_v53, %v9409_v53  ;;  %10070 = vmatprep.subr.bf16.mxu0 %v20736_v17  ;;  %v20830_v7 = vld [vmem:[%s27298_s11 + $0x360] ss:$8 sps:$4 sm:$0xff]   ;;  %v20797_v53 = vld [vmem:[%s27298_s11 + $0x90] ss:$8 sps:$4 sm:$0xff]  }
0x1733   :  { %v19766_v61 = vpop.f32.mrf.mxu0  ;;  %v9411_v27 = vpop.f32.mrf.mxu1  ;;  %v20794_v17 = vld [vmem:[%s27298_s11 + $0xa0] ss:$8 sps:$4 sm:$0xff]  }
0x1734   :  { %9778 = vmatprep.mubr.bf16.mxu1 %v9455_v11  ;;  %v20836_v56 = vld [vmem:[%s27298_s11 + $0x340] ss:$8 sps:$4 sm:$0xff]   ;;  %v20841_v11 = vld [vmem:[%s27298_s11 + $0x334] ss:$8 sps:$4 sm:$0xff]   ;;  %v9322_v61 = vpack.c.bf16 %v24946_v4, %v24946_v4  ;;  %v20845_v4 = vld [vmem:[%s27298_s11 + $0x310] ss:$8 sps:$4 sm:$0xff]  }
0x1735   :  { %10071 = vmatpush1.bf16.msra.mxu0 %v20734_v32  ;;  %9779 = vmatmul.mubr.bf16.vlgmr.msra.gmra.mxu1 %v9454_v49  ;;  %v9412_v33 = vpop.f32.mrf.mxu1  ;;  %v20838_v49 = vld [vmem:[%s27298_s11 + $0x344] ss:$8 sps:$4 sm:$0xff]   ;;  %v20805_v27 = vld [vmem:[%s27298_s11 + $0x474] ss:$8 sps:$4 sm:$0xff]  }
0x1736   :  { %10110 = vmatpush1.bf16.msra.mxu1 %v20737_v5  ;;  %10072 = vmatprep.subr.bf16.mxu0 %v20742_v43  ;;  %v20802_v32 = vld [vmem:[%s27298_s11 + $0x84] ss:$8 sps:$4 sm:$0xff]   ;;  %v20800_v5 = vld [vmem:[%s27298_s11 + $0x80] ss:$8 sps:$4 sm:$0xff]   ;;  %v20839_v43 = vld [vmem:[%s27298_s11 + $0x330] ss:$8 sps:$4 sm:$0xff]  }
0x1737   :  { %10111 = vmatprep.subr.bf16.mxu1 %v20745_v36  ;;  %10141 = vmatprep.mubr.bf16.mxu1 %v27320_v39  ;;  %v20844_v36 = vld [vmem:[%s27298_s11 + $0x324] ss:$8 sps:$4 sm:$0xff]   ;;  %v20847_v33 = vld [vmem:[%s27298_s11 + $0x314] ss:$8 sps:$4 sm:$0xff]  }
0x1739   :  { %10073 = vmatpush1.bf16.msra.mxu0 %v20740_v62  ;;  %v20842_v62 = vld [vmem:[%s27298_s11 + $0x320] ss:$8 sps:$4 sm:$0xff]  }
0x173a   :  { %10112 = vmatpush1.bf16.msra.mxu1 %v20743_v24  ;;  %10074 = vmatprep.subr.bf16.mxu0 %v20748_v14  ;;  %v20850_v24 = vld [vmem:[%s27298_s11 + $0x304] ss:$8 sps:$4 sm:$0xff]   ;;  %v20803_v14 = vld [vmem:[%s27298_s11 + $0x470] ss:$8 sps:$4 sm:$0xff]  }
0x173b   :  { %10113 = vmatprep.subr.bf16.mxu1 %v20751_v1  ;;  %v20808_v1 = vld [vmem:[%s27298_s11 + $0x464] ss:$8 sps:$4 sm:$0xff]  }
0x173d   :  { %10075 = vmatpush1.bf16.msra.mxu0 %v20746_v2  ;;  %v20848_v2 = vld [vmem:[%s27298_s11 + $0x300] ss:$8 sps:$4 sm:$0xff]  }
0x173e   :  { %10114 = vmatpush1.bf16.msra.mxu1 %v20749_v60  ;;  %10076 = vmatprep.subr.bf16.mxu0 %v20754_v22  ;;  %v20853_v60 = vld [vmem:[%s27298_s11 + $0x3f4] ss:$8 sps:$4 sm:$0xff]   ;;  %v20806_v22 = vld [vmem:[%s27298_s11 + $0x460] ss:$8 sps:$4 sm:$0xff]  }
0x173f   :  { %10115 = vmatprep.subr.bf16.mxu1 %v20757_v30  ;;  %v20811_v30 = vld [vmem:[%s27298_s11 + $0x454] ss:$8 sps:$4 sm:$0xff]  }
0x1741   :  { %10077 = vmatpush1.bf16.msra.mxu0 %v20752_v48  ;;  %v20851_v48 = vld [vmem:[%s27298_s11 + $0x3f0] ss:$8 sps:$4 sm:$0xff]  }
0x1742   :  { %10116 = vmatpush1.bf16.msra.mxu1 %v20755_v58  ;;  %10078 = vmatprep.subr.bf16.mxu0 %v20760_v51  ;;  %v20856_v58 = vld [vmem:[%s27298_s11 + $0x3e4] ss:$8 sps:$4 sm:$0xff]   ;;  %v20809_v51 = vld [vmem:[%s27298_s11 + $0x450] ss:$8 sps:$4 sm:$0xff]  }
0x1743   :  { %10117 = vmatprep.subr.bf16.mxu1 %v20763_v15  ;;  %v20814_v15 = vld [vmem:[%s27298_s11 + $0x444] ss:$8 sps:$4 sm:$0xff]  }
0x1745   :  { %10079 = vmatpush1.bf16.msra.mxu0 %v20758_v23  ;;  %v20854_v23 = vld [vmem:[%s27298_s11 + $0x3e0] ss:$8 sps:$4 sm:$0xff]  }
0x1746   :  { %10118 = vmatpush1.bf16.msra.mxu1 %v20761_v52  ;;  %10080 = vmatprep.subr.bf16.mxu0 %v20766_v45  ;;  %v20859_v52 = vld [vmem:[%s27298_s11 + $0x3d4] ss:$8 sps:$4 sm:$0xff]   ;;  %v20812_v45 = vld [vmem:[%s27298_s11 + $0x440] ss:$8 sps:$4 sm:$0xff]  }
0x1747   :  { %10119 = vmatprep.subr.bf16.mxu1 %v20769_v26  ;;  %v20817_v26 = vld [vmem:[%s27298_s11 + $0x434] ss:$8 sps:$4 sm:$0xff]  }
0x1749   :  { %10081 = vmatpush1.bf16.msra.mxu0 %v20764_v20  ;;  %v20857_v20 = vld [vmem:[%s27298_s11 + $0x3d0] ss:$8 sps:$4 sm:$0xff]  }
0x174a   :  { %10120 = vmatpush1.bf16.msra.mxu1 %v20767_v42  ;;  %10082 = vmatprep.subr.bf16.mxu0 %v20772_v47  ;;  %v20862_v42 = vld [vmem:[%s27298_s11 + $0x3c4] ss:$8 sps:$4 sm:$0xff]   ;;  %v20815_v47 = vld [vmem:[%s27298_s11 + $0x430] ss:$8 sps:$4 sm:$0xff]  }
0x174b   :  { %10121 = vmatprep.subr.bf16.mxu1 %v20775_v40  ;;  %v20820_v40 = vld [vmem:[%s27298_s11 + $0x424] ss:$8 sps:$4 sm:$0xff]  }
0x174d   :  { %10083 = vmatpush1.bf16.msra.mxu0 %v20770_v16  ;;  %v20860_v16 = vld [vmem:[%s27298_s11 + $0x3c0] ss:$8 sps:$4 sm:$0xff]  }
0x174e   :  { %10122 = vmatpush1.bf16.msra.mxu1 %v20773_v50  ;;  %10084 = vmatprep.subr.bf16.mxu0 %v20778_v6  ;;  %v20865_v50 = vld [vmem:[%s27298_s11 + $0x3b4] ss:$8 sps:$4 sm:$0xff]   ;;  %v20818_v6 = vld [vmem:[%s27298_s11 + $0x420] ss:$8 sps:$4 sm:$0xff]  }
0x174f   :  { %10123 = vmatprep.subr.bf16.mxu1 %v20781_v18  ;;  %v20823_v18 = vld [vmem:[%s27298_s11 + $0x414] ss:$8 sps:$4 sm:$0xff]  }
0x1751   :  { %10085 = vmatpush2.bf16.msra.mxu0 %v20776_v0  ;;  %v20863_v0 = vld [vmem:[%s27298_s11 + $0x3b0] ss:$8 sps:$4 sm:$0xff]  }
0x1752   :  { %10124 = vmatpush1.bf16.msra.mxu1 %v20779_v29  ;;  %10086 = vmatprep.subr.bf16.mxu0 %v20784_v34  ;;  %v20821_v29 = vld [vmem:[%s27298_s11 + $0x410] ss:$8 sps:$4 sm:$0xff]   ;;  %v20826_v34 = vld [vmem:[%s27298_s11 + $0x404] ss:$8 sps:$4 sm:$0xff]  }
0x1753   :  { %17900 = vmatprep.subr.msk.bf16.mxu1 %vm5827_vm2, %v24766_v63 }
0x1755   :  { %10087 = vmatpush2.bf16.msra.mxu0 %v20782_v28  ;;  %10142 = vmatmul.mubr.bf16.vlgmr.msra.gmra.mxu1 %v9324_v19  ;;  %v20824_v28 = vld [vmem:[%s27298_s11 + $0x400] ss:$8 sps:$4 sm:$0xff]   ;;  %v20868_v19 = vld [vmem:[%s27298_s11 + $0x3a4] ss:$8 sps:$4 sm:$0xff]  }
0x1756   :  { %10165 = vmatpush1.bf16.msra.mxu1 %v24770_v44  ;;  %10088 = vmatprep.subr.bf16.mxu0 %v20787_v12  ;;  %v20866_v12 = vld [vmem:[%s27298_s11 + $0x3a0] ss:$8 sps:$4 sm:$0xff]  }
0x1757   :  { %10182 = vmatprep.mubr.bf16.mxu1 %v27320_v39  ;;  %10523 = vmatprep.subr.bf16.mxu1 %v20829_v13  ;;  %v20869_v13 = vld [vmem:[%s27298_s11 + $0x390] ss:$8 sps:$4 sm:$0xff]  }
0x1759   :  { %10089 = vmatpush2.bf16.msra.mxu0 %v20785_v57  ;;  %v20871_v57 = vld [vmem:[%s27298_s11 + $0x394] ss:$8 sps:$4 sm:$0xff]  }
0x175a   :  { %10090 = vmatprep.subr.bf16.mxu0 %v20790_v37  ;;  %v20874_v37 = vld [vmem:[%s27298_s11 + $0x384] ss:$8 sps:$4 sm:$0xff]  }
0x175d   :  { %10091 = vmatpush2.bf16.msra.mxu0 %v20788_v35  ;;  %17901 = vmatmul.mubr.msk.bf16.vlgmr.msra.gmra.mxu1 %vm5823_vm3, %v21757_v38  ;;  %v20872_v35 = vld [vmem:[%s27298_s11 + $0x380] ss:$8 sps:$4 sm:$0xff]  }
0x175e   :  { %10092 = vmatprep.subr.bf16.mxu0 %v20793_v54  ;;  %10524 = vmatpush1.bf16.msra.mxu1 %v20827_v8  ;;  %v20877_v54 = vld [vmem:[%s27298_s11 + $0x5f4] ss:$8 sps:$4 sm:$0xff]  }
0x175f   :  { %10525 = vmatprep.subr.bf16.mxu1 %v20832_v21 }
0x1761   :  { %10093 = vmatpush2.bf16.msra.mxu0 %v20791_v41 }
0x1762   :  { %10094 = vmatprep.subr.bf16.mxu0 %v20796_v55  ;;  %10526 = vmatpush1.bf16.msra.mxu1 %v20830_v7 }
0x1763   :  { %10527 = vmatprep.subr.bf16.mxu1 %v20835_v46 }
0x1765   :  { %10095 = vmatpush2.bf16.msra.mxu0 %v20794_v17 }
0x1766   :  { %10096 = vmatprep.subr.bf16.mxu0 %v20799_v31  ;;  %10528 = vmatpush1.bf16.msra.mxu1 %v20833_v59 }
0x1767   :  { %10529 = vmatprep.subr.bf16.mxu1 %v20838_v49 }
0x1769   :  { %10097 = vmatpush2.bf16.msra.mxu0 %v20797_v53 }
0x176a   :  { %10098 = vmatprep.subr.bf16.mxu0 %v20802_v32  ;;  %10530 = vmatpush1.bf16.msra.mxu1 %v20836_v56 }
0x176b   :  { %10531 = vmatprep.subr.bf16.mxu1 %v20841_v11 }
0x176d   :  { %10099 = vmatpush2.bf16.msra.mxu0 %v20800_v5 }
0x176e   :  { %19767 = vmatprep.subr.bf16.mxu0 %v21796_v25  ;;  %10532 = vmatpush1.bf16.msra.mxu1 %v20839_v43 }
0x176f   :  { %10533 = vmatprep.subr.bf16.mxu1 %v20844_v36 }
0x1770   :  { %10101 = vmatmul.mubr.bf16.vlgmr.msra.gmra.mxu0 %v9322_v61  ;;  %v20875_v61 = vld [vmem:[%s27298_s11 + $0x5f0] ss:$8 sps:$4 sm:$0xff]  }
0x1771   :  { %19768 = vmatpush3.bf16.msra.mxu0 %v24764_v3  ;;  %19769 = vmatprep.mubr.msk.bf16.mxu0 %vm21797_vm4, %v21796_v25 }
0x1772   :  { %10564 = vmatprep.subr.bf16.mxu0 %v20805_v27  ;;  %10534 = vmatpush1.bf16.msra.mxu1 %v20842_v62  ;;  %v20880_v27 = vld [vmem:[%s27298_s11 + $0x5e4] ss:$8 sps:$4 sm:$0xff]  }
0x1773   :  { %10535 = vmatprep.subr.bf16.mxu1 %v20847_v33 }
0x1776   :  { %10536 = vmatpush1.bf16.msra.mxu1 %v20845_v4  ;;  %v20878_v4 = vld [vmem:[%s27298_s11 + $0x5e0] ss:$8 sps:$4 sm:$0xff]  }
0x1777   :  { %10537 = vmatprep.subr.bf16.mxu1 %v20850_v24  ;;  %v20883_v24 = vld [vmem:[%s27298_s11 + $0x5d4] ss:$8 sps:$4 sm:$0xff]  }
0x1778   :  { %19770 = vmatmul.mubr.msk.bf16.vlgmr.msra.gmra.mxu0 %vm5823_vm3, %v21757_v38 }
0x1779   :  { %10565 = vmatpush1.bf16.msra.mxu0 %v20803_v14  ;;  %10596 = vmatprep.mubr.bf16.mxu0 %v27320_v39  ;;  %v20881_v14 = vld [vmem:[%s27298_s11 + $0x5d0] ss:$8 sps:$4 sm:$0xff]  }
0x177a   :  { %10566 = vmatprep.subr.bf16.mxu0 %v20808_v1  ;;  %10538 = vmatpush1.bf16.msra.mxu1 %v20848_v2  ;;  %v20886_v1 = vld [vmem:[%s27298_s11 + $0x5c4] ss:$8 sps:$4 sm:$0xff]   ;;  %v20884_v2 = vld [vmem:[%s27298_s11 + $0x5c0] ss:$8 sps:$4 sm:$0xff]  }
0x177b   :  { %10539 = vmatprep.subr.bf16.mxu1 %v20853_v60  ;;  %v20889_v60 = vld [vmem:[%s27298_s11 + $0x5b4] ss:$8 sps:$4 sm:$0xff]  }
0x177d   :  { %10567 = vmatpush1.bf16.msra.mxu0 %v20806_v22 }
0x177e   :  { %10568 = vmatprep.subr.bf16.mxu0 %v20811_v30  ;;  %10540 = vmatpush2.bf16.msra.mxu1 %v20851_v48  ;;  %v20887_v30 = vld [vmem:[%s27298_s11 + $0x5b0] ss:$8 sps:$4 sm:$0xff]  }
0x177f   :  { %10541 = vmatprep.subr.bf16.mxu1 %v20856_v58  ;;  %v20892_v58 = vld [vmem:[%s27298_s11 + $0x5a4] ss:$8 sps:$4 sm:$0xff]  }
0x1781   :  { %10569 = vmatpush1.bf16.msra.mxu0 %v20809_v51 }
0x1782   :  { %10570 = vmatprep.subr.bf16.mxu0 %v20814_v15  ;;  %10542 = vmatpush2.bf16.msra.mxu1 %v20854_v23 }
0x1783   :  { %10543 = vmatprep.subr.bf16.mxu1 %v20859_v52 }
0x1785   :  { %10571 = vmatpush1.bf16.msra.mxu0 %v20812_v45  ;;  %v20890_v45 = vld [vmem:[%s27298_s11 + $0x5a0] ss:$8 sps:$4 sm:$0xff]  }
0x1786   :  { %10572 = vmatprep.subr.bf16.mxu0 %v20817_v26  ;;  %10544 = vmatpush2.bf16.msra.mxu1 %v20857_v20  ;;  %v20895_v20 = vld [vmem:[%s27298_s11 + $0x594] ss:$8 sps:$4 sm:$0xff]  }
0x1787   :  { %10545 = vmatprep.subr.bf16.mxu1 %v20862_v42 }
0x1789   :  { %10573 = vmatpush1.bf16.msra.mxu0 %v20815_v47 }
0x178a   :  { %10574 = vmatprep.subr.bf16.mxu0 %v20820_v40  ;;  %10546 = vmatpush2.bf16.msra.mxu1 %v20860_v16  ;;  %v20893_v40 = vld [vmem:[%s27298_s11 + $0x590] ss:$8 sps:$4 sm:$0xff]  }
0x178b   :  { %10547 = vmatprep.subr.bf16.mxu1 %v20865_v50  ;;  %v20898_v50 = vld [vmem:[%s27298_s11 + $0x584] ss:$8 sps:$4 sm:$0xff]  }
0x178d   :  { %10575 = vmatpush1.bf16.msra.mxu0 %v20818_v6 }
0x178e   :  { %10576 = vmatprep.subr.bf16.mxu0 %v20823_v18  ;;  %10548 = vmatpush2.bf16.msra.mxu1 %v20863_v0  ;;  %v20896_v18 = vld [vmem:[%s27298_s11 + $0x580] ss:$8 sps:$4 sm:$0xff]  }
0x178f   :  { %10549 = vmatprep.subr.bf16.mxu1 %v20868_v19  ;;  %v20904_v19 = vld [vmem:[%s27298_s11 + $0x4e4] ss:$8 sps:$4 sm:$0xff]  }
0x1791   :  { %10577 = vmatpush1.bf16.msra.mxu0 %v20821_v29 }
0x1792   :  { %10578 = vmatprep.subr.bf16.mxu0 %v20826_v34  ;;  %10550 = vmatpush2.bf16.msra.mxu1 %v20866_v12  ;;  %v20901_v34 = vld [vmem:[%s27298_s11 + $0x4f4] ss:$8 sps:$4 sm:$0xff]   ;;  %v20899_v12 = vld [vmem:[%s27298_s11 + $0x4f0] ss:$8 sps:$4 sm:$0xff]  }
0x1793   :  { %10551 = vmatprep.subr.bf16.mxu1 %v20871_v57  ;;  %v20907_v57 = vld [vmem:[%s27298_s11 + $0x4d4] ss:$8 sps:$4 sm:$0xff]  }
0x1795   :  { %10579 = vmatpush1.bf16.msra.mxu0 %v20824_v28  ;;  %v21758_v28 = vld [vmem:[%s27295_s8 + $0xc] sm:$0xf] }
0x1796   :  { %17999 = vmatprep.subr.msk.bf16.mxu0 %vm5827_vm2, %v24766_v63  ;;  %10552 = vmatpush2.bf16.msra.mxu1 %v20869_v13  ;;  %v20902_v13 = vld [vmem:[%s27298_s11 + $0x4e0] ss:$8 sps:$4 sm:$0xff]  }
0x1797   :  { %10553 = vmatprep.subr.bf16.mxu1 %v20874_v37  ;;  %v20905_v37 = vld [vmem:[%s27298_s11 + $0x4d0] ss:$8 sps:$4 sm:$0xff]  }
0x179a   :  { %10554 = vmatpush2.bf16.msra.mxu1 %v20872_v35  ;;  %v20910_v35 = vld [vmem:[%s27298_s11 + $0x4c4] ss:$8 sps:$4 sm:$0xff]  }
0x179b   :  { %11021 = vmatprep.subr.bf16.mxu1 %v20877_v54  ;;  %v20908_v54 = vld [vmem:[%s27298_s11 + $0x4c0] ss:$8 sps:$4 sm:$0xff]  }
0x17f0   :  { %v9821_v8 = vpop.f32.mrf.mxu0 }
0x17f2   :  { %v9823_v21 = vpop.f32.mrf.mxu0 }
0x17f4   :  { %v9825_v38 = vpop.f32.mrf.mxu0 }
0x17f5   :  { %v9780_v41 = vpop.f32.mrf.mxu1  ;;  %v20916_v38 = vld [vmem:[%s27298_s11 + $0x4a4] ss:$8 sps:$4 sm:$0xff]  }
0x17f6   :  { %v9822_v55 = vadd.f32 %v9821_v8, %v9780_v41  ;;  %v9826_v7 = vpop.f32.mrf.mxu0  ;;  %v20913_v8 = vld [vmem:[%s27298_s11 + $0x4b4] ss:$8 sps:$4 sm:$0xff]   ;;  %v20914_v41 = vld [vmem:[%s27298_s11 + $0x4a0] ss:$8 sps:$4 sm:$0xff]  }
0x17f7   :  { %v9782_v46 = vpop.f32.mrf.mxu1  ;;  %v20917_v7 = vld [vmem:[%s27298_s11 + $0x490] ss:$8 sps:$4 sm:$0xff]  }
0x17f8   :  { %v9824_v17 = vadd.f32 %v9823_v21, %v9782_v46  ;;  %v20911_v21 = vld [vmem:[%s27298_s11 + $0x4b0] ss:$8 sps:$4 sm:$0xff]   ;;  %v20922_v46 = vld [vmem:[%s27298_s11 + $0x484] ss:$8 sps:$4 sm:$0xff]  }
0x17f9   :  { %v9784_v31 = vpop.f32.mrf.mxu1 }
0x17fa   :  { %v20925_v31 = vld [vmem:[%s27298_s11 + $0x574] ss:$8 sps:$4 sm:$0xff]  }
0x17fb   :  { %v9785_v59 = vpop.f32.mrf.mxu1 }
0x17fc   :  { %v20923_v59 = vld [vmem:[%s27298_s11 + $0x570] ss:$8 sps:$4 sm:$0xff]  }
0x1815   :  { %v10143_v49 = vpop.f32.mrf.mxu1 }
0x1817   :  { %v10145_v53 = vpop.f32.mrf.mxu1 }
0x1819   :  { %v10147_v32 = vpop.f32.mrf.mxu1 }
0x181a   :  { %v20931_v32 = vld [vmem:[%s27298_s11 + $0x554] ss:$8 sps:$4 sm:$0xff]  }
0x181b   :  { %v10148_v56 = vpop.f32.mrf.mxu1 }
0x181c   :  { %v20929_v56 = vld [vmem:[%s27298_s11 + $0x550] ss:$8 sps:$4 sm:$0xff]  }
0x181d   :  { %v10184_v11 = vpop.f32.mrf.mxu1 }
0x181e   :  { %v10231_v5 = vpack.c.bf16 %v10184_v11, %v10184_v11  ;;  %v20934_v11 = vld [vmem:[%s27298_s11 + $0x544] ss:$8 sps:$4 sm:$0xff]  }
0x181f   :  { %v10186_v43 = vpop.f32.mrf.mxu1 }
0x1820   :  { %v10232_v36 = vpack.c.bf16 %v10186_v43, %v10186_v43  ;;  %v20937_v43 = vld [vmem:[%s27298_s11 + $0x534] ss:$8 sps:$4 sm:$0xff]  }
0x1821   :  { %v10188_v62 = vpop.f32.mrf.mxu1 }
0x1822   :  { %10555 = vmatprep.mubr.bf16.mxu1 %v10232_v36  ;;  %v20935_v36 = vld [vmem:[%s27298_s11 + $0x530] ss:$8 sps:$4 sm:$0xff]   ;;  %v20943_v62 = vld [vmem:[%s27298_s11 + $0x514] ss:$8 sps:$4 sm:$0xff]  }
0x1823   :  { %10556 = vmatmul.mubr.bf16.vlgmr.msra.gmra.mxu1 %v10231_v5  ;;  %v10189_v33 = vpop.f32.mrf.mxu1  ;;  %v20932_v5 = vld [vmem:[%s27298_s11 + $0x540] ss:$8 sps:$4 sm:$0xff]  }
0x1824   :  { %11022 = vmatpush1.bf16.msra.mxu1 %v20875_v61  ;;  %11053 = vmatprep.mubr.bf16.mxu1 %v27320_v39  ;;  %v20940_v61 = vld [vmem:[%s27298_s11 + $0x524] ss:$8 sps:$4 sm:$0xff]   ;;  %v20941_v33 = vld [vmem:[%s27298_s11 + $0x510] ss:$8 sps:$4 sm:$0xff]  }
0x1825   :  { %11023 = vmatprep.subr.bf16.mxu1 %v20880_v27  ;;  %v20938_v27 = vld [vmem:[%s27298_s11 + $0x520] ss:$8 sps:$4 sm:$0xff]  }
0x1828   :  { %11024 = vmatpush1.bf16.msra.mxu1 %v20878_v4  ;;  %v20946_v4 = vld [vmem:[%s27298_s11 + $0x504] ss:$8 sps:$4 sm:$0xff]  }
0x1829   :  { %11025 = vmatprep.subr.bf16.mxu1 %v20883_v24  ;;  %v20944_v24 = vld [vmem:[%s27298_s11 + $0x500] ss:$8 sps:$4 sm:$0xff]  }
0x182c   :  { %11026 = vmatpush1.bf16.msra.mxu1 %v20881_v14  ;;  %v20949_v14 = vld [vmem:[%s27298_s11 + $0x774] ss:$8 sps:$4 sm:$0xff]  }
0x182d   :  { %11027 = vmatprep.subr.bf16.mxu1 %v20886_v1 }
0x1830   :  { %11028 = vmatpush1.bf16.msra.mxu1 %v20884_v2  ;;  %v10102_v22 = vpop.f32.mrf.mxu0 }
0x1831   :  { %v10103_v48 = vadd.f32 %v10102_v22, %v9822_v55  ;;  %11029 = vmatprep.subr.bf16.mxu1 %v20889_v60  ;;  %v20919_v55 = vld [vmem:[%s27298_s11 + $0x494] ss:$8 sps:$4 sm:$0xff]  }
0x1832   :  { %v10104_v51 = vpop.f32.mrf.mxu0 }
0x1833   :  { %v25285_v15 = vadd.f32 %v10143_v49, %v10103_v48  ;;  %v10105_v23 = vadd.f32 %v10104_v51, %v9824_v17  ;;  %v20920_v17 = vld [vmem:[%s27298_s11 + $0x480] ss:$8 sps:$4 sm:$0xff]   ;;  %v20928_v49 = vld [vmem:[%s27298_s11 + $0x564] ss:$8 sps:$4 sm:$0xff]  }
0x1834   :  { %11030 = vmatpush1.bf16.msra.mxu1 %v20887_v30  ;;  %v10106_v52 = vpop.f32.mrf.mxu0 }
0x1835   :  { %v25290_v26 = vadd.f32 %v10145_v53, %v10105_v23  ;;  %11031 = vmatprep.subr.bf16.mxu1 %v20892_v58  ;;  %v20926_v53 = vld [vmem:[%s27298_s11 + $0x560] ss:$8 sps:$4 sm:$0xff]  }
0x1836   :  { %v10107_v42 = vpop.f32.mrf.mxu0 }
0x1838   :  { %11032 = vmatpush1.bf16.msra.mxu1 %v20890_v45  ;;  %v10225_v47 = vpop.f32.mrf.mxu0 }
0x1839   :  { %v10233_v16 = vpack.c.bf16 %v10225_v47, %v10225_v47  ;;  %11033 = vmatprep.subr.bf16.mxu1 %v20895_v20 }
0x183a   :  { %v19771_v6 = vpop.f32.mrf.mxu0 }
0x183b   :  { %10597 = vmatmul.mubr.bf16.vlgmr.msra.gmra.mxu0 %v10233_v16  ;;  %v20947_v16 = vld [vmem:[%s27298_s11 + $0x770] ss:$8 sps:$4 sm:$0xff]  }
0x183c   :  { %10622 = vmatpush1.bf16.msra.mxu0 %v24770_v44  ;;  %11034 = vmatpush1.bf16.msra.mxu1 %v20893_v40  ;;  %v10228_v0 = vpop.f32.mrf.mxu0 }
0x183d   :  { %11035 = vmatprep.subr.bf16.mxu1 %v20898_v50  ;;  %10639 = vmatprep.mubr.bf16.mxu0 %v27320_v39 }
0x183e   :  { %19773 = vmatprep.subr.bf16.mxu0 %v21796_v25  ;;  %v19772_v29 = vpop.f32.mrf.mxu0 }
0x183f   :  { %v20955_v29 = vld [vmem:[%s27298_s11 + $0x754] ss:$8 sps:$4 sm:$0xff]  }
0x1840   :  { %11036 = vmatpush1.bf16.msra.mxu1 %v20896_v18 }
0x1841   :  { %18098 = vmatprep.subr.msk.bf16.mxu1 %vm5827_vm2, %v24766_v63 }
0x1843   :  { %18000 = vmatmul.mubr.msk.bf16.vlgmr.msra.gmra.mxu0 %vm5823_vm3, %v21758_v28 }
0x1844   :  { %19774 = vmatpush3.bf16.msra.mxu0 %v24764_v3  ;;  %19775 = vmatprep.mubr.msk.bf16.mxu0 %vm21797_vm4, %v21796_v25 }
0x1845   :  { %10980 = vmatprep.subr.bf16.mxu0 %v20901_v34 }
0x184b   :  { %19776 = vmatmul.mubr.msk.bf16.vlgmr.msra.gmra.mxu0 %vm5823_vm3, %v21758_v28 }
0x184c   :  { %10981 = vmatpush1.bf16.msra.mxu0 %v20899_v12  ;;  %v20953_v12 = vld [vmem:[%s27298_s11 + $0x750] ss:$8 sps:$4 sm:$0xff]  }
0x184d   :  { %10982 = vmatprep.subr.bf16.mxu0 %v20904_v19  ;;  %v20958_v19 = vld [vmem:[%s27298_s11 + $0x744] ss:$8 sps:$4 sm:$0xff]  }
0x1850   :  { %10983 = vmatpush1.bf16.msra.mxu0 %v20902_v13 }
0x1851   :  { %10984 = vmatprep.subr.bf16.mxu0 %v20907_v57 }
0x1854   :  { %10985 = vmatpush1.bf16.msra.mxu0 %v20905_v37  ;;  %v20956_v37 = vld [vmem:[%s27298_s11 + $0x740] ss:$8 sps:$4 sm:$0xff]  }
0x1855   :  { %10986 = vmatprep.subr.bf16.mxu0 %v20910_v35  ;;  %v20961_v35 = vld [vmem:[%s27298_s11 + $0x734] ss:$8 sps:$4 sm:$0xff]  }
0x1858   :  { %10987 = vmatpush1.bf16.msra.mxu0 %v20908_v54  ;;  %v20973_v54 = vld [vmem:[%s27298_s11 + $0x674] ss:$8 sps:$4 sm:$0xff]  }
0x1859   :  { %10988 = vmatprep.subr.bf16.mxu0 %v20913_v8  ;;  %v21759_v8 = vld [vmem:[%s27295_s8 + $0x10] sm:$0xf] }
0x185c   :  { %10989 = vmatpush1.bf16.msra.mxu0 %v20911_v21  ;;  %v20959_v21 = vld [vmem:[%s27298_s11 + $0x730] ss:$8 sps:$4 sm:$0xff]  }
0x185d   :  { %10990 = vmatprep.subr.bf16.mxu0 %v20916_v38  ;;  %v20964_v38 = vld [vmem:[%s27298_s11 + $0x724] ss:$8 sps:$4 sm:$0xff]  }
0x1860   :  { %10991 = vmatpush1.bf16.msra.mxu0 %v20914_v41  ;;  %v20962_v41 = vld [vmem:[%s27298_s11 + $0x720] ss:$8 sps:$4 sm:$0xff]  }
0x1861   :  { %10992 = vmatprep.subr.bf16.mxu0 %v20919_v55  ;;  %v20967_v55 = vld [vmem:[%s27298_s11 + $0x714] ss:$8 sps:$4 sm:$0xff]  }
0x1864   :  { %10993 = vmatpush1.bf16.msra.mxu0 %v20917_v7  ;;  %v20971_v7 = vld [vmem:[%s27298_s11 + $0x670] ss:$8 sps:$4 sm:$0xff]  }
0x1865   :  { %10994 = vmatprep.subr.bf16.mxu0 %v20922_v46  ;;  %v20976_v46 = vld [vmem:[%s27298_s11 + $0x664] ss:$8 sps:$4 sm:$0xff]  }
0x1868   :  { %10995 = vmatpush1.bf16.msra.mxu0 %v20920_v17  ;;  %v20965_v17 = vld [vmem:[%s27298_s11 + $0x710] ss:$8 sps:$4 sm:$0xff]  }
0x1869   :  { %10996 = vmatprep.subr.bf16.mxu0 %v20925_v31  ;;  %v20970_v31 = vld [vmem:[%s27298_s11 + $0x704] ss:$8 sps:$4 sm:$0xff]  }
0x186c   :  { %10997 = vmatpush2.bf16.msra.mxu0 %v20923_v59  ;;  %v20974_v59 = vld [vmem:[%s27298_s11 + $0x660] ss:$8 sps:$4 sm:$0xff]  }
0x186d   :  { %10998 = vmatprep.subr.bf16.mxu0 %v20928_v49  ;;  %v20979_v49 = vld [vmem:[%s27298_s11 + $0x654] ss:$8 sps:$4 sm:$0xff]  }
0x1870   :  { %10999 = vmatpush2.bf16.msra.mxu0 %v20926_v53  ;;  %v20968_v53 = vld [vmem:[%s27298_s11 + $0x700] ss:$8 sps:$4 sm:$0xff]  }
0x1871   :  { %11000 = vmatprep.subr.bf16.mxu0 %v20931_v32  ;;  %v20977_v32 = vld [vmem:[%s27298_s11 + $0x650] ss:$8 sps:$4 sm:$0xff]  }
0x1874   :  { %11001 = vmatpush2.bf16.msra.mxu0 %v20929_v56  ;;  %v20982_v56 = vld [vmem:[%s27298_s11 + $0x644] ss:$8 sps:$4 sm:$0xff]  }
0x1875   :  { %11002 = vmatprep.subr.bf16.mxu0 %v20934_v11  ;;  %v20980_v11 = vld [vmem:[%s27298_s11 + $0x640] ss:$8 sps:$4 sm:$0xff]  }
0x1878   :  { %11003 = vmatpush2.bf16.msra.mxu0 %v20932_v5  ;;  %v20985_v5 = vld [vmem:[%s27298_s11 + $0x634] ss:$8 sps:$4 sm:$0xff]  }
0x1879   :  { %11004 = vmatprep.subr.bf16.mxu0 %v20937_v43  ;;  %v20983_v43 = vld [vmem:[%s27298_s11 + $0x630] ss:$8 sps:$4 sm:$0xff]  }
0x187c   :  { %11005 = vmatpush2.bf16.msra.mxu0 %v20935_v36  ;;  %v20988_v36 = vld [vmem:[%s27298_s11 + $0x624] ss:$8 sps:$4 sm:$0xff]  }
0x187d   :  { %11006 = vmatprep.subr.bf16.mxu0 %v20940_v61  ;;  %v20986_v61 = vld [vmem:[%s27298_s11 + $0x620] ss:$8 sps:$4 sm:$0xff]  }
0x1880   :  { %11007 = vmatpush2.bf16.msra.mxu0 %v20938_v27  ;;  %v20991_v27 = vld [vmem:[%s27298_s11 + $0x614] ss:$8 sps:$4 sm:$0xff]  }
0x1881   :  { %11008 = vmatprep.subr.bf16.mxu0 %v20943_v62  ;;  %v20989_v62 = vld [vmem:[%s27298_s11 + $0x610] ss:$8 sps:$4 sm:$0xff]  }
0x1884   :  { %11009 = vmatpush2.bf16.msra.mxu0 %v20941_v33  ;;  %v20994_v33 = vld [vmem:[%s27298_s11 + $0x604] ss:$8 sps:$4 sm:$0xff]  }
0x1885   :  { %11010 = vmatprep.subr.bf16.mxu0 %v20946_v4  ;;  %v20992_v4 = vld [vmem:[%s27298_s11 + $0x600] ss:$8 sps:$4 sm:$0xff]  }
0x1888   :  { %11011 = vmatpush2.bf16.msra.mxu0 %v20944_v24  ;;  %v20997_v24 = vld [vmem:[%s27298_s11 + $0x6f4] ss:$8 sps:$4 sm:$0xff]  }
0x1889   :  { %11478 = vmatprep.subr.bf16.mxu0 %v20949_v14  ;;  %v20995_v14 = vld [vmem:[%s27298_s11 + $0x6f0] ss:$8 sps:$4 sm:$0xff]  }
0x18e3   :  { %v10557_v1 = vpop.f32.mrf.mxu1 }
0x18e5   :  { %v10559_v2 = vpop.f32.mrf.mxu1 }
0x18e7   :  { %v10561_v60 = vpop.f32.mrf.mxu1 }
0x18e8   :  { %v21003_v60 = vld [vmem:[%s27298_s11 + $0x6d4] ss:$8 sps:$4 sm:$0xff]  }
0x18e9   :  { %v10562_v22 = vpop.f32.mrf.mxu1 }
0x18ea   :  { %v21001_v22 = vld [vmem:[%s27298_s11 + $0x6d0] ss:$8 sps:$4 sm:$0xff]  }
0x18fb   :  { %v10598_v30 = vpop.f32.mrf.mxu0 }
0x18fc   :  { %v10599_v48 = vadd.f32 %v10598_v30, %v10557_v1  ;;  %v21000_v1 = vld [vmem:[%s27298_s11 + $0x6e4] ss:$8 sps:$4 sm:$0xff]  }
0x18fd   :  { %v10600_v58 = vpop.f32.mrf.mxu0  ;;  %v21006_v30 = vld [vmem:[%s27298_s11 + $0x6c4] ss:$8 sps:$4 sm:$0xff]  }
0x18fe   :  { %v25417_v51 = vadd.f32 %v10599_v48, %v25285_v15  ;;  %v10601_v23 = vadd.f32 %v10600_v58, %v10559_v2  ;;  %v20952_v15 = vld [vmem:[%s27298_s11 + $0x764] ss:$8 sps:$4 sm:$0xff]   ;;  %v20998_v2 = vld [vmem:[%s27298_s11 + $0x6e0] ss:$8 sps:$4 sm:$0xff]   ;;  %v21009_v58 = vld [vmem:[%s27298_s11 + $0x6b4] ss:$8 sps:$4 sm:$0xff]  }
0x18ff   :  { %v10602_v52 = vpop.f32.mrf.mxu0  ;;  %v21004_v48 = vld [vmem:[%s27298_s11 + $0x6c0] ss:$8 sps:$4 sm:$0xff]  }
0x1900   :  { %v25420_v45 = vadd.f32 %v10601_v23, %v25290_v26  ;;  %v20950_v26 = vld [vmem:[%s27298_s11 + $0x760] ss:$8 sps:$4 sm:$0xff]   ;;  %v21007_v23 = vld [vmem:[%s27298_s11 + $0x6b0] ss:$8 sps:$4 sm:$0xff]   ;;  %v21012_v52 = vld [vmem:[%s27298_s11 + $0x6a4] ss:$8 sps:$4 sm:$0xff]  }
0x1901   :  { %v10603_v20 = vpop.f32.mrf.mxu0 }
0x1902   :  { %v21010_v20 = vld [vmem:[%s27298_s11 + $0x6a0] ss:$8 sps:$4 sm:$0xff]  }
0x1903   :  { %v10641_v42 = vpop.f32.mrf.mxu0 }
0x1904   :  { %v10688_v50 = vpack.c.bf16 %v10641_v42, %v10641_v42  ;;  %v21015_v42 = vld [vmem:[%s27298_s11 + $0x694] ss:$8 sps:$4 sm:$0xff]  }
0x1905   :  { %v10643_v47 = vpop.f32.mrf.mxu0 }
0x1906   :  { %v10689_v40 = vpack.c.bf16 %v10643_v47, %v10643_v47  ;;  %v21013_v47 = vld [vmem:[%s27298_s11 + $0x690] ss:$8 sps:$4 sm:$0xff]  }
0x1907   :  { %v10645_v6 = vpop.f32.mrf.mxu0 }
0x1908   :  { %11012 = vmatprep.mubr.bf16.mxu0 %v10689_v40  ;;  %v21018_v40 = vld [vmem:[%s27298_s11 + $0x684] ss:$8 sps:$4 sm:$0xff]  }
0x1909   :  { %v10646_v18 = vpop.f32.mrf.mxu0  ;;  %11013 = vmatmul.mubr.bf16.vlgmr.msra.gmra.mxu0 %v10688_v50  ;;  %v21021_v50 = vld [vmem:[%s27298_s11 + $0x8f4] ss:$8 sps:$4 sm:$0xff]  }
0x190a   :  { %11479 = vmatpush1.bf16.msra.mxu0 %v20947_v16  ;;  %11510 = vmatprep.mubr.bf16.mxu0 %v27320_v39  ;;  %v21016_v16 = vld [vmem:[%s27298_s11 + $0x680] ss:$8 sps:$4 sm:$0xff]  }
0x190b   :  { %v10682_v0 = vpop.f32.mrf.mxu0  ;;  %11480 = vmatprep.subr.bf16.mxu0 %v20952_v15 }
0x190c   :  { %v10690_v34 = vpack.c.bf16 %v10682_v0, %v10682_v0 }
0x190d   :  { %v19777_v28 = vpop.f32.mrf.mxu0 }
0x190e   :  { %11481 = vmatpush1.bf16.msra.mxu0 %v20950_v26  ;;  %11054 = vmatmul.mubr.bf16.vlgmr.msra.gmra.mxu1 %v10690_v34 }
0x190f   :  { %11079 = vmatpush1.bf16.msra.mxu1 %v24770_v44  ;;  %11482 = vmatprep.subr.bf16.mxu0 %v20955_v29  ;;  %v10685_v13 = vpop.f32.mrf.mxu0 }
0x1910   :  { %11096 = vmatprep.mubr.bf16.mxu1 %v27320_v39  ;;  %19779 = vmatprep.subr.bf16.mxu1 %v21796_v25 }
0x1911   :  { %v19778_v57 = vpop.f32.mrf.mxu0 }
0x1912   :  { %11483 = vmatpush1.bf16.msra.mxu0 %v20953_v12 }
0x1913   :  { %11484 = vmatprep.subr.bf16.mxu0 %v20958_v19 }
0x1916   :  { %11485 = vmatpush1.bf16.msra.mxu0 %v20956_v37  ;;  %18099 = vmatmul.mubr.msk.bf16.vlgmr.msra.gmra.mxu1 %vm5823_vm3, %v21759_v8 }
0x1917   :  { %19780 = vmatpush3.bf16.msra.mxu1 %v24764_v3  ;;  %11486 = vmatprep.subr.bf16.mxu0 %v20961_v35 }
0x1918   :  { %19781 = vmatprep.mubr.msk.bf16.mxu1 %vm21797_vm4, %v21796_v25  ;;  %11437 = vmatprep.subr.bf16.mxu1 %v20973_v54 }
0x191a   :  { %11487 = vmatpush1.bf16.msra.mxu0 %v20959_v21 }
0x191b   :  { %11488 = vmatprep.subr.bf16.mxu0 %v20964_v38 }
0x191e   :  { %11489 = vmatpush1.bf16.msra.mxu0 %v20962_v41  ;;  %19782 = vmatmul.mubr.msk.bf16.vlgmr.msra.gmra.mxu1 %vm5823_vm3, %v21759_v8  ;;  %v21019_v8 = vld [vmem:[%s27298_s11 + $0x8f0] ss:$8 sps:$4 sm:$0xff]  }
0x191f   :  { %11490 = vmatprep.subr.bf16.mxu0 %v20967_v55  ;;  %11438 = vmatpush1.bf16.msra.mxu1 %v20971_v7  ;;  %v21027_v7 = vld [vmem:[%s27298_s11 + $0x8d4] ss:$8 sps:$4 sm:$0xff]  }
0x1920   :  { %11439 = vmatprep.subr.bf16.mxu1 %v20976_v46 }
0x1922   :  { %11491 = vmatpush1.bf16.msra.mxu0 %v20965_v17 }
0x1923   :  { %11492 = vmatprep.subr.bf16.mxu0 %v20970_v31  ;;  %11440 = vmatpush1.bf16.msra.mxu1 %v20974_v59  ;;  %v21025_v31 = vld [vmem:[%s27298_s11 + $0x8d0] ss:$8 sps:$4 sm:$0xff]   ;;  %v21030_v59 = vld [vmem:[%s27298_s11 + $0x8c4] ss:$8 sps:$4 sm:$0xff]  }
0x1924   :  { %11441 = vmatprep.subr.bf16.mxu1 %v20979_v49 }
0x1926   :  { %11493 = vmatpush1.bf16.msra.mxu0 %v20968_v53 }
0x1927   :  { %18197 = vmatprep.subr.msk.bf16.mxu0 %vm5827_vm2, %v24766_v63  ;;  %11442 = vmatpush1.bf16.msra.mxu1 %v20977_v32  ;;  %v21028_v32 = vld [vmem:[%s27298_s11 + $0x8c0] ss:$8 sps:$4 sm:$0xff]  }
0x1928   :  { %11443 = vmatprep.subr.bf16.mxu1 %v20982_v56  ;;  %v21033_v56 = vld [vmem:[%s27298_s11 + $0x8b4] ss:$8 sps:$4 sm:$0xff]  }
0x192b   :  { %11444 = vmatpush1.bf16.msra.mxu1 %v20980_v11  ;;  %v21045_v11 = vld [vmem:[%s27298_s11 + $0x7f4] ss:$8 sps:$4 sm:$0xff]  }
0x192c   :  { %11445 = vmatprep.subr.bf16.mxu1 %v20985_v5  ;;  %v21760_v5 = vld [vmem:[%s27295_s8 + $0x14] sm:$0xf] }
0x192f   :  { %11446 = vmatpush1.bf16.msra.mxu1 %v20983_v43  ;;  %v21031_v43 = vld [vmem:[%s27298_s11 + $0x8b0] ss:$8 sps:$4 sm:$0xff]  }
0x1930   :  { %11447 = vmatprep.subr.bf16.mxu1 %v20988_v36  ;;  %v21036_v36 = vld [vmem:[%s27298_s11 + $0x8a4] ss:$8 sps:$4 sm:$0xff]  }
0x1933   :  { %11448 = vmatpush1.bf16.msra.mxu1 %v20986_v61  ;;  %v21034_v61 = vld [vmem:[%s27298_s11 + $0x8a0] ss:$8 sps:$4 sm:$0xff]  }
0x1934   :  { %11449 = vmatprep.subr.bf16.mxu1 %v20991_v27  ;;  %v21039_v27 = vld [vmem:[%s27298_s11 + $0x894] ss:$8 sps:$4 sm:$0xff]  }
0x1937   :  { %11450 = vmatpush1.bf16.msra.mxu1 %v20989_v62  ;;  %v21043_v62 = vld [vmem:[%s27298_s11 + $0x7f0] ss:$8 sps:$4 sm:$0xff]  }
0x1938   :  { %11451 = vmatprep.subr.bf16.mxu1 %v20994_v33  ;;  %v21048_v33 = vld [vmem:[%s27298_s11 + $0x7e4] ss:$8 sps:$4 sm:$0xff]  }
0x193b   :  { %11452 = vmatpush1.bf16.msra.mxu1 %v20992_v4  ;;  %v21037_v4 = vld [vmem:[%s27298_s11 + $0x890] ss:$8 sps:$4 sm:$0xff]  }
0x193c   :  { %11453 = vmatprep.subr.bf16.mxu1 %v20997_v24  ;;  %v21042_v24 = vld [vmem:[%s27298_s11 + $0x884] ss:$8 sps:$4 sm:$0xff]  }
0x193f   :  { %11454 = vmatpush2.bf16.msra.mxu1 %v20995_v14  ;;  %v21046_v14 = vld [vmem:[%s27298_s11 + $0x7e0] ss:$8 sps:$4 sm:$0xff]  }
0x1940   :  { %11455 = vmatprep.subr.bf16.mxu1 %v21000_v1  ;;  %v21051_v1 = vld [vmem:[%s27298_s11 + $0x7d4] ss:$8 sps:$4 sm:$0xff]  }
0x1943   :  { %11456 = vmatpush2.bf16.msra.mxu1 %v20998_v2  ;;  %v21040_v2 = vld [vmem:[%s27298_s11 + $0x880] ss:$8 sps:$4 sm:$0xff]  }
0x1944   :  { %11457 = vmatprep.subr.bf16.mxu1 %v21003_v60  ;;  %v21049_v60 = vld [vmem:[%s27298_s11 + $0x7d0] ss:$8 sps:$4 sm:$0xff]  }
0x1947   :  { %11458 = vmatpush2.bf16.msra.mxu1 %v21001_v22  ;;  %v21054_v22 = vld [vmem:[%s27298_s11 + $0x7c4] ss:$8 sps:$4 sm:$0xff]  }
0x1948   :  { %11459 = vmatprep.subr.bf16.mxu1 %v21006_v30  ;;  %v21052_v30 = vld [vmem:[%s27298_s11 + $0x7c0] ss:$8 sps:$4 sm:$0xff]  }
0x194b   :  { %11460 = vmatpush2.bf16.msra.mxu1 %v21004_v48  ;;  %v21057_v48 = vld [vmem:[%s27298_s11 + $0x7b4] ss:$8 sps:$4 sm:$0xff]  }
0x194c   :  { %11461 = vmatprep.subr.bf16.mxu1 %v21009_v58  ;;  %v21055_v58 = vld [vmem:[%s27298_s11 + $0x7b0] ss:$8 sps:$4 sm:$0xff]  }
0x194f   :  { %11462 = vmatpush2.bf16.msra.mxu1 %v21007_v23  ;;  %v21060_v23 = vld [vmem:[%s27298_s11 + $0x7a4] ss:$8 sps:$4 sm:$0xff]  }
0x1950   :  { %11463 = vmatprep.subr.bf16.mxu1 %v21012_v52  ;;  %v21058_v52 = vld [vmem:[%s27298_s11 + $0x7a0] ss:$8 sps:$4 sm:$0xff]  }
0x1953   :  { %11464 = vmatpush2.bf16.msra.mxu1 %v21010_v20  ;;  %v21063_v20 = vld [vmem:[%s27298_s11 + $0x794] ss:$8 sps:$4 sm:$0xff]  }
0x1954   :  { %11465 = vmatprep.subr.bf16.mxu1 %v21015_v42  ;;  %v21061_v42 = vld [vmem:[%s27298_s11 + $0x790] ss:$8 sps:$4 sm:$0xff]  }
0x1957   :  { %11466 = vmatpush2.bf16.msra.mxu1 %v21013_v47  ;;  %v21066_v47 = vld [vmem:[%s27298_s11 + $0x784] ss:$8 sps:$4 sm:$0xff]  }
0x1958   :  { %11467 = vmatprep.subr.bf16.mxu1 %v21018_v40  ;;  %v21064_v40 = vld [vmem:[%s27298_s11 + $0x780] ss:$8 sps:$4 sm:$0xff]  }
0x195b   :  { %11468 = vmatpush2.bf16.msra.mxu1 %v21016_v16  ;;  %v21069_v16 = vld [vmem:[%s27298_s11 + $0x874] ss:$8 sps:$4 sm:$0xff]  }
0x195c   :  { %11935 = vmatprep.subr.bf16.mxu1 %v21021_v50  ;;  %v21067_v50 = vld [vmem:[%s27298_s11 + $0x870] ss:$8 sps:$4 sm:$0xff]  }
0x19c9   :  { %v11014_v6 = vpop.f32.mrf.mxu0 }
0x19cb   :  { %v11016_v15 = vpop.f32.mrf.mxu0 }
0x19cd   :  { %v11018_v18 = vpop.f32.mrf.mxu0 }
0x19ce   :  { %v11055_v26 = vpop.f32.mrf.mxu1  ;;  %v21075_v18 = vld [vmem:[%s27298_s11 + $0x854] ss:$8 sps:$4 sm:$0xff]  }
0x19cf   :  { %v11056_v0 = vadd.f32 %v11055_v26, %v11014_v6  ;;  %v11019_v29 = vpop.f32.mrf.mxu0  ;;  %v21072_v6 = vld [vmem:[%s27298_s11 + $0x864] ss:$8 sps:$4 sm:$0xff]   ;;  %v21073_v26 = vld [vmem:[%s27298_s11 + $0x850] ss:$8 sps:$4 sm:$0xff]  }
0x19d0   :  { %v11057_v34 = vpop.f32.mrf.mxu1  ;;  %v21076_v29 = vld [vmem:[%s27298_s11 + $0x840] ss:$8 sps:$4 sm:$0xff]  }
0x19d1   :  { %v25581_v28 = vadd.f32 %v11056_v0, %v25417_v51  ;;  %v11058_v12 = vadd.f32 %v11057_v34, %v11016_v15  ;;  %v21024_v51 = vld [vmem:[%s27298_s11 + $0x8e4] ss:$8 sps:$4 sm:$0xff]   ;;  %v21070_v15 = vld [vmem:[%s27298_s11 + $0x860] ss:$8 sps:$4 sm:$0xff]   ;;  %v21081_v34 = vld [vmem:[%s27298_s11 + $0x834] ss:$8 sps:$4 sm:$0xff]  }
0x19d2   :  { %v11059_v19 = vpop.f32.mrf.mxu1  ;;  %v21078_v0 = vld [vmem:[%s27298_s11 + $0x844] ss:$8 sps:$4 sm:$0xff]  }
0x19d3   :  { %v25584_v13 = vadd.f32 %v11058_v12, %v25420_v45  ;;  %v21022_v45 = vld [vmem:[%s27298_s11 + $0x8e0] ss:$8 sps:$4 sm:$0xff]   ;;  %v21079_v12 = vld [vmem:[%s27298_s11 + $0x830] ss:$8 sps:$4 sm:$0xff]   ;;  %v21084_v19 = vld [vmem:[%s27298_s11 + $0x824] ss:$8 sps:$4 sm:$0xff]  }
0x19d4   :  { %v11060_v57 = vpop.f32.mrf.mxu1 }
0x19d5   :  { %v21082_v57 = vld [vmem:[%s27298_s11 + $0x820] ss:$8 sps:$4 sm:$0xff]  }
0x19d6   :  { %v11098_v37 = vpop.f32.mrf.mxu1 }
0x19d7   :  { %v11145_v21 = vpack.c.bf16 %v11098_v37, %v11098_v37  ;;  %v21087_v37 = vld [vmem:[%s27298_s11 + $0x814] ss:$8 sps:$4 sm:$0xff]  }
0x19d8   :  { %v11100_v35 = vpop.f32.mrf.mxu1 }
0x19d9   :  { %v11146_v54 = vpack.c.bf16 %v11100_v35, %v11100_v35  ;;  %v21085_v35 = vld [vmem:[%s27298_s11 + $0x810] ss:$8 sps:$4 sm:$0xff]  }
0x19da   :  { %v11102_v38 = vpop.f32.mrf.mxu1 }
0x19db   :  { %11469 = vmatprep.mubr.bf16.mxu1 %v11146_v54  ;;  %v21090_v54 = vld [vmem:[%s27298_s11 + $0x804] ss:$8 sps:$4 sm:$0xff]  }
0x19dc   :  { %v11103_v41 = vpop.f32.mrf.mxu1  ;;  %11470 = vmatmul.mubr.bf16.vlgmr.msra.gmra.mxu1 %v11145_v21  ;;  %v21093_v21 = vld [vmem:[%s27298_s11 + $0xa74] ss:$8 sps:$4 sm:$0xff]  }
0x19dd   :  { %11936 = vmatpush1.bf16.msra.mxu1 %v21019_v8  ;;  %11967 = vmatprep.mubr.bf16.mxu1 %v27320_v39  ;;  %v21088_v8 = vld [vmem:[%s27298_s11 + $0x800] ss:$8 sps:$4 sm:$0xff]  }
0x19de   :  { %v11139_v55 = vpop.f32.mrf.mxu1  ;;  %11937 = vmatprep.subr.bf16.mxu1 %v21024_v51 }
0x19df   :  { %v11147_v46 = vpack.c.bf16 %v11139_v55, %v11139_v55 }
0x19e0   :  { %v19783_v17 = vpop.f32.mrf.mxu1 }
0x19e1   :  { %11938 = vmatpush1.bf16.msra.mxu1 %v21022_v45  ;;  %11511 = vmatmul.mubr.bf16.vlgmr.msra.gmra.mxu0 %v11147_v46 }
0x19e2   :  { %11536 = vmatpush1.bf16.msra.mxu0 %v24770_v44  ;;  %11939 = vmatprep.subr.bf16.mxu1 %v21027_v7  ;;  %v11142_v49 = vpop.f32.mrf.mxu1 }
0x19e3   :  { %11553 = vmatprep.mubr.bf16.mxu0 %v27320_v39  ;;  %19785 = vmatprep.subr.bf16.mxu0 %v21796_v25 }
0x19e4   :  { %v19784_v53 = vpop.f32.mrf.mxu1 }
0x19e5   :  { %11940 = vmatpush1.bf16.msra.mxu1 %v21025_v31 }
0x19e6   :  { %11941 = vmatprep.subr.bf16.mxu1 %v21030_v59 }
0x19e9   :  { %11942 = vmatpush1.bf16.msra.mxu1 %v21028_v32  ;;  %18198 = vmatmul.mubr.msk.bf16.vlgmr.msra.gmra.mxu0 %vm5823_vm3, %v21760_v5 }
0x19ea   :  { %19786 = vmatpush3.bf16.msra.mxu0 %v24764_v3  ;;  %11943 = vmatprep.subr.bf16.mxu1 %v21033_v56 }
0x19eb   :  { %19787 = vmatprep.mubr.msk.bf16.mxu0 %vm21797_vm4, %v21796_v25  ;;  %11894 = vmatprep.subr.bf16.mxu0 %v21045_v11 }
0x19ed   :  { %11944 = vmatpush1.bf16.msra.mxu1 %v21031_v43 }
0x19ee   :  { %11945 = vmatprep.subr.bf16.mxu1 %v21036_v36 }
0x19f1   :  { %11946 = vmatpush1.bf16.msra.mxu1 %v21034_v61  ;;  %19788 = vmatmul.mubr.msk.bf16.vlgmr.msra.gmra.mxu0 %vm5823_vm3, %v21760_v5  ;;  %v21091_v5 = vld [vmem:[%s27298_s11 + $0xa70] ss:$8 sps:$4 sm:$0xff]  }
0x19f2   :  { %11947 = vmatprep.subr.bf16.mxu1 %v21039_v27  ;;  %11895 = vmatpush1.bf16.msra.mxu0 %v21043_v62  ;;  %v21099_v62 = vld [vmem:[%s27298_s11 + $0xa54] ss:$8 sps:$4 sm:$0xff]  }
0x19f3   :  { %11896 = vmatprep.subr.bf16.mxu0 %v21048_v33 }
0x19f5   :  { %11948 = vmatpush1.bf16.msra.mxu1 %v21037_v4 }
0x19f6   :  { %11949 = vmatprep.subr.bf16.mxu1 %v21042_v24  ;;  %11897 = vmatpush1.bf16.msra.mxu0 %v21046_v14  ;;  %v21097_v24 = vld [vmem:[%s27298_s11 + $0xa50] ss:$8 sps:$4 sm:$0xff]   ;;  %v21102_v14 = vld [vmem:[%s27298_s11 + $0xa44] ss:$8 sps:$4 sm:$0xff]  }
0x19f7   :  { %11898 = vmatprep.subr.bf16.mxu0 %v21051_v1 }
0x19f9   :  { %11950 = vmatpush1.bf16.msra.mxu1 %v21040_v2 }
0x19fa   :  { %18296 = vmatprep.subr.msk.bf16.mxu1 %vm5827_vm2, %v24766_v63  ;;  %11899 = vmatpush1.bf16.msra.mxu0 %v21049_v60  ;;  %v21100_v60 = vld [vmem:[%s27298_s11 + $0xa40] ss:$8 sps:$4 sm:$0xff]  }
0x19fb   :  { %11900 = vmatprep.subr.bf16.mxu0 %v21054_v22  ;;  %v21105_v22 = vld [vmem:[%s27298_s11 + $0xa34] ss:$8 sps:$4 sm:$0xff]  }
0x19fe   :  { %11901 = vmatpush1.bf16.msra.mxu0 %v21052_v30  ;;  %v21117_v30 = vld [vmem:[%s27298_s11 + $0x974] ss:$8 sps:$4 sm:$0xff]  }
0x19ff   :  { %11902 = vmatprep.subr.bf16.mxu0 %v21057_v48  ;;  %v21761_v48 = vld [vmem:[%s27295_s8 + $0x18] sm:$0xf] }
0x1a02   :  { %11903 = vmatpush1.bf16.msra.mxu0 %v21055_v58  ;;  %v21103_v58 = vld [vmem:[%s27298_s11 + $0xa30] ss:$8 sps:$4 sm:$0xff]  }
0x1a03   :  { %11904 = vmatprep.subr.bf16.mxu0 %v21060_v23  ;;  %v21108_v23 = vld [vmem:[%s27298_s11 + $0xa24] ss:$8 sps:$4 sm:$0xff]  }
0x1a06   :  { %11905 = vmatpush1.bf16.msra.mxu0 %v21058_v52  ;;  %v21106_v52 = vld [vmem:[%s27298_s11 + $0xa20] ss:$8 sps:$4 sm:$0xff]  }
0x1a07   :  { %11906 = vmatprep.subr.bf16.mxu0 %v21063_v20  ;;  %v21111_v20 = vld [vmem:[%s27298_s11 + $0xa14] ss:$8 sps:$4 sm:$0xff]  }
0x1a0a   :  { %11907 = vmatpush1.bf16.msra.mxu0 %v21061_v42  ;;  %v21115_v42 = vld [vmem:[%s27298_s11 + $0x970] ss:$8 sps:$4 sm:$0xff]  }
0x1a0b   :  { %11908 = vmatprep.subr.bf16.mxu0 %v21066_v47  ;;  %v21120_v47 = vld [vmem:[%s27298_s11 + $0x964] ss:$8 sps:$4 sm:$0xff]  }
0x1a0e   :  { %11909 = vmatpush1.bf16.msra.mxu0 %v21064_v40  ;;  %v21109_v40 = vld [vmem:[%s27298_s11 + $0xa10] ss:$8 sps:$4 sm:$0xff]  }
0x1a0f   :  { %11910 = vmatprep.subr.bf16.mxu0 %v21069_v16  ;;  %v21114_v16 = vld [vmem:[%s27298_s11 + $0xa04] ss:$8 sps:$4 sm:$0xff]  }
0x1a12   :  { %11911 = vmatpush2.bf16.msra.mxu0 %v21067_v50  ;;  %v21118_v50 = vld [vmem:[%s27298_s11 + $0x960] ss:$8 sps:$4 sm:$0xff]  }
0x1a13   :  { %11912 = vmatprep.subr.bf16.mxu0 %v21072_v6  ;;  %v21123_v6 = vld [vmem:[%s27298_s11 + $0x954] ss:$8 sps:$4 sm:$0xff]  }
0x1a16   :  { %11913 = vmatpush2.bf16.msra.mxu0 %v21070_v15  ;;  %v21112_v15 = vld [vmem:[%s27298_s11 + $0xa00] ss:$8 sps:$4 sm:$0xff]  }
0x1a17   :  { %11914 = vmatprep.subr.bf16.mxu0 %v21075_v18  ;;  %v21121_v18 = vld [vmem:[%s27298_s11 + $0x950] ss:$8 sps:$4 sm:$0xff]  }
0x1a1a   :  { %11915 = vmatpush2.bf16.msra.mxu0 %v21073_v26  ;;  %v21126_v26 = vld [vmem:[%s27298_s11 + $0x944] ss:$8 sps:$4 sm:$0xff]  }
0x1a1b   :  { %11916 = vmatprep.subr.bf16.mxu0 %v21078_v0  ;;  %v21124_v0 = vld [vmem:[%s27298_s11 + $0x940] ss:$8 sps:$4 sm:$0xff]  }
0x1a1e   :  { %11917 = vmatpush2.bf16.msra.mxu0 %v21076_v29  ;;  %v21129_v29 = vld [vmem:[%s27298_s11 + $0x934] ss:$8 sps:$4 sm:$0xff]  }
0x1a1f   :  { %11918 = vmatprep.subr.bf16.mxu0 %v21081_v34  ;;  %v21127_v34 = vld [vmem:[%s27298_s11 + $0x930] ss:$8 sps:$4 sm:$0xff]  }
0x1a22   :  { %11919 = vmatpush2.bf16.msra.mxu0 %v21079_v12  ;;  %v21132_v12 = vld [vmem:[%s27298_s11 + $0x924] ss:$8 sps:$4 sm:$0xff]  }
0x1a23   :  { %11920 = vmatprep.subr.bf16.mxu0 %v21084_v19  ;;  %v21130_v19 = vld [vmem:[%s27298_s11 + $0x920] ss:$8 sps:$4 sm:$0xff]  }
0x1a26   :  { %11921 = vmatpush2.bf16.msra.mxu0 %v21082_v57  ;;  %v21135_v57 = vld [vmem:[%s27298_s11 + $0x914] ss:$8 sps:$4 sm:$0xff]  }
0x1a27   :  { %11922 = vmatprep.subr.bf16.mxu0 %v21087_v37  ;;  %v21133_v37 = vld [vmem:[%s27298_s11 + $0x910] ss:$8 sps:$4 sm:$0xff]  }
0x1a2a   :  { %11923 = vmatpush2.bf16.msra.mxu0 %v21085_v35  ;;  %v21138_v35 = vld [vmem:[%s27298_s11 + $0x904] ss:$8 sps:$4 sm:$0xff]  }
0x1a2b   :  { %11924 = vmatprep.subr.bf16.mxu0 %v21090_v54  ;;  %v21136_v54 = vld [vmem:[%s27298_s11 + $0x900] ss:$8 sps:$4 sm:$0xff]  }
0x1a2e   :  { %11925 = vmatpush2.bf16.msra.mxu0 %v21088_v8  ;;  %v21141_v8 = vld [vmem:[%s27298_s11 + $0x9f4] ss:$8 sps:$4 sm:$0xff]  }
0x1a2f   :  { %12392 = vmatprep.subr.bf16.mxu0 %v21093_v21  ;;  %v21139_v21 = vld [vmem:[%s27298_s11 + $0x9f0] ss:$8 sps:$4 sm:$0xff]  }
0x1a9c   :  { %v11471_v38 = vpop.f32.mrf.mxu1 }
0x1a9e   :  { %v11473_v51 = vpop.f32.mrf.mxu1 }
0x1aa0   :  { %v11475_v41 = vpop.f32.mrf.mxu1 }
0x1aa1   :  { %v11512_v45 = vpop.f32.mrf.mxu0  ;;  %v21147_v41 = vld [vmem:[%s27298_s11 + $0x9d4] ss:$8 sps:$4 sm:$0xff]  }
0x1aa2   :  { %v11513_v55 = vadd.f32 %v11512_v45, %v11471_v38  ;;  %v11476_v7 = vpop.f32.mrf.mxu1  ;;  %v21144_v38 = vld [vmem:[%s27298_s11 + $0x9e4] ss:$8 sps:$4 sm:$0xff]   ;;  %v21145_v45 = vld [vmem:[%s27298_s11 + $0x9d0] ss:$8 sps:$4 sm:$0xff]  }
0x1aa3   :  { %v11514_v46 = vpop.f32.mrf.mxu0  ;;  %v21148_v7 = vld [vmem:[%s27298_s11 + $0x9c0] ss:$8 sps:$4 sm:$0xff]  }
0x1aa4   :  { %v25745_v17 = vadd.f32 %v11513_v55, %v25581_v28  ;;  %v11515_v31 = vadd.f32 %v11514_v46, %v11473_v51  ;;  %v21096_v28 = vld [vmem:[%s27298_s11 + $0xa64] ss:$8 sps:$4 sm:$0xff]   ;;  %v21142_v51 = vld [vmem:[%s27298_s11 + $0x9e0] ss:$8 sps:$4 sm:$0xff]   ;;  %v21153_v46 = vld [vmem:[%s27298_s11 + $0x9b4] ss:$8 sps:$4 sm:$0xff]  }
0x1aa5   :  { %v11516_v59 = vpop.f32.mrf.mxu0  ;;  %v21150_v55 = vld [vmem:[%s27298_s11 + $0x9c4] ss:$8 sps:$4 sm:$0xff]  }
0x1aa6   :  { %v25748_v49 = vadd.f32 %v11515_v31, %v25584_v13  ;;  %v21094_v13 = vld [vmem:[%s27298_s11 + $0xa60] ss:$8 sps:$4 sm:$0xff]   ;;  %v21151_v31 = vld [vmem:[%s27298_s11 + $0x9b0] ss:$8 sps:$4 sm:$0xff]   ;;  %v21156_v59 = vld [vmem:[%s27298_s11 + $0x9a4] ss:$8 sps:$4 sm:$0xff]  }
0x1aa7   :  { %v11517_v53 = vpop.f32.mrf.mxu0 }
0x1aa8   :  { %v21154_v53 = vld [vmem:[%s27298_s11 + $0x9a0] ss:$8 sps:$4 sm:$0xff]  }
0x1aa9   :  { %v11555_v32 = vpop.f32.mrf.mxu0 }
0x1aaa   :  { %v11602_v43 = vpack.c.bf16 %v11555_v32, %v11555_v32  ;;  %v21159_v32 = vld [vmem:[%s27298_s11 + $0x994] ss:$8 sps:$4 sm:$0xff]  }
0x1aab   :  { %v11557_v56 = vpop.f32.mrf.mxu0 }
0x1aac   :  { %v11603_v11 = vpack.c.bf16 %v11557_v56, %v11557_v56  ;;  %v21157_v56 = vld [vmem:[%s27298_s11 + $0x990] ss:$8 sps:$4 sm:$0xff]  }
0x1aad   :  { %v11559_v36 = vpop.f32.mrf.mxu0 }
0x1aae   :  { %11926 = vmatprep.mubr.bf16.mxu0 %v11603_v11  ;;  %v21162_v11 = vld [vmem:[%s27298_s11 + $0x984] ss:$8 sps:$4 sm:$0xff]  }
0x1aaf   :  { %v11560_v61 = vpop.f32.mrf.mxu0  ;;  %11927 = vmatmul.mubr.bf16.vlgmr.msra.gmra.mxu0 %v11602_v43  ;;  %v21165_v43 = vld [vmem:[%s27298_s11 + $0xbf4] ss:$8 sps:$4 sm:$0xff]  }
0x1ab0   :  { %12393 = vmatpush1.bf16.msra.mxu0 %v21091_v5  ;;  %12424 = vmatprep.mubr.bf16.mxu0 %v27320_v39  ;;  %v21160_v5 = vld [vmem:[%s27298_s11 + $0x980] ss:$8 sps:$4 sm:$0xff]  }
0x1ab1   :  { %v11596_v27 = vpop.f32.mrf.mxu0  ;;  %12394 = vmatprep.subr.bf16.mxu0 %v21096_v28 }
0x1ab2   :  { %v11604_v33 = vpack.c.bf16 %v11596_v27, %v11596_v27 }
0x1ab3   :  { %v19789_v4 = vpop.f32.mrf.mxu0 }
0x1ab4   :  { %12395 = vmatpush1.bf16.msra.mxu0 %v21094_v13  ;;  %11968 = vmatmul.mubr.bf16.vlgmr.msra.gmra.mxu1 %v11604_v33 }
0x1ab5   :  { %11993 = vmatpush1.bf16.msra.mxu1 %v24770_v44  ;;  %12396 = vmatprep.subr.bf16.mxu0 %v21099_v62  ;;  %v11599_v1 = vpop.f32.mrf.mxu0 }
0x1ab6   :  { %12010 = vmatprep.mubr.bf16.mxu1 %v27320_v39  ;;  %19791 = vmatprep.subr.bf16.mxu1 %v21796_v25 }
0x1ab7   :  { %v19790_v2 = vpop.f32.mrf.mxu0 }
0x1ab8   :  { %12397 = vmatpush1.bf16.msra.mxu0 %v21097_v24 }
0x1ab9   :  { %12398 = vmatprep.subr.bf16.mxu0 %v21102_v14 }
0x1abc   :  { %12399 = vmatpush1.bf16.msra.mxu0 %v21100_v60  ;;  %18297 = vmatmul.mubr.msk.bf16.vlgmr.msra.gmra.mxu1 %vm5823_vm3, %v21761_v48 }
0x1abd   :  { %19792 = vmatpush3.bf16.msra.mxu1 %v24764_v3  ;;  %12400 = vmatprep.subr.bf16.mxu0 %v21105_v22 }
0x1abe   :  { %19793 = vmatprep.mubr.msk.bf16.mxu1 %vm21797_vm4, %v21796_v25  ;;  %12351 = vmatprep.subr.bf16.mxu1 %v21117_v30 }
0x1ac0   :  { %12401 = vmatpush1.bf16.msra.mxu0 %v21103_v58 }
0x1ac1   :  { %12402 = vmatprep.subr.bf16.mxu0 %v21108_v23 }
0x1ac4   :  { %12403 = vmatpush1.bf16.msra.mxu0 %v21106_v52  ;;  %19794 = vmatmul.mubr.msk.bf16.vlgmr.msra.gmra.mxu1 %vm5823_vm3, %v21761_v48  ;;  %v21163_v48 = vld [vmem:[%s27298_s11 + $0xbf0] ss:$8 sps:$4 sm:$0xff]  }
0x1ac5   :  { %12404 = vmatprep.subr.bf16.mxu0 %v21111_v20  ;;  %12352 = vmatpush1.bf16.msra.mxu1 %v21115_v42  ;;  %v21171_v42 = vld [vmem:[%s27298_s11 + $0xbd4] ss:$8 sps:$4 sm:$0xff]  }
0x1ac6   :  { %12353 = vmatprep.subr.bf16.mxu1 %v21120_v47 }
0x1ac8   :  { %12405 = vmatpush1.bf16.msra.mxu0 %v21109_v40 }
0x1ac9   :  { %12406 = vmatprep.subr.bf16.mxu0 %v21114_v16  ;;  %12354 = vmatpush1.bf16.msra.mxu1 %v21118_v50  ;;  %v21169_v16 = vld [vmem:[%s27298_s11 + $0xbd0] ss:$8 sps:$4 sm:$0xff]   ;;  %v21174_v50 = vld [vmem:[%s27298_s11 + $0xbc4] ss:$8 sps:$4 sm:$0xff]  }
0x1aca   :  { %12355 = vmatprep.subr.bf16.mxu1 %v21123_v6 }
0x1acc   :  { %12407 = vmatpush1.bf16.msra.mxu0 %v21112_v15 }
0x1acd   :  { %18395 = vmatprep.subr.msk.bf16.mxu0 %vm5827_vm2, %v24766_v63  ;;  %12356 = vmatpush1.bf16.msra.mxu1 %v21121_v18  ;;  %v21172_v18 = vld [vmem:[%s27298_s11 + $0xbc0] ss:$8 sps:$4 sm:$0xff]  }
0x1ace   :  { %12357 = vmatprep.subr.bf16.mxu1 %v21126_v26  ;;  %v21177_v26 = vld [vmem:[%s27298_s11 + $0xbb4] ss:$8 sps:$4 sm:$0xff]  }
0x1ad1   :  { %12358 = vmatpush1.bf16.msra.mxu1 %v21124_v0  ;;  %v21189_v0 = vld [vmem:[%s27298_s11 + $0xaf4] ss:$8 sps:$4 sm:$0xff]  }
0x1ad2   :  { %12359 = vmatprep.subr.bf16.mxu1 %v21129_v29  ;;  %v21762_v29 = vld [vmem:[%s27295_s8 + $0x1c] sm:$0xf] }
0x1ad5   :  { %12360 = vmatpush1.bf16.msra.mxu1 %v21127_v34  ;;  %v21175_v34 = vld [vmem:[%s27298_s11 + $0xbb0] ss:$8 sps:$4 sm:$0xff]  }
0x1ad6   :  { %12361 = vmatprep.subr.bf16.mxu1 %v21132_v12  ;;  %v21180_v12 = vld [vmem:[%s27298_s11 + $0xba4] ss:$8 sps:$4 sm:$0xff]  }
0x1ad9   :  { %12362 = vmatpush1.bf16.msra.mxu1 %v21130_v19  ;;  %v21178_v19 = vld [vmem:[%s27298_s11 + $0xba0] ss:$8 sps:$4 sm:$0xff]  }
0x1ada   :  { %12363 = vmatprep.subr.bf16.mxu1 %v21135_v57  ;;  %v21183_v57 = vld [vmem:[%s27298_s11 + $0xb94] ss:$8 sps:$4 sm:$0xff]  }
0x1add   :  { %12364 = vmatpush1.bf16.msra.mxu1 %v21133_v37  ;;  %v21187_v37 = vld [vmem:[%s27298_s11 + $0xaf0] ss:$8 sps:$4 sm:$0xff]  }
0x1ade   :  { %12365 = vmatprep.subr.bf16.mxu1 %v21138_v35  ;;  %v21192_v35 = vld [vmem:[%s27298_s11 + $0xae4] ss:$8 sps:$4 sm:$0xff]  }
0x1ae1   :  { %12366 = vmatpush1.bf16.msra.mxu1 %v21136_v54  ;;  %v21181_v54 = vld [vmem:[%s27298_s11 + $0xb90] ss:$8 sps:$4 sm:$0xff]  }
0x1ae2   :  { %12367 = vmatprep.subr.bf16.mxu1 %v21141_v8  ;;  %v21186_v8 = vld [vmem:[%s27298_s11 + $0xb84] ss:$8 sps:$4 sm:$0xff]  }
0x1ae5   :  { %12368 = vmatpush2.bf16.msra.mxu1 %v21139_v21  ;;  %v21190_v21 = vld [vmem:[%s27298_s11 + $0xae0] ss:$8 sps:$4 sm:$0xff]  }
0x1ae6   :  { %12369 = vmatprep.subr.bf16.mxu1 %v21144_v38  ;;  %v21195_v38 = vld [vmem:[%s27298_s11 + $0xad4] ss:$8 sps:$4 sm:$0xff]  }
0x1ae9   :  { %12370 = vmatpush2.bf16.msra.mxu1 %v21142_v51  ;;  %v21184_v51 = vld [vmem:[%s27298_s11 + $0xb80] ss:$8 sps:$4 sm:$0xff]  }
0x1aea   :  { %12371 = vmatprep.subr.bf16.mxu1 %v21147_v41  ;;  %v21193_v41 = vld [vmem:[%s27298_s11 + $0xad0] ss:$8 sps:$4 sm:$0xff]  }
0x1aed   :  { %12372 = vmatpush2.bf16.msra.mxu1 %v21145_v45  ;;  %v21198_v45 = vld [vmem:[%s27298_s11 + $0xac4] ss:$8 sps:$4 sm:$0xff]  }
0x1aee   :  { %12373 = vmatprep.subr.bf16.mxu1 %v21150_v55  ;;  %v21196_v55 = vld [vmem:[%s27298_s11 + $0xac0] ss:$8 sps:$4 sm:$0xff]  }
0x1af1   :  { %12374 = vmatpush2.bf16.msra.mxu1 %v21148_v7  ;;  %v21201_v7 = vld [vmem:[%s27298_s11 + $0xab4] ss:$8 sps:$4 sm:$0xff]  }
0x1af2   :  { %12375 = vmatprep.subr.bf16.mxu1 %v21153_v46  ;;  %v21199_v46 = vld [vmem:[%s27298_s11 + $0xab0] ss:$8 sps:$4 sm:$0xff]  }
0x1af5   :  { %12376 = vmatpush2.bf16.msra.mxu1 %v21151_v31  ;;  %v21202_v31 = vld [vmem:[%s27298_s11 + $0xaa0] ss:$8 sps:$4 sm:$0xff]  }
0x1af6   :  { %12377 = vmatprep.subr.bf16.mxu1 %v21156_v59  ;;  %v21207_v59 = vld [vmem:[%s27298_s11 + $0xa94] ss:$8 sps:$4 sm:$0xff]  }
0x1af9   :  { %12378 = vmatpush2.bf16.msra.mxu1 %v21154_v53  ;;  %v21205_v53 = vld [vmem:[%s27298_s11 + $0xa90] ss:$8 sps:$4 sm:$0xff]  }
0x1afa   :  { %12379 = vmatprep.subr.bf16.mxu1 %v21159_v32  ;;  %v21210_v32 = vld [vmem:[%s27298_s11 + $0xa84] ss:$8 sps:$4 sm:$0xff]  }
0x1afd   :  { %12380 = vmatpush2.bf16.msra.mxu1 %v21157_v56  ;;  %v21208_v56 = vld [vmem:[%s27298_s11 + $0xa80] ss:$8 sps:$4 sm:$0xff]  }
0x1afe   :  { %12381 = vmatprep.subr.bf16.mxu1 %v21162_v11  ;;  %v21213_v11 = vld [vmem:[%s27298_s11 + $0xb74] ss:$8 sps:$4 sm:$0xff]  }
0x1b01   :  { %12382 = vmatpush2.bf16.msra.mxu1 %v21160_v5  ;;  %v21211_v5 = vld [vmem:[%s27298_s11 + $0xb70] ss:$8 sps:$4 sm:$0xff]  }
0x1b02   :  { %12849 = vmatprep.subr.bf16.mxu1 %v21165_v43  ;;  %v21216_v43 = vld [vmem:[%s27298_s11 + $0xb64] ss:$8 sps:$4 sm:$0xff]  }
0x1b6f   :  { %v11928_v36 = vpop.f32.mrf.mxu0 }
0x1b71   :  { %v11930_v28 = vpop.f32.mrf.mxu0 }
0x1b73   :  { %v11932_v61 = vpop.f32.mrf.mxu0 }
0x1b74   :  { %v11969_v13 = vpop.f32.mrf.mxu1  ;;  %v21217_v61 = vld [vmem:[%s27298_s11 + $0xb50] ss:$8 sps:$4 sm:$0xff]  }
0x1b75   :  { %v11970_v27 = vadd.f32 %v11969_v13, %v11928_v36  ;;  %v11933_v62 = vpop.f32.mrf.mxu0  ;;  %v21214_v36 = vld [vmem:[%s27298_s11 + $0xb60] ss:$8 sps:$4 sm:$0xff]   ;;  %v21222_v13 = vld [vmem:[%s27298_s11 + $0xb44] ss:$8 sps:$4 sm:$0xff]  }
0x1b76   :  { %v11971_v33 = vpop.f32.mrf.mxu1  ;;  %v21225_v62 = vld [vmem:[%s27298_s11 + $0xb34] ss:$8 sps:$4 sm:$0xff]  }
0x1b77   :  { %v25909_v4 = vadd.f32 %v11970_v27, %v25745_v17  ;;  %v11972_v24 = vadd.f32 %v11971_v33, %v11930_v28  ;;  %v21168_v17 = vld [vmem:[%s27298_s11 + $0xbe4] ss:$8 sps:$4 sm:$0xff]   ;;  %v21219_v28 = vld [vmem:[%s27298_s11 + $0xb54] ss:$8 sps:$4 sm:$0xff]   ;;  %v21220_v27 = vld [vmem:[%s27298_s11 + $0xb40] ss:$8 sps:$4 sm:$0xff]  }
0x1b78   :  { %v11973_v14 = vpop.f32.mrf.mxu1  ;;  %v21223_v33 = vld [vmem:[%s27298_s11 + $0xb30] ss:$8 sps:$4 sm:$0xff]  }
0x1b79   :  { %v25912_v1 = vadd.f32 %v11972_v24, %v25748_v49  ;;  %v21166_v49 = vld [vmem:[%s27298_s11 + $0xbe0] ss:$8 sps:$4 sm:$0xff]   ;;  %v21228_v24 = vld [vmem:[%s27298_s11 + $0xb24] ss:$8 sps:$4 sm:$0xff]  }
0x1b7a   :  { %v11974_v2 = vpop.f32.mrf.mxu1  ;;  %v21226_v14 = vld [vmem:[%s27298_s11 + $0xb20] ss:$8 sps:$4 sm:$0xff]  }
0x1b7b   :  { %v21231_v2 = vld [vmem:[%s27298_s11 + $0xb14] ss:$8 sps:$4 sm:$0xff]  }
0x1b7c   :  { %v12012_v60 = vpop.f32.mrf.mxu1 }
0x1b7d   :  { %v12059_v58 = vpack.c.bf16 %v12012_v60, %v12012_v60  ;;  %v21229_v60 = vld [vmem:[%s27298_s11 + $0xb10] ss:$8 sps:$4 sm:$0xff]  }
0x1b7e   :  { %v12014_v22 = vpop.f32.mrf.mxu1 }
0x1b7f   :  { %v12060_v30 = vpack.c.bf16 %v12014_v22, %v12014_v22  ;;  %v21234_v22 = vld [vmem:[%s27298_s11 + $0xb04] ss:$8 sps:$4 sm:$0xff]  }
0x1b80   :  { %v12016_v23 = vpop.f32.mrf.mxu1 }
0x1b81   :  { %12383 = vmatprep.mubr.bf16.mxu1 %v12060_v30  ;;  %v21232_v30 = vld [vmem:[%s27298_s11 + $0xb00] ss:$8 sps:$4 sm:$0xff]  }
0x1b82   :  { %v12017_v52 = vpop.f32.mrf.mxu1  ;;  %12384 = vmatmul.mubr.bf16.vlgmr.msra.gmra.mxu1 %v12059_v58 }
0x1b83   :  { %12850 = vmatpush1.bf16.msra.mxu1 %v21163_v48  ;;  %12881 = vmatprep.mubr.bf16.mxu1 %v27320_v39  ;;  %v21264_v48 = vld [vmem:[%s27298_s11 + $0xd74] ss:$8 sps:$4 sm:$0xff]  }
0x1b84   :  { %v12053_v20 = vpop.f32.mrf.mxu1  ;;  %12851 = vmatprep.subr.bf16.mxu1 %v21168_v17 }
0x1b85   :  { %v12061_v47 = vpack.c.bf16 %v12053_v20, %v12053_v20 }
0x1b86   :  { %v19795_v40 = vpop.f32.mrf.mxu1 }
0x1b87   :  { %12852 = vmatpush1.bf16.msra.mxu1 %v21166_v49  ;;  %12425 = vmatmul.mubr.bf16.vlgmr.msra.gmra.mxu0 %v12061_v47 }
0x1b88   :  { %12450 = vmatpush1.bf16.msra.mxu0 %v24770_v44  ;;  %12853 = vmatprep.subr.bf16.mxu1 %v21171_v42  ;;  %v12056_v6 = vpop.f32.mrf.mxu1 }
0x1b89   :  { %12467 = vmatprep.mubr.bf16.mxu0 %v27320_v39  ;;  %19797 = vmatprep.subr.bf16.mxu0 %v21796_v25 }
0x1b8a   :  { %v19796_v15 = vpop.f32.mrf.mxu1 }
0x1b8b   :  { %12854 = vmatpush1.bf16.msra.mxu1 %v21169_v16 }
0x1b8c   :  { %12855 = vmatprep.subr.bf16.mxu1 %v21174_v50 }
0x1b8f   :  { %12856 = vmatpush1.bf16.msra.mxu1 %v21172_v18  ;;  %18396 = vmatmul.mubr.msk.bf16.vlgmr.msra.gmra.mxu0 %vm5823_vm3, %v21762_v29 }
0x1b90   :  { %19798 = vmatpush3.bf16.msra.mxu0 %v24764_v3  ;;  %12857 = vmatprep.subr.bf16.mxu1 %v21177_v26 }
0x1b91   :  { %19799 = vmatprep.mubr.msk.bf16.mxu0 %vm21797_vm4, %v21796_v25  ;;  %12808 = vmatprep.subr.bf16.mxu0 %v21189_v0  ;;  %v21262_v0 = vld [vmem:[%s27298_s11 + $0xd70] ss:$8 sps:$4 sm:$0xff]  }
0x1b93   :  { %12858 = vmatpush1.bf16.msra.mxu1 %v21175_v34 }
0x1b94   :  { %12859 = vmatprep.subr.bf16.mxu1 %v21180_v12 }
0x1b97   :  { %12860 = vmatpush1.bf16.msra.mxu1 %v21178_v19  ;;  %19800 = vmatmul.mubr.msk.bf16.vlgmr.msra.gmra.mxu0 %vm5823_vm3, %v21762_v29 }
0x1b98   :  { %12861 = vmatprep.subr.bf16.mxu1 %v21183_v57  ;;  %12809 = vmatpush1.bf16.msra.mxu0 %v21187_v37  ;;  %v21276_v37 = vld [vmem:[%s27298_s11 + $0xd54] ss:$8 sps:$4 sm:$0xff]  }
0x1b99   :  { %12810 = vmatprep.subr.bf16.mxu0 %v21192_v35 }
0x1b9b   :  { %12862 = vmatpush1.bf16.msra.mxu1 %v21181_v54  ;;  %v21274_v54 = vld [vmem:[%s27298_s11 + $0xd50] ss:$8 sps:$4 sm:$0xff]  }
0x1b9c   :  { %12863 = vmatprep.subr.bf16.mxu1 %v21186_v8  ;;  %12811 = vmatpush1.bf16.msra.mxu0 %v21190_v21  ;;  %v21282_v21 = vld [vmem:[%s27298_s11 + $0xd44] ss:$8 sps:$4 sm:$0xff]  }
0x1b9d   :  { %12812 = vmatprep.subr.bf16.mxu0 %v21195_v38 }
0x1b9f   :  { %12864 = vmatpush1.bf16.msra.mxu1 %v21184_v51  ;;  %v21280_v51 = vld [vmem:[%s27298_s11 + $0xd40] ss:$8 sps:$4 sm:$0xff]  }
0x1ba0   :  { %18494 = vmatprep.subr.msk.bf16.mxu1 %vm5827_vm2, %v24766_v63  ;;  %12813 = vmatpush1.bf16.msra.mxu0 %v21193_v41  ;;  %v21204_v63 = vld [vmem:[%s27298_s11 + $0xaa4] ss:$8 sps:$4 sm:$0xff]   ;;  %v21763_v41 = vld [vmem:[%s27295_s8 + $0x20] sm:$0xf] }
0x1ba1   :  { %12814 = vmatprep.subr.bf16.mxu0 %v21198_v45  ;;  %v21235_v45 = vld [vmem:[%s27298_s11 + $0xc70] ss:$8 sps:$4 sm:$0xff]  }
0x1ba4   :  { %12815 = vmatpush1.bf16.msra.mxu0 %v21196_v55  ;;  %v21240_v55 = vld [vmem:[%s27298_s11 + $0xc64] ss:$8 sps:$4 sm:$0xff]  }
0x1ba5   :  { %12816 = vmatprep.subr.bf16.mxu0 %v21201_v7  ;;  %v21238_v7 = vld [vmem:[%s27298_s11 + $0xc60] ss:$8 sps:$4 sm:$0xff]  }
0x1ba8   :  { %12817 = vmatpush1.bf16.msra.mxu0 %v21199_v46  ;;  %v21246_v46 = vld [vmem:[%s27298_s11 + $0xc44] ss:$8 sps:$4 sm:$0xff]  }
0x1ba9   :  { %12818 = vmatprep.subr.bf16.mxu0 %v21204_v63  ;;  %v21244_v63 = vld [vmem:[%s27298_s11 + $0xc40] ss:$8 sps:$4 sm:$0xff]  }
0x1bac   :  { %12819 = vmatpush1.bf16.msra.mxu0 %v21202_v31  ;;  %v21249_v31 = vld [vmem:[%s27298_s11 + $0xc34] ss:$8 sps:$4 sm:$0xff]  }
0x1bad   :  { %12820 = vmatprep.subr.bf16.mxu0 %v21207_v59  ;;  %v21247_v59 = vld [vmem:[%s27298_s11 + $0xc30] ss:$8 sps:$4 sm:$0xff]  }
0x1bb0   :  { %12821 = vmatpush1.bf16.msra.mxu0 %v21205_v53  ;;  %v21252_v53 = vld [vmem:[%s27298_s11 + $0xc24] ss:$8 sps:$4 sm:$0xff]  }
0x1bb1   :  { %12822 = vmatprep.subr.bf16.mxu0 %v21210_v32  ;;  %v21250_v32 = vld [vmem:[%s27298_s11 + $0xc20] ss:$8 sps:$4 sm:$0xff]  }
0x1bb4   :  { %12823 = vmatpush1.bf16.msra.mxu0 %v21208_v56  ;;  %v21255_v56 = vld [vmem:[%s27298_s11 + $0xc14] ss:$8 sps:$4 sm:$0xff]  }
0x1bb5   :  { %12824 = vmatprep.subr.bf16.mxu0 %v21213_v11  ;;  %v21253_v11 = vld [vmem:[%s27298_s11 + $0xc10] ss:$8 sps:$4 sm:$0xff]  }
0x1bb8   :  { %12825 = vmatpush2.bf16.msra.mxu0 %v21211_v5  ;;  %v21258_v5 = vld [vmem:[%s27298_s11 + $0xc04] ss:$8 sps:$4 sm:$0xff]  }
0x1bb9   :  { %12826 = vmatprep.subr.bf16.mxu0 %v21216_v43  ;;  %v21256_v43 = vld [vmem:[%s27298_s11 + $0xc00] ss:$8 sps:$4 sm:$0xff]  }
0x1bbc   :  { %12827 = vmatpush2.bf16.msra.mxu0 %v21214_v36  ;;  %v21261_v36 = vld [vmem:[%s27298_s11 + $0xcf4] ss:$8 sps:$4 sm:$0xff]  }
0x1bbd   :  { %12828 = vmatprep.subr.bf16.mxu0 %v21219_v28  ;;  %v21259_v28 = vld [vmem:[%s27298_s11 + $0xcf0] ss:$8 sps:$4 sm:$0xff]  }
0x1bc0   :  { %12829 = vmatpush2.bf16.msra.mxu0 %v21217_v61  ;;  %v21267_v61 = vld [vmem:[%s27298_s11 + $0xce4] ss:$8 sps:$4 sm:$0xff]  }
0x1bc1   :  { %12830 = vmatprep.subr.bf16.mxu0 %v21222_v13  ;;  %v21265_v13 = vld [vmem:[%s27298_s11 + $0xce0] ss:$8 sps:$4 sm:$0xff]  }
0x1bc4   :  { %12831 = vmatpush2.bf16.msra.mxu0 %v21220_v27  ;;  %v21273_v27 = vld [vmem:[%s27298_s11 + $0xcd4] ss:$8 sps:$4 sm:$0xff]  }
0x1bc5   :  { %12832 = vmatprep.subr.bf16.mxu0 %v21225_v62  ;;  %v21271_v62 = vld [vmem:[%s27298_s11 + $0xcd0] ss:$8 sps:$4 sm:$0xff]  }
0x1bc8   :  { %12833 = vmatpush2.bf16.msra.mxu0 %v21223_v33  ;;  %v21279_v33 = vld [vmem:[%s27298_s11 + $0xcc4] ss:$8 sps:$4 sm:$0xff]  }
0x1bc9   :  { %12834 = vmatprep.subr.bf16.mxu0 %v21228_v24  ;;  %v21277_v24 = vld [vmem:[%s27298_s11 + $0xcc0] ss:$8 sps:$4 sm:$0xff]  }
0x1bcc   :  { %12835 = vmatpush2.bf16.msra.mxu0 %v21226_v14  ;;  %v21285_v14 = vld [vmem:[%s27298_s11 + $0xcb4] ss:$8 sps:$4 sm:$0xff]  }
0x1bcd   :  { %12836 = vmatprep.subr.bf16.mxu0 %v21231_v2  ;;  %v21283_v2 = vld [vmem:[%s27298_s11 + $0xcb0] ss:$8 sps:$4 sm:$0xff]  }
0x1bd0   :  { %12837 = vmatpush2.bf16.msra.mxu0 %v21229_v60  ;;  %v21291_v60 = vld [vmem:[%s27298_s11 + $0xca4] ss:$8 sps:$4 sm:$0xff]  }
0x1bd1   :  { %12838 = vmatprep.subr.bf16.mxu0 %v21234_v22  ;;  %v21288_v22 = vld [vmem:[%s27298_s11 + $0xd34] ss:$8 sps:$4 sm:$0xff]  }
0x1bd4   :  { %12839 = vmatpush2.bf16.msra.mxu0 %v21232_v30  ;;  %v21289_v30 = vld [vmem:[%s27298_s11 + $0xca0] ss:$8 sps:$4 sm:$0xff]  }
0x1bd5   :  { %13306 = vmatprep.subr.bf16.mxu0 %v21264_v48  ;;  %v21286_v48 = vld [vmem:[%s27298_s11 + $0xd30] ss:$8 sps:$4 sm:$0xff]  }
0x1c42   :  { %v12385_v58 = vpop.f32.mrf.mxu1 }
0x1c44   :  { %v12387_v23 = vpop.f32.mrf.mxu1 }
0x1c46   :  { %v12389_v17 = vpop.f32.mrf.mxu1 }
0x1c47   :  { %v12426_v52 = vpop.f32.mrf.mxu0  ;;  %v21294_v17 = vld [vmem:[%s27298_s11 + $0xd24] ss:$8 sps:$4 sm:$0xff]  }
0x1c48   :  { %v12427_v49 = vadd.f32 %v12426_v52, %v12385_v58  ;;  %v12390_v20 = vpop.f32.mrf.mxu1  ;;  %v21297_v58 = vld [vmem:[%s27298_s11 + $0xc94] ss:$8 sps:$4 sm:$0xff]   ;;  %v21295_v52 = vld [vmem:[%s27298_s11 + $0xc90] ss:$8 sps:$4 sm:$0xff]  }
0x1c49   :  { %v12428_v42 = vpop.f32.mrf.mxu0  ;;  %v21300_v20 = vld [vmem:[%s27298_s11 + $0xd14] ss:$8 sps:$4 sm:$0xff]  }
0x1c4a   :  { %v26073_v47 = vadd.f32 %v12427_v49, %v25909_v4  ;;  %v12429_v40 = vadd.f32 %v12428_v42, %v12387_v23  ;;  %v21270_v4 = vld [vmem:[%s27298_s11 + $0xd64] ss:$8 sps:$4 sm:$0xff]   ;;  %v21292_v23 = vld [vmem:[%s27298_s11 + $0xd20] ss:$8 sps:$4 sm:$0xff]  }
0x1c4b   :  { %v12430_v16 = vpop.f32.mrf.mxu0  ;;  %v21303_v49 = vld [vmem:[%s27298_s11 + $0xc84] ss:$8 sps:$4 sm:$0xff]   ;;  %v21301_v42 = vld [vmem:[%s27298_s11 + $0xc80] ss:$8 sps:$4 sm:$0xff]  }
0x1c4c   :  { %v26076_v50 = vadd.f32 %v12429_v40, %v25912_v1  ;;  %v21268_v1 = vld [vmem:[%s27298_s11 + $0xd60] ss:$8 sps:$4 sm:$0xff]   ;;  %v21298_v40 = vld [vmem:[%s27298_s11 + $0xd10] ss:$8 sps:$4 sm:$0xff]  }
0x1c4d   :  { %v12431_v6 = vpop.f32.mrf.mxu0  ;;  %v21304_v16 = vld [vmem:[%s27298_s11 + $0xd00] ss:$8 sps:$4 sm:$0xff]  }
0x1c4e   :  { %v21306_v6 = vld [vmem:[%s27298_s11 + $0xd04] ss:$8 sps:$4 sm:$0xff]  }
0x1c4f   :  { %v12469_v15 = vpop.f32.mrf.mxu0 }
0x1c50   :  { %v12516_v29 = vpack.c.bf16 %v12469_v15, %v12469_v15  ;;  %v21309_v15 = vld [vmem:[%s27300_s13 + $0x74] ss:$8 sps:$4 sm:$0xff]  }
0x1c51   :  { %v12471_v18 = vpop.f32.mrf.mxu0 }
0x1c52   :  { %v12517_v26 = vpack.c.bf16 %v12471_v18, %v12471_v18 }
0x1c53   :  { %v12473_v34 = vpop.f32.mrf.mxu0 }
0x1c54   :  { %12840 = vmatprep.mubr.bf16.mxu0 %v12517_v26 }
0x1c55   :  { %v12474_v12 = vpop.f32.mrf.mxu0  ;;  %12841 = vmatmul.mubr.bf16.vlgmr.msra.gmra.mxu0 %v12516_v29 }
0x1c56   :  { %13307 = vmatpush1.bf16.msra.mxu0 %v21262_v0  ;;  %13338 = vmatprep.mubr.bf16.mxu0 %v27320_v39 }
0x1c57   :  { %v12510_v19 = vpop.f32.mrf.mxu0  ;;  %13308 = vmatprep.subr.bf16.mxu0 %v21270_v4 }
0x1c58   :  { %v12518_v57 = vpack.c.bf16 %v12510_v19, %v12510_v19 }
0x1c59   :  { %v19801_v35 = vpop.f32.mrf.mxu0 }
0x1c5a   :  { %12882 = vmatmul.mubr.bf16.vlgmr.msra.gmra.mxu1 %v12518_v57  ;;  %13309 = vmatpush1.bf16.msra.mxu0 %v21268_v1 }
0x1c5b   :  { %12907 = vmatpush1.bf16.msra.mxu1 %v24770_v44  ;;  %12924 = vmatprep.mubr.bf16.mxu1 %v27320_v39  ;;  %v12513_v8 = vpop.f32.mrf.mxu0  ;;  %v21237_v44 = vld [vmem:[%s27298_s11 + $0xc74] ss:$8 sps:$4 sm:$0xff]  }
0x1c5c   :  { %19803 = vmatprep.subr.bf16.mxu1 %v21796_v25  ;;  %13310 = vmatprep.subr.bf16.mxu0 %v21276_v37 }
0x1c5d   :  { %v19802_v38 = vpop.f32.mrf.mxu0 }
0x1c5e   :  { %13311 = vmatpush1.bf16.msra.mxu0 %v21274_v54  ;;  %v21307_v38 = vld [vmem:[%s27300_s13 + $0x70] ss:$8 sps:$4 sm:$0xff]  }
0x1c5f   :  { %13312 = vmatprep.subr.bf16.mxu0 %v21282_v21 }
0x1c62   :  { %18495 = vmatmul.mubr.msk.bf16.vlgmr.msra.gmra.mxu1 %vm5823_vm3, %v21763_v41  ;;  %13313 = vmatpush1.bf16.msra.mxu0 %v21280_v51 }
0x1c63   :  { %19804 = vmatpush3.bf16.msra.mxu1 %v24764_v3  ;;  %19805 = vmatprep.mubr.msk.bf16.mxu1 %vm21797_vm4, %v21796_v25  ;;  %v21243_v25 = vld [vmem:[%s27298_s11 + $0xc54] ss:$8 sps:$4 sm:$0xff]   ;;  %v21241_v3 = vld [vmem:[%s27298_s11 + $0xc50] ss:$8 sps:$4 sm:$0xff]  }
0x1c64   :  { %13265 = vmatprep.subr.bf16.mxu1 %v21237_v44  ;;  %13314 = vmatprep.subr.bf16.mxu0 %v21288_v22  ;;  %v21343_v22 = vld [vmem:[%s27300_s13 + $0xb0] ss:$8 sps:$4 sm:$0xff]  }
0x1c66   :  { %13315 = vmatpush1.bf16.msra.mxu0 %v21286_v48  ;;  %v21346_v48 = vld [vmem:[%s27300_s13 + $0xa0] ss:$8 sps:$4 sm:$0xff]  }
0x1c67   :  { %13316 = vmatprep.subr.bf16.mxu0 %v21294_v17  ;;  %v21354_v17 = vld [vmem:[%s27300_s13 + $0x84] ss:$8 sps:$4 sm:$0xff]  }
0x1c6a   :  { %19806 = vmatmul.mubr.msk.bf16.vlgmr.msra.gmra.mxu1 %vm5823_vm3, %v21763_v41  ;;  %13317 = vmatpush1.bf16.msra.mxu0 %v21292_v23  ;;  %v21349_v23 = vld [vmem:[%s27300_s13 + $0x90] ss:$8 sps:$4 sm:$0xff]  }
0x1c6b   :  { %13266 = vmatpush1.bf16.msra.mxu1 %v21235_v45  ;;  %13318 = vmatprep.subr.bf16.mxu0 %v21300_v20 }
0x1c6c   :  { %13267 = vmatprep.subr.bf16.mxu1 %v21240_v55  ;;  %v21315_v55 = vld [vmem:[%s27300_s13 + $0x54] ss:$8 sps:$4 sm:$0xff]  }
0x1c6e   :  { %13319 = vmatpush1.bf16.msra.mxu0 %v21298_v40 }
0x1c6f   :  { %13268 = vmatpush1.bf16.msra.mxu1 %v21238_v7  ;;  %13320 = vmatprep.subr.bf16.mxu0 %v21306_v6 }
0x1c70   :  { %13269 = vmatprep.subr.bf16.mxu1 %v21243_v25 }
0x1c72   :  { %13321 = vmatpush1.bf16.msra.mxu0 %v21304_v16 }
0x1c73   :  { %13270 = vmatpush1.bf16.msra.mxu1 %v21241_v3  ;;  %v21313_v3 = vld [vmem:[%s27300_s13 + $0x50] ss:$8 sps:$4 sm:$0xff]  }
0x1c74   :  { %13271 = vmatprep.subr.bf16.mxu1 %v21246_v46 }
0x1c77   :  { %13272 = vmatpush1.bf16.msra.mxu1 %v21244_v63  ;;  %v21318_v63 = vld [vmem:[%s27300_s13 + $0x44] ss:$8 sps:$4 sm:$0xff]  }
0x1c78   :  { %13273 = vmatprep.subr.bf16.mxu1 %v21249_v31 }
0x1c7b   :  { %13274 = vmatpush1.bf16.msra.mxu1 %v21247_v59  ;;  %v21316_v59 = vld [vmem:[%s27300_s13 + $0x40] ss:$8 sps:$4 sm:$0xff]  }
0x1c7c   :  { %13275 = vmatprep.subr.bf16.mxu1 %v21252_v53  ;;  %v21321_v53 = vld [vmem:[%s27300_s13 + $0x34] ss:$8 sps:$4 sm:$0xff]  }
0x1c7f   :  { %13276 = vmatpush1.bf16.msra.mxu1 %v21250_v32  ;;  %v21319_v32 = vld [vmem:[%s27300_s13 + $0x30] ss:$8 sps:$4 sm:$0xff]  }
0x1c80   :  { %13277 = vmatprep.subr.bf16.mxu1 %v21255_v56  ;;  %v21324_v56 = vld [vmem:[%s27300_s13 + $0x24] ss:$8 sps:$4 sm:$0xff]  }
0x1c83   :  { %13278 = vmatpush1.bf16.msra.mxu1 %v21253_v11  ;;  %v21322_v11 = vld [vmem:[%s27300_s13 + $0x20] ss:$8 sps:$4 sm:$0xff]  }
0x1c84   :  { %13279 = vmatprep.subr.bf16.mxu1 %v21258_v5  ;;  %v21327_v5 = vld [vmem:[%s27300_s13 + $0x14] ss:$8 sps:$4 sm:$0xff]  }
0x1c87   :  { %13280 = vmatpush1.bf16.msra.mxu1 %v21256_v43  ;;  %v21325_v43 = vld [vmem:[%s27300_s13 + $0x10] ss:$8 sps:$4 sm:$0xff]  }
0x1c88   :  { %13281 = vmatprep.subr.bf16.mxu1 %v21261_v36  ;;  %v21330_v36 = vld [vmem:[%s27300_s13 + $0x4] ss:$8 sps:$4 sm:$0xff]  }
0x1c8b   :  { %13282 = vmatpush2.bf16.msra.mxu1 %v21259_v28  ;;  %v21328_v28 = vld [vmem:[%s27300_s13] ss:$8 sps:$4 sm:$0xff]  }
0x1c8c   :  { %13283 = vmatprep.subr.bf16.mxu1 %v21267_v61  ;;  %v21333_v61 = vld [vmem:[%s27300_s13 + $0xf4] ss:$8 sps:$4 sm:$0xff]  }
0x1c8f   :  { %13284 = vmatpush2.bf16.msra.mxu1 %v21265_v13  ;;  %v21331_v13 = vld [vmem:[%s27300_s13 + $0xf0] ss:$8 sps:$4 sm:$0xff]  }
0x1c90   :  { %13285 = vmatprep.subr.bf16.mxu1 %v21273_v27  ;;  %v21336_v27 = vld [vmem:[%s27300_s13 + $0xe4] ss:$8 sps:$4 sm:$0xff]  }
0x1c93   :  { %13286 = vmatpush2.bf16.msra.mxu1 %v21271_v62  ;;  %v21334_v62 = vld [vmem:[%s27300_s13 + $0xe0] ss:$8 sps:$4 sm:$0xff]  }
0x1c94   :  { %13287 = vmatprep.subr.bf16.mxu1 %v21279_v33  ;;  %v21339_v33 = vld [vmem:[%s27300_s13 + $0xd4] ss:$8 sps:$4 sm:$0xff]  }
0x1c97   :  { %13288 = vmatpush2.bf16.msra.mxu1 %v21277_v24  ;;  %v21337_v24 = vld [vmem:[%s27300_s13 + $0xd0] ss:$8 sps:$4 sm:$0xff]  }
0x1c98   :  { %13289 = vmatprep.subr.bf16.mxu1 %v21285_v14  ;;  %v21342_v14 = vld [vmem:[%s27300_s13 + $0xc4] ss:$8 sps:$4 sm:$0xff]  }
0x1c9b   :  { %13290 = vmatpush2.bf16.msra.mxu1 %v21283_v2  ;;  %v21340_v2 = vld [vmem:[%s27300_s13 + $0xc0] ss:$8 sps:$4 sm:$0xff]  }
0x1c9c   :  { %13291 = vmatprep.subr.bf16.mxu1 %v21291_v60  ;;  %v21345_v60 = vld [vmem:[%s27300_s13 + $0xb4] ss:$8 sps:$4 sm:$0xff]  }
0x1c9f   :  { %13292 = vmatpush2.bf16.msra.mxu1 %v21289_v30  ;;  %v21348_v30 = vld [vmem:[%s27300_s13 + $0xa4] ss:$8 sps:$4 sm:$0xff]  }
0x1ca0   :  { %13293 = vmatprep.subr.bf16.mxu1 %v21297_v58  ;;  %v21351_v58 = vld [vmem:[%s27300_s13 + $0x94] ss:$8 sps:$4 sm:$0xff]  }
0x1ca3   :  { %13294 = vmatpush2.bf16.msra.mxu1 %v21295_v52  ;;  %v21352_v52 = vld [vmem:[%s27300_s13 + $0x80] ss:$8 sps:$4 sm:$0xff]  }
0x1ca4   :  { %13295 = vmatprep.subr.bf16.mxu1 %v21303_v49 }
0x1ca7   :  { %13296 = vmatpush2.bf16.msra.mxu1 %v21301_v42  ;;  %v13349_v42 = vld [vmem:[%s27299_s12] sm:$0x3] }
0x1ca8   :  { %13885 = vmatprep.subr.bf16.mxu1 %v21309_v15  ;;  %v13354_v15 = vrot.slane %v13349_v42, %v23473_v9 }
0x1d15   :  { %v12842_v18 = vpop.f32.mrf.mxu0 }
0x1d17   :  { %v12844_v26 = vpop.f32.mrf.mxu0 }
0x1d19   :  { %v12846_v0 = vpop.f32.mrf.mxu0 }
0x1d1a   :  { %v12883_v29 = vpop.f32.mrf.mxu1 }
0x1d1b   :  { %v12884_v34 = vadd.f32 %v12883_v29, %v12842_v18  ;;  %v12847_v4 = vpop.f32.mrf.mxu0 }
0x1d1c   :  { %v12885_v12 = vpop.f32.mrf.mxu1 }
0x1d1d   :  { %v26235_v1 = vadd.f32 %v12884_v34, %v26073_v47  ;;  %v12886_v19 = vadd.f32 %v12885_v12, %v12844_v26  ;;  %v21312_v47 = vld [vmem:[%s27300_s13 + $0x64] ss:$8 sps:$4 sm:$0xff]   ;;  %v13358_v34 = vrot.slane %v13349_v42, %v23495_v10 }
0x1d1e   :  { %v12887_v57 = vpop.f32.mrf.mxu1 }
0x1d1f   :  { %v26238_v37 = vadd.f32 %v12886_v19, %v26076_v50  ;;  %v21310_v50 = vld [vmem:[%s27300_s13 + $0x60] ss:$8 sps:$4 sm:$0xff]  }
0x1d20   :  { %v12888_v35 = vpop.f32.mrf.mxu1 }
0x1d22   :  { %v12926_v54 = vpop.f32.mrf.mxu1 }
0x1d23   :  { %v12973_v51 = vpack.c.bf16 %v12926_v54, %v12926_v54 }
0x1d24   :  { %v12928_v8 = vpop.f32.mrf.mxu1 }
0x1d25   :  { %v12974_v21 = vpack.c.bf16 %v12928_v8, %v12928_v8 }
0x1d26   :  { %v12930_v44 = vpop.f32.mrf.mxu1 }
0x1d27   :  { %13297 = vmatprep.mubr.bf16.mxu1 %v12974_v21  ;;  %v21355_v44 = vld [vmem:[%s27300_s13 + $0x170] ss:$8 sps:$4 sm:$0xff]  }
0x1d28   :  { %v12931_v41 = vpop.f32.mrf.mxu1  ;;  %13298 = vmatmul.mubr.bf16.vlgmr.msra.gmra.mxu1 %v12973_v51 }
0x1d29   :  { %13886 = vmatpush1.bf16.msra.mxu1 %v21307_v38  ;;  %v21765_v41 = vld [vmem:[%s27295_s8 + $0x4] sm:$0xf] }
0x1d2a   :  { %v12967_v45 = vpop.f32.mrf.mxu1  ;;  %13887 = vmatprep.subr.bf16.mxu1 %v21312_v47  ;;  %v21360_v47 = vld [vmem:[%s27300_s13 + $0x164] ss:$8 sps:$4 sm:$0xff]  }
0x1d2b   :  { %v12975_v7 = vpack.c.bf16 %v12967_v45, %v12967_v45  ;;  %v21363_v45 = vld [vmem:[%s27300_s13 + $0x154] ss:$8 sps:$4 sm:$0xff]  }
0x1d2c   :  { %v19807_v25 = vpop.f32.mrf.mxu1 }
0x1d2d   :  { %13339 = vmatmul.mubr.bf16.vlgmr.msra.gmra.mxu0 %v12975_v7  ;;  %13888 = vmatpush1.bf16.msra.mxu1 %v21310_v50  ;;  %v21358_v50 = vld [vmem:[%s27300_s13 + $0x160] ss:$8 sps:$4 sm:$0xff]   ;;  %v21366_v7 = vld [vmem:[%s27300_s13 + $0x144] ss:$8 sps:$4 sm:$0xff]  }
0x1d2e   :  { %v12970_v46 = vpop.f32.mrf.mxu1  ;;  %13889 = vmatprep.subr.bf16.mxu1 %v21315_v55  ;;  %13405 = vmatprep.mubr.bf16.mxu0 %v27320_v39  ;;  %v21361_v55 = vld [vmem:[%s27300_s13 + $0x150] ss:$8 sps:$4 sm:$0xff]   ;;  %v21364_v25 = vld [vmem:[%s27300_s13 + $0x140] ss:$8 sps:$4 sm:$0xff]  }
0x1d2f   :  { %v21367_v46 = vld [vmem:[%s27300_s13 + $0x130] ss:$8 sps:$4 sm:$0xff]  }
0x1d30   :  { %v19808_v31 = vpop.f32.mrf.mxu1 }
0x1d31   :  { %13890 = vmatpush1.bf16.msra.mxu1 %v21313_v3  ;;  %v21369_v3 = vld [vmem:[%s27300_s13 + $0x134] ss:$8 sps:$4 sm:$0xff]   ;;  %v21370_v31 = vld [vmem:[%s27300_s13 + $0x120] ss:$8 sps:$4 sm:$0xff]  }
0x1d32   :  { %13891 = vmatprep.subr.bf16.mxu1 %v21318_v63  ;;  %v21372_v63 = vld [vmem:[%s27300_s13 + $0x124] ss:$8 sps:$4 sm:$0xff]  }
0x1d35   :  { %13892 = vmatpush1.bf16.msra.mxu1 %v21316_v59  ;;  %v21375_v59 = vld [vmem:[%s27300_s13 + $0x114] ss:$8 sps:$4 sm:$0xff]  }
0x1d36   :  { %13893 = vmatprep.subr.bf16.mxu1 %v21321_v53  ;;  %v21373_v53 = vld [vmem:[%s27300_s13 + $0x110] ss:$8 sps:$4 sm:$0xff]  }
0x1d39   :  { %13894 = vmatpush1.bf16.msra.mxu1 %v21319_v32  ;;  %v21378_v32 = vld [vmem:[%s27300_s13 + $0x104] ss:$8 sps:$4 sm:$0xff]  }
0x1d3a   :  { %13895 = vmatprep.subr.bf16.mxu1 %v21324_v56  ;;  %v21376_v56 = vld [vmem:[%s27300_s13 + $0x100] ss:$8 sps:$4 sm:$0xff]  }
0x1d3d   :  { %13896 = vmatpush1.bf16.msra.mxu1 %v21322_v11  ;;  %v21381_v11 = vld [vmem:[%s27300_s13 + $0x1f4] ss:$8 sps:$4 sm:$0xff]  }
0x1d3e   :  { %13897 = vmatprep.subr.bf16.mxu1 %v21327_v5  ;;  %v21379_v5 = vld [vmem:[%s27300_s13 + $0x1f0] ss:$8 sps:$4 sm:$0xff]  }
0x1d41   :  { %13898 = vmatpush1.bf16.msra.mxu1 %v21325_v43  ;;  %v21384_v43 = vld [vmem:[%s27300_s13 + $0x1e4] ss:$8 sps:$4 sm:$0xff]  }
0x1d42   :  { %13899 = vmatprep.subr.bf16.mxu1 %v21330_v36  ;;  %v21382_v36 = vld [vmem:[%s27300_s13 + $0x1e0] ss:$8 sps:$4 sm:$0xff]  }
0x1d45   :  { %13900 = vmatpush1.bf16.msra.mxu1 %v21328_v28  ;;  %v21387_v28 = vld [vmem:[%s27300_s13 + $0x1d4] ss:$8 sps:$4 sm:$0xff]  }
0x1d46   :  { %13901 = vmatprep.subr.bf16.mxu1 %v21333_v61  ;;  %v21385_v61 = vld [vmem:[%s27300_s13 + $0x1d0] ss:$8 sps:$4 sm:$0xff]  }
0x1d49   :  { %13902 = vmatpush2.bf16.msra.mxu1 %v21331_v13  ;;  %v21390_v13 = vld [vmem:[%s27300_s13 + $0x1c4] ss:$8 sps:$4 sm:$0xff]  }
0x1d4a   :  { %13903 = vmatprep.subr.bf16.mxu1 %v21336_v27  ;;  %v21388_v27 = vld [vmem:[%s27300_s13 + $0x1c0] ss:$8 sps:$4 sm:$0xff]  }
0x1d4d   :  { %13904 = vmatpush2.bf16.msra.mxu1 %v21334_v62  ;;  %v21393_v62 = vld [vmem:[%s27300_s13 + $0x1b4] ss:$8 sps:$4 sm:$0xff]  }
0x1d4e   :  { %13905 = vmatprep.subr.bf16.mxu1 %v21339_v33  ;;  %v21391_v33 = vld [vmem:[%s27300_s13 + $0x1b0] ss:$8 sps:$4 sm:$0xff]  }
0x1d51   :  { %13906 = vmatpush2.bf16.msra.mxu1 %v21337_v24  ;;  %v21396_v24 = vld [vmem:[%s27300_s13 + $0x1a4] ss:$8 sps:$4 sm:$0xff]  }
0x1d52   :  { %13907 = vmatprep.subr.bf16.mxu1 %v21342_v14  ;;  %v21394_v14 = vld [vmem:[%s27300_s13 + $0x1a0] ss:$8 sps:$4 sm:$0xff]  }
0x1d55   :  { %13908 = vmatpush2.bf16.msra.mxu1 %v21340_v2  ;;  %v21399_v2 = vld [vmem:[%s27300_s13 + $0x194] ss:$8 sps:$4 sm:$0xff]  }
0x1d56   :  { %13909 = vmatprep.subr.bf16.mxu1 %v21345_v60  ;;  %v21397_v60 = vld [vmem:[%s27300_s13 + $0x190] ss:$8 sps:$4 sm:$0xff]  }
0x1d59   :  { %13910 = vmatpush2.bf16.msra.mxu1 %v21343_v22  ;;  %v21402_v22 = vld [vmem:[%s27300_s13 + $0x184] ss:$8 sps:$4 sm:$0xff]  }
0x1d5a   :  { %13911 = vmatprep.subr.bf16.mxu1 %v21348_v30  ;;  %v21400_v30 = vld [vmem:[%s27300_s13 + $0x180] ss:$8 sps:$4 sm:$0xff]  }
0x1d5d   :  { %13912 = vmatpush2.bf16.msra.mxu1 %v21346_v48 }
0x1d5e   :  { %13913 = vmatprep.subr.bf16.mxu1 %v21351_v58 }
0x1d61   :  { %13914 = vmatpush2.bf16.msra.mxu1 %v21349_v23 }
0x1d62   :  { %13915 = vmatprep.subr.bf16.mxu1 %v21354_v17 }
0x1d65   :  { %13916 = vmatpush2.bf16.msra.mxu1 %v21352_v52 }
0x1de8   :  { %v13299_v49 = vpop.f32.mrf.mxu1 }
0x1dea   :  { %v13301_v20 = vpop.f32.mrf.mxu1 }
0x1dec   :  { %v13303_v40 = vpop.f32.mrf.mxu1 }
0x1ded   :  { %v13340_v16 = vpop.f32.mrf.mxu0 }
0x1dee   :  { %v13341_v6 = vadd.f32 %v13340_v16, %v13299_v49  ;;  %v13304_v18 = vpop.f32.mrf.mxu1  ;;  %v21405_v49 = vld [vmem:[%s27300_s13 + $0x374] ss:$8 sps:$4 sm:$0xff]  }
0x1def   :  { %v13342_v26 = vpop.f32.mrf.mxu0  ;;  %v21408_v18 = vld [vmem:[%s27300_s13 + $0x364] ss:$8 sps:$4 sm:$0xff]  }
0x1df0   :  { %v13347_v0 = vadd.f32 %v13341_v6, %v26235_v1  ;;  %v13343_v29 = vadd.f32 %v13342_v26, %v13301_v20  ;;  %v21357_v1 = vld [vmem:[%s27300_s13 + $0x174] ss:$8 sps:$4 sm:$0xff]   ;;  %v21403_v6 = vld [vmem:[%s27300_s13 + $0x370] ss:$8 sps:$4 sm:$0xff]  }
0x1df1   :  { %v13344_v4 = vpop.f32.mrf.mxu0 }
0x1df2   :  { %v13361_v12 = vadd.f32 %v13354_v15, %v13347_v0  ;;  %v13348_v19 = vadd.f32 %v13343_v29, %v26238_v37  ;;  %v21764_v37 = vld [vmem:[%s27295_s8] sm:$0xf]  ;;  %v21411_v0 = vld [vmem:[%s27300_s13 + $0x274] ss:$8 sps:$4 sm:$0xff]   ;;  %v21766_v29 = vld [vmem:[%s27295_s8 + $0xc] sm:$0xf] }
0x1df3   :  { %v13345_v57 = vpop.f32.mrf.mxu0  ;;  %v21406_v4 = vld [vmem:[%s27300_s13 + $0x360] ss:$8 sps:$4 sm:$0xff]  }
0x1df4   :  { %v13363_v35 = vmax.f32 %v13361_v12, 0.0  ;;  %v13362_v54 = vadd.f32 %v13358_v34, %v13348_v19  ;;  %v21414_v12 = vld [vmem:[%s27300_s13 + $0x354] ss:$8 sps:$4 sm:$0xff]   ;;  %v21409_v19 = vld [vmem:[%s27300_s13 + $0x270] ss:$8 sps:$4 sm:$0xff]  }
0x1df5   :  { %v21412_v57 = vld [vmem:[%s27300_s13 + $0x350] ss:$8 sps:$4 sm:$0xff]  }
0x1df6   :  { %v13365_v8 = vpack.c.bf16 %v13363_v35, %v13363_v35  ;;  %v13364_v21 = vmax.f32 %v13362_v54, 0.0  ;;  %v21417_v35 = vld [vmem:[%s27300_s13 + $0x264] ss:$8 sps:$4 sm:$0xff]  }
0x1df7   :  { %v21420_v54 = vld [vmem:[%s27300_s13 + $0x344] ss:$8 sps:$4 sm:$0xff]  }
0x1df8   :  { %v26341_v38 = vpack.c.bf16 %v13364_v21, %v13364_v21  ;;  %v26344_v51 = vsel %vm5827_vm2, %v13365_v8, 0  ;;  %v21767_v8 = vld [vmem:[%s27295_s8 + $0x8] sm:$0xf] }
0x1df9   :  { %v21415_v21 = vld [vmem:[%s27300_s13 + $0x260] ss:$8 sps:$4 sm:$0xff]  }
0x1dfa   :  { %18593 = vmatprep.subr.msk.bf16.mxu0 %vm5827_vm2, %v26341_v38  ;;  %18759 = vmatprep.subr.msk.bf16.mxu1 %vm5827_vm2, %v26341_v38 }
0x1dfb   :  { %13388 = vmatpush1.bf16.msra.mxu0 %v26344_v51 }
0x1dfc   :  { %18595 = vmatprep.subr.msk.bf16.mxu0 %vm5827_vm2, %v26341_v38 }
0x1dfe   :  { %18594 = vmatmul.mubr.msk.bf16.vlgmr.msra.gmra.mxu0 %vm5823_vm3, %v21764_v37  ;;  %v21423_v37 = vld [vmem:[%s27300_s13 + $0x254] ss:$8 sps:$4 sm:$0xff]  }
0x1dff   :  { %13463 = vmatpush1.bf16.msra.mxu0 %v26344_v51  ;;  %13480 = vmatprep.mubr.bf16.mxu0 %v27320_v39 }
0x1e00   :  { %13684 = vmatprep.subr.bf16.mxu0 %v21357_v1  ;;  %v21418_v1 = vld [vmem:[%s27300_s13 + $0x340] ss:$8 sps:$4 sm:$0xff]  }
0x1e06   :  { %18596 = vmatmul.mubr.msk.bf16.vlgmr.msra.gmra.mxu0 %vm5823_vm3, %v21765_v41  ;;  %v21424_v41 = vld [vmem:[%s27300_s13 + $0x330] ss:$8 sps:$4 sm:$0xff]  }
0x1e07   :  { %13685 = vmatpush1.bf16.msra.mxu0 %v21355_v44  ;;  %v21426_v44 = vld [vmem:[%s27300_s13 + $0x334] ss:$8 sps:$4 sm:$0xff]  }
0x1e08   :  { %13686 = vmatprep.subr.bf16.mxu0 %v21360_v47  ;;  %v21421_v47 = vld [vmem:[%s27300_s13 + $0x250] ss:$8 sps:$4 sm:$0xff]  }
0x1e0b   :  { %13687 = vmatpush1.bf16.msra.mxu0 %v21358_v50  ;;  %v21429_v50 = vld [vmem:[%s27300_s13 + $0x244] ss:$8 sps:$4 sm:$0xff]  }
0x1e0c   :  { %13688 = vmatprep.subr.bf16.mxu0 %v21363_v45  ;;  %v21432_v45 = vld [vmem:[%s27300_s13 + $0x324] ss:$8 sps:$4 sm:$0xff]  }
0x1e0f   :  { %13689 = vmatpush1.bf16.msra.mxu0 %v21361_v55  ;;  %v21427_v55 = vld [vmem:[%s27300_s13 + $0x240] ss:$8 sps:$4 sm:$0xff]  }
0x1e10   :  { %13690 = vmatprep.subr.bf16.mxu0 %v21366_v7  ;;  %v21430_v7 = vld [vmem:[%s27300_s13 + $0x320] ss:$8 sps:$4 sm:$0xff]  }
0x1e13   :  { %13691 = vmatpush1.bf16.msra.mxu0 %v21364_v25  ;;  %v21435_v25 = vld [vmem:[%s27300_s13 + $0x234] ss:$8 sps:$4 sm:$0xff]  }
0x1e14   :  { %13692 = vmatprep.subr.bf16.mxu0 %v21369_v3  ;;  %v21438_v3 = vld [vmem:[%s27300_s13 + $0x314] ss:$8 sps:$4 sm:$0xff]  }
0x1e17   :  { %13693 = vmatpush1.bf16.msra.mxu0 %v21367_v46  ;;  %v21433_v46 = vld [vmem:[%s27300_s13 + $0x230] ss:$8 sps:$4 sm:$0xff]  }
0x1e18   :  { %13694 = vmatprep.subr.bf16.mxu0 %v21372_v63  ;;  %v21436_v63 = vld [vmem:[%s27300_s13 + $0x310] ss:$8 sps:$4 sm:$0xff]  }
0x1e1b   :  { %13695 = vmatpush1.bf16.msra.mxu0 %v21370_v31  ;;  %v21441_v31 = vld [vmem:[%s27300_s13 + $0x224] ss:$8 sps:$4 sm:$0xff]  }
0x1e1c   :  { %13696 = vmatprep.subr.bf16.mxu0 %v21375_v59  ;;  %v21444_v59 = vld [vmem:[%s27300_s13 + $0x304] ss:$8 sps:$4 sm:$0xff]  }
0x1e1f   :  { %13697 = vmatpush1.bf16.msra.mxu0 %v21373_v53  ;;  %v21439_v53 = vld [vmem:[%s27300_s13 + $0x220] ss:$8 sps:$4 sm:$0xff]  }
0x1e20   :  { %13698 = vmatprep.subr.bf16.mxu0 %v21378_v32  ;;  %v21442_v32 = vld [vmem:[%s27300_s13 + $0x300] ss:$8 sps:$4 sm:$0xff]  }
0x1e23   :  { %13699 = vmatpush1.bf16.msra.mxu0 %v21376_v56  ;;  %v21447_v56 = vld [vmem:[%s27300_s13 + $0x214] ss:$8 sps:$4 sm:$0xff]  }
0x1e24   :  { %13700 = vmatprep.subr.bf16.mxu0 %v21381_v11  ;;  %v21450_v11 = vld [vmem:[%s27300_s13 + $0x3f4] ss:$8 sps:$4 sm:$0xff]  }
0x1e27   :  { %13701 = vmatpush2.bf16.msra.mxu0 %v21379_v5  ;;  %v21445_v5 = vld [vmem:[%s27300_s13 + $0x210] ss:$8 sps:$4 sm:$0xff]  }
0x1e28   :  { %13702 = vmatprep.subr.bf16.mxu0 %v21384_v43  ;;  %v21448_v43 = vld [vmem:[%s27300_s13 + $0x3f0] ss:$8 sps:$4 sm:$0xff]  }
0x1e2b   :  { %13703 = vmatpush2.bf16.msra.mxu0 %v21382_v36  ;;  %v21453_v36 = vld [vmem:[%s27300_s13 + $0x204] ss:$8 sps:$4 sm:$0xff]  }
0x1e2c   :  { %13704 = vmatprep.subr.bf16.mxu0 %v21387_v28  ;;  %v21456_v28 = vld [vmem:[%s27300_s13 + $0x3e4] ss:$8 sps:$4 sm:$0xff]  }
0x1e2f   :  { %13705 = vmatpush2.bf16.msra.mxu0 %v21385_v61  ;;  %v21451_v61 = vld [vmem:[%s27300_s13 + $0x200] ss:$8 sps:$4 sm:$0xff]  }
0x1e30   :  { %13706 = vmatprep.subr.bf16.mxu0 %v21390_v13  ;;  %v21454_v13 = vld [vmem:[%s27300_s13 + $0x3e0] ss:$8 sps:$4 sm:$0xff]  }
0x1e33   :  { %13707 = vmatpush2.bf16.msra.mxu0 %v21388_v27  ;;  %v21459_v27 = vld [vmem:[%s27300_s13 + $0x2f4] ss:$8 sps:$4 sm:$0xff]  }
0x1e34   :  { %13708 = vmatprep.subr.bf16.mxu0 %v21393_v62  ;;  %v21462_v62 = vld [vmem:[%s27300_s13 + $0x3d4] ss:$8 sps:$4 sm:$0xff]  }
0x1e37   :  { %13709 = vmatpush2.bf16.msra.mxu0 %v21391_v33  ;;  %v21457_v33 = vld [vmem:[%s27300_s13 + $0x2f0] ss:$8 sps:$4 sm:$0xff]  }
0x1e38   :  { %13710 = vmatprep.subr.bf16.mxu0 %v21396_v24  ;;  %v21460_v24 = vld [vmem:[%s27300_s13 + $0x3d0] ss:$8 sps:$4 sm:$0xff]  }
0x1e3b   :  { %13711 = vmatpush2.bf16.msra.mxu0 %v21394_v14  ;;  %v21465_v14 = vld [vmem:[%s27300_s13 + $0x2e4] ss:$8 sps:$4 sm:$0xff]  }
0x1e3c   :  { %13712 = vmatprep.subr.bf16.mxu0 %v21399_v2  ;;  %v21468_v2 = vld [vmem:[%s27300_s13 + $0x3c4] ss:$8 sps:$4 sm:$0xff]  }
0x1e3f   :  { %13713 = vmatpush2.bf16.msra.mxu0 %v21397_v60  ;;  %v21463_v60 = vld [vmem:[%s27300_s13 + $0x2e0] ss:$8 sps:$4 sm:$0xff]  }
0x1e40   :  { %13714 = vmatprep.subr.bf16.mxu0 %v21402_v22  ;;  %v21466_v22 = vld [vmem:[%s27300_s13 + $0x3c0] ss:$8 sps:$4 sm:$0xff]  }
0x1e43   :  { %13715 = vmatpush2.bf16.msra.mxu0 %v21400_v30  ;;  %v21471_v30 = vld [vmem:[%s27300_s13 + $0x2d4] ss:$8 sps:$4 sm:$0xff]  }
0x1e44   :  { %18693 = vmatprep.subr.msk.bf16.mxu0 %vm5827_vm2, %v26341_v38 }
0x1ebe   :  { %v13407_v48 = vpop.f32.mrf.mxu0 }
0x1ebf   :  { %v13414_v17 = vpack.c.bf16 %v13407_v48, %v13407_v48  ;;  %v21474_v48 = vld [vmem:[%s27300_s13 + $0x3b4] ss:$8 sps:$4 sm:$0xff]  }
0x1ec0   :  { %v13409_v58 = vpop.f32.mrf.mxu0 }
0x1ec1   :  { %v13415_v23 = vpack.c.bf16 %v13409_v58, %v13409_v58  ;;  %v21469_v58 = vld [vmem:[%s27300_s13 + $0x2d0] ss:$8 sps:$4 sm:$0xff]  }
0x1ec2   :  { %v13411_v52 = vpop.f32.mrf.mxu0 }
0x1ec3   :  { %13917 = vmatprep.mubr.bf16.mxu1 %v13415_v23  ;;  %v21472_v23 = vld [vmem:[%s27300_s13 + $0x3b0] ss:$8 sps:$4 sm:$0xff]   ;;  %v21480_v52 = vld [vmem:[%s27300_s13 + $0x3a4] ss:$8 sps:$4 sm:$0xff]  }
0x1ec4   :  { %v13412_v20 = vpop.f32.mrf.mxu0  ;;  %13918 = vmatmul.mubr.bf16.vlgmr.msra.gmra.mxu1 %v13414_v17  ;;  %v21477_v17 = vld [vmem:[%s27300_s13 + $0x2c4] ss:$8 sps:$4 sm:$0xff]  }
0x1ec5   :  { %14220 = vmatpush1.bf16.msra.mxu1 %v26344_v51  ;;  %14237 = vmatprep.mubr.bf16.mxu1 %v27320_v39  ;;  %v21478_v20 = vld [vmem:[%s27300_s13 + $0x3a0] ss:$8 sps:$4 sm:$0xff]  }
0x1ec6   :  { %v13482_v42 = vpop.f32.mrf.mxu0  ;;  %14441 = vmatprep.subr.bf16.mxu1 %v21405_v49  ;;  %v21475_v49 = vld [vmem:[%s27300_s13 + $0x2c0] ss:$8 sps:$4 sm:$0xff]  }
0x1ec7   :  { %v13489_v15 = vpack.c.bf16 %v13482_v42, %v13482_v42  ;;  %v21483_v42 = vld [vmem:[%s27300_s13 + $0x2b4] ss:$8 sps:$4 sm:$0xff]  }
0x1ec8   :  { %v13484_v40 = vpop.f32.mrf.mxu0 }
0x1ec9   :  { %v13490_v16 = vpack.c.bf16 %v13484_v40, %v13484_v40  ;;  %v21486_v40 = vld [vmem:[%s27300_s13 + $0x394] ss:$8 sps:$4 sm:$0xff]  }
0x1eca   :  { %v13486_v26 = vpop.f32.mrf.mxu0 }
0x1ecb   :  { %13716 = vmatprep.mubr.bf16.mxu0 %v13490_v16  ;;  %v21481_v16 = vld [vmem:[%s27300_s13 + $0x2b0] ss:$8 sps:$4 sm:$0xff]   ;;  %v21487_v26 = vld [vmem:[%s27300_s13 + $0x2a0] ss:$8 sps:$4 sm:$0xff]  }
0x1ecc   :  { %13717 = vmatmul.mubr.bf16.vlgmr.msra.gmra.mxu0 %v13489_v15  ;;  %18760 = vmatmul.mubr.msk.bf16.vlgmr.msra.gmra.mxu1 %vm5823_vm3, %v21766_v29  ;;  %v13487_v34 = vpop.f32.mrf.mxu0  ;;  %v21489_v15 = vld [vmem:[%s27300_s13 + $0x2a4] ss:$8 sps:$4 sm:$0xff]   ;;  %v21495_v29 = vld [vmem:[%s27300_s13 + $0x294] ss:$8 sps:$4 sm:$0xff]  }
0x1ecd   :  { %13941 = vmatpush1.bf16.msra.mxu0 %v26344_v51  ;;  %14442 = vmatpush1.bf16.msra.mxu1 %v21403_v6  ;;  %v21484_v6 = vld [vmem:[%s27300_s13 + $0x390] ss:$8 sps:$4 sm:$0xff]  }
0x1ece   :  { %14443 = vmatprep.subr.bf16.mxu1 %v21408_v18  ;;  %13958 = vmatprep.mubr.bf16.mxu0 %v27320_v39  ;;  %v21492_v18 = vld [vmem:[%s27300_s13 + $0x384] ss:$8 sps:$4 sm:$0xff]   ;;  %v21493_v34 = vld [vmem:[%s27300_s13 + $0x290] ss:$8 sps:$4 sm:$0xff]  }
0x1ecf   :  { %14162 = vmatprep.subr.bf16.mxu0 %v21411_v0  ;;  %v21490_v0 = vld [vmem:[%s27300_s13 + $0x380] ss:$8 sps:$4 sm:$0xff]  }
0x1ed1   :  { %14444 = vmatpush1.bf16.msra.mxu1 %v21406_v4  ;;  %v21498_v4 = vld [vmem:[%s27300_s13 + $0x284] ss:$8 sps:$4 sm:$0xff]  }
0x1ed2   :  { %14445 = vmatprep.subr.bf16.mxu1 %v21414_v12  ;;  %v21496_v12 = vld [vmem:[%s27300_s13 + $0x280] ss:$8 sps:$4 sm:$0xff]  }
0x1ed4   :  { %18694 = vmatmul.mubr.msk.bf16.vlgmr.msra.gmra.mxu0 %vm5823_vm3, %v21767_v8 }
0x1ed5   :  { %14163 = vmatpush1.bf16.msra.mxu0 %v21409_v19  ;;  %14446 = vmatpush1.bf16.msra.mxu1 %v21412_v57 }
0x1ed6   :  { %14164 = vmatprep.subr.bf16.mxu0 %v21417_v35  ;;  %14447 = vmatprep.subr.bf16.mxu1 %v21420_v54 }
0x1ed9   :  { %14165 = vmatpush1.bf16.msra.mxu0 %v21415_v21  ;;  %14448 = vmatpush1.bf16.msra.mxu1 %v21418_v1 }
0x1eda   :  { %14166 = vmatprep.subr.bf16.mxu0 %v21423_v37  ;;  %14449 = vmatprep.subr.bf16.mxu1 %v21426_v44 }
0x1edd   :  { %14167 = vmatpush1.bf16.msra.mxu0 %v21421_v47  ;;  %14450 = vmatpush1.bf16.msra.mxu1 %v21424_v41 }
0x1ede   :  { %14168 = vmatprep.subr.bf16.mxu0 %v21429_v50  ;;  %14451 = vmatprep.subr.bf16.mxu1 %v21432_v45 }
0x1ee1   :  { %14169 = vmatpush1.bf16.msra.mxu0 %v21427_v55  ;;  %14452 = vmatpush1.bf16.msra.mxu1 %v21430_v7  ;;  %v21501_v55 = vld [vmem:[%s27300_s13 + $0x574] ss:$8 sps:$4 sm:$0xff]  }
0x1ee2   :  { %14170 = vmatprep.subr.bf16.mxu0 %v21435_v25  ;;  %14453 = vmatprep.subr.bf16.mxu1 %v21438_v3 }
0x1ee5   :  { %14171 = vmatpush1.bf16.msra.mxu0 %v21433_v46  ;;  %14454 = vmatpush1.bf16.msra.mxu1 %v21436_v63 }
0x1ee6   :  { %14172 = vmatprep.subr.bf16.mxu0 %v21441_v31  ;;  %14455 = vmatprep.subr.bf16.mxu1 %v21444_v59  ;;  %v21499_v59 = vld [vmem:[%s27300_s13 + $0x570] ss:$8 sps:$4 sm:$0xff]  }
0x1ee9   :  { %14173 = vmatpush1.bf16.msra.mxu0 %v21439_v53  ;;  %14456 = vmatpush1.bf16.msra.mxu1 %v21442_v32  ;;  %v21504_v32 = vld [vmem:[%s27300_s13 + $0x564] ss:$8 sps:$4 sm:$0xff]  }
0x1eea   :  { %14174 = vmatprep.subr.bf16.mxu0 %v21447_v56  ;;  %14457 = vmatprep.subr.bf16.mxu1 %v21450_v11  ;;  %v21507_v11 = vld [vmem:[%s27300_s13 + $0x474] ss:$8 sps:$4 sm:$0xff]  }
0x1eed   :  { %14175 = vmatpush1.bf16.msra.mxu0 %v21445_v5  ;;  %14458 = vmatpush2.bf16.msra.mxu1 %v21448_v43  ;;  %v21768_v5 = vld [vmem:[%s27295_s8 + $0x14] sm:$0xf] }
0x1eee   :  { %14176 = vmatprep.subr.bf16.mxu0 %v21453_v36  ;;  %14459 = vmatprep.subr.bf16.mxu1 %v21456_v28  ;;  %v21502_v36 = vld [vmem:[%s27300_s13 + $0x560] ss:$8 sps:$4 sm:$0xff]   ;;  %v21510_v28 = vld [vmem:[%s27300_s13 + $0x554] ss:$8 sps:$4 sm:$0xff]  }
0x1ef1   :  { %14177 = vmatpush1.bf16.msra.mxu0 %v21451_v61  ;;  %14460 = vmatpush2.bf16.msra.mxu1 %v21454_v13  ;;  %v21505_v61 = vld [vmem:[%s27300_s13 + $0x470] ss:$8 sps:$4 sm:$0xff]  }
0x1ef2   :  { %14178 = vmatprep.subr.bf16.mxu0 %v21459_v27  ;;  %14461 = vmatprep.subr.bf16.mxu1 %v21462_v62  ;;  %v21508_v13 = vld [vmem:[%s27300_s13 + $0x550] ss:$8 sps:$4 sm:$0xff]   ;;  %v21513_v27 = vld [vmem:[%s27300_s13 + $0x464] ss:$8 sps:$4 sm:$0xff]  }
0x1ef3   :  { %v21516_v62 = vld [vmem:[%s27300_s13 + $0x544] ss:$8 sps:$4 sm:$0xff]  }
0x1ef5   :  { %14179 = vmatpush2.bf16.msra.mxu0 %v21457_v33  ;;  %14462 = vmatpush2.bf16.msra.mxu1 %v21460_v24  ;;  %v21769_v33 = vld [vmem:[%s27295_s8 + $0x10] sm:$0xf]  ;;  %v21511_v24 = vld [vmem:[%s27300_s13 + $0x460] ss:$8 sps:$4 sm:$0xff]  }
0x1ef6   :  { %14180 = vmatprep.subr.bf16.mxu0 %v21465_v14  ;;  %14463 = vmatprep.subr.bf16.mxu1 %v21468_v2  ;;  %v21514_v14 = vld [vmem:[%s27300_s13 + $0x540] ss:$8 sps:$4 sm:$0xff]   ;;  %v21519_v2 = vld [vmem:[%s27300_s13 + $0x454] ss:$8 sps:$4 sm:$0xff]  }
0x1ef9   :  { %14181 = vmatpush2.bf16.msra.mxu0 %v21463_v60  ;;  %14464 = vmatpush2.bf16.msra.mxu1 %v21466_v22  ;;  %v21522_v60 = vld [vmem:[%s27300_s13 + $0x534] ss:$8 sps:$4 sm:$0xff]   ;;  %v21517_v22 = vld [vmem:[%s27300_s13 + $0x450] ss:$8 sps:$4 sm:$0xff]  }
0x1efa   :  { %14182 = vmatprep.subr.bf16.mxu0 %v21471_v30  ;;  %14465 = vmatprep.subr.bf16.mxu1 %v21474_v48  ;;  %v21520_v30 = vld [vmem:[%s27300_s13 + $0x530] ss:$8 sps:$4 sm:$0xff]   ;;  %v21525_v48 = vld [vmem:[%s27300_s13 + $0x444] ss:$8 sps:$4 sm:$0xff]  }
0x1efd   :  { %14183 = vmatpush2.bf16.msra.mxu0 %v21469_v58  ;;  %14466 = vmatpush2.bf16.msra.mxu1 %v21472_v23  ;;  %v21528_v58 = vld [vmem:[%s27300_s13 + $0x524] ss:$8 sps:$4 sm:$0xff]   ;;  %v21523_v23 = vld [vmem:[%s27300_s13 + $0x440] ss:$8 sps:$4 sm:$0xff]  }
0x1efe   :  { %14184 = vmatprep.subr.bf16.mxu0 %v21477_v17  ;;  %14467 = vmatprep.subr.bf16.mxu1 %v21480_v52  ;;  %v21526_v17 = vld [vmem:[%s27300_s13 + $0x520] ss:$8 sps:$4 sm:$0xff]   ;;  %v21531_v52 = vld [vmem:[%s27300_s13 + $0x434] ss:$8 sps:$4 sm:$0xff]  }
0x1f01   :  { %14185 = vmatpush2.bf16.msra.mxu0 %v21475_v49  ;;  %14468 = vmatpush2.bf16.msra.mxu1 %v21478_v20  ;;  %v21534_v49 = vld [vmem:[%s27300_s13 + $0x514] ss:$8 sps:$4 sm:$0xff]   ;;  %v21529_v20 = vld [vmem:[%s27300_s13 + $0x430] ss:$8 sps:$4 sm:$0xff]  }
0x1f02   :  { %14186 = vmatprep.subr.bf16.mxu0 %v21483_v42  ;;  %14469 = vmatprep.subr.bf16.mxu1 %v21486_v40  ;;  %v21532_v42 = vld [vmem:[%s27300_s13 + $0x510] ss:$8 sps:$4 sm:$0xff]   ;;  %v21537_v40 = vld [vmem:[%s27300_s13 + $0x424] ss:$8 sps:$4 sm:$0xff]  }
0x1f05   :  { %14187 = vmatpush2.bf16.msra.mxu0 %v21481_v16  ;;  %14470 = vmatpush2.bf16.msra.mxu1 %v21484_v6  ;;  %v21540_v16 = vld [vmem:[%s27300_s13 + $0x504] ss:$8 sps:$4 sm:$0xff]   ;;  %v21535_v6 = vld [vmem:[%s27300_s13 + $0x420] ss:$8 sps:$4 sm:$0xff]  }
0x1f06   :  { %14188 = vmatprep.subr.bf16.mxu0 %v21489_v15  ;;  %14471 = vmatprep.subr.bf16.mxu1 %v21492_v18  ;;  %v21538_v15 = vld [vmem:[%s27300_s13 + $0x500] ss:$8 sps:$4 sm:$0xff]   ;;  %v21543_v18 = vld [vmem:[%s27300_s13 + $0x414] ss:$8 sps:$4 sm:$0xff]  }
0x1f09   :  { %14189 = vmatpush2.bf16.msra.mxu0 %v21487_v26  ;;  %14472 = vmatpush2.bf16.msra.mxu1 %v21490_v0  ;;  %v21546_v26 = vld [vmem:[%s27300_s13 + $0x5f4] ss:$8 sps:$4 sm:$0xff]   ;;  %v21541_v0 = vld [vmem:[%s27300_s13 + $0x410] ss:$8 sps:$4 sm:$0xff]  }
0x1f0a   :  { %18891 = vmatprep.subr.msk.bf16.mxu1 %vm5827_vm2, %v26341_v38  ;;  %14190 = vmatprep.subr.bf16.mxu0 %v21495_v29  ;;  %v21544_v29 = vld [vmem:[%s27300_s13 + $0x5f0] ss:$8 sps:$4 sm:$0xff]  }
0x1f0d   :  { %14191 = vmatpush2.bf16.msra.mxu0 %v21493_v34  ;;  %v21549_v34 = vld [vmem:[%s27300_s13 + $0x404] ss:$8 sps:$4 sm:$0xff]  }
0x1f0e   :  { %14192 = vmatprep.subr.bf16.mxu0 %v21498_v4  ;;  %v21552_v4 = vld [vmem:[%s27300_s13 + $0x5e4] ss:$8 sps:$4 sm:$0xff]  }
0x1f11   :  { %14193 = vmatpush2.bf16.msra.mxu0 %v21496_v12  ;;  %v21547_v12 = vld [vmem:[%s27300_s13 + $0x400] ss:$8 sps:$4 sm:$0xff]  }
0x1f12   :  { %18825 = vmatprep.subr.msk.bf16.mxu0 %vm5827_vm2, %v26341_v38 }
0x1f84   :  { %v13919_v19 = vpop.f32.mrf.mxu1 }
0x1f86   :  { %v13921_v57 = vpop.f32.mrf.mxu1 }
0x1f88   :  { %v13923_v35 = vpop.f32.mrf.mxu1 }
0x1f89   :  { %v21558_v35 = vld [vmem:[%s27300_s13 + $0x5d4] ss:$8 sps:$4 sm:$0xff]  }
0x1f8a   :  { %v13924_v54 = vpop.f32.mrf.mxu1 }
0x1f8b   :  { %v21553_v54 = vld [vmem:[%s27300_s13 + $0x4f0] ss:$8 sps:$4 sm:$0xff]  }
0x1f8c   :  { %v13718_v8 = vpop.f32.mrf.mxu0  ;;  %v14239_v21 = vpop.f32.mrf.mxu1 }
0x1f8d   :  { %v26669_v1 = vadd.f32 %v13919_v19, %v13718_v8  ;;  %v14246_v37 = vpack.c.bf16 %v14239_v21, %v14239_v21  ;;  %v21550_v19 = vld [vmem:[%s27300_s13 + $0x5e0] ss:$8 sps:$4 sm:$0xff]   ;;  %v21556_v8 = vld [vmem:[%s27300_s13 + $0x5d0] ss:$8 sps:$4 sm:$0xff]   ;;  %v21561_v21 = vld [vmem:[%s27300_s13 + $0x4e4] ss:$8 sps:$4 sm:$0xff]  }
0x1f8e   :  { %v13720_v44 = vpop.f32.mrf.mxu0  ;;  %v14241_v47 = vpop.f32.mrf.mxu1 }
0x1f8f   :  { %v26671_v41 = vadd.f32 %v13921_v57, %v13720_v44  ;;  %v14247_v50 = vpack.c.bf16 %v14241_v47, %v14241_v47  ;;  %v21555_v57 = vld [vmem:[%s27300_s13 + $0x4f4] ss:$8 sps:$4 sm:$0xff]   ;;  %v21559_v44 = vld [vmem:[%s27300_s13 + $0x4e0] ss:$8 sps:$4 sm:$0xff]  }
0x1f90   :  { %v13722_v45 = vpop.f32.mrf.mxu0  ;;  %v14243_v7 = vpop.f32.mrf.mxu1  ;;  %v21562_v47 = vld [vmem:[%s27300_s13 + $0x5c0] ss:$8 sps:$4 sm:$0xff]  }
0x1f91   :  { %14473 = vmatprep.mubr.bf16.mxu1 %v14247_v50  ;;  %v21567_v50 = vld [vmem:[%s27300_s13 + $0x4d4] ss:$8 sps:$4 sm:$0xff]   ;;  %v21568_v7 = vld [vmem:[%s27300_s13 + $0x5b0] ss:$8 sps:$4 sm:$0xff]  }
0x1f92   :  { %v13723_v25 = vpop.f32.mrf.mxu0  ;;  %14474 = vmatmul.mubr.bf16.vlgmr.msra.gmra.mxu1 %v14246_v37  ;;  %v14244_v3 = vpop.f32.mrf.mxu1  ;;  %v21564_v37 = vld [vmem:[%s27300_s13 + $0x5c4] ss:$8 sps:$4 sm:$0xff]   ;;  %v21570_v45 = vld [vmem:[%s27300_s13 + $0x5b4] ss:$8 sps:$4 sm:$0xff]  }
0x1f93   :  { %14778 = vmatpush1.bf16.msra.mxu1 %v26344_v51  ;;  %14795 = vmatprep.mubr.bf16.mxu1 %v27320_v39  ;;  %v21573_v25 = vld [vmem:[%s27300_s13 + $0x4c4] ss:$8 sps:$4 sm:$0xff]  }
0x1f94   :  { %v13960_v46 = vpop.f32.mrf.mxu0  ;;  %14999 = vmatprep.subr.bf16.mxu1 %v21501_v55  ;;  %v21565_v55 = vld [vmem:[%s27300_s13 + $0x4d0] ss:$8 sps:$4 sm:$0xff]   ;;  %v21576_v3 = vld [vmem:[%s27300_s13 + $0x5a4] ss:$8 sps:$4 sm:$0xff]  }
0x1f95   :  { %v13967_v53 = vpack.c.bf16 %v13960_v46, %v13960_v46  ;;  %v21571_v46 = vld [vmem:[%s27300_s13 + $0x4c0] ss:$8 sps:$4 sm:$0xff]  }
0x1f96   :  { %v13962_v63 = vpop.f32.mrf.mxu0 }
0x1f97   :  { %v13968_v31 = vpack.c.bf16 %v13962_v63, %v13962_v63  ;;  %v21574_v63 = vld [vmem:[%s27300_s13 + $0x5a0] ss:$8 sps:$4 sm:$0xff]  }
0x1f98   :  { %v13964_v56 = vpop.f32.mrf.mxu0 }
0x1f99   :  { %14194 = vmatprep.mubr.bf16.mxu0 %v13968_v31  ;;  %v21579_v31 = vld [vmem:[%s27300_s13 + $0x4b4] ss:$8 sps:$4 sm:$0xff]   ;;  %v21585_v56 = vld [vmem:[%s27300_s13 + $0x4a4] ss:$8 sps:$4 sm:$0xff]  }
0x1f9a   :  { %14195 = vmatmul.mubr.bf16.vlgmr.msra.gmra.mxu0 %v13967_v53  ;;  %18892 = vmatmul.mubr.msk.bf16.vlgmr.msra.gmra.mxu1 %vm5823_vm3, %v21768_v5  ;;  %v13965_v43 = vpop.f32.mrf.mxu0  ;;  %v21577_v53 = vld [vmem:[%s27300_s13 + $0x4b0] ss:$8 sps:$4 sm:$0xff]   ;;  %v21583_v5 = vld [vmem:[%s27300_s13 + $0x4a0] ss:$8 sps:$4 sm:$0xff]  }
0x1f9b   :  { %14499 = vmatpush1.bf16.msra.mxu0 %v26344_v51  ;;  %15000 = vmatpush1.bf16.msra.mxu1 %v21499_v59  ;;  %v21582_v59 = vld [vmem:[%s27300_s13 + $0x594] ss:$8 sps:$4 sm:$0xff]   ;;  %v21586_v43 = vld [vmem:[%s27300_s13 + $0x580] ss:$8 sps:$4 sm:$0xff]  }
0x1f9c   :  { %15001 = vmatprep.subr.bf16.mxu1 %v21504_v32  ;;  %14516 = vmatprep.mubr.bf16.mxu0 %v27320_v39  ;;  %v21580_v32 = vld [vmem:[%s27300_s13 + $0x590] ss:$8 sps:$4 sm:$0xff]  }
0x1f9d   :  { %14720 = vmatprep.subr.bf16.mxu0 %v21507_v11  ;;  %v21588_v11 = vld [vmem:[%s27300_s13 + $0x584] ss:$8 sps:$4 sm:$0xff]  }
0x1f9f   :  { %15002 = vmatpush1.bf16.msra.mxu1 %v21502_v36  ;;  %v21591_v36 = vld [vmem:[%s27300_s13 + $0x494] ss:$8 sps:$4 sm:$0xff]  }
0x1fa0   :  { %15003 = vmatprep.subr.bf16.mxu1 %v21510_v28  ;;  %v21589_v28 = vld [vmem:[%s27300_s13 + $0x490] ss:$8 sps:$4 sm:$0xff]  }
0x1fa2   :  { %18826 = vmatmul.mubr.msk.bf16.vlgmr.msra.gmra.mxu0 %vm5823_vm3, %v21769_v33 }
0x1fa3   :  { %14721 = vmatpush1.bf16.msra.mxu0 %v21505_v61  ;;  %15004 = vmatpush1.bf16.msra.mxu1 %v21508_v13  ;;  %v21594_v61 = vld [vmem:[%s27300_s13 + $0x484] ss:$8 sps:$4 sm:$0xff]   ;;  %v21592_v13 = vld [vmem:[%s27300_s13 + $0x480] ss:$8 sps:$4 sm:$0xff]  }
0x1fa4   :  { %14722 = vmatprep.subr.bf16.mxu0 %v21513_v27  ;;  %15005 = vmatprep.subr.bf16.mxu1 %v21516_v62 }
0x1fa7   :  { %14723 = vmatpush1.bf16.msra.mxu0 %v21511_v24  ;;  %15006 = vmatpush1.bf16.msra.mxu1 %v21514_v14 }
0x1fa8   :  { %14724 = vmatprep.subr.bf16.mxu0 %v21519_v2  ;;  %15007 = vmatprep.subr.bf16.mxu1 %v21522_v60 }
0x1fab   :  { %14725 = vmatpush1.bf16.msra.mxu0 %v21517_v22  ;;  %15008 = vmatpush1.bf16.msra.mxu1 %v21520_v30 }
0x1fac   :  { %14726 = vmatprep.subr.bf16.mxu0 %v21525_v48  ;;  %15009 = vmatprep.subr.bf16.mxu1 %v21528_v58 }
0x1faf   :  { %14727 = vmatpush1.bf16.msra.mxu0 %v21523_v23  ;;  %15010 = vmatpush1.bf16.msra.mxu1 %v21526_v17 }
0x1fb0   :  { %14728 = vmatprep.subr.bf16.mxu0 %v21531_v52  ;;  %15011 = vmatprep.subr.bf16.mxu1 %v21534_v49  ;;  %v21645_v49 = vld [vmem:[%s27300_s13 + $0x774] ss:$8 sps:$4 sm:$0xff]  }
0x1fb3   :  { %14729 = vmatpush1.bf16.msra.mxu0 %v21529_v20  ;;  %15012 = vmatpush1.bf16.msra.mxu1 %v21532_v42 }
0x1fb4   :  { %14730 = vmatprep.subr.bf16.mxu0 %v21537_v40  ;;  %15013 = vmatprep.subr.bf16.mxu1 %v21540_v16 }
0x1fb7   :  { %14731 = vmatpush1.bf16.msra.mxu0 %v21535_v6  ;;  %15014 = vmatpush1.bf16.msra.mxu1 %v21538_v15 }
0x1fb8   :  { %14732 = vmatprep.subr.bf16.mxu0 %v21543_v18  ;;  %15015 = vmatprep.subr.bf16.mxu1 %v21546_v26  ;;  %v21597_v18 = vld [vmem:[%s27300_s13 + $0x674] ss:$8 sps:$4 sm:$0xff]  }
0x1fbb   :  { %14733 = vmatpush1.bf16.msra.mxu0 %v21541_v0  ;;  %15016 = vmatpush2.bf16.msra.mxu1 %v21544_v29  ;;  %v21643_v0 = vld [vmem:[%s27300_s13 + $0x770] ss:$8 sps:$4 sm:$0xff]   ;;  %v21648_v29 = vld [vmem:[%s27300_s13 + $0x764] ss:$8 sps:$4 sm:$0xff]  }
0x1fbc   :  { %14734 = vmatprep.subr.bf16.mxu0 %v21549_v34  ;;  %15017 = vmatprep.subr.bf16.mxu1 %v21552_v4  ;;  %v21770_v34 = vld [vmem:[%s27295_s8 + $0x1c] sm:$0xf] }
0x1fbf   :  { %14735 = vmatpush1.bf16.msra.mxu0 %v21547_v12  ;;  %15018 = vmatpush2.bf16.msra.mxu1 %v21550_v19  ;;  %v21646_v12 = vld [vmem:[%s27300_s13 + $0x760] ss:$8 sps:$4 sm:$0xff]   ;;  %v21651_v19 = vld [vmem:[%s27300_s13 + $0x754] ss:$8 sps:$4 sm:$0xff]  }
0x1fc0   :  { %14736 = vmatprep.subr.bf16.mxu0 %v21555_v57  ;;  %15019 = vmatprep.subr.bf16.mxu1 %v21558_v35  ;;  %v21595_v57 = vld [vmem:[%s27300_s13 + $0x670] ss:$8 sps:$4 sm:$0xff]   ;;  %v21600_v35 = vld [vmem:[%s27300_s13 + $0x664] ss:$8 sps:$4 sm:$0xff]  }
0x1fc3   :  { %14737 = vmatpush2.bf16.msra.mxu0 %v21553_v54  ;;  %15020 = vmatpush2.bf16.msra.mxu1 %v21556_v8  ;;  %v21649_v54 = vld [vmem:[%s27300_s13 + $0x750] ss:$8 sps:$4 sm:$0xff]   ;;  %v21654_v8 = vld [vmem:[%s27300_s13 + $0x744] ss:$8 sps:$4 sm:$0xff]  }
0x1fc4   :  { %14738 = vmatprep.subr.bf16.mxu0 %v21561_v21  ;;  %15021 = vmatprep.subr.bf16.mxu1 %v21564_v37  ;;  %v21771_v21 = vld [vmem:[%s27295_s8 + $0x18] sm:$0xf]  ;;  %v21598_v37 = vld [vmem:[%s27300_s13 + $0x660] ss:$8 sps:$4 sm:$0xff]  }
0x1fc7   :  { %14739 = vmatpush2.bf16.msra.mxu0 %v21559_v44  ;;  %15022 = vmatpush2.bf16.msra.mxu1 %v21562_v47  ;;  %v21603_v44 = vld [vmem:[%s27300_s13 + $0x654] ss:$8 sps:$4 sm:$0xff]   ;;  %v21652_v47 = vld [vmem:[%s27300_s13 + $0x740] ss:$8 sps:$4 sm:$0xff]  }
0x1fc8   :  { %14740 = vmatprep.subr.bf16.mxu0 %v21567_v50  ;;  %15023 = vmatprep.subr.bf16.mxu1 %v21570_v45  ;;  %v21657_v50 = vld [vmem:[%s27300_s13 + $0x734] ss:$8 sps:$4 sm:$0xff]   ;;  %v21601_v45 = vld [vmem:[%s27300_s13 + $0x650] ss:$8 sps:$4 sm:$0xff]  }
0x1fcb   :  { %14741 = vmatpush2.bf16.msra.mxu0 %v21565_v55  ;;  %15024 = vmatpush2.bf16.msra.mxu1 %v21568_v7  ;;  %v21606_v55 = vld [vmem:[%s27300_s13 + $0x644] ss:$8 sps:$4 sm:$0xff]   ;;  %v21655_v7 = vld [vmem:[%s27300_s13 + $0x730] ss:$8 sps:$4 sm:$0xff]  }
0x1fcc   :  { %14742 = vmatprep.subr.bf16.mxu0 %v21573_v25  ;;  %15025 = vmatprep.subr.bf16.mxu1 %v21576_v3  ;;  %v21660_v25 = vld [vmem:[%s27300_s13 + $0x724] ss:$8 sps:$4 sm:$0xff]   ;;  %v21604_v3 = vld [vmem:[%s27300_s13 + $0x640] ss:$8 sps:$4 sm:$0xff]  }
0x1fcf   :  { %14743 = vmatpush2.bf16.msra.mxu0 %v21571_v46  ;;  %15026 = vmatpush2.bf16.msra.mxu1 %v21574_v63  ;;  %v21609_v46 = vld [vmem:[%s27300_s13 + $0x634] ss:$8 sps:$4 sm:$0xff]   ;;  %v21658_v63 = vld [vmem:[%s27300_s13 + $0x720] ss:$8 sps:$4 sm:$0xff]  }
0x1fd0   :  { %14744 = vmatprep.subr.bf16.mxu0 %v21579_v31  ;;  %15027 = vmatprep.subr.bf16.mxu1 %v21582_v59  ;;  %v21663_v31 = vld [vmem:[%s27300_s13 + $0x714] ss:$8 sps:$4 sm:$0xff]   ;;  %v21607_v59 = vld [vmem:[%s27300_s13 + $0x630] ss:$8 sps:$4 sm:$0xff]  }
0x1fd3   :  { %14745 = vmatpush2.bf16.msra.mxu0 %v21577_v53  ;;  %15028 = vmatpush2.bf16.msra.mxu1 %v21580_v32  ;;  %v21612_v53 = vld [vmem:[%s27300_s13 + $0x624] ss:$8 sps:$4 sm:$0xff]   ;;  %v21661_v32 = vld [vmem:[%s27300_s13 + $0x710] ss:$8 sps:$4 sm:$0xff]  }
0x1fd4   :  { %14746 = vmatprep.subr.bf16.mxu0 %v21585_v56  ;;  %15029 = vmatprep.subr.bf16.mxu1 %v21588_v11  ;;  %v21666_v56 = vld [vmem:[%s27300_s13 + $0x704] ss:$8 sps:$4 sm:$0xff]   ;;  %v21610_v11 = vld [vmem:[%s27300_s13 + $0x620] ss:$8 sps:$4 sm:$0xff]  }
0x1fd7   :  { %14747 = vmatpush2.bf16.msra.mxu0 %v21583_v5  ;;  %15030 = vmatpush2.bf16.msra.mxu1 %v21586_v43  ;;  %v21615_v5 = vld [vmem:[%s27300_s13 + $0x614] ss:$8 sps:$4 sm:$0xff]   ;;  %v21664_v43 = vld [vmem:[%s27300_s13 + $0x700] ss:$8 sps:$4 sm:$0xff]  }
0x1fd8   :  { %19023 = vmatprep.subr.msk.bf16.mxu1 %vm5827_vm2, %v26341_v38  ;;  %14748 = vmatprep.subr.bf16.mxu0 %v21591_v36  ;;  %v21669_v36 = vld [vmem:[%s27300_s13 + $0x7f4] ss:$8 sps:$4 sm:$0xff]  }
0x1fdb   :  { %14749 = vmatpush2.bf16.msra.mxu0 %v21589_v28  ;;  %v21613_v28 = vld [vmem:[%s27300_s13 + $0x610] ss:$8 sps:$4 sm:$0xff]  }
0x1fdc   :  { %14750 = vmatprep.subr.bf16.mxu0 %v21594_v61  ;;  %v21618_v61 = vld [vmem:[%s27300_s13 + $0x604] ss:$8 sps:$4 sm:$0xff]  }
0x1fdf   :  { %14751 = vmatpush2.bf16.msra.mxu0 %v21592_v13  ;;  %v21667_v13 = vld [vmem:[%s27300_s13 + $0x7f0] ss:$8 sps:$4 sm:$0xff]  }
0x1fe0   :  { %18957 = vmatprep.subr.msk.bf16.mxu0 %vm5827_vm2, %v26341_v38 }
0x2052   :  { %v14475_v27 = vpop.f32.mrf.mxu1 }
0x2054   :  { %v14477_v62 = vpop.f32.mrf.mxu1 }
0x2056   :  { %v14479_v33 = vpop.f32.mrf.mxu1 }
0x2057   :  { %v21621_v33 = vld [vmem:[%s27300_s13 + $0x6f4] ss:$8 sps:$4 sm:$0xff]  }
0x2058   :  { %v14480_v24 = vpop.f32.mrf.mxu1 }
0x2059   :  { %v21670_v24 = vld [vmem:[%s27300_s13 + $0x7e0] ss:$8 sps:$4 sm:$0xff]  }
0x205a   :  { %v14196_v14 = vpop.f32.mrf.mxu0  ;;  %v14797_v2 = vpop.f32.mrf.mxu1 }
0x205b   :  { %v14203_v60 = vadd.f32 %v14196_v14, %v26669_v1  ;;  %v14804_v22 = vpack.c.bf16 %v14797_v2, %v14797_v2  ;;  %v21675_v14 = vld [vmem:[%s27300_s13 + $0x7d4] ss:$8 sps:$4 sm:$0xff]   ;;  %v21619_v2 = vld [vmem:[%s27300_s13 + $0x6f0] ss:$8 sps:$4 sm:$0xff]  }
0x205c   :  { %v14198_v30 = vpop.f32.mrf.mxu0  ;;  %v14799_v48 = vpop.f32.mrf.mxu1 }
0x205d   :  { %v14204_v58 = vadd.f32 %v14198_v30, %v26671_v41  ;;  %v14805_v23 = vpack.c.bf16 %v14799_v48, %v14799_v48  ;;  %v26883_v17 = vadd.f32 %v14475_v27, %v14203_v60  ;;  %v21672_v27 = vld [vmem:[%s27300_s13 + $0x7e4] ss:$8 sps:$4 sm:$0xff]   ;;  %v21622_v48 = vld [vmem:[%s27300_s13 + $0x6e0] ss:$8 sps:$4 sm:$0xff]  }
0x205e   :  { %v14200_v52 = vpop.f32.mrf.mxu0  ;;  %v14801_v20 = vpop.f32.mrf.mxu1  ;;  %v21624_v60 = vld [vmem:[%s27300_s13 + $0x6e4] ss:$8 sps:$4 sm:$0xff]  }
0x205f   :  { %15031 = vmatprep.mubr.bf16.mxu1 %v14805_v23  ;;  %v26888_v42 = vadd.f32 %v14477_v62, %v14204_v58  ;;  %v21616_v62 = vld [vmem:[%s27300_s13 + $0x600] ss:$8 sps:$4 sm:$0xff]   ;;  %v21678_v30 = vld [vmem:[%s27300_s13 + $0x7c4] ss:$8 sps:$4 sm:$0xff]   ;;  %v21627_v58 = vld [vmem:[%s27300_s13 + $0x6d4] ss:$8 sps:$4 sm:$0xff]  }
0x2060   :  { %v14201_v40 = vpop.f32.mrf.mxu0  ;;  %15032 = vmatmul.mubr.bf16.vlgmr.msra.gmra.mxu1 %v14804_v22  ;;  %v14802_v1 = vpop.f32.mrf.mxu1  ;;  %v21673_v22 = vld [vmem:[%s27300_s13 + $0x7d0] ss:$8 sps:$4 sm:$0xff]   ;;  %v21676_v23 = vld [vmem:[%s27300_s13 + $0x7c0] ss:$8 sps:$4 sm:$0xff]  }
0x2061   :  { %15336 = vmatpush1.bf16.msra.mxu1 %v26344_v51  ;;  %15353 = vmatprep.mubr.bf16.mxu1 %v27320_v39  ;;  %v21625_v52 = vld [vmem:[%s27300_s13 + $0x6d0] ss:$8 sps:$4 sm:$0xff]   ;;  %v21628_v20 = vld [vmem:[%s27300_s13 + $0x6c0] ss:$8 sps:$4 sm:$0xff]   ;;  %v21633_v40 = vld [vmem:[%s27300_s13 + $0x6b4] ss:$8 sps:$4 sm:$0xff]  }
0x2062   :  { %v14518_v41 = vpop.f32.mrf.mxu0  ;;  %15557 = vmatprep.subr.bf16.mxu1 %v21645_v49  ;;  %v21630_v49 = vld [vmem:[%s27300_s13 + $0x6c4] ss:$8 sps:$4 sm:$0xff]   ;;  %v21631_v1 = vld [vmem:[%s27300_s13 + $0x6b0] ss:$8 sps:$4 sm:$0xff]  }
0x2063   :  { %v14525_v15 = vpack.c.bf16 %v14518_v41, %v14518_v41  ;;  %v21636_v41 = vld [vmem:[%s27300_s13 + $0x6a4] ss:$8 sps:$4 sm:$0xff]  }
0x2064   :  { %v14520_v16 = vpop.f32.mrf.mxu0 }
0x2065   :  { %v14526_v6 = vpack.c.bf16 %v14520_v16, %v14520_v16  ;;  %v21634_v16 = vld [vmem:[%s27300_s13 + $0x6a0] ss:$8 sps:$4 sm:$0xff]  }
0x2066   :  { %v14522_v26 = vpop.f32.mrf.mxu0 }
0x2067   :  { %14752 = vmatprep.mubr.bf16.mxu0 %v14526_v6  ;;  %v21639_v6 = vld [vmem:[%s27300_s13 + $0x694] ss:$8 sps:$4 sm:$0xff]  }
0x2068   :  { %14753 = vmatmul.mubr.bf16.vlgmr.msra.gmra.mxu0 %v14525_v15  ;;  %19024 = vmatmul.mubr.msk.bf16.vlgmr.msra.gmra.mxu1 %vm5823_vm3, %v21770_v34  ;;  %v14523_v4 = vpop.f32.mrf.mxu0  ;;  %v21637_v15 = vld [vmem:[%s27300_s13 + $0x690] ss:$8 sps:$4 sm:$0xff]   ;;  %v21681_v26 = vld [vmem:[%s27300_s13 + $0x7b4] ss:$8 sps:$4 sm:$0xff]   ;;  %v21684_v34 = vld [vmem:[%s27300_s13 + $0x7a4] ss:$8 sps:$4 sm:$0xff]  }
0x2069   :  { %15057 = vmatpush1.bf16.msra.mxu0 %v26344_v51  ;;  %15074 = vmatprep.mubr.bf16.mxu0 %v27320_v39  ;;  %v21682_v4 = vld [vmem:[%s27300_s13 + $0x7a0] ss:$8 sps:$4 sm:$0xff]  }
0x206a   :  { %15278 = vmatprep.subr.bf16.mxu0 %v21597_v18  ;;  %15558 = vmatpush1.bf16.msra.mxu1 %v21643_v0  ;;  %v21642_v18 = vld [vmem:[%s27300_s13 + $0x684] ss:$8 sps:$4 sm:$0xff]   ;;  %v21679_v0 = vld [vmem:[%s27300_s13 + $0x7b0] ss:$8 sps:$4 sm:$0xff]  }
0x206b   :  { %15559 = vmatprep.subr.bf16.mxu1 %v21648_v29  ;;  %v21640_v29 = vld [vmem:[%s27300_s13 + $0x680] ss:$8 sps:$4 sm:$0xff]  }
0x206e   :  { %15560 = vmatpush1.bf16.msra.mxu1 %v21646_v12  ;;  %v21687_v12 = vld [vmem:[%s27300_s13 + $0x794] ss:$8 sps:$4 sm:$0xff]  }
0x206f   :  { %15561 = vmatprep.subr.bf16.mxu1 %v21651_v19  ;;  %v21685_v19 = vld [vmem:[%s27300_s13 + $0x790] ss:$8 sps:$4 sm:$0xff]  }
0x2070   :  { %18958 = vmatmul.mubr.msk.bf16.vlgmr.msra.gmra.mxu0 %vm5823_vm3, %v21771_v21 }
0x2071   :  { %15279 = vmatpush1.bf16.msra.mxu0 %v21595_v57  ;;  %v21688_v57 = vld [vmem:[%s27300_s13 + $0x780] ss:$8 sps:$4 sm:$0xff]  }
0x2072   :  { %15280 = vmatprep.subr.bf16.mxu0 %v21600_v35  ;;  %15562 = vmatpush1.bf16.msra.mxu1 %v21649_v54  ;;  %v21690_v35 = vld [vmem:[%s27300_s13 + $0x784] ss:$8 sps:$4 sm:$0xff]  }
0x2073   :  { %15563 = vmatprep.subr.bf16.mxu1 %v21654_v8 }
0x2075   :  { %15281 = vmatpush1.bf16.msra.mxu0 %v21598_v37 }
0x2076   :  { %15282 = vmatprep.subr.bf16.mxu0 %v21603_v44  ;;  %15564 = vmatpush1.bf16.msra.mxu1 %v21652_v47 }
0x2077   :  { %15565 = vmatprep.subr.bf16.mxu1 %v21657_v50 }
0x2079   :  { %15283 = vmatpush1.bf16.msra.mxu0 %v21601_v45 }
0x207a   :  { %15284 = vmatprep.subr.bf16.mxu0 %v21606_v55  ;;  %15566 = vmatpush1.bf16.msra.mxu1 %v21655_v7 }
0x207b   :  { %15567 = vmatprep.subr.bf16.mxu1 %v21660_v25 }
0x207d   :  { %15285 = vmatpush1.bf16.msra.mxu0 %v21604_v3 }
0x207e   :  { %15286 = vmatprep.subr.bf16.mxu0 %v21609_v46  ;;  %15568 = vmatpush1.bf16.msra.mxu1 %v21658_v63 }
0x207f   :  { %15569 = vmatprep.subr.bf16.mxu1 %v21663_v31 }
0x2081   :  { %15287 = vmatpush1.bf16.msra.mxu0 %v21607_v59 }
0x2082   :  { %15288 = vmatprep.subr.bf16.mxu0 %v21612_v53  ;;  %15570 = vmatpush1.bf16.msra.mxu1 %v21661_v32 }
0x2083   :  { %15571 = vmatprep.subr.bf16.mxu1 %v21666_v56 }
0x2085   :  { %15289 = vmatpush1.bf16.msra.mxu0 %v21610_v11 }
0x2086   :  { %15290 = vmatprep.subr.bf16.mxu0 %v21615_v5  ;;  %15572 = vmatpush1.bf16.msra.mxu1 %v21664_v43 }
0x2087   :  { %15573 = vmatprep.subr.bf16.mxu1 %v21669_v36  ;;  %v21691_v36 = vld [vmem:[%s27300_s13 + $0x870] ss:$8 sps:$4 sm:$0xff]  }
0x2089   :  { %15291 = vmatpush1.bf16.msra.mxu0 %v21613_v28  ;;  %v21696_v28 = vld [vmem:[%s27300_s13 + $0x864] ss:$8 sps:$4 sm:$0xff]  }
0x208a   :  { %15292 = vmatprep.subr.bf16.mxu0 %v21618_v61  ;;  %15574 = vmatpush2.bf16.msra.mxu1 %v21667_v13  ;;  %v21772_v61 = vld [vmem:[%s27295_s8 + $0x20] sm:$0xf]  ;;  %v21699_v13 = vld [vmem:[%s27300_s13 + $0x854] ss:$8 sps:$4 sm:$0xff]  }
0x208b   :  { %15575 = vmatprep.subr.bf16.mxu1 %v21672_v27  ;;  %v21697_v27 = vld [vmem:[%s27300_s13 + $0x850] ss:$8 sps:$4 sm:$0xff]  }
0x208d   :  { %15293 = vmatpush1.bf16.msra.mxu0 %v21616_v62  ;;  %v21702_v62 = vld [vmem:[%s27300_s13 + $0x844] ss:$8 sps:$4 sm:$0xff]  }
0x208e   :  { %15294 = vmatprep.subr.bf16.mxu0 %v21621_v33  ;;  %15576 = vmatpush2.bf16.msra.mxu1 %v21670_v24  ;;  %v21700_v33 = vld [vmem:[%s27300_s13 + $0x840] ss:$8 sps:$4 sm:$0xff]   ;;  %v21705_v24 = vld [vmem:[%s27300_s13 + $0x834] ss:$8 sps:$4 sm:$0xff]  }
0x208f   :  { %15577 = vmatprep.subr.bf16.mxu1 %v21675_v14  ;;  %v21703_v14 = vld [vmem:[%s27300_s13 + $0x830] ss:$8 sps:$4 sm:$0xff]  }
0x2091   :  { %15295 = vmatpush2.bf16.msra.mxu0 %v21619_v2  ;;  %v21708_v2 = vld [vmem:[%s27300_s13 + $0x824] ss:$8 sps:$4 sm:$0xff]  }
0x2092   :  { %15296 = vmatprep.subr.bf16.mxu0 %v21624_v60  ;;  %15578 = vmatpush2.bf16.msra.mxu1 %v21673_v22  ;;  %v21706_v60 = vld [vmem:[%s27300_s13 + $0x820] ss:$8 sps:$4 sm:$0xff]   ;;  %v21711_v22 = vld [vmem:[%s27300_s13 + $0x814] ss:$8 sps:$4 sm:$0xff]  }
0x2093   :  { %15579 = vmatprep.subr.bf16.mxu1 %v21678_v30  ;;  %v21709_v30 = vld [vmem:[%s27300_s13 + $0x810] ss:$8 sps:$4 sm:$0xff]  }
0x2095   :  { %15297 = vmatpush2.bf16.msra.mxu0 %v21622_v48  ;;  %v21714_v48 = vld [vmem:[%s27300_s13 + $0x804] ss:$8 sps:$4 sm:$0xff]  }
0x2096   :  { %15298 = vmatprep.subr.bf16.mxu0 %v21627_v58  ;;  %15580 = vmatpush2.bf16.msra.mxu1 %v21676_v23  ;;  %v21712_v58 = vld [vmem:[%s27300_s13 + $0x800] ss:$8 sps:$4 sm:$0xff]   ;;  %v21717_v23 = vld [vmem:[%s27300_s13 + $0x8f4] ss:$8 sps:$4 sm:$0xff]  }
0x2097   :  { %15581 = vmatprep.subr.bf16.mxu1 %v21681_v26  ;;  %v21730_v26 = vld [vmem:[%s27300_s13 + $0x8a0] ss:$8 sps:$4 sm:$0xff]  }
0x2099   :  { %15299 = vmatpush2.bf16.msra.mxu0 %v21625_v52  ;;  %v21715_v52 = vld [vmem:[%s27300_s13 + $0x8f0] ss:$8 sps:$4 sm:$0xff]  }
0x209a   :  { %15300 = vmatprep.subr.bf16.mxu0 %v21630_v49  ;;  %15582 = vmatpush2.bf16.msra.mxu1 %v21679_v0  ;;  %v21720_v49 = vld [vmem:[%s27300_s13 + $0x8e4] ss:$8 sps:$4 sm:$0xff]   ;;  %v21735_v0 = vld [vmem:[%s27300_s13 + $0x894] ss:$8 sps:$4 sm:$0xff]  }
0x209b   :  { %15583 = vmatprep.subr.bf16.mxu1 %v21684_v34  ;;  %v21738_v34 = vld [vmem:[%s27300_s13 + $0x884] ss:$8 sps:$4 sm:$0xff]  }
0x209d   :  { %15301 = vmatpush2.bf16.msra.mxu0 %v21628_v20  ;;  %v21718_v20 = vld [vmem:[%s27300_s13 + $0x8e0] ss:$8 sps:$4 sm:$0xff]  }
0x209e   :  { %15302 = vmatprep.subr.bf16.mxu0 %v21633_v40  ;;  %15584 = vmatpush2.bf16.msra.mxu1 %v21682_v4  ;;  %v21723_v40 = vld [vmem:[%s27300_s13 + $0x8d4] ss:$8 sps:$4 sm:$0xff]   ;;  %v21736_v4 = vld [vmem:[%s27300_s13 + $0x880] ss:$8 sps:$4 sm:$0xff]  }
0x209f   :  { %15585 = vmatprep.subr.bf16.mxu1 %v21687_v12 }
0x20a1   :  { %15303 = vmatpush2.bf16.msra.mxu0 %v21631_v1  ;;  %v21721_v1 = vld [vmem:[%s27300_s13 + $0x8d0] ss:$8 sps:$4 sm:$0xff]  }
0x20a2   :  { %15304 = vmatprep.subr.bf16.mxu0 %v21636_v41  ;;  %15586 = vmatpush2.bf16.msra.mxu1 %v21685_v19  ;;  %v21726_v41 = vld [vmem:[%s27300_s13 + $0x8c4] ss:$8 sps:$4 sm:$0xff]  }
0x20a3   :  { %15587 = vmatprep.subr.bf16.mxu1 %v21690_v35 }
0x20a5   :  { %15305 = vmatpush2.bf16.msra.mxu0 %v21634_v16  ;;  %v21724_v16 = vld [vmem:[%s27300_s13 + $0x8c0] ss:$8 sps:$4 sm:$0xff]  }
0x20a6   :  { %15306 = vmatprep.subr.bf16.mxu0 %v21639_v6  ;;  %15588 = vmatpush2.bf16.msra.mxu1 %v21688_v57  ;;  %v21729_v6 = vld [vmem:[%s27300_s13 + $0x8b4] ss:$8 sps:$4 sm:$0xff]  }
0x20a9   :  { %15307 = vmatpush2.bf16.msra.mxu0 %v21637_v15  ;;  %v21727_v15 = vld [vmem:[%s27300_s13 + $0x8b0] ss:$8 sps:$4 sm:$0xff]  }
0x20aa   :  { %15308 = vmatprep.subr.bf16.mxu0 %v21642_v18  ;;  %v21732_v18 = vld [vmem:[%s27300_s13 + $0x8a4] ss:$8 sps:$4 sm:$0xff]  }
0x20ad   :  { %15309 = vmatpush2.bf16.msra.mxu0 %v21640_v29  ;;  %v21733_v29 = vld [vmem:[%s27300_s13 + $0x890] ss:$8 sps:$4 sm:$0xff]  }
0x20ae   :  { %19089 = vmatprep.subr.msk.bf16.mxu0 %vm5827_vm2, %v26341_v38 }
0x2120   :  { %v15033_v38 = vpop.f32.mrf.mxu1 }
0x2122   :  { %v15035_v54 = vpop.f32.mrf.mxu1 }
0x2124   :  { %v15037_v8 = vpop.f32.mrf.mxu1 }
0x2126   :  { %v15038_v21 = vpop.f32.mrf.mxu1 }
0x2128   :  { %v14754_v37 = vpop.f32.mrf.mxu0  ;;  %v15355_v44 = vpop.f32.mrf.mxu1 }
0x2129   :  { %v14761_v47 = vadd.f32 %v14754_v37, %v26883_v17  ;;  %v15362_v45 = vpack.c.bf16 %v15355_v44, %v15355_v44 }
0x212a   :  { %v14756_v50 = vpop.f32.mrf.mxu0  ;;  %v15357_v55 = vpop.f32.mrf.mxu1 }
0x212b   :  { %v14762_v7 = vadd.f32 %v14756_v50, %v26888_v42  ;;  %v27095_v25 = vadd.f32 %v15033_v38, %v14761_v47  ;;  %v15363_v3 = vpack.c.bf16 %v15357_v55, %v15357_v55  ;;  %v21693_v42 = vld [vmem:[%s27300_s13 + $0x874] ss:$8 sps:$4 sm:$0xff]  }
0x212c   :  { %v14758_v46 = vpop.f32.mrf.mxu0  ;;  %v15359_v63 = vpop.f32.mrf.mxu1 }
0x212d   :  { %v27097_v31 = vadd.f32 %v15035_v54, %v14762_v7  ;;  %15589 = vmatprep.mubr.bf16.mxu1 %v15363_v3 }
0x212e   :  { %v14759_v59 = vpop.f32.mrf.mxu0  ;;  %15590 = vmatmul.mubr.bf16.vlgmr.msra.gmra.mxu1 %v15362_v45  ;;  %v15360_v53 = vpop.f32.mrf.mxu1 }
0x212f   :  { %15939 = vmatprep.mubr.bf16.mxu1 %v27320_v39  ;;  %v15879_v59 = vld [vmem:[%s27301_s14] sm:$0x3] }
0x2130   :  { %v15076_v32 = vpop.f32.mrf.mxu0 }
0x2131   :  { %v15083_v11 = vpack.c.bf16 %v15076_v32, %v15076_v32  ;;  %v15888_v32 = vrot.slane %v15879_v59, %v23495_v10  ;;  %v19157_v10 = vld [vmem:[%s27302_s15 + $0x1] sm:$0x1] }
0x2132   :  { %v15078_v17 = vpop.f32.mrf.mxu0 }
0x2133   :  { %v15084_v56 = vpack.c.bf16 %v15078_v17, %v15078_v17 }
0x2134   :  { %v15080_v5 = vpop.f32.mrf.mxu0 }
0x2135   :  { %15310 = vmatprep.mubr.bf16.mxu0 %v15084_v56 }
0x2136   :  { %15311 = vmatmul.mubr.bf16.vlgmr.msra.gmra.mxu0 %v15083_v11  ;;  %v15081_v43 = vpop.f32.mrf.mxu0 }
0x2137   :  { %15615 = vmatpush1.bf16.msra.mxu0 %v26344_v51  ;;  %15632 = vmatprep.mubr.bf16.mxu0 %v27320_v39  ;;  %v21694_v51 = vld [vmem:[%s27300_s13 + $0x860] ss:$8 sps:$4 sm:$0xff]  }
0x2138   :  { %15836 = vmatprep.subr.bf16.mxu0 %v21693_v42 }
0x213e   :  { %19090 = vmatmul.mubr.msk.bf16.vlgmr.msra.gmra.mxu0 %vm5823_vm3, %v21772_v61 }
0x213f   :  { %15837 = vmatpush1.bf16.msra.mxu0 %v21691_v36 }
0x2140   :  { %15838 = vmatprep.subr.bf16.mxu0 %v21696_v28 }
0x2143   :  { %15839 = vmatpush1.bf16.msra.mxu0 %v21694_v51 }
0x2144   :  { %15840 = vmatprep.subr.bf16.mxu0 %v21699_v13 }
0x2147   :  { %15841 = vmatpush1.bf16.msra.mxu0 %v21697_v27  ;;  %v19160_v27 = vld [vmem:[%s27302_s15 + $0x2] sm:$0x1] }
0x2148   :  { %15842 = vmatprep.subr.bf16.mxu0 %v21702_v62  ;;  %v19163_v62 = vld [vmem:[%s27302_s15 + $0x3] sm:$0x1] }
0x214b   :  { %15843 = vmatpush1.bf16.msra.mxu0 %v21700_v33  ;;  %v21739_v33 = vld [vmem:[%s27303_s16 + $0x78] sm:$0xff]  }
0x214c   :  { %15844 = vmatprep.subr.bf16.mxu0 %v21705_v24  ;;  %v21740_v24 = vld [vmem:[%s27303_s16 + $0x38] sm:$0xff]  }
0x214f   :  { %15845 = vmatpush1.bf16.msra.mxu0 %v21703_v14  ;;  %v21742_v14 = vld [vmem:[%s27303_s16 + $0x30] sm:$0xff]  }
0x2150   :  { %15846 = vmatprep.subr.bf16.mxu0 %v21708_v2  ;;  %v21743_v2 = vld [vmem:[%s27303_s16 + $0x68] sm:$0xff]  }
0x2153   :  { %15847 = vmatpush1.bf16.msra.mxu0 %v21706_v60  ;;  %v21744_v60 = vld [vmem:[%s27303_s16 + $0x28] sm:$0xff]  }
0x2154   :  { %15848 = vmatprep.subr.bf16.mxu0 %v21711_v22  ;;  %v21745_v22 = vld [vmem:[%s27303_s16 + $0x60] sm:$0xff]  }
0x2157   :  { %15849 = vmatpush1.bf16.msra.mxu0 %v21709_v30  ;;  %v21746_v30 = vld [vmem:[%s27303_s16 + $0x20] sm:$0xff]  }
0x2158   :  { %15850 = vmatprep.subr.bf16.mxu0 %v21714_v48  ;;  %v21747_v48 = vld [vmem:[%s27303_s16 + $0x58] sm:$0xff]  }
0x215b   :  { %15851 = vmatpush1.bf16.msra.mxu0 %v21712_v58  ;;  %v21748_v58 = vld [vmem:[%s27303_s16 + $0x18] sm:$0xff]  }
0x215c   :  { %15852 = vmatprep.subr.bf16.mxu0 %v21717_v23  ;;  %v21749_v23 = vld [vmem:[%s27303_s16 + $0x50] sm:$0xff]  }
0x215f   :  { %15853 = vmatpush2.bf16.msra.mxu0 %v21715_v52  ;;  %v21750_v52 = vld [vmem:[%s27303_s16 + $0x10] sm:$0xff]  }
0x2160   :  { %15854 = vmatprep.subr.bf16.mxu0 %v21720_v49  ;;  %v21751_v49 = vld [vmem:[%s27303_s16 + $0x48] sm:$0xff]  }
0x2163   :  { %15855 = vmatpush2.bf16.msra.mxu0 %v21718_v20  ;;  %v21752_v20 = vld [vmem:[%s27303_s16 + $0x8] sm:$0xff]  }
0x2164   :  { %15856 = vmatprep.subr.bf16.mxu0 %v21723_v40  ;;  %v21753_v40 = vld [vmem:[%s27303_s16 + $0x40] sm:$0xff]  }
0x2167   :  { %15857 = vmatpush2.bf16.msra.mxu0 %v21721_v1  ;;  %v21754_v1 = vld [vmem:[%s27303_s16] sm:$0xff]  }
0x2168   :  { %15858 = vmatprep.subr.bf16.mxu0 %v21726_v41 }
0x216b   :  { %15859 = vmatpush2.bf16.msra.mxu0 %v21724_v16 }
0x216c   :  { %15860 = vmatprep.subr.bf16.mxu0 %v21729_v6 }
0x216f   :  { %15861 = vmatpush2.bf16.msra.mxu0 %v21727_v15 }
0x2170   :  { %15862 = vmatprep.subr.bf16.mxu0 %v21732_v18 }
0x2173   :  { %15863 = vmatpush2.bf16.msra.mxu0 %v21730_v26 }
0x2174   :  { %15864 = vmatprep.subr.bf16.mxu0 %v21735_v0 }
0x2177   :  { %15865 = vmatpush2.bf16.msra.mxu0 %v21733_v29 }
0x2178   :  { %15866 = vmatprep.subr.bf16.mxu0 %v21738_v34 }
0x217b   :  { %15867 = vmatpush2.bf16.msra.mxu0 %v21736_v4 }
0x21ee   :  { %v15591_v12 = vpop.f32.mrf.mxu1 }
0x21f0   :  { %v15593_v19 = vpop.f32.mrf.mxu1 }
0x21f2   :  { %v15595_v57 = vpop.f32.mrf.mxu1 }
0x21f4   :  { %v15596_v35 = vpop.f32.mrf.mxu1 }
0x21f6   :  { %v15312_v38 = vpop.f32.mrf.mxu0 }
0x21f7   :  { %v15319_v54 = vadd.f32 %v15312_v38, %v27095_v25  ;;  %v15884_v25 = vrot.slane %v15879_v59, %v23473_v9  ;;  %v15897_v9 = vld [vmem:[%s27302_s15] sm:$0x1] }
0x21f8   :  { %v15314_v8 = vpop.f32.mrf.mxu0 }
0x21f9   :  { %v15320_v21 = vadd.f32 %v15314_v8, %v27097_v31  ;;  %v15598_v37 = vadd.f32 %v15591_v12, %v15319_v54 }
0x21fa   :  { %v15316_v44 = vpop.f32.mrf.mxu0 }
0x21fb   :  { %v15599_v47 = vadd.f32 %v15593_v19, %v15320_v21 }
0x21fc   :  { %v15317_v50 = vpop.f32.mrf.mxu0 }
0x21fe   :  { %v15634_v45 = vpop.f32.mrf.mxu0 }
0x21ff   :  { %v15641_v3 = vpack.c.bf16 %v15634_v45, %v15634_v45 }
0x2200   :  { %v15636_v55 = vpop.f32.mrf.mxu0 }
0x2201   :  { %v15642_v7 = vpack.c.bf16 %v15636_v55, %v15636_v55 }
0x2202   :  { %v15638_v46 = vpop.f32.mrf.mxu0 }
0x2203   :  { %15868 = vmatprep.mubr.bf16.mxu0 %v15642_v7  ;;  %v19166_v46 = vld [vmem:[%s27304_s17] ss:$0 sm:$0xff] }
0x2204   :  { %15869 = vmatmul.mubr.bf16.vlgmr.msra.gmra.mxu0 %v15641_v3  ;;  %v15639_v63 = vpop.f32.mrf.mxu0 }
0x22c4   :  { %v15870_v53 = vpop.f32.mrf.mxu0 }
0x22c5   :  { %v15877_v31 = vadd.f32 %v15870_v53, %v15598_v37 }
0x22c6   :  { %v15872_v17 = vpop.f32.mrf.mxu0 }
0x22c7   :  { %v15891_v56 = vadd.f32 %v15884_v25, %v15877_v31  ;;  %v15878_v11 = vadd.f32 %v15872_v17, %v15599_v47 }
0x22c8   :  { %v15874_v5 = vpop.f32.mrf.mxu0 }
0x22c9   :  { %v15893_v42 = vmax.f32 %v15891_v56, 0.0  ;;  %v15892_v43 = vadd.f32 %v15888_v32, %v15878_v11 }
0x22ca   :  { %v15875_v36 = vpop.f32.mrf.mxu0 }
0x22cb   :  { %v15895_v28 = vpack.c.bf16 %v15893_v42, %v15893_v42  ;;  %v15894_v61 = vmax.f32 %v15892_v43, 0.0 }
0x22cd   :  { %v15896_v51 = vpack.c.bf16 %v15894_v61, %v15894_v61  ;;  %v15902_v13 = vsel %vm5827_vm2, %v15895_v28, 0 }
0x22cf   :  { %19155 = vmatprep.subr.msk.bf16.mxu1 %vm5827_vm2, %v15896_v51 }
0x22d0   :  { %15922 = vmatpush1.bf16.msra.mxu1 %v15902_v13 }
0x22d1   :  { %19158 = vmatprep.subr.msk.bf16.mxu1 %vm5827_vm2, %v15896_v51 }
0x22d3   :  { %19156 = vmatmul.mubr.msk.bf16.vlgmr.msra.gmra.mxu1 %vm5823_vm3, %v15897_v9 }
0x22d4   :  { %15968 = vmatpush1.bf16.msra.mxu1 %v15902_v13  ;;  %15985 = vmatprep.mubr.bf16.mxu1 %v27320_v39 }
0x22d5   :  { %19161 = vmatprep.subr.msk.bf16.mxu1 %vm5827_vm2, %v15896_v51 }
0x22db   :  { %19159 = vmatmul.mubr.msk.bf16.vlgmr.msra.gmra.mxu1 %vm5823_vm3, %v19157_v10 }
0x22dc   :  { %16014 = vmatpush1.bf16.msra.mxu1 %v15902_v13  ;;  %16031 = vmatprep.mubr.bf16.mxu1 %v27320_v39 }
0x22dd   :  { %19164 = vmatprep.subr.msk.bf16.mxu1 %vm5827_vm2, %v15896_v51 }
0x22e3   :  { %19162 = vmatmul.mubr.msk.bf16.vlgmr.msra.gmra.mxu1 %vm5823_vm3, %v19160_v27 }
0x22e4   :  { %16060 = vmatpush1.bf16.msra.mxu1 %v15902_v13  ;;  %16077 = vmatprep.mubr.bf16.mxu1 %v27320_v39  ;;  %v21741_v39 = vld [vmem:[%s27303_s16 + $0x70] sm:$0xff]  }
0x22e5   :  { %19421 = vmatprep.subr.bf16.mxu1 %v21739_v33 }
0x22eb   :  { %19165 = vmatmul.mubr.msk.bf16.vlgmr.msra.gmra.mxu1 %vm5823_vm3, %v19163_v62 }
0x22ec   :  { %19422 = vmatpush3.bf16.msra.mxu1 %v21740_v24 }
0x22ed   :  { %19423 = vmatprep.subr.bf16.mxu1 %v21741_v39 }
0x22f0   :  { %19424 = vmatpush3.bf16.msra.mxu1 %v21742_v14 }
0x22f1   :  { %19425 = vmatprep.subr.bf16.mxu1 %v21743_v2 }
0x22f4   :  { %19426 = vmatpush3.bf16.msra.mxu1 %v21744_v60 }
0x22f5   :  { %19427 = vmatprep.subr.bf16.mxu1 %v21745_v22 }
0x22f8   :  { %19428 = vmatpush3.bf16.msra.mxu1 %v21746_v30 }
0x22f9   :  { %19429 = vmatprep.subr.bf16.mxu1 %v21747_v48 }
0x22fc   :  { %19430 = vmatpush3.bf16.msra.mxu1 %v21748_v58 }
0x22fd   :  { %19431 = vmatprep.subr.bf16.mxu1 %v21749_v23 }
0x2300   :  { %19432 = vmatpush3.bf16.msra.mxu1 %v21750_v52 }
0x2301   :  { %19433 = vmatprep.subr.bf16.mxu1 %v21751_v49 }
0x2304   :  { %19434 = vmatpush3.bf16.msra.mxu1 %v21752_v20 }
0x2305   :  { %19435 = vmatprep.subr.bf16.mxu1 %v21753_v40 }
0x2308   :  { %19436 = vmatpush3.bf16.msra.mxu1 %v21754_v1 }
0x2393   :  { %v15941_v41 = vpop.f32.mrf.mxu1 }
0x2395   :  { %v15943_v16 = vpop.f32.mrf.mxu1 }
0x2397   :  { %v15945_v6 = vpop.f32.mrf.mxu1 }
0x2399   :  { %v15946_v15 = vpop.f32.mrf.mxu1 }
0x239b   :  { %v15987_v18 = vpop.f32.mrf.mxu1 }
0x239c   :  { %v16086_v38 = vmax.f32 %v15941_v41, %v15987_v18 }
0x239d   :  { %v15989_v26 = vpop.f32.mrf.mxu1 }
0x239e   :  { %v16087_v8 = vmax.f32 %v15943_v16, %v15989_v26 }
0x239f   :  { %v15991_v0 = vpop.f32.mrf.mxu1 }
0x23a1   :  { %v15992_v29 = vpop.f32.mrf.mxu1 }
0x23a3   :  { %v16033_v34 = vpop.f32.mrf.mxu1 }
0x23a5   :  { %v16035_v4 = vpop.f32.mrf.mxu1 }
0x23a7   :  { %v16037_v12 = vpop.f32.mrf.mxu1 }
0x23a9   :  { %v16038_v19 = vpop.f32.mrf.mxu1 }
0x23ab   :  { %v16079_v57 = vpop.f32.mrf.mxu1 }
0x23ac   :  { %v16088_v35 = vmax.f32 %v16033_v34, %v16079_v57 }
0x23ad   :  { %v16081_v54 = vpop.f32.mrf.mxu1 }
0x23ae   :  { %v16089_v21 = vmax.f32 %v16035_v4, %v16081_v54  ;;  %v16090_v37 = vmax.f32 %v16086_v38, %v16088_v35 }
0x23af   :  { %v16083_v44 = vpop.f32.mrf.mxu1 }
0x23b0   :  { %v16091_v47 = vmax.f32 %v16087_v8, %v16089_v21  ;;  %v16092_v55 = vpack.c.bf16 %v16090_v37, %v16090_v37 }
0x23b1   :  { %v16084_v50 = vpop.f32.mrf.mxu1 }
0x23b2   :  { %v16093_v45 = vpack.c.bf16 %v16091_v47, %v16091_v47 }
0x23b4   :  { %16261 = vmatprep.mubr.bf16.mxu1 %v16093_v45 }
0x23b5   :  { %16262 = vmatmul.mubr.bf16.vlgmr.msra.gmra.mxu1 %v16092_v55 }
0x2475   :  { %v19437_v7 = vpop.f32.mrf.mxu1 }
0x2477   :  { %v19438_v3 = vpop.f32.mrf.mxu1 }
0x2478   :  { %v19439_v63 = vadd.f32 %v19438_v3, %v19437_v7 }
0x2479   :  { %v19440_v59 = vpop.f32.mrf.mxu1 }
0x247a   :  { %v16264_v25 = vadd.f32 %v19439_v63, %v19166_v46 }
0x247b   :  { %v19441_v53 = vpop.f32.mrf.mxu1 }
0x247c   :  { %16269 = vst [vmem:[#allocation2] sm:$0x3] %v16264_v25 }
0x247d   :  { %21784 = shalt.err (!%p21781_p4)
}
0x247e   :  { %16279 = dma.vmem_to_hbm [thread:$0]  %s16277_s22, 32, %s27305_s18, [#allocation3]  }
0x247f   :  { %21793 = dma.done.wait [#allocation3], 32  }
0x2480   :  { %21794 = vsyncadd [#allocation3], 4294967264 }
0x2481   :  { %16283 = vsyncpa [#allocation3], 1 }

</bundles_post_ra>
